<compile_context>
chip_gen: v7x
topology: tpu7x:2x2x1
jax: 0.10.0
libtpu: 0.0.40
codegen_flags: <defaults>
</compile_context>

<pallas_src>
import functools

import jax
import jax.numpy as jnp
from jax import lax
from jax.experimental import pallas as pl
from jax.experimental.pallas import tpu as pltpu


# ----------------------------------------------------------------------------
# In-kernel complex matmul helpers (real/imag planes).  Only the standard
# ((1,),(0,)) and transpose-RHS ((1,),(1,)) dot_general forms are used.
# ----------------------------------------------------------------------------
def _dot(a, b, dims):
    return lax.dot_general(a, b, dimension_numbers=(dims, ((), ())),
                           preferred_element_type=jnp.float32)


def _cmm(ar, ai, br, bi):
    """C = A @ B."""
    d = ((1,), (0,))
    rr = _dot(ar, br, d)
    ii = _dot(ai, bi, d)
    ri = _dot(ar, bi, d)
    ir = _dot(ai, br, d)
    return rr - ii, ri + ir


def _cmm_ABh(ar, ai, br, bi):
    """C = A @ B^H  (contract last axis of both; conjugation folded in signs)."""
    d = ((1,), (1,))
    rr = _dot(ar, br, d)
    ii = _dot(ai, bi, d)
    ri = _dot(ar, bi, d)
    ir = _dot(ai, br, d)
    return rr + ii, ir - ri


def _eye(n):
    r = lax.broadcasted_iota(jnp.int32, (n, n), 0)
    c = lax.broadcasted_iota(jnp.int32, (n, n), 1)
    return (r == c).astype(jnp.float32)


# ----------------------------------------------------------------------------
# Kernel 1: fused statistics / F-update pre-computation
#   outputs (per batch element):
#     vec   = [xi_ck (K), Re(theta_ck) (K), Im(theta_ck) (K), xi_sm (M)]
#     theta_sm planes (2,M,K), F_Last planes (2,Nr,M),
#     temp = sum_j (G_j W)(G_j W)^H + NoisePower*Nr*I  planes (2,Nr,Nr)
# ----------------------------------------------------------------------------
def _pre_kernel(hh_ref, w_ref, g_ref, gs_ref, fh_ref,
                vec_ref, th_ref, fl_ref, tmp_ref,
                *, Nr, Nt, K, M, T, noise_ck, noise_ts, noise_f):
    hhr, hhi = hh_ref[0, 0], hh_ref[0, 1]        # (K, Nt)  = H^H
    wr, wi = w_ref[0, 0], w_ref[0, 1]            # (Nt, K)
    fhr, fhi = fh_ref[0, 0], fh_ref[0, 1]        # (M, Nr)  = F^H

    # ---- communication branch: HW = H^H W, T_ck, xi_ck, theta_ck ----
    hw_r, hw_i = _cmm(hhr, hhi, wr, wi)                          # (K, K)
    t_ck = jnp.sum(hw_r * hw_r + hw_i * hw_i, axis=1,
                   keepdims=True) + noise_ck                     # (K, 1)
    eye_k = _eye(K)
    d_r = jnp.sum(hw_r * eye_k, axis=1, keepdims=True)           # diag(HW)
    d_i = jnp.sum(hw_i * eye_k, axis=1, keepdims=True)
    xi_ck = t_ck / (t_ck - (d_r * d_r + d_i * d_i)) - 1.0
    s_ck = jnp.sqrt(1.0 + xi_ck) / t_ck
    vec_ref[0, 0:K, 0:1] = xi_ck
    vec_ref[0, K:2 * K, 0:1] = s_ck * d_r
    vec_ref[0, 2 * K:3 * K, 0:1] = s_ck * d_i

    # ---- sensing branch: T_s and temp, fused loop over all G blocks ----
    fn2 = jnp.sum(fhr * fhr + fhi * fhi, axis=1, keepdims=True)  # (M,1) ||f_m||^2
    t_s = (Nr * noise_ts) * fn2
    tmp_r = (Nr * noise_f) * _eye(Nr)
    tmp_i = jnp.zeros((Nr, Nr), jnp.float32)
    for j in range(T):
        gjr = g_ref[0, 0, j * Nr:(j + 1) * Nr, :]
        gji = g_ref[0, 1, j * Nr:(j + 1) * Nr, :]
        pr, pi_ = _cmm(gjr, gji, wr, wi)                 # G_j W          (Nr,K)
        rr, ri = _cmm(fhr, fhi, pr, pi_)                 # F^H G_j W      (M,K)
        t_s = t_s + jnp.sum(rr * rr + ri * ri, axis=1, keepdims=True)
        qr, qi = _cmm_ABh(pr, pi_, pr, pi_)              # (G_j W)(G_j W)^H
        tmp_r = tmp_r + qr
        tmp_i = tmp_i + qi
    tmp_ref[0, 0] = tmp_r
    tmp_ref[0, 1] = tmp_i

    # ---- per-target quantities: SCNR, xi_sm, theta_sm, F_Last ----
    for m in range(M):
        gmr = gs_ref[0, 0, m * Nr:(m + 1) * Nr, :]
        gmi = gs_ref[0, 1, m * Nr:(m + 1) * Nr, :]
        pr, pi_ = _cmm(gmr, gmi, wr, wi)                 # G_m W          (Nr,K)
        fhm_r = fhr[m:m + 1, :]                          # (1, Nr) = f_m^H
        fhm_i = fhi[m:m + 1, :]
        vr, vi = _cmm(fhm_r, fhm_i, pr, pi_)             # f_m^H G_m W    (1,K)
        scnr_m = jnp.sum(vr * vr + vi * vi, axis=1, keepdims=True)   # (1,1)
        ts_m = t_s[m:m + 1, 0:1]
        xi_m = scnr_m / (ts_m - scnr_m)
        vec_ref[0, 3 * K + m:3 * K + m + 1, 0:1] = xi_m
        th_scale = jnp.sqrt(1.0 + xi_m) / ts_m
        thr_m = vr * th_scale                            # theta_sm row   (1,K)
        thi_m = vi * th_scale
        th_ref[0, 0, m:m + 1, :] = thr_m
        th_ref[0, 1, m:m + 1, :] = thi_m
        # F_Last column m: sqrt(1+xi)/||theta_m||^2 * (G_m W) conj(theta_m)
        thn2 = jnp.sum(thr_m * thr_m + thi_m * thi_m, axis=1, keepdims=True)
        coeff = jnp.sqrt(1.0 + xi_m) / thn2              # (1,1)
        cr, ci = _cmm_ABh(pr, pi_, thr_m, thi_m)         # (Nr,1)
        fl_ref[0, 0, :, m:m + 1] = coeff * cr
        fl_ref[0, 1, :, m:m + 1] = coeff * ci


# ----------------------------------------------------------------------------
# Kernel 2: fused gradient + projected-gradient W update
#   grad_unit = (B_t W - A_t^H) / ||.||_F   (never written to HBM)
#   then n_iter_w * n_inner PGD steps with per-step sizes in SMEM.
#   coef = [Re(a) (K), Im(a) (K), c2 (K), c3 (M), s (M)] with
#     a  = z_ck sqrt(1+xi_ck) conj(theta_ck),  c2 = z_ck |theta_ck|^2
#     c3 = z_sm sqrt(1+xi_sm),                 s  = z_sm ||theta_m||^2
# ----------------------------------------------------------------------------
def _grad_wstep_kernel(steps_ref, h_ref, hh_ref, g_ref, gh_ref, gsh_ref, f_ref,
                       w_ref, th_ref, c_ref, o_ref,
                       *, Nr, Nt, K, M, T, delta, Pt, n_iter_w, n_inner):
    hr, hi = h_ref[0, 0], h_ref[0, 1]            # (Nt, K)
    hhr, hhi = hh_ref[0, 0], hh_ref[0, 1]        # (K, Nt) = H^H
    wr, wi = w_ref[0, 0], w_ref[0, 1]            # (Nt, K)
    fr, fi = f_ref[0, 0], f_ref[0, 1]            # (Nr, M)  (updated F)
    thr, thi = th_ref[0, 0], th_ref[0, 1]        # (M, K)

    a_r = c_ref[0, 0:1, 0:K]                     # (1, K)
    a_i = c_ref[0, 0:1, K:2 * K]
    c2 = c_ref[0, 0:1, 2 * K:3 * K]
    c3 = c_ref[0, 0:1, 3 * K:3 * K + M]          # (1, M)
    s_ = c_ref[0, 0:1, 3 * K + M:3 * K + 2 * M]  # (1, M)

    # ---- A_t^H = H diag(conj(a)) + delta * sum_m c3_m (G_m^H f_m) theta_m ----
    ath_r = hr * a_r + hi * a_i
    ath_i = hi * a_r - hr * a_i
    for m in range(M):
        ghm_r = gsh_ref[0, 0, m * Nt:(m + 1) * Nt, :]   # (Nt, Nr) = G_m^H
        ghm_i = gsh_ref[0, 1, m * Nt:(m + 1) * Nt, :]
        fmr = fr[:, m:m + 1]                            # (Nr, 1)
        fmi = fi[:, m:m + 1]
        ur, ui = _cmm(ghm_r, ghm_i, fmr, fmi)           # G_m^H f_m   (Nt,1)
        tr_ = thr[m:m + 1, :]                           # (1, K)
        ti_ = thi[m:m + 1, :]
        c3m = c3[0:1, m:m + 1]                          # (1, 1)
        ath_r = ath_r + delta * c3m * (ur * tr_ - ui * ti_)
        ath_i = ath_i + delta * c3m * (ur * ti_ + ui * tr_)

    # ---- B_t W = (H diag(c2))(H^H W) + delta * sum_j G_j^H (mid (G_j W)) ----
    hw_r, hw_i = _cmm(hhr, hhi, wr, wi)                 # (K, K)
    bw_r, bw_i = _cmm(hr * c2, hi * c2, hw_r, hw_i)     # (Nt, K)
    mid_r, mid_i = _cmm_ABh(fr * s_, fi * s_, fr, fi)   # F diag(s) F^H (Nr,Nr)
    yw_r = jnp.zeros((Nt, K), jnp.float32)
    yw_i = jnp.zeros((Nt, K), jnp.float32)
    for j in range(T):
        gjr = g_ref[0, 0, j * Nr:(j + 1) * Nr, :]       # (Nr, Nt)
        gji = g_ref[0, 1, j * Nr:(j + 1) * Nr, :]
        ghj_r = gh_ref[0, 0, j * Nt:(j + 1) * Nt, :]    # (Nt, Nr) = G_j^H
        ghj_i = gh_ref[0, 1, j * Nt:(j + 1) * Nt, :]
        pr, pi_ = _cmm(gjr, gji, wr, wi)                # G_j W       (Nr,K)
        qr, qi = _cmm(mid_r, mid_i, pr, pi_)            # mid G_j W
        zr, zi = _cmm(ghj_r, ghj_i, qr, qi)             # G_j^H (mid G_j W)
        yw_r = yw_r + zr
        yw_i = yw_i + zi

    gr_ = bw_r + delta * yw_r - ath_r
    gi_ = bw_i + delta * yw_i - ath_i

    nrm = jnp.sqrt(jnp.sum(gr_ * gr_ + gi_ * gi_, keepdims=True))   # (1,1)
    nrm = jnp.maximum(nrm, 1e-8)
    inv = 1.0 / nrm
    gr_u = gr_ * inv
    gi_u = gi_ * inv

    # ---- fused projected-gradient W update (step sizes read from SMEM) ----
    target = Pt / float(Nt)
    for _ in range(n_iter_w):
        for i in range(n_inner):
            s = steps_ref[i]                                  # SMEM scalar
            wr = wr - s * gr_u
            wi = wi - s * gi_u
            rn = jnp.sum(wr * wr + wi * wi, axis=1, keepdims=True)  # diag(WW^H)
            sc = jnp.sqrt(target / rn)
            wr = wr * sc
            wi = wi * sc
    o_ref[0, 0] = wr
    o_ref[0, 1] = wi


# ----------------------------------------------------------------------------
# pallas_call builders
# ----------------------------------------------------------------------------
def _idx4(b):
    return (b, 0, 0, 0)


def _idx3(b):
    return (b, 0, 0)


def _make_pre_call(B, Nr, Nt, K, M, T, noise_ck, noise_ts, noise_f):
    P0 = 3 * K + M
    kern = functools.partial(_pre_kernel, Nr=Nr, Nt=Nt, K=K, M=M, T=T,
                             noise_ck=noise_ck, noise_ts=noise_ts,
                             noise_f=noise_f)
    return pl.pallas_call(
        kern,
        grid=(B,),
        in_specs=[
            pl.BlockSpec((1, 2, K, Nt), _idx4),        # H^H
            pl.BlockSpec((1, 2, Nt, K), _idx4),        # W
            pl.BlockSpec((1, 2, T * Nr, Nt), _idx4),   # G (stacked blocks)
            pl.BlockSpec((1, 2, M * Nr, Nt), _idx4),   # G_s (stacked blocks)
            pl.BlockSpec((1, 2, M, Nr), _idx4),        # F^H
        ],
        out_specs=(
            pl.BlockSpec((1, P0, 1), _idx3),           # packed scalar vector
            pl.BlockSpec((1, 2, M, K), _idx4),         # theta_sm
            pl.BlockSpec((1, 2, Nr, M), _idx4),        # F_Last
            pl.BlockSpec((1, 2, Nr, Nr), _idx4),       # temp
        ),
        out_shape=(
            jax.ShapeDtypeStruct((B, P0, 1), jnp.float32),
            jax.ShapeDtypeStruct((B, 2, M, K), jnp.float32),
            jax.ShapeDtypeStruct((B, 2, Nr, M), jnp.float32),
            jax.ShapeDtypeStruct((B, 2, Nr, Nr), jnp.float32),
        ),
        compiler_params=pltpu.CompilerParams(
            dimension_semantics=("parallel",)),
    )


def _make_grad_wstep_call(B, Nr, Nt, K, M, T, delta, Pt, n_iter_w, n_inner):
    Q = 3 * K + 2 * M
    kern = functools.partial(_grad_wstep_kernel, Nr=Nr, Nt=Nt, K=K, M=M, T=T,
                             delta=delta, Pt=Pt, n_iter_w=n_iter_w,
                             n_inner=n_inner)
    return pl.pallas_call(
        kern,
        grid=(B,),
        in_specs=[
            pl.BlockSpec(memory_space=pltpu.MemorySpace.SMEM),   # step sizes
            pl.BlockSpec((1, 2, Nt, K), _idx4),        # H
            pl.BlockSpec((1, 2, K, Nt), _idx4),        # H^H
            pl.BlockSpec((1, 2, T * Nr, Nt), _idx4),   # G blocks
            pl.BlockSpec((1, 2, T * Nt, Nr), _idx4),   # G^H blocks
            pl.BlockSpec((1, 2, M * Nt, Nr), _idx4),   # G_s^H blocks
            pl.BlockSpec((1, 2, Nr, M), _idx4),        # F (updated)
            pl.BlockSpec((1, 2, Nt, K), _idx4),        # W
            pl.BlockSpec((1, 2, M, K), _idx4),         # theta_sm
            pl.BlockSpec((1, 1, Q), _idx3),            # packed coefficients
        ],
        out_specs=pl.BlockSpec((1, 2, Nt, K), _idx4),
        out_shape=jax.ShapeDtypeStruct((B, 2, Nt, K), jnp.float32),
        compiler_params=pltpu.CompilerParams(
            dimension_semantics=("parallel",)),
    )


# ----------------------------------------------------------------------------
# JAX glue helpers
# ----------------------------------------------------------------------------
def conj_T(x):
    return jnp.conj(jnp.swapaxes(x, -1, -2))


def cpack(x):
    """complex (B, R, C) -> packed float32 (B, 2, R, C) [real, imag planes]."""
    return jnp.stack([jnp.real(x), jnp.imag(x)], axis=1).astype(jnp.float32)


def _conjT_packed(p):
    """Packed (B,2,R,C) -> packed conj-transpose (B,2,C,R)."""
    return jnp.stack([jnp.swapaxes(p[:, 0], 1, 2),
                      -jnp.swapaxes(p[:, 1], 1, 2)], axis=1)


def _blocks_conj_T(x, nblk, rows, cols):
    """(B, nblk*rows, cols) complex -> (B, nblk*cols, rows), per-block conj-T."""
    B = x.shape[0]
    xb = x.reshape(B, nblk, rows, cols)
    return jnp.conj(jnp.swapaxes(xb, 2, 3)).reshape(B, nblk * cols, rows)


def _softmax_rows(mu, x):
    """Row-wise version of the reference logsumexp() softmax output."""
    xmax = jnp.max(x, axis=1, keepdims=True)
    e = jnp.exp(-mu * (x - xmax))
    return e / (1.0 + jnp.sum(e, axis=1, keepdims=True))


# ----------------------------------------------------------------------------
# UnfoldNet forward
# ----------------------------------------------------------------------------
class UnfoldNet:
    def __init__(self, smoothing_factor, step_size, Nr, Nt, K, M, C,
                 NoisePower, delta):
        self.NumIter_outer, self.NumIter_inter = step_size.shape
        self.step_size = jnp.asarray(step_size, jnp.float32)
        self.smoothing_factor = jnp.asarray(smoothing_factor, jnp.float32)
        self.Nr, self.Nt, self.K, self.M, self.C = Nr, Nt, K, M, C
        self.NoisePower, self.delta = NoisePower, delta

    def forward(self, H, G, G_s, F, W, Pt, NoisePower, delta, n_iter_W,
                NumIter_outer):
        B = H.shape[0]
        Nr, Nt, K, M = self.Nr, self.Nt, self.K, self.M
        T = G.shape[1] // Nr
        L = self.NumIter_inter

        # ---- pack complex operands once; hoist loop-invariant transposes ----
        Hp = cpack(H)
        Hh_p = cpack(conj_T(H))
        Gp = cpack(G)
        Gh_p = cpack(_blocks_conj_T(G, T, Nr, Nt))
        Gs_mat = jnp.transpose(G_s, (0, 3, 1, 2)).reshape(B, M * Nr, Nt)
        Gsp = cpack(Gs_mat)
        Gsh_p = cpack(_blocks_conj_T(Gs_mat, M, Nr, Nt))
        Wp = cpack(W)
        Fp = cpack(F)

        pre_call = _make_pre_call(B, Nr, Nt, K, M, T,
                                  noise_ck=float(NoisePower),
                                  noise_ts=float(NoisePower),
                                  noise_f=float(self.NoisePower))
        grad_w_call = _make_grad_wstep_call(B, Nr, Nt, K, M, T,
                                            delta=float(delta), Pt=float(Pt),
                                            n_iter_w=n_iter_W, n_inner=L)

        mu_ck = self.smoothing_factor[0]
        mu_sm = self.smoothing_factor[1]

        Obj_list, SNR_list, Rate_list, Loss = [], [], [], []
        for iter_out in range(NumIter_outer):
            # ---- fused statistics kernel ----
            Fh_p = _conjT_packed(Fp)
            vec, theta_p, flast_p, temp_p = pre_call(Hh_p, Wp, Gp, Gsp, Fh_p)
            xi_ck = vec[:, 0:K, 0]
            th_ck_r = vec[:, K:2 * K, 0]
            th_ck_i = vec[:, 2 * K:3 * K, 0]
            xi_sm = vec[:, 3 * K:3 * K + M, 0]

            z_ck = _softmax_rows(mu_ck, jnp.log1p(xi_ck))
            z_sm = _softmax_rows(mu_sm, jnp.log1p(xi_sm))

            # ---- F update: solve the Hermitian system in its real 2Nr form ----
            tr_, ti_ = temp_p[:, 0], temp_p[:, 1]
            A_real = jnp.concatenate(
                [jnp.concatenate([tr_, -ti_], axis=2),
                 jnp.concatenate([ti_, tr_], axis=2)], axis=1)       # (B,2Nr,2Nr)
            rhs = jnp.concatenate([flast_p[:, 0], flast_p[:, 1]], axis=1)
            sol = jnp.linalg.solve(A_real, rhs)
            Fp = jnp.stack([sol[:, :Nr, :], sol[:, Nr:, :]], axis=1)  # new F

            # ---- fused gradient + projected-gradient W update kernel ----
            g_ck = z_ck * jnp.sqrt(1.0 + xi_ck)
            a_r = g_ck * th_ck_r
            a_i = -g_ck * th_ck_i
            c2 = z_ck * (th_ck_r ** 2 + th_ck_i ** 2)
            c3 = z_sm * jnp.sqrt(1.0 + xi_sm)
            thn2 = jnp.sum(theta_p[:, 0] ** 2 + theta_p[:, 1] ** 2, axis=2)
            s_ = z_sm * thn2
            coef = jnp.concatenate([a_r, a_i, c2, c3, s_], axis=1)[:, None, :]
            steps = self.step_size[iter_out].astype(jnp.float32)      # (L,)
            Wp = grad_w_call(steps, Hp, Hh_p, Gp, Gh_p, Gsh_p, Fp, Wp,
                             theta_p, coef)

            # NOTE: obj_pgd (trace terms) of the reference is dead code (never
            # used in the returned values), so it is skipped here.

            # ---- logged quantities ----
            rate_ck = jnp.min(jnp.log1p(xi_ck), axis=1)
            rate_sm = jnp.min(jnp.log1p(xi_sm), axis=1)
            obj_batch = delta * rate_sm + rate_ck
            Obj_list.append(obj_batch)
            Rate_list.append(jnp.stack((rate_ck, rate_sm), axis=1))
            SNR_list.append(jnp.stack((jnp.min(xi_ck, axis=1),
                                       jnp.min(xi_sm, axis=1)), axis=1))
            Loss.append(-1.0 / (iter_out + 1) * jnp.mean(obj_batch))

        Obj_cache = jnp.stack(Obj_list, axis=1)           # (B, NumIter_outer)
        Rate_cache = jnp.stack(Rate_list, axis=1)         # (B, NumIter_outer, 2)
        SNR_cache = jnp.stack(SNR_list, axis=1)           # (B, NumIter_outer, 2)
        return Loss, Obj_cache, Rate_cache, SNR_cache


# ----------------------------------------------------------------------------
# Main
# ----------------------------------------------------------------------------
def _crandn(key, shape, scale=1.0):
    kr, ki = jax.random.split(key)
    return (scale * lax.complex(jax.random.normal(kr, shape),
                                jax.random.normal(ki, shape))
            ).astype(jnp.complex64)


if __name__ == "__main__":
    batch, Nr, Nt, K, M, C = 2, 4, 8, 4, 2, 1
    Pt, NoisePower, delta = 1.0, 0.1, 1.0
    n_iter_W, NumIter_outer, NumIter_inter = 1, 2, 2

    key = jax.random.PRNGKey(0)
    k_h, k_gs, k_cl, k_f, k_w = jax.random.split(key, 5)

    H = _crandn(k_h, (batch, Nt, K))
    G_s = _crandn(k_gs, (batch, Nr, Nt, M), scale=0.5)
    clutter = _crandn(k_cl, (batch, C * Nr, Nt), scale=0.5)
    # G stacks the M sensing blocks and C clutter blocks along dim 1
    G = jnp.concatenate([G_s[:, :, :, m] for m in range(M)] + [clutter], axis=1)
    F = _crandn(k_f, (batch, Nr, M))
    W = _crandn(k_w, (batch, Nt, K))

    step_size = jnp.full((NumIter_outer, NumIter_inter), 0.01, dtype=jnp.float32)
    smoothing_factor = jnp.array([1.0, 1.0], dtype=jnp.float32)

    net = UnfoldNet(smoothing_factor, step_size, Nr, Nt, K, M, C,
                    NoisePower, delta)

    fwd = jax.jit(lambda H_, G_, Gs_, F_, W_: net.forward(
        H_, G_, Gs_, F_, W_, Pt, NoisePower, delta, n_iter_W, NumIter_outer))

    Loss, Obj_cache, Rate_cache, SNR_cache = fwd(H, G, G_s, F, W)
    jax.block_until_ready((Loss, Obj_cache, Rate_cache, SNR_cache))
    print("KERNEL_OK")
</pallas_src>

<mosaic_0001>
module attributes {stable_mosaic.version = 11 : i64} {
  func.func @_pre_kernel(%arg0: i32, %arg1: memref<1x2x4x8xf32, #tpu.memory_space<vmem>>, %arg2: memref<1x2x8x4xf32, #tpu.memory_space<vmem>>, %arg3: memref<1x2x12x8xf32, #tpu.memory_space<vmem>>, %arg4: memref<1x2x8x8xf32, #tpu.memory_space<vmem>>, %arg5: memref<1x2x2x4xf32, #tpu.memory_space<vmem>>, %arg6: memref<1x14x1xf32, #tpu.memory_space<vmem>>, %arg7: memref<1x2x2x4xf32, #tpu.memory_space<vmem>>, %arg8: memref<1x2x4x2xf32, #tpu.memory_space<vmem>>, %arg9: memref<1x2x4x4xf32, #tpu.memory_space<vmem>>) attributes {dimension_semantics = [#tpu.dimension_semantics<parallel>], iteration_bounds = array<i64: 2>, scalar_prefetch = 0 : i64, scratch_operands = 0 : i64, tpu.core_type = #tpu.core_type<tc>, window_params = [{transform_indices = @transform_0, window_bounds = array<i64: 1, 2, 4, 8>}, {transform_indices = @transform_1, window_bounds = array<i64: 1, 2, 8, 4>}, {transform_indices = @transform_2, window_bounds = array<i64: 1, 2, 12, 8>}, {transform_indices = @transform_3, window_bounds = array<i64: 1, 2, 8, 8>}, {transform_indices = @transform_4, window_bounds = array<i64: 1, 2, 2, 4>}, {transform_indices = @transform_5, window_bounds = array<i64: 1, 14, 1>}, {transform_indices = @transform_6, window_bounds = array<i64: 1, 2, 2, 4>}, {transform_indices = @transform_7, window_bounds = array<i64: 1, 2, 4, 2>}, {transform_indices = @transform_8, window_bounds = array<i64: 1, 2, 4, 4>}]} {
    %c0 = arith.constant 0 : index
    %c0_0 = arith.constant 0 : index
    %c0_1 = arith.constant 0 : index
    %c0_2 = arith.constant 0 : index
    %0 = vector.load %arg1[%c0, %c0_0, %c0_1, %c0_2] : memref<1x2x4x8xf32, #tpu.memory_space<vmem>>, vector<1x1x4x8xf32>
    %1 = vector.shape_cast %0 : vector<1x1x4x8xf32> to vector<4x8xf32>
    %c0_3 = arith.constant 0 : index
    %c1 = arith.constant 1 : index
    %c0_4 = arith.constant 0 : index
    %c0_5 = arith.constant 0 : index
    %2 = vector.load %arg1[%c0_3, %c1, %c0_4, %c0_5] : memref<1x2x4x8xf32, #tpu.memory_space<vmem>>, vector<1x1x4x8xf32>
    %3 = vector.shape_cast %2 : vector<1x1x4x8xf32> to vector<4x8xf32>
    %c0_6 = arith.constant 0 : index
    %c0_7 = arith.constant 0 : index
    %c0_8 = arith.constant 0 : index
    %c0_9 = arith.constant 0 : index
    %4 = vector.load %arg2[%c0_6, %c0_7, %c0_8, %c0_9] : memref<1x2x8x4xf32, #tpu.memory_space<vmem>>, vector<1x1x8x4xf32>
    %5 = vector.shape_cast %4 : vector<1x1x8x4xf32> to vector<8x4xf32>
    %c0_10 = arith.constant 0 : index
    %c1_11 = arith.constant 1 : index
    %c0_12 = arith.constant 0 : index
    %c0_13 = arith.constant 0 : index
    %6 = vector.load %arg2[%c0_10, %c1_11, %c0_12, %c0_13] : memref<1x2x8x4xf32, #tpu.memory_space<vmem>>, vector<1x1x8x4xf32>
    %7 = vector.shape_cast %6 : vector<1x1x8x4xf32> to vector<8x4xf32>
    %c0_14 = arith.constant 0 : index
    %c0_15 = arith.constant 0 : index
    %c0_16 = arith.constant 0 : index
    %c0_17 = arith.constant 0 : index
    %8 = vector.load %arg5[%c0_14, %c0_15, %c0_16, %c0_17] : memref<1x2x2x4xf32, #tpu.memory_space<vmem>>, vector<1x1x2x4xf32>
    %9 = vector.shape_cast %8 : vector<1x1x2x4xf32> to vector<2x4xf32>
    %c0_18 = arith.constant 0 : index
    %c1_19 = arith.constant 1 : index
    %c0_20 = arith.constant 0 : index
    %c0_21 = arith.constant 0 : index
    %10 = vector.load %arg5[%c0_18, %c1_19, %c0_20, %c0_21] : memref<1x2x2x4xf32, #tpu.memory_space<vmem>>, vector<1x1x2x4xf32>
    %11 = vector.shape_cast %10 : vector<1x1x2x4xf32> to vector<2x4xf32>
    %cst = arith.constant dense<0.000000e+00> : vector<4x4xf32>
    %12 = tpu.matmul %1, %5, %cst {dimension_numbers = #tpu.dot_dimension_numbers<[1], [0], [0], [1], [0, 0, 1, 1], [], []>} : vector<4x8xf32>, vector<8x4xf32>, vector<4x4xf32> -> vector<4x4xf32>
    %cst_22 = arith.constant dense<0.000000e+00> : vector<4x4xf32>
    %13 = tpu.matmul %3, %7, %cst_22 {dimension_numbers = #tpu.dot_dimension_numbers<[1], [0], [0], [1], [0, 0, 1, 1], [], []>} : vector<4x8xf32>, vector<8x4xf32>, vector<4x4xf32> -> vector<4x4xf32>
    %cst_23 = arith.constant dense<0.000000e+00> : vector<4x4xf32>
    %14 = tpu.matmul %1, %7, %cst_23 {dimension_numbers = #tpu.dot_dimension_numbers<[1], [0], [0], [1], [0, 0, 1, 1], [], []>} : vector<4x8xf32>, vector<8x4xf32>, vector<4x4xf32> -> vector<4x4xf32>
    %cst_24 = arith.constant dense<0.000000e+00> : vector<4x4xf32>
    %15 = tpu.matmul %3, %5, %cst_24 {dimension_numbers = #tpu.dot_dimension_numbers<[1], [0], [0], [1], [0, 0, 1, 1], [], []>} : vector<4x8xf32>, vector<8x4xf32>, vector<4x4xf32> -> vector<4x4xf32>
    %16 = arith.subf %12, %13 : vector<4x4xf32>
    %17 = arith.addf %14, %15 : vector<4x4xf32>
    %18 = arith.mulf %16, %16 : vector<4x4xf32>
    %19 = arith.mulf %17, %17 : vector<4x4xf32>
    %20 = arith.addf %18, %19 : vector<4x4xf32>
    %cst_25 = arith.constant dense<0.000000e+00> : vector<4xf32>
    %21 = vector.multi_reduction <add>, %20, %cst_25 [1] : vector<4x4xf32> to vector<4xf32>
    %22 = vector.shape_cast %21 : vector<4xf32> to vector<4x1xf32>
    %cst_26 = arith.constant 1.000000e-01 : f32
    %23 = vector.broadcast %cst_26 : f32 to vector<4x1xf32>
    %24 = arith.addf %22, %23 : vector<4x1xf32>
    %25 = tpu.iota {dimensions = array<i32: 0>} : vector<4x4xi32>
    %26 = tpu.iota {dimensions = array<i32: 1>} : vector<4x4xi32>
    %27 = arith.cmpi eq, %25, %26 : vector<4x4xi32>
    %28 = arith.extui %27 : vector<4x4xi1> to vector<4x4xi32>
    %29 = arith.sitofp %28 : vector<4x4xi32> to vector<4x4xf32>
    %30 = arith.mulf %16, %29 : vector<4x4xf32>
    %cst_27 = arith.constant dense<0.000000e+00> : vector<4xf32>
    %31 = vector.multi_reduction <add>, %30, %cst_27 [1] : vector<4x4xf32> to vector<4xf32>
    %32 = vector.shape_cast %31 : vector<4xf32> to vector<4x1xf32>
    %33 = arith.mulf %17, %29 : vector<4x4xf32>
    %cst_28 = arith.constant dense<0.000000e+00> : vector<4xf32>
    %34 = vector.multi_reduction <add>, %33, %cst_28 [1] : vector<4x4xf32> to vector<4xf32>
    %35 = vector.shape_cast %34 : vector<4xf32> to vector<4x1xf32>
    %36 = arith.mulf %32, %32 : vector<4x1xf32>
    %37 = arith.mulf %35, %35 : vector<4x1xf32>
    %38 = arith.addf %36, %37 : vector<4x1xf32>
    %39 = arith.subf %24, %38 : vector<4x1xf32>
    %40 = arith.divf %24, %39 : vector<4x1xf32>
    %cst_29 = arith.constant 1.000000e+00 : f32
    %41 = vector.broadcast %cst_29 : f32 to vector<4x1xf32>
    %42 = arith.subf %40, %41 : vector<4x1xf32>
    %cst_30 = arith.constant 1.000000e+00 : f32
    %43 = vector.broadcast %cst_30 : f32 to vector<4x1xf32>
    %44 = arith.addf %43, %42 : vector<4x1xf32>
    %45 = math.sqrt %44 : vector<4x1xf32>
    %46 = arith.divf %45, %24 : vector<4x1xf32>
    %c0_31 = arith.constant 0 : index
    %c0_32 = arith.constant 0 : index
    %c0_33 = arith.constant 0 : index
    %47 = vector.load %arg6[%c0_31, %c0_32, %c0_33] : memref<1x14x1xf32, #tpu.memory_space<vmem>>, vector<1x4x1xf32>
    %48 = vector.shape_cast %47 : vector<1x4x1xf32> to vector<4x1xf32>
    %49 = vector.shape_cast %42 : vector<4x1xf32> to vector<1x4x1xf32>
    tpu.vector_store %arg6[%c0_31, %c0_32, %c0_33], %49 {strides = array<i32>} : memref<1x14x1xf32, #tpu.memory_space<vmem>>, vector<1x4x1xf32>,
    %50 = arith.mulf %46, %32 : vector<4x1xf32>
    %c0_34 = arith.constant 0 : index
    %c4 = arith.constant 4 : index
    %c0_35 = arith.constant 0 : index
    %51 = vector.load %arg6[%c0_34, %c4, %c0_35] : memref<1x14x1xf32, #tpu.memory_space<vmem>>, vector<1x4x1xf32>
    %52 = vector.shape_cast %51 : vector<1x4x1xf32> to vector<4x1xf32>
    %53 = vector.shape_cast %50 : vector<4x1xf32> to vector<1x4x1xf32>
    tpu.vector_store %arg6[%c0_34, %c4, %c0_35], %53 {strides = array<i32>} : memref<1x14x1xf32, #tpu.memory_space<vmem>>, vector<1x4x1xf32>,
    %54 = arith.mulf %46, %35 : vector<4x1xf32>
    %c0_36 = arith.constant 0 : index
    %c8 = arith.constant 8 : index
    %c0_37 = arith.constant 0 : index
    %55 = vector.load %arg6[%c0_36, %c8, %c0_37] : memref<1x14x1xf32, #tpu.memory_space<vmem>>, vector<1x4x1xf32>
    %56 = vector.shape_cast %55 : vector<1x4x1xf32> to vector<4x1xf32>
    %57 = vector.shape_cast %54 : vector<4x1xf32> to vector<1x4x1xf32>
    tpu.vector_store %arg6[%c0_36, %c8, %c0_37], %57 {strides = array<i32>} : memref<1x14x1xf32, #tpu.memory_space<vmem>>, vector<1x4x1xf32>,
    %58 = arith.mulf %9, %9 : vector<2x4xf32>
    %59 = arith.mulf %11, %11 : vector<2x4xf32>
    %60 = arith.addf %58, %59 : vector<2x4xf32>
    %cst_38 = arith.constant dense<0.000000e+00> : vector<2xf32>
    %61 = vector.multi_reduction <add>, %60, %cst_38 [1] : vector<2x4xf32> to vector<2xf32>
    %62 = vector.shape_cast %61 : vector<2xf32> to vector<2x1xf32>
    %cst_39 = arith.constant 4.000000e-01 : f32
    %63 = vector.broadcast %cst_39 : f32 to vector<2x1xf32>
    %64 = arith.mulf %63, %62 : vector<2x1xf32>
    %65 = tpu.iota {dimensions = array<i32: 0>} : vector<4x4xi32>
    %66 = tpu.iota {dimensions = array<i32: 1>} : vector<4x4xi32>
    %67 = arith.cmpi eq, %65, %66 : vector<4x4xi32>
    %68 = arith.extui %67 : vector<4x4xi1> to vector<4x4xi32>
    %69 = arith.sitofp %68 : vector<4x4xi32> to vector<4x4xf32>
    %cst_40 = arith.constant 4.000000e-01 : f32
    %70 = vector.broadcast %cst_40 : f32 to vector<4x4xf32>
    %71 = arith.mulf %70, %69 : vector<4x4xf32>
    %cst_41 = arith.constant 0.000000e+00 : f32
    %72 = vector.broadcast %cst_41 : f32 to vector<4x4xf32>
    %c0_42 = arith.constant 0 : index
    %c0_43 = arith.constant 0 : index
    %c0_44 = arith.constant 0 : index
    %c0_45 = arith.constant 0 : index
    %73 = vector.load %arg3[%c0_42, %c0_43, %c0_44, %c0_45] : memref<1x2x12x8xf32, #tpu.memory_space<vmem>>, vector<1x1x4x8xf32>
    %74 = vector.shape_cast %73 : vector<1x1x4x8xf32> to vector<4x8xf32>
    %c0_46 = arith.constant 0 : index
    %c1_47 = arith.constant 1 : index
    %c0_48 = arith.constant 0 : index
    %c0_49 = arith.constant 0 : index
    %75 = vector.load %arg3[%c0_46, %c1_47, %c0_48, %c0_49] : memref<1x2x12x8xf32, #tpu.memory_space<vmem>>, vector<1x1x4x8xf32>
    %76 = vector.shape_cast %75 : vector<1x1x4x8xf32> to vector<4x8xf32>
    %cst_50 = arith.constant dense<0.000000e+00> : vector<4x4xf32>
    %77 = tpu.matmul %74, %5, %cst_50 {dimension_numbers = #tpu.dot_dimension_numbers<[1], [0], [0], [1], [0, 0, 1, 1], [], []>} : vector<4x8xf32>, vector<8x4xf32>, vector<4x4xf32> -> vector<4x4xf32>
    %cst_51 = arith.constant dense<0.000000e+00> : vector<4x4xf32>
    %78 = tpu.matmul %76, %7, %cst_51 {dimension_numbers = #tpu.dot_dimension_numbers<[1], [0], [0], [1], [0, 0, 1, 1], [], []>} : vector<4x8xf32>, vector<8x4xf32>, vector<4x4xf32> -> vector<4x4xf32>
    %cst_52 = arith.constant dense<0.000000e+00> : vector<4x4xf32>
    %79 = tpu.matmul %74, %7, %cst_52 {dimension_numbers = #tpu.dot_dimension_numbers<[1], [0], [0], [1], [0, 0, 1, 1], [], []>} : vector<4x8xf32>, vector<8x4xf32>, vector<4x4xf32> -> vector<4x4xf32>
    %cst_53 = arith.constant dense<0.000000e+00> : vector<4x4xf32>
    %80 = tpu.matmul %76, %5, %cst_53 {dimension_numbers = #tpu.dot_dimension_numbers<[1], [0], [0], [1], [0, 0, 1, 1], [], []>} : vector<4x8xf32>, vector<8x4xf32>, vector<4x4xf32> -> vector<4x4xf32>
    %81 = arith.subf %77, %78 : vector<4x4xf32>
    %82 = arith.addf %79, %80 : vector<4x4xf32>
    %cst_54 = arith.constant dense<0.000000e+00> : vector<2x4xf32>
    %83 = tpu.matmul %9, %81, %cst_54 {dimension_numbers = #tpu.dot_dimension_numbers<[1], [0], [0], [1], [0, 0, 1, 1], [], []>} : vector<2x4xf32>, vector<4x4xf32>, vector<2x4xf32> -> vector<2x4xf32>
    %cst_55 = arith.constant dense<0.000000e+00> : vector<2x4xf32>
    %84 = tpu.matmul %11, %82, %cst_55 {dimension_numbers = #tpu.dot_dimension_numbers<[1], [0], [0], [1], [0, 0, 1, 1], [], []>} : vector<2x4xf32>, vector<4x4xf32>, vector<2x4xf32> -> vector<2x4xf32>
    %cst_56 = arith.constant dense<0.000000e+00> : vector<2x4xf32>
    %85 = tpu.matmul %9, %82, %cst_56 {dimension_numbers = #tpu.dot_dimension_numbers<[1], [0], [0], [1], [0, 0, 1, 1], [], []>} : vector<2x4xf32>, vector<4x4xf32>, vector<2x4xf32> -> vector<2x4xf32>
    %cst_57 = arith.constant dense<0.000000e+00> : vector<2x4xf32>
    %86 = tpu.matmul %11, %81, %cst_57 {dimension_numbers = #tpu.dot_dimension_numbers<[1], [0], [0], [1], [0, 0, 1, 1], [], []>} : vector<2x4xf32>, vector<4x4xf32>, vector<2x4xf32> -> vector<2x4xf32>
    %87 = arith.subf %83, %84 : vector<2x4xf32>
    %88 = arith.addf %85, %86 : vector<2x4xf32>
    %89 = arith.mulf %87, %87 : vector<2x4xf32>
    %90 = arith.mulf %88, %88 : vector<2x4xf32>
    %91 = arith.addf %89, %90 : vector<2x4xf32>
    %cst_58 = arith.constant dense<0.000000e+00> : vector<2xf32>
    %92 = vector.multi_reduction <add>, %91, %cst_58 [1] : vector<2x4xf32> to vector<2xf32>
    %93 = vector.shape_cast %92 : vector<2xf32> to vector<2x1xf32>
    %94 = arith.addf %64, %93 : vector<2x1xf32>
    %cst_59 = arith.constant dense<0.000000e+00> : vector<4x4xf32>
    %95 = tpu.matmul %81, %81, %cst_59 {dimension_numbers = #tpu.dot_dimension_numbers<[1], [1], [0], [0], [0, 0, 1, 0], [], []>} : vector<4x4xf32>, vector<4x4xf32>, vector<4x4xf32> -> vector<4x4xf32>
    %cst_60 = arith.constant dense<0.000000e+00> : vector<4x4xf32>
    %96 = tpu.matmul %82, %82, %cst_60 {dimension_numbers = #tpu.dot_dimension_numbers<[1], [1], [0], [0], [0, 0, 1, 0], [], []>} : vector<4x4xf32>, vector<4x4xf32>, vector<4x4xf32> -> vector<4x4xf32>
    %cst_61 = arith.constant dense<0.000000e+00> : vector<4x4xf32>
    %97 = tpu.matmul %81, %82, %cst_61 {dimension_numbers = #tpu.dot_dimension_numbers<[1], [1], [0], [0], [0, 0, 1, 0], [], []>} : vector<4x4xf32>, vector<4x4xf32>, vector<4x4xf32> -> vector<4x4xf32>
    %cst_62 = arith.constant dense<0.000000e+00> : vector<4x4xf32>
    %98 = tpu.matmul %82, %81, %cst_62 {dimension_numbers = #tpu.dot_dimension_numbers<[1], [1], [0], [0], [0, 0, 1, 0], [], []>} : vector<4x4xf32>, vector<4x4xf32>, vector<4x4xf32> -> vector<4x4xf32>
    %99 = arith.addf %95, %96 : vector<4x4xf32>
    %100 = arith.subf %98, %97 : vector<4x4xf32>
    %101 = arith.addf %71, %99 : vector<4x4xf32>
    %102 = arith.addf %72, %100 : vector<4x4xf32>
    %c0_63 = arith.constant 0 : index
    %c0_64 = arith.constant 0 : index
    %c4_65 = arith.constant 4 : index
    %c0_66 = arith.constant 0 : index
    %103 = vector.load %arg3[%c0_63, %c0_64, %c4_65, %c0_66] : memref<1x2x12x8xf32, #tpu.memory_space<vmem>>, vector<1x1x4x8xf32>
    %104 = vector.shape_cast %103 : vector<1x1x4x8xf32> to vector<4x8xf32>
    %c0_67 = arith.constant 0 : index
    %c1_68 = arith.constant 1 : index
    %c4_69 = arith.constant 4 : index
    %c0_70 = arith.constant 0 : index
    %105 = vector.load %arg3[%c0_67, %c1_68, %c4_69, %c0_70] : memref<1x2x12x8xf32, #tpu.memory_space<vmem>>, vector<1x1x4x8xf32>
    %106 = vector.shape_cast %105 : vector<1x1x4x8xf32> to vector<4x8xf32>
    %cst_71 = arith.constant dense<0.000000e+00> : vector<4x4xf32>
    %107 = tpu.matmul %104, %5, %cst_71 {dimension_numbers = #tpu.dot_dimension_numbers<[1], [0], [0], [1], [0, 0, 1, 1], [], []>} : vector<4x8xf32>, vector<8x4xf32>, vector<4x4xf32> -> vector<4x4xf32>
    %cst_72 = arith.constant dense<0.000000e+00> : vector<4x4xf32>
    %108 = tpu.matmul %106, %7, %cst_72 {dimension_numbers = #tpu.dot_dimension_numbers<[1], [0], [0], [1], [0, 0, 1, 1], [], []>} : vector<4x8xf32>, vector<8x4xf32>, vector<4x4xf32> -> vector<4x4xf32>
    %cst_73 = arith.constant dense<0.000000e+00> : vector<4x4xf32>
    %109 = tpu.matmul %104, %7, %cst_73 {dimension_numbers = #tpu.dot_dimension_numbers<[1], [0], [0], [1], [0, 0, 1, 1], [], []>} : vector<4x8xf32>, vector<8x4xf32>, vector<4x4xf32> -> vector<4x4xf32>
    %cst_74 = arith.constant dense<0.000000e+00> : vector<4x4xf32>
    %110 = tpu.matmul %106, %5, %cst_74 {dimension_numbers = #tpu.dot_dimension_numbers<[1], [0], [0], [1], [0, 0, 1, 1], [], []>} : vector<4x8xf32>, vector<8x4xf32>, vector<4x4xf32> -> vector<4x4xf32>
    %111 = arith.subf %107, %108 : vector<4x4xf32>
    %112 = arith.addf %109, %110 : vector<4x4xf32>
    %cst_75 = arith.constant dense<0.000000e+00> : vector<2x4xf32>
    %113 = tpu.matmul %9, %111, %cst_75 {dimension_numbers = #tpu.dot_dimension_numbers<[1], [0], [0], [1], [0, 0, 1, 1], [], []>} : vector<2x4xf32>, vector<4x4xf32>, vector<2x4xf32> -> vector<2x4xf32>
    %cst_76 = arith.constant dense<0.000000e+00> : vector<2x4xf32>
    %114 = tpu.matmul %11, %112, %cst_76 {dimension_numbers = #tpu.dot_dimension_numbers<[1], [0], [0], [1], [0, 0, 1, 1], [], []>} : vector<2x4xf32>, vector<4x4xf32>, vector<2x4xf32> -> vector<2x4xf32>
    %cst_77 = arith.constant dense<0.000000e+00> : vector<2x4xf32>
    %115 = tpu.matmul %9, %112, %cst_77 {dimension_numbers = #tpu.dot_dimension_numbers<[1], [0], [0], [1], [0, 0, 1, 1], [], []>} : vector<2x4xf32>, vector<4x4xf32>, vector<2x4xf32> -> vector<2x4xf32>
    %cst_78 = arith.constant dense<0.000000e+00> : vector<2x4xf32>
    %116 = tpu.matmul %11, %111, %cst_78 {dimension_numbers = #tpu.dot_dimension_numbers<[1], [0], [0], [1], [0, 0, 1, 1], [], []>} : vector<2x4xf32>, vector<4x4xf32>, vector<2x4xf32> -> vector<2x4xf32>
    %117 = arith.subf %113, %114 : vector<2x4xf32>
    %118 = arith.addf %115, %116 : vector<2x4xf32>
    %119 = arith.mulf %117, %117 : vector<2x4xf32>
    %120 = arith.mulf %118, %118 : vector<2x4xf32>
    %121 = arith.addf %119, %120 : vector<2x4xf32>
    %cst_79 = arith.constant dense<0.000000e+00> : vector<2xf32>
    %122 = vector.multi_reduction <add>, %121, %cst_79 [1] : vector<2x4xf32> to vector<2xf32>
    %123 = vector.shape_cast %122 : vector<2xf32> to vector<2x1xf32>
    %124 = arith.addf %94, %123 : vector<2x1xf32>
    %cst_80 = arith.constant dense<0.000000e+00> : vector<4x4xf32>
    %125 = tpu.matmul %111, %111, %cst_80 {dimension_numbers = #tpu.dot_dimension_numbers<[1], [1], [0], [0], [0, 0, 1, 0], [], []>} : vector<4x4xf32>, vector<4x4xf32>, vector<4x4xf32> -> vector<4x4xf32>
    %cst_81 = arith.constant dense<0.000000e+00> : vector<4x4xf32>
    %126 = tpu.matmul %112, %112, %cst_81 {dimension_numbers = #tpu.dot_dimension_numbers<[1], [1], [0], [0], [0, 0, 1, 0], [], []>} : vector<4x4xf32>, vector<4x4xf32>, vector<4x4xf32> -> vector<4x4xf32>
    %cst_82 = arith.constant dense<0.000000e+00> : vector<4x4xf32>
    %127 = tpu.matmul %111, %112, %cst_82 {dimension_numbers = #tpu.dot_dimension_numbers<[1], [1], [0], [0], [0, 0, 1, 0], [], []>} : vector<4x4xf32>, vector<4x4xf32>, vector<4x4xf32> -> vector<4x4xf32>
    %cst_83 = arith.constant dense<0.000000e+00> : vector<4x4xf32>
    %128 = tpu.matmul %112, %111, %cst_83 {dimension_numbers = #tpu.dot_dimension_numbers<[1], [1], [0], [0], [0, 0, 1, 0], [], []>} : vector<4x4xf32>, vector<4x4xf32>, vector<4x4xf32> -> vector<4x4xf32>
    %129 = arith.addf %125, %126 : vector<4x4xf32>
    %130 = arith.subf %128, %127 : vector<4x4xf32>
    %131 = arith.addf %101, %129 : vector<4x4xf32>
    %132 = arith.addf %102, %130 : vector<4x4xf32>
    %c0_84 = arith.constant 0 : index
    %c0_85 = arith.constant 0 : index
    %c8_86 = arith.constant 8 : index
    %c0_87 = arith.constant 0 : index
    %133 = vector.load %arg3[%c0_84, %c0_85, %c8_86, %c0_87] : memref<1x2x12x8xf32, #tpu.memory_space<vmem>>, vector<1x1x4x8xf32>
    %134 = vector.shape_cast %133 : vector<1x1x4x8xf32> to vector<4x8xf32>
    %c0_88 = arith.constant 0 : index
    %c1_89 = arith.constant 1 : index
    %c8_90 = arith.constant 8 : index
    %c0_91 = arith.constant 0 : index
    %135 = vector.load %arg3[%c0_88, %c1_89, %c8_90, %c0_91] : memref<1x2x12x8xf32, #tpu.memory_space<vmem>>, vector<1x1x4x8xf32>
    %136 = vector.shape_cast %135 : vector<1x1x4x8xf32> to vector<4x8xf32>
    %cst_92 = arith.constant dense<0.000000e+00> : vector<4x4xf32>
    %137 = tpu.matmul %134, %5, %cst_92 {dimension_numbers = #tpu.dot_dimension_numbers<[1], [0], [0], [1], [0, 0, 1, 1], [], []>} : vector<4x8xf32>, vector<8x4xf32>, vector<4x4xf32> -> vector<4x4xf32>
    %cst_93 = arith.constant dense<0.000000e+00> : vector<4x4xf32>
    %138 = tpu.matmul %136, %7, %cst_93 {dimension_numbers = #tpu.dot_dimension_numbers<[1], [0], [0], [1], [0, 0, 1, 1], [], []>} : vector<4x8xf32>, vector<8x4xf32>, vector<4x4xf32> -> vector<4x4xf32>
    %cst_94 = arith.constant dense<0.000000e+00> : vector<4x4xf32>
    %139 = tpu.matmul %134, %7, %cst_94 {dimension_numbers = #tpu.dot_dimension_numbers<[1], [0], [0], [1], [0, 0, 1, 1], [], []>} : vector<4x8xf32>, vector<8x4xf32>, vector<4x4xf32> -> vector<4x4xf32>
    %cst_95 = arith.constant dense<0.000000e+00> : vector<4x4xf32>
    %140 = tpu.matmul %136, %5, %cst_95 {dimension_numbers = #tpu.dot_dimension_numbers<[1], [0], [0], [1], [0, 0, 1, 1], [], []>} : vector<4x8xf32>, vector<8x4xf32>, vector<4x4xf32> -> vector<4x4xf32>
    %141 = arith.subf %137, %138 : vector<4x4xf32>
    %142 = arith.addf %139, %140 : vector<4x4xf32>
    %cst_96 = arith.constant dense<0.000000e+00> : vector<2x4xf32>
    %143 = tpu.matmul %9, %141, %cst_96 {dimension_numbers = #tpu.dot_dimension_numbers<[1], [0], [0], [1], [0, 0, 1, 1], [], []>} : vector<2x4xf32>, vector<4x4xf32>, vector<2x4xf32> -> vector<2x4xf32>
    %cst_97 = arith.constant dense<0.000000e+00> : vector<2x4xf32>
    %144 = tpu.matmul %11, %142, %cst_97 {dimension_numbers = #tpu.dot_dimension_numbers<[1], [0], [0], [1], [0, 0, 1, 1], [], []>} : vector<2x4xf32>, vector<4x4xf32>, vector<2x4xf32> -> vector<2x4xf32>
    %cst_98 = arith.constant dense<0.000000e+00> : vector<2x4xf32>
    %145 = tpu.matmul %9, %142, %cst_98 {dimension_numbers = #tpu.dot_dimension_numbers<[1], [0], [0], [1], [0, 0, 1, 1], [], []>} : vector<2x4xf32>, vector<4x4xf32>, vector<2x4xf32> -> vector<2x4xf32>
    %cst_99 = arith.constant dense<0.000000e+00> : vector<2x4xf32>
    %146 = tpu.matmul %11, %141, %cst_99 {dimension_numbers = #tpu.dot_dimension_numbers<[1], [0], [0], [1], [0, 0, 1, 1], [], []>} : vector<2x4xf32>, vector<4x4xf32>, vector<2x4xf32> -> vector<2x4xf32>
    %147 = arith.subf %143, %144 : vector<2x4xf32>
    %148 = arith.addf %145, %146 : vector<2x4xf32>
    %149 = arith.mulf %147, %147 : vector<2x4xf32>
    %150 = arith.mulf %148, %148 : vector<2x4xf32>
    %151 = arith.addf %149, %150 : vector<2x4xf32>
    %cst_100 = arith.constant dense<0.000000e+00> : vector<2xf32>
    %152 = vector.multi_reduction <add>, %151, %cst_100 [1] : vector<2x4xf32> to vector<2xf32>
    %153 = vector.shape_cast %152 : vector<2xf32> to vector<2x1xf32>
    %154 = arith.addf %124, %153 : vector<2x1xf32>
    %cst_101 = arith.constant dense<0.000000e+00> : vector<4x4xf32>
    %155 = tpu.matmul %141, %141, %cst_101 {dimension_numbers = #tpu.dot_dimension_numbers<[1], [1], [0], [0], [0, 0, 1, 0], [], []>} : vector<4x4xf32>, vector<4x4xf32>, vector<4x4xf32> -> vector<4x4xf32>
    %cst_102 = arith.constant dense<0.000000e+00> : vector<4x4xf32>
    %156 = tpu.matmul %142, %142, %cst_102 {dimension_numbers = #tpu.dot_dimension_numbers<[1], [1], [0], [0], [0, 0, 1, 0], [], []>} : vector<4x4xf32>, vector<4x4xf32>, vector<4x4xf32> -> vector<4x4xf32>
    %cst_103 = arith.constant dense<0.000000e+00> : vector<4x4xf32>
    %157 = tpu.matmul %141, %142, %cst_103 {dimension_numbers = #tpu.dot_dimension_numbers<[1], [1], [0], [0], [0, 0, 1, 0], [], []>} : vector<4x4xf32>, vector<4x4xf32>, vector<4x4xf32> -> vector<4x4xf32>
    %cst_104 = arith.constant dense<0.000000e+00> : vector<4x4xf32>
    %158 = tpu.matmul %142, %141, %cst_104 {dimension_numbers = #tpu.dot_dimension_numbers<[1], [1], [0], [0], [0, 0, 1, 0], [], []>} : vector<4x4xf32>, vector<4x4xf32>, vector<4x4xf32> -> vector<4x4xf32>
    %159 = arith.addf %155, %156 : vector<4x4xf32>
    %160 = arith.subf %158, %157 : vector<4x4xf32>
    %161 = arith.addf %131, %159 : vector<4x4xf32>
    %162 = arith.addf %132, %160 : vector<4x4xf32>
    %c0_105 = arith.constant 0 : index
    %c0_106 = arith.constant 0 : index
    %c0_107 = arith.constant 0 : index
    %c0_108 = arith.constant 0 : index
    %163 = vector.load %arg9[%c0_105, %c0_106, %c0_107, %c0_108] : memref<1x2x4x4xf32, #tpu.memory_space<vmem>>, vector<1x1x4x4xf32>
    %164 = vector.shape_cast %163 : vector<1x1x4x4xf32> to vector<4x4xf32>
    %165 = vector.shape_cast %161 : vector<4x4xf32> to vector<1x1x4x4xf32>
    tpu.vector_store %arg9[%c0_105, %c0_106, %c0_107, %c0_108], %165 {strides = array<i32>} : memref<1x2x4x4xf32, #tpu.memory_space<vmem>>, vector<1x1x4x4xf32>,
    %c0_109 = arith.constant 0 : index
    %c1_110 = arith.constant 1 : index
    %c0_111 = arith.constant 0 : index
    %c0_112 = arith.constant 0 : index
    %166 = vector.load %arg9[%c0_109, %c1_110, %c0_111, %c0_112] : memref<1x2x4x4xf32, #tpu.memory_space<vmem>>, vector<1x1x4x4xf32>
    %167 = vector.shape_cast %166 : vector<1x1x4x4xf32> to vector<4x4xf32>
    %168 = vector.shape_cast %162 : vector<4x4xf32> to vector<1x1x4x4xf32>
    tpu.vector_store %arg9[%c0_109, %c1_110, %c0_111, %c0_112], %168 {strides = array<i32>} : memref<1x2x4x4xf32, #tpu.memory_space<vmem>>, vector<1x1x4x4xf32>,
    %c0_113 = arith.constant 0 : index
    %c0_114 = arith.constant 0 : index
    %c0_115 = arith.constant 0 : index
    %c0_116 = arith.constant 0 : index
    %169 = vector.load %arg4[%c0_113, %c0_114, %c0_115, %c0_116] : memref<1x2x8x8xf32, #tpu.memory_space<vmem>>, vector<1x1x4x8xf32>
    %170 = vector.shape_cast %169 : vector<1x1x4x8xf32> to vector<4x8xf32>
    %c0_117 = arith.constant 0 : index
    %c1_118 = arith.constant 1 : index
    %c0_119 = arith.constant 0 : index
    %c0_120 = arith.constant 0 : index
    %171 = vector.load %arg4[%c0_117, %c1_118, %c0_119, %c0_120] : memref<1x2x8x8xf32, #tpu.memory_space<vmem>>, vector<1x1x4x8xf32>
    %172 = vector.shape_cast %171 : vector<1x1x4x8xf32> to vector<4x8xf32>
    %cst_121 = arith.constant dense<0.000000e+00> : vector<4x4xf32>
    %173 = tpu.matmul %170, %5, %cst_121 {dimension_numbers = #tpu.dot_dimension_numbers<[1], [0], [0], [1], [0, 0, 1, 1], [], []>} : vector<4x8xf32>, vector<8x4xf32>, vector<4x4xf32> -> vector<4x4xf32>
    %cst_122 = arith.constant dense<0.000000e+00> : vector<4x4xf32>
    %174 = tpu.matmul %172, %7, %cst_122 {dimension_numbers = #tpu.dot_dimension_numbers<[1], [0], [0], [1], [0, 0, 1, 1], [], []>} : vector<4x8xf32>, vector<8x4xf32>, vector<4x4xf32> -> vector<4x4xf32>
    %cst_123 = arith.constant dense<0.000000e+00> : vector<4x4xf32>
    %175 = tpu.matmul %170, %7, %cst_123 {dimension_numbers = #tpu.dot_dimension_numbers<[1], [0], [0], [1], [0, 0, 1, 1], [], []>} : vector<4x8xf32>, vector<8x4xf32>, vector<4x4xf32> -> vector<4x4xf32>
    %cst_124 = arith.constant dense<0.000000e+00> : vector<4x4xf32>
    %176 = tpu.matmul %172, %5, %cst_124 {dimension_numbers = #tpu.dot_dimension_numbers<[1], [0], [0], [1], [0, 0, 1, 1], [], []>} : vector<4x8xf32>, vector<8x4xf32>, vector<4x4xf32> -> vector<4x4xf32>
    %177 = arith.subf %173, %174 : vector<4x4xf32>
    %178 = arith.addf %175, %176 : vector<4x4xf32>
    %179 = vector.extract_strided_slice %9 {offsets = [0, 0], sizes = [1, 4], strides = [1, 1]} : vector<2x4xf32> to vector<1x4xf32>
    %180 = vector.extract_strided_slice %11 {offsets = [0, 0], sizes = [1, 4], strides = [1, 1]} : vector<2x4xf32> to vector<1x4xf32>
    %cst_125 = arith.constant dense<0.000000e+00> : vector<1x4xf32>
    %181 = tpu.matmul %179, %177, %cst_125 {dimension_numbers = #tpu.dot_dimension_numbers<[1], [0], [0], [1], [0, 0, 1, 1], [], []>} : vector<1x4xf32>, vector<4x4xf32>, vector<1x4xf32> -> vector<1x4xf32>
    %cst_126 = arith.constant dense<0.000000e+00> : vector<1x4xf32>
    %182 = tpu.matmul %180, %178, %cst_126 {dimension_numbers = #tpu.dot_dimension_numbers<[1], [0], [0], [1], [0, 0, 1, 1], [], []>} : vector<1x4xf32>, vector<4x4xf32>, vector<1x4xf32> -> vector<1x4xf32>
    %cst_127 = arith.constant dense<0.000000e+00> : vector<1x4xf32>
    %183 = tpu.matmul %179, %178, %cst_127 {dimension_numbers = #tpu.dot_dimension_numbers<[1], [0], [0], [1], [0, 0, 1, 1], [], []>} : vector<1x4xf32>, vector<4x4xf32>, vector<1x4xf32> -> vector<1x4xf32>
    %cst_128 = arith.constant dense<0.000000e+00> : vector<1x4xf32>
    %184 = tpu.matmul %180, %177, %cst_128 {dimension_numbers = #tpu.dot_dimension_numbers<[1], [0], [0], [1], [0, 0, 1, 1], [], []>} : vector<1x4xf32>, vector<4x4xf32>, vector<1x4xf32> -> vector<1x4xf32>
    %185 = arith.subf %181, %182 : vector<1x4xf32>
    %186 = arith.addf %183, %184 : vector<1x4xf32>
    %187 = arith.mulf %185, %185 : vector<1x4xf32>
    %188 = arith.mulf %186, %186 : vector<1x4xf32>
    %189 = arith.addf %187, %188 : vector<1x4xf32>
    %cst_129 = arith.constant dense<0.000000e+00> : vector<1xf32>
    %190 = vector.multi_reduction <add>, %189, %cst_129 [1] : vector<1x4xf32> to vector<1xf32>
    %191 = vector.shape_cast %190 : vector<1xf32> to vector<1x1xf32>
    %192 = vector.extract_strided_slice %154 {offsets = [0, 0], sizes = [1, 1], strides = [1, 1]} : vector<2x1xf32> to vector<1x1xf32>
    %193 = arith.subf %192, %191 : vector<1x1xf32>
    %194 = arith.divf %191, %193 : vector<1x1xf32>
    %c0_130 = arith.constant 0 : index
    %c12 = arith.constant 12 : index
    %c0_131 = arith.constant 0 : index
    %195 = vector.load %arg6[%c0_130, %c12, %c0_131] : memref<1x14x1xf32, #tpu.memory_space<vmem>>, vector<1x1x1xf32>
    %196 = vector.shape_cast %195 : vector<1x1x1xf32> to vector<1x1xf32>
    %197 = vector.shape_cast %194 : vector<1x1xf32> to vector<1x1x1xf32>
    tpu.vector_store %arg6[%c0_130, %c12, %c0_131], %197 {strides = array<i32>} : memref<1x14x1xf32, #tpu.memory_space<vmem>>, vector<1x1x1xf32>,
    %cst_132 = arith.constant 1.000000e+00 : f32
    %198 = vector.broadcast %cst_132 : f32 to vector<1x1xf32>
    %199 = arith.addf %198, %194 : vector<1x1xf32>
    %200 = math.sqrt %199 : vector<1x1xf32>
    %201 = arith.divf %200, %192 : vector<1x1xf32>
    %202 = vector.broadcast %201 : vector<1x1xf32> to vector<1x4xf32>
    %203 = arith.mulf %185, %202 : vector<1x4xf32>
    %204 = vector.broadcast %201 : vector<1x1xf32> to vector<1x4xf32>
    %205 = arith.mulf %186, %204 : vector<1x4xf32>
    %c0_133 = arith.constant 0 : index
    %c0_134 = arith.constant 0 : index
    %c0_135 = arith.constant 0 : index
    %c0_136 = arith.constant 0 : index
    %206 = vector.load %arg7[%c0_133, %c0_134, %c0_135, %c0_136] : memref<1x2x2x4xf32, #tpu.memory_space<vmem>>, vector<1x1x1x4xf32>
    %207 = vector.shape_cast %206 : vector<1x1x1x4xf32> to vector<1x4xf32>
    %208 = vector.shape_cast %203 : vector<1x4xf32> to vector<1x1x1x4xf32>
    tpu.vector_store %arg7[%c0_133, %c0_134, %c0_135, %c0_136], %208 {strides = array<i32>} : memref<1x2x2x4xf32, #tpu.memory_space<vmem>>, vector<1x1x1x4xf32>,
    %c0_137 = arith.constant 0 : index
    %c1_138 = arith.constant 1 : index
    %c0_139 = arith.constant 0 : index
    %c0_140 = arith.constant 0 : index
    %209 = vector.load %arg7[%c0_137, %c1_138, %c0_139, %c0_140] : memref<1x2x2x4xf32, #tpu.memory_space<vmem>>, vector<1x1x1x4xf32>
    %210 = vector.shape_cast %209 : vector<1x1x1x4xf32> to vector<1x4xf32>
    %211 = vector.shape_cast %205 : vector<1x4xf32> to vector<1x1x1x4xf32>
    tpu.vector_store %arg7[%c0_137, %c1_138, %c0_139, %c0_140], %211 {strides = array<i32>} : memref<1x2x2x4xf32, #tpu.memory_space<vmem>>, vector<1x1x1x4xf32>,
    %212 = arith.mulf %203, %203 : vector<1x4xf32>
    %213 = arith.mulf %205, %205 : vector<1x4xf32>
    %214 = arith.addf %212, %213 : vector<1x4xf32>
    %cst_141 = arith.constant dense<0.000000e+00> : vector<1xf32>
    %215 = vector.multi_reduction <add>, %214, %cst_141 [1] : vector<1x4xf32> to vector<1xf32>
    %216 = vector.shape_cast %215 : vector<1xf32> to vector<1x1xf32>
    %cst_142 = arith.constant 1.000000e+00 : f32
    %217 = vector.broadcast %cst_142 : f32 to vector<1x1xf32>
    %218 = arith.addf %217, %194 : vector<1x1xf32>
    %219 = math.sqrt %218 : vector<1x1xf32>
    %220 = arith.divf %219, %216 : vector<1x1xf32>
    %cst_143 = arith.constant dense<0.000000e+00> : vector<4x1xf32>
    %221 = tpu.matmul %177, %203, %cst_143 {dimension_numbers = #tpu.dot_dimension_numbers<[1], [1], [0], [0], [0, 0, 1, 0], [], []>} : vector<4x4xf32>, vector<1x4xf32>, vector<4x1xf32> -> vector<4x1xf32>
    %cst_144 = arith.constant dense<0.000000e+00> : vector<4x1xf32>
    %222 = tpu.matmul %178, %205, %cst_144 {dimension_numbers = #tpu.dot_dimension_numbers<[1], [1], [0], [0], [0, 0, 1, 0], [], []>} : vector<4x4xf32>, vector<1x4xf32>, vector<4x1xf32> -> vector<4x1xf32>
    %cst_145 = arith.constant dense<0.000000e+00> : vector<4x1xf32>
    %223 = tpu.matmul %177, %205, %cst_145 {dimension_numbers = #tpu.dot_dimension_numbers<[1], [1], [0], [0], [0, 0, 1, 0], [], []>} : vector<4x4xf32>, vector<1x4xf32>, vector<4x1xf32> -> vector<4x1xf32>
    %cst_146 = arith.constant dense<0.000000e+00> : vector<4x1xf32>
    %224 = tpu.matmul %178, %203, %cst_146 {dimension_numbers = #tpu.dot_dimension_numbers<[1], [1], [0], [0], [0, 0, 1, 0], [], []>} : vector<4x4xf32>, vector<1x4xf32>, vector<4x1xf32> -> vector<4x1xf32>
    %225 = arith.addf %221, %222 : vector<4x1xf32>
    %226 = arith.subf %224, %223 : vector<4x1xf32>
    %227 = vector.broadcast %220 : vector<1x1xf32> to vector<4x1xf32>
    %228 = arith.mulf %227, %225 : vector<4x1xf32>
    %c0_147 = arith.constant 0 : index
    %c0_148 = arith.constant 0 : index
    %c0_149 = arith.constant 0 : index
    %c0_150 = arith.constant 0 : index
    %229 = vector.load %arg8[%c0_147, %c0_148, %c0_149, %c0_150] : memref<1x2x4x2xf32, #tpu.memory_space<vmem>>, vector<1x1x4x1xf32>
    %230 = vector.shape_cast %229 : vector<1x1x4x1xf32> to vector<4x1xf32>
    %231 = vector.shape_cast %228 : vector<4x1xf32> to vector<1x1x4x1xf32>
    tpu.vector_store %arg8[%c0_147, %c0_148, %c0_149, %c0_150], %231 {strides = array<i32>} : memref<1x2x4x2xf32, #tpu.memory_space<vmem>>, vector<1x1x4x1xf32>,
    %232 = vector.broadcast %220 : vector<1x1xf32> to vector<4x1xf32>
    %233 = arith.mulf %232, %226 : vector<4x1xf32>
    %c0_151 = arith.constant 0 : index
    %c1_152 = arith.constant 1 : index
    %c0_153 = arith.constant 0 : index
    %c0_154 = arith.constant 0 : index
    %234 = vector.load %arg8[%c0_151, %c1_152, %c0_153, %c0_154] : memref<1x2x4x2xf32, #tpu.memory_space<vmem>>, vector<1x1x4x1xf32>
    %235 = vector.shape_cast %234 : vector<1x1x4x1xf32> to vector<4x1xf32>
    %236 = vector.shape_cast %233 : vector<4x1xf32> to vector<1x1x4x1xf32>
    tpu.vector_store %arg8[%c0_151, %c1_152, %c0_153, %c0_154], %236 {strides = array<i32>} : memref<1x2x4x2xf32, #tpu.memory_space<vmem>>, vector<1x1x4x1xf32>,
    %c0_155 = arith.constant 0 : index
    %c0_156 = arith.constant 0 : index
    %c4_157 = arith.constant 4 : index
    %c0_158 = arith.constant 0 : index
    %237 = vector.load %arg4[%c0_155, %c0_156, %c4_157, %c0_158] : memref<1x2x8x8xf32, #tpu.memory_space<vmem>>, vector<1x1x4x8xf32>
    %238 = vector.shape_cast %237 : vector<1x1x4x8xf32> to vector<4x8xf32>
    %c0_159 = arith.constant 0 : index
    %c1_160 = arith.constant 1 : index
    %c4_161 = arith.constant 4 : index
    %c0_162 = arith.constant 0 : index
    %239 = vector.load %arg4[%c0_159, %c1_160, %c4_161, %c0_162] : memref<1x2x8x8xf32, #tpu.memory_space<vmem>>, vector<1x1x4x8xf32>
    %240 = vector.shape_cast %239 : vector<1x1x4x8xf32> to vector<4x8xf32>
    %cst_163 = arith.constant dense<0.000000e+00> : vector<4x4xf32>
    %241 = tpu.matmul %238, %5, %cst_163 {dimension_numbers = #tpu.dot_dimension_numbers<[1], [0], [0], [1], [0, 0, 1, 1], [], []>} : vector<4x8xf32>, vector<8x4xf32>, vector<4x4xf32> -> vector<4x4xf32>
    %cst_164 = arith.constant dense<0.000000e+00> : vector<4x4xf32>
    %242 = tpu.matmul %240, %7, %cst_164 {dimension_numbers = #tpu.dot_dimension_numbers<[1], [0], [0], [1], [0, 0, 1, 1], [], []>} : vector<4x8xf32>, vector<8x4xf32>, vector<4x4xf32> -> vector<4x4xf32>
    %cst_165 = arith.constant dense<0.000000e+00> : vector<4x4xf32>
    %243 = tpu.matmul %238, %7, %cst_165 {dimension_numbers = #tpu.dot_dimension_numbers<[1], [0], [0], [1], [0, 0, 1, 1], [], []>} : vector<4x8xf32>, vector<8x4xf32>, vector<4x4xf32> -> vector<4x4xf32>
    %cst_166 = arith.constant dense<0.000000e+00> : vector<4x4xf32>
    %244 = tpu.matmul %240, %5, %cst_166 {dimension_numbers = #tpu.dot_dimension_numbers<[1], [0], [0], [1], [0, 0, 1, 1], [], []>} : vector<4x8xf32>, vector<8x4xf32>, vector<4x4xf32> -> vector<4x4xf32>
    %245 = arith.subf %241, %242 : vector<4x4xf32>
    %246 = arith.addf %243, %244 : vector<4x4xf32>
    %247 = vector.extract_strided_slice %9 {offsets = [1, 0], sizes = [1, 4], strides = [1, 1]} : vector<2x4xf32> to vector<1x4xf32>
    %248 = vector.extract_strided_slice %11 {offsets = [1, 0], sizes = [1, 4], strides = [1, 1]} : vector<2x4xf32> to vector<1x4xf32>
    %cst_167 = arith.constant dense<0.000000e+00> : vector<1x4xf32>
    %249 = tpu.matmul %247, %245, %cst_167 {dimension_numbers = #tpu.dot_dimension_numbers<[1], [0], [0], [1], [0, 0, 1, 1], [], []>} : vector<1x4xf32>, vector<4x4xf32>, vector<1x4xf32> -> vector<1x4xf32>
    %cst_168 = arith.constant dense<0.000000e+00> : vector<1x4xf32>
    %250 = tpu.matmul %248, %246, %cst_168 {dimension_numbers = #tpu.dot_dimension_numbers<[1], [0], [0], [1], [0, 0, 1, 1], [], []>} : vector<1x4xf32>, vector<4x4xf32>, vector<1x4xf32> -> vector<1x4xf32>
    %cst_169 = arith.constant dense<0.000000e+00> : vector<1x4xf32>
    %251 = tpu.matmul %247, %246, %cst_169 {dimension_numbers = #tpu.dot_dimension_numbers<[1], [0], [0], [1], [0, 0, 1, 1], [], []>} : vector<1x4xf32>, vector<4x4xf32>, vector<1x4xf32> -> vector<1x4xf32>
    %cst_170 = arith.constant dense<0.000000e+00> : vector<1x4xf32>
    %252 = tpu.matmul %248, %245, %cst_170 {dimension_numbers = #tpu.dot_dimension_numbers<[1], [0], [0], [1], [0, 0, 1, 1], [], []>} : vector<1x4xf32>, vector<4x4xf32>, vector<1x4xf32> -> vector<1x4xf32>
    %253 = arith.subf %249, %250 : vector<1x4xf32>
    %254 = arith.addf %251, %252 : vector<1x4xf32>
    %255 = arith.mulf %253, %253 : vector<1x4xf32>
    %256 = arith.mulf %254, %254 : vector<1x4xf32>
    %257 = arith.addf %255, %256 : vector<1x4xf32>
    %cst_171 = arith.constant dense<0.000000e+00> : vector<1xf32>
    %258 = vector.multi_reduction <add>, %257, %cst_171 [1] : vector<1x4xf32> to vector<1xf32>
    %259 = vector.shape_cast %258 : vector<1xf32> to vector<1x1xf32>
    %260 = vector.extract_strided_slice %154 {offsets = [1, 0], sizes = [1, 1], strides = [1, 1]} : vector<2x1xf32> to vector<1x1xf32>
    %261 = arith.subf %260, %259 : vector<1x1xf32>
    %262 = arith.divf %259, %261 : vector<1x1xf32>
    %c0_172 = arith.constant 0 : index
    %c13 = arith.constant 13 : index
    %c0_173 = arith.constant 0 : index
    %263 = vector.load %arg6[%c0_172, %c13, %c0_173] : memref<1x14x1xf32, #tpu.memory_space<vmem>>, vector<1x1x1xf32>
    %264 = vector.shape_cast %263 : vector<1x1x1xf32> to vector<1x1xf32>
    %265 = vector.shape_cast %262 : vector<1x1xf32> to vector<1x1x1xf32>
    tpu.vector_store %arg6[%c0_172, %c13, %c0_173], %265 {strides = array<i32>} : memref<1x14x1xf32, #tpu.memory_space<vmem>>, vector<1x1x1xf32>,
    %cst_174 = arith.constant 1.000000e+00 : f32
    %266 = vector.broadcast %cst_174 : f32 to vector<1x1xf32>
    %267 = arith.addf %266, %262 : vector<1x1xf32>
    %268 = math.sqrt %267 : vector<1x1xf32>
    %269 = arith.divf %268, %260 : vector<1x1xf32>
    %270 = vector.broadcast %269 : vector<1x1xf32> to vector<1x4xf32>
    %271 = arith.mulf %253, %270 : vector<1x4xf32>
    %272 = vector.broadcast %269 : vector<1x1xf32> to vector<1x4xf32>
    %273 = arith.mulf %254, %272 : vector<1x4xf32>
    %c0_175 = arith.constant 0 : index
    %c0_176 = arith.constant 0 : index
    %c1_177 = arith.constant 1 : index
    %c0_178 = arith.constant 0 : index
    %274 = vector.load %arg7[%c0_175, %c0_176, %c1_177, %c0_178] : memref<1x2x2x4xf32, #tpu.memory_space<vmem>>, vector<1x1x1x4xf32>
    %275 = vector.shape_cast %274 : vector<1x1x1x4xf32> to vector<1x4xf32>
    %276 = vector.shape_cast %271 : vector<1x4xf32> to vector<1x1x1x4xf32>
    tpu.vector_store %arg7[%c0_175, %c0_176, %c1_177, %c0_178], %276 {strides = array<i32>} : memref<1x2x2x4xf32, #tpu.memory_space<vmem>>, vector<1x1x1x4xf32>,
    %c0_179 = arith.constant 0 : index
    %c1_180 = arith.constant 1 : index
    %c1_181 = arith.constant 1 : index
    %c0_182 = arith.constant 0 : index
    %277 = vector.load %arg7[%c0_179, %c1_180, %c1_181, %c0_182] : memref<1x2x2x4xf32, #tpu.memory_space<vmem>>, vector<1x1x1x4xf32>
    %278 = vector.shape_cast %277 : vector<1x1x1x4xf32> to vector<1x4xf32>
    %279 = vector.shape_cast %273 : vector<1x4xf32> to vector<1x1x1x4xf32>
    tpu.vector_store %arg7[%c0_179, %c1_180, %c1_181, %c0_182], %279 {strides = array<i32>} : memref<1x2x2x4xf32, #tpu.memory_space<vmem>>, vector<1x1x1x4xf32>,
    %280 = arith.mulf %271, %271 : vector<1x4xf32>
    %281 = arith.mulf %273, %273 : vector<1x4xf32>
    %282 = arith.addf %280, %281 : vector<1x4xf32>
    %cst_183 = arith.constant dense<0.000000e+00> : vector<1xf32>
    %283 = vector.multi_reduction <add>, %282, %cst_183 [1] : vector<1x4xf32> to vector<1xf32>
    %284 = vector.shape_cast %283 : vector<1xf32> to vector<1x1xf32>
    %cst_184 = arith.constant 1.000000e+00 : f32
    %285 = vector.broadcast %cst_184 : f32 to vector<1x1xf32>
    %286 = arith.addf %285, %262 : vector<1x1xf32>
    %287 = math.sqrt %286 : vector<1x1xf32>
    %288 = arith.divf %287, %284 : vector<1x1xf32>
    %cst_185 = arith.constant dense<0.000000e+00> : vector<4x1xf32>
    %289 = tpu.matmul %245, %271, %cst_185 {dimension_numbers = #tpu.dot_dimension_numbers<[1], [1], [0], [0], [0, 0, 1, 0], [], []>} : vector<4x4xf32>, vector<1x4xf32>, vector<4x1xf32> -> vector<4x1xf32>
    %cst_186 = arith.constant dense<0.000000e+00> : vector<4x1xf32>
    %290 = tpu.matmul %246, %273, %cst_186 {dimension_numbers = #tpu.dot_dimension_numbers<[1], [1], [0], [0], [0, 0, 1, 0], [], []>} : vector<4x4xf32>, vector<1x4xf32>, vector<4x1xf32> -> vector<4x1xf32>
    %cst_187 = arith.constant dense<0.000000e+00> : vector<4x1xf32>
    %291 = tpu.matmul %245, %273, %cst_187 {dimension_numbers = #tpu.dot_dimension_numbers<[1], [1], [0], [0], [0, 0, 1, 0], [], []>} : vector<4x4xf32>, vector<1x4xf32>, vector<4x1xf32> -> vector<4x1xf32>
    %cst_188 = arith.constant dense<0.000000e+00> : vector<4x1xf32>
    %292 = tpu.matmul %246, %271, %cst_188 {dimension_numbers = #tpu.dot_dimension_numbers<[1], [1], [0], [0], [0, 0, 1, 0], [], []>} : vector<4x4xf32>, vector<1x4xf32>, vector<4x1xf32> -> vector<4x1xf32>
    %293 = arith.addf %289, %290 : vector<4x1xf32>
    %294 = arith.subf %292, %291 : vector<4x1xf32>
    %295 = vector.broadcast %288 : vector<1x1xf32> to vector<4x1xf32>
    %296 = arith.mulf %295, %293 : vector<4x1xf32>
    %c0_189 = arith.constant 0 : index
    %c0_190 = arith.constant 0 : index
    %c0_191 = arith.constant 0 : index
    %c1_192 = arith.constant 1 : index
    %297 = vector.load %arg8[%c0_189, %c0_190, %c0_191, %c1_192] : memref<1x2x4x2xf32, #tpu.memory_space<vmem>>, vector<1x1x4x1xf32>
    %298 = vector.shape_cast %297 : vector<1x1x4x1xf32> to vector<4x1xf32>
    %299 = vector.shape_cast %296 : vector<4x1xf32> to vector<1x1x4x1xf32>
    tpu.vector_store %arg8[%c0_189, %c0_190, %c0_191, %c1_192], %299 {strides = array<i32>} : memref<1x2x4x2xf32, #tpu.memory_space<vmem>>, vector<1x1x4x1xf32>,
    %300 = vector.broadcast %288 : vector<1x1xf32> to vector<4x1xf32>
    %301 = arith.mulf %300, %294 : vector<4x1xf32>
    %c0_193 = arith.constant 0 : index
    %c1_194 = arith.constant 1 : index
    %c0_195 = arith.constant 0 : index
    %c1_196 = arith.constant 1 : index
    %302 = vector.load %arg8[%c0_193, %c1_194, %c0_195, %c1_196] : memref<1x2x4x2xf32, #tpu.memory_space<vmem>>, vector<1x1x4x1xf32>
    %303 = vector.shape_cast %302 : vector<1x1x4x1xf32> to vector<4x1xf32>
    %304 = vector.shape_cast %301 : vector<4x1xf32> to vector<1x1x4x1xf32>
    tpu.vector_store %arg8[%c0_193, %c1_194, %c0_195, %c1_196], %304 {strides = array<i32>} : memref<1x2x4x2xf32, #tpu.memory_space<vmem>>, vector<1x1x4x1xf32>,
    return
  }
  func.func @transform_0(%arg0: i32) -> (i32, i32, i32, i32) {
    %c0_i32 = arith.constant 0 : i32
    %c0_i32_0 = arith.constant 0 : i32
    %c0_i32_1 = arith.constant 0 : i32
    %c0_i32_2 = arith.constant 0 : i32
    return %arg0, %c0_i32, %c0_i32_0, %c0_i32_1 : i32, i32, i32, i32
  }
  func.func @transform_1(%arg0: i32) -> (i32, i32, i32, i32) {
    %c0_i32 = arith.constant 0 : i32
    %c0_i32_0 = arith.constant 0 : i32
    %c0_i32_1 = arith.constant 0 : i32
    %c0_i32_2 = arith.constant 0 : i32
    return %arg0, %c0_i32, %c0_i32_0, %c0_i32_1 : i32, i32, i32, i32
  }
  func.func @transform_2(%arg0: i32) -> (i32, i32, i32, i32) {
    %c0_i32 = arith.constant 0 : i32
    %c0_i32_0 = arith.constant 0 : i32
    %c0_i32_1 = arith.constant 0 : i32
    %c0_i32_2 = arith.constant 0 : i32
    return %arg0, %c0_i32, %c0_i32_0, %c0_i32_1 : i32, i32, i32, i32
  }
  func.func @transform_3(%arg0: i32) -> (i32, i32, i32, i32) {
    %c0_i32 = arith.constant 0 : i32
    %c0_i32_0 = arith.constant 0 : i32
    %c0_i32_1 = arith.constant 0 : i32
    %c0_i32_2 = arith.constant 0 : i32
    return %arg0, %c0_i32, %c0_i32_0, %c0_i32_1 : i32, i32, i32, i32
  }
  func.func @transform_4(%arg0: i32) -> (i32, i32, i32, i32) {
    %c0_i32 = arith.constant 0 : i32
    %c0_i32_0 = arith.constant 0 : i32
    %c0_i32_1 = arith.constant 0 : i32
    %c0_i32_2 = arith.constant 0 : i32
    return %arg0, %c0_i32, %c0_i32_0, %c0_i32_1 : i32, i32, i32, i32
  }
  func.func @transform_5(%arg0: i32) -> (i32, i32, i32) {
    %c0_i32 = arith.constant 0 : i32
    %c0_i32_0 = arith.constant 0 : i32
    %c0_i32_1 = arith.constant 0 : i32
    return %arg0, %c0_i32, %c0_i32_0 : i32, i32, i32
  }
  func.func @transform_6(%arg0: i32) -> (i32, i32, i32, i32) {
    %c0_i32 = arith.constant 0 : i32
    %c0_i32_0 = arith.constant 0 : i32
    %c0_i32_1 = arith.constant 0 : i32
    %c0_i32_2 = arith.constant 0 : i32
    return %arg0, %c0_i32, %c0_i32_0, %c0_i32_1 : i32, i32, i32, i32
  }
  func.func @transform_7(%arg0: i32) -> (i32, i32, i32, i32) {
    %c0_i32 = arith.constant 0 : i32
    %c0_i32_0 = arith.constant 0 : i32
    %c0_i32_1 = arith.constant 0 : i32
    %c0_i32_2 = arith.constant 0 : i32
    return %arg0, %c0_i32, %c0_i32_0, %c0_i32_1 : i32, i32, i32, i32
  }
  func.func @transform_8(%arg0: i32) -> (i32, i32, i32, i32) {
    %c0_i32 = arith.constant 0 : i32
    %c0_i32_0 = arith.constant 0 : i32
    %c0_i32_1 = arith.constant 0 : i32
    %c0_i32_2 = arith.constant 0 : i32
    return %arg0, %c0_i32, %c0_i32_0, %c0_i32_1 : i32, i32, i32, i32
  }
}

module attributes {stable_mosaic.version = 11 : i64} {
  func.func @_grad_wstep_kernel(%arg0: i32, %arg1: memref<2xf32, #tpu.memory_space<smem>>, %arg2: memref<1x2x8x4xf32, #tpu.memory_space<vmem>>, %arg3: memref<1x2x4x8xf32, #tpu.memory_space<vmem>>, %arg4: memref<1x2x12x8xf32, #tpu.memory_space<vmem>>, %arg5: memref<1x2x24x4xf32, #tpu.memory_space<vmem>>, %arg6: memref<1x2x16x4xf32, #tpu.memory_space<vmem>>, %arg7: memref<1x2x4x2xf32, #tpu.memory_space<vmem>>, %arg8: memref<1x2x8x4xf32, #tpu.memory_space<vmem>>, %arg9: memref<1x2x2x4xf32, #tpu.memory_space<vmem>>, %arg10: memref<1x1x16xf32, #tpu.memory_space<vmem>>, %arg11: memref<1x2x8x4xf32, #tpu.memory_space<vmem>>) attributes {dimension_semantics = [#tpu.dimension_semantics<parallel>], iteration_bounds = array<i64: 2>, scalar_prefetch = 0 : i64, scratch_operands = 0 : i64, tpu.core_type = #tpu.core_type<tc>, window_params = [{transform_indices = @transform_0, window_bounds = array<i64: 2>}, {transform_indices = @transform_1, window_bounds = array<i64: 1, 2, 8, 4>}, {transform_indices = @transform_2, window_bounds = array<i64: 1, 2, 4, 8>}, {transform_indices = @transform_3, window_bounds = array<i64: 1, 2, 12, 8>}, {transform_indices = @transform_4, window_bounds = array<i64: 1, 2, 24, 4>}, {transform_indices = @transform_5, window_bounds = array<i64: 1, 2, 16, 4>}, {transform_indices = @transform_6, window_bounds = array<i64: 1, 2, 4, 2>}, {transform_indices = @transform_7, window_bounds = array<i64: 1, 2, 8, 4>}, {transform_indices = @transform_8, window_bounds = array<i64: 1, 2, 2, 4>}, {transform_indices = @transform_9, window_bounds = array<i64: 1, 1, 16>}, {transform_indices = @transform_10, window_bounds = array<i64: 1, 2, 8, 4>}]} {
    %c0 = arith.constant 0 : index
    %c0_0 = arith.constant 0 : index
    %c0_1 = arith.constant 0 : index
    %c0_2 = arith.constant 0 : index
    %0 = vector.load %arg2[%c0, %c0_0, %c0_1, %c0_2] : memref<1x2x8x4xf32, #tpu.memory_space<vmem>>, vector<1x1x8x4xf32>
    %1 = vector.shape_cast %0 : vector<1x1x8x4xf32> to vector<8x4xf32>
    %c0_3 = arith.constant 0 : index
    %c1 = arith.constant 1 : index
    %c0_4 = arith.constant 0 : index
    %c0_5 = arith.constant 0 : index
    %2 = vector.load %arg2[%c0_3, %c1, %c0_4, %c0_5] : memref<1x2x8x4xf32, #tpu.memory_space<vmem>>, vector<1x1x8x4xf32>
    %3 = vector.shape_cast %2 : vector<1x1x8x4xf32> to vector<8x4xf32>
    %c0_6 = arith.constant 0 : index
    %c0_7 = arith.constant 0 : index
    %c0_8 = arith.constant 0 : index
    %c0_9 = arith.constant 0 : index
    %4 = vector.load %arg3[%c0_6, %c0_7, %c0_8, %c0_9] : memref<1x2x4x8xf32, #tpu.memory_space<vmem>>, vector<1x1x4x8xf32>
    %5 = vector.shape_cast %4 : vector<1x1x4x8xf32> to vector<4x8xf32>
    %c0_10 = arith.constant 0 : index
    %c1_11 = arith.constant 1 : index
    %c0_12 = arith.constant 0 : index
    %c0_13 = arith.constant 0 : index
    %6 = vector.load %arg3[%c0_10, %c1_11, %c0_12, %c0_13] : memref<1x2x4x8xf32, #tpu.memory_space<vmem>>, vector<1x1x4x8xf32>
    %7 = vector.shape_cast %6 : vector<1x1x4x8xf32> to vector<4x8xf32>
    %c0_14 = arith.constant 0 : index
    %c0_15 = arith.constant 0 : index
    %c0_16 = arith.constant 0 : index
    %c0_17 = arith.constant 0 : index
    %8 = vector.load %arg8[%c0_14, %c0_15, %c0_16, %c0_17] : memref<1x2x8x4xf32, #tpu.memory_space<vmem>>, vector<1x1x8x4xf32>
    %9 = vector.shape_cast %8 : vector<1x1x8x4xf32> to vector<8x4xf32>
    %c0_18 = arith.constant 0 : index
    %c1_19 = arith.constant 1 : index
    %c0_20 = arith.constant 0 : index
    %c0_21 = arith.constant 0 : index
    %10 = vector.load %arg8[%c0_18, %c1_19, %c0_20, %c0_21] : memref<1x2x8x4xf32, #tpu.memory_space<vmem>>, vector<1x1x8x4xf32>
    %11 = vector.shape_cast %10 : vector<1x1x8x4xf32> to vector<8x4xf32>
    %c0_22 = arith.constant 0 : index
    %c0_23 = arith.constant 0 : index
    %c0_24 = arith.constant 0 : index
    %c0_25 = arith.constant 0 : index
    %12 = vector.load %arg7[%c0_22, %c0_23, %c0_24, %c0_25] : memref<1x2x4x2xf32, #tpu.memory_space<vmem>>, vector<1x1x4x2xf32>
    %13 = vector.shape_cast %12 : vector<1x1x4x2xf32> to vector<4x2xf32>
    %c0_26 = arith.constant 0 : index
    %c1_27 = arith.constant 1 : index
    %c0_28 = arith.constant 0 : index
    %c0_29 = arith.constant 0 : index
    %14 = vector.load %arg7[%c0_26, %c1_27, %c0_28, %c0_29] : memref<1x2x4x2xf32, #tpu.memory_space<vmem>>, vector<1x1x4x2xf32>
    %15 = vector.shape_cast %14 : vector<1x1x4x2xf32> to vector<4x2xf32>
    %c0_30 = arith.constant 0 : index
    %c0_31 = arith.constant 0 : index
    %c0_32 = arith.constant 0 : index
    %c0_33 = arith.constant 0 : index
    %16 = vector.load %arg9[%c0_30, %c0_31, %c0_32, %c0_33] : memref<1x2x2x4xf32, #tpu.memory_space<vmem>>, vector<1x1x2x4xf32>
    %17 = vector.shape_cast %16 : vector<1x1x2x4xf32> to vector<2x4xf32>
    %c0_34 = arith.constant 0 : index
    %c1_35 = arith.constant 1 : index
    %c0_36 = arith.constant 0 : index
    %c0_37 = arith.constant 0 : index
    %18 = vector.load %arg9[%c0_34, %c1_35, %c0_36, %c0_37] : memref<1x2x2x4xf32, #tpu.memory_space<vmem>>, vector<1x1x2x4xf32>
    %19 = vector.shape_cast %18 : vector<1x1x2x4xf32> to vector<2x4xf32>
    %c0_38 = arith.constant 0 : index
    %c0_39 = arith.constant 0 : index
    %c0_40 = arith.constant 0 : index
    %20 = vector.load %arg10[%c0_38, %c0_39, %c0_40] : memref<1x1x16xf32, #tpu.memory_space<vmem>>, vector<1x1x4xf32>
    %21 = vector.shape_cast %20 : vector<1x1x4xf32> to vector<1x4xf32>
    %c0_41 = arith.constant 0 : index
    %c0_42 = arith.constant 0 : index
    %c4 = arith.constant 4 : index
    %22 = vector.load %arg10[%c0_41, %c0_42, %c4] : memref<1x1x16xf32, #tpu.memory_space<vmem>>, vector<1x1x4xf32>
    %23 = vector.shape_cast %22 : vector<1x1x4xf32> to vector<1x4xf32>
    %c0_43 = arith.constant 0 : index
    %c0_44 = arith.constant 0 : index
    %c8 = arith.constant 8 : index
    %24 = vector.load %arg10[%c0_43, %c0_44, %c8] : memref<1x1x16xf32, #tpu.memory_space<vmem>>, vector<1x1x4xf32>
    %25 = vector.shape_cast %24 : vector<1x1x4xf32> to vector<1x4xf32>
    %c0_45 = arith.constant 0 : index
    %c0_46 = arith.constant 0 : index
    %c12 = arith.constant 12 : index
    %26 = vector.load %arg10[%c0_45, %c0_46, %c12] : memref<1x1x16xf32, #tpu.memory_space<vmem>>, vector<1x1x2xf32>
    %27 = vector.shape_cast %26 : vector<1x1x2xf32> to vector<1x2xf32>
    %c0_47 = arith.constant 0 : index
    %c0_48 = arith.constant 0 : index
    %c14 = arith.constant 14 : index
    %28 = vector.load %arg10[%c0_47, %c0_48, %c14] : memref<1x1x16xf32, #tpu.memory_space<vmem>>, vector<1x1x2xf32>
    %29 = vector.shape_cast %28 : vector<1x1x2xf32> to vector<1x2xf32>
    %30 = vector.broadcast %21 : vector<1x4xf32> to vector<8x4xf32>
    %31 = arith.mulf %1, %30 : vector<8x4xf32>
    %32 = vector.broadcast %23 : vector<1x4xf32> to vector<8x4xf32>
    %33 = arith.mulf %3, %32 : vector<8x4xf32>
    %34 = arith.addf %31, %33 : vector<8x4xf32>
    %35 = vector.broadcast %21 : vector<1x4xf32> to vector<8x4xf32>
    %36 = arith.mulf %3, %35 : vector<8x4xf32>
    %37 = vector.broadcast %23 : vector<1x4xf32> to vector<8x4xf32>
    %38 = arith.mulf %1, %37 : vector<8x4xf32>
    %39 = arith.subf %36, %38 : vector<8x4xf32>
    %c0_49 = arith.constant 0 : index
    %c0_50 = arith.constant 0 : index
    %c0_51 = arith.constant 0 : index
    %c0_52 = arith.constant 0 : index
    %40 = vector.load %arg6[%c0_49, %c0_50, %c0_51, %c0_52] : memref<1x2x16x4xf32, #tpu.memory_space<vmem>>, vector<1x1x8x4xf32>
    %41 = vector.shape_cast %40 : vector<1x1x8x4xf32> to vector<8x4xf32>
    %c0_53 = arith.constant 0 : index
    %c1_54 = arith.constant 1 : index
    %c0_55 = arith.constant 0 : index
    %c0_56 = arith.constant 0 : index
    %42 = vector.load %arg6[%c0_53, %c1_54, %c0_55, %c0_56] : memref<1x2x16x4xf32, #tpu.memory_space<vmem>>, vector<1x1x8x4xf32>
    %43 = vector.shape_cast %42 : vector<1x1x8x4xf32> to vector<8x4xf32>
    %44 = vector.extract_strided_slice %13 {offsets = [0, 0], sizes = [4, 1], strides = [1, 1]} : vector<4x2xf32> to vector<4x1xf32>
    %45 = vector.extract_strided_slice %15 {offsets = [0, 0], sizes = [4, 1], strides = [1, 1]} : vector<4x2xf32> to vector<4x1xf32>
    %cst = arith.constant dense<0.000000e+00> : vector<8x1xf32>
    %46 = tpu.matmul %41, %44, %cst {dimension_numbers = #tpu.dot_dimension_numbers<[1], [0], [0], [1], [0, 0, 1, 1], [], []>} : vector<8x4xf32>, vector<4x1xf32>, vector<8x1xf32> -> vector<8x1xf32>
    %cst_57 = arith.constant dense<0.000000e+00> : vector<8x1xf32>
    %47 = tpu.matmul %43, %45, %cst_57 {dimension_numbers = #tpu.dot_dimension_numbers<[1], [0], [0], [1], [0, 0, 1, 1], [], []>} : vector<8x4xf32>, vector<4x1xf32>, vector<8x1xf32> -> vector<8x1xf32>
    %cst_58 = arith.constant dense<0.000000e+00> : vector<8x1xf32>
    %48 = tpu.matmul %41, %45, %cst_58 {dimension_numbers = #tpu.dot_dimension_numbers<[1], [0], [0], [1], [0, 0, 1, 1], [], []>} : vector<8x4xf32>, vector<4x1xf32>, vector<8x1xf32> -> vector<8x1xf32>
    %cst_59 = arith.constant dense<0.000000e+00> : vector<8x1xf32>
    %49 = tpu.matmul %43, %44, %cst_59 {dimension_numbers = #tpu.dot_dimension_numbers<[1], [0], [0], [1], [0, 0, 1, 1], [], []>} : vector<8x4xf32>, vector<4x1xf32>, vector<8x1xf32> -> vector<8x1xf32>
    %50 = arith.subf %46, %47 : vector<8x1xf32>
    %51 = arith.addf %48, %49 : vector<8x1xf32>
    %52 = vector.extract_strided_slice %17 {offsets = [0, 0], sizes = [1, 4], strides = [1, 1]} : vector<2x4xf32> to vector<1x4xf32>
    %53 = vector.extract_strided_slice %19 {offsets = [0, 0], sizes = [1, 4], strides = [1, 1]} : vector<2x4xf32> to vector<1x4xf32>
    %54 = vector.extract_strided_slice %27 {offsets = [0, 0], sizes = [1, 1], strides = [1, 1]} : vector<1x2xf32> to vector<1x1xf32>
    %cst_60 = arith.constant 1.000000e+00 : f32
    %55 = vector.broadcast %cst_60 : f32 to vector<1x1xf32>
    %56 = arith.mulf %55, %54 : vector<1x1xf32>
    %57 = vector.broadcast %50 : vector<8x1xf32> to vector<8x4xf32>
    %58 = vector.broadcast %52 : vector<1x4xf32> to vector<8x4xf32>
    %59 = arith.mulf %57, %58 : vector<8x4xf32>
    %60 = vector.broadcast %51 : vector<8x1xf32> to vector<8x4xf32>
    %61 = vector.broadcast %53 : vector<1x4xf32> to vector<8x4xf32>
    %62 = arith.mulf %60, %61 : vector<8x4xf32>
    %63 = arith.subf %59, %62 : vector<8x4xf32>
    %64 = vector.broadcast %56 : vector<1x1xf32> to vector<8x4xf32>
    %65 = arith.mulf %64, %63 : vector<8x4xf32>
    %66 = arith.addf %34, %65 : vector<8x4xf32>
    %cst_61 = arith.constant 1.000000e+00 : f32
    %67 = vector.broadcast %cst_61 : f32 to vector<1x1xf32>
    %68 = arith.mulf %67, %54 : vector<1x1xf32>
    %69 = vector.broadcast %50 : vector<8x1xf32> to vector<8x4xf32>
    %70 = vector.broadcast %53 : vector<1x4xf32> to vector<8x4xf32>
    %71 = arith.mulf %69, %70 : vector<8x4xf32>
    %72 = vector.broadcast %51 : vector<8x1xf32> to vector<8x4xf32>
    %73 = vector.broadcast %52 : vector<1x4xf32> to vector<8x4xf32>
    %74 = arith.mulf %72, %73 : vector<8x4xf32>
    %75 = arith.addf %71, %74 : vector<8x4xf32>
    %76 = vector.broadcast %68 : vector<1x1xf32> to vector<8x4xf32>
    %77 = arith.mulf %76, %75 : vector<8x4xf32>
    %78 = arith.addf %39, %77 : vector<8x4xf32>
    %c0_62 = arith.constant 0 : index
    %c0_63 = arith.constant 0 : index
    %c8_64 = arith.constant 8 : index
    %c0_65 = arith.constant 0 : index
    %79 = vector.load %arg6[%c0_62, %c0_63, %c8_64, %c0_65] : memref<1x2x16x4xf32, #tpu.memory_space<vmem>>, vector<1x1x8x4xf32>
    %80 = vector.shape_cast %79 : vector<1x1x8x4xf32> to vector<8x4xf32>
    %c0_66 = arith.constant 0 : index
    %c1_67 = arith.constant 1 : index
    %c8_68 = arith.constant 8 : index
    %c0_69 = arith.constant 0 : index
    %81 = vector.load %arg6[%c0_66, %c1_67, %c8_68, %c0_69] : memref<1x2x16x4xf32, #tpu.memory_space<vmem>>, vector<1x1x8x4xf32>
    %82 = vector.shape_cast %81 : vector<1x1x8x4xf32> to vector<8x4xf32>
    %83 = vector.extract_strided_slice %13 {offsets = [0, 1], sizes = [4, 1], strides = [1, 1]} : vector<4x2xf32> to vector<4x1xf32>
    %84 = vector.extract_strided_slice %15 {offsets = [0, 1], sizes = [4, 1], strides = [1, 1]} : vector<4x2xf32> to vector<4x1xf32>
    %cst_70 = arith.constant dense<0.000000e+00> : vector<8x1xf32>
    %85 = tpu.matmul %80, %83, %cst_70 {dimension_numbers = #tpu.dot_dimension_numbers<[1], [0], [0], [1], [0, 0, 1, 1], [], []>} : vector<8x4xf32>, vector<4x1xf32>, vector<8x1xf32> -> vector<8x1xf32>
    %cst_71 = arith.constant dense<0.000000e+00> : vector<8x1xf32>
    %86 = tpu.matmul %82, %84, %cst_71 {dimension_numbers = #tpu.dot_dimension_numbers<[1], [0], [0], [1], [0, 0, 1, 1], [], []>} : vector<8x4xf32>, vector<4x1xf32>, vector<8x1xf32> -> vector<8x1xf32>
    %cst_72 = arith.constant dense<0.000000e+00> : vector<8x1xf32>
    %87 = tpu.matmul %80, %84, %cst_72 {dimension_numbers = #tpu.dot_dimension_numbers<[1], [0], [0], [1], [0, 0, 1, 1], [], []>} : vector<8x4xf32>, vector<4x1xf32>, vector<8x1xf32> -> vector<8x1xf32>
    %cst_73 = arith.constant dense<0.000000e+00> : vector<8x1xf32>
    %88 = tpu.matmul %82, %83, %cst_73 {dimension_numbers = #tpu.dot_dimension_numbers<[1], [0], [0], [1], [0, 0, 1, 1], [], []>} : vector<8x4xf32>, vector<4x1xf32>, vector<8x1xf32> -> vector<8x1xf32>
    %89 = arith.subf %85, %86 : vector<8x1xf32>
    %90 = arith.addf %87, %88 : vector<8x1xf32>
    %91 = vector.extract_strided_slice %17 {offsets = [1, 0], sizes = [1, 4], strides = [1, 1]} : vector<2x4xf32> to vector<1x4xf32>
    %92 = vector.extract_strided_slice %19 {offsets = [1, 0], sizes = [1, 4], strides = [1, 1]} : vector<2x4xf32> to vector<1x4xf32>
    %93 = vector.extract_strided_slice %27 {offsets = [0, 1], sizes = [1, 1], strides = [1, 1]} : vector<1x2xf32> to vector<1x1xf32>
    %cst_74 = arith.constant 1.000000e+00 : f32
    %94 = vector.broadcast %cst_74 : f32 to vector<1x1xf32>
    %95 = arith.mulf %94, %93 : vector<1x1xf32>
    %96 = vector.broadcast %89 : vector<8x1xf32> to vector<8x4xf32>
    %97 = vector.broadcast %91 : vector<1x4xf32> to vector<8x4xf32>
    %98 = arith.mulf %96, %97 : vector<8x4xf32>
    %99 = vector.broadcast %90 : vector<8x1xf32> to vector<8x4xf32>
    %100 = vector.broadcast %92 : vector<1x4xf32> to vector<8x4xf32>
    %101 = arith.mulf %99, %100 : vector<8x4xf32>
    %102 = arith.subf %98, %101 : vector<8x4xf32>
    %103 = vector.broadcast %95 : vector<1x1xf32> to vector<8x4xf32>
    %104 = arith.mulf %103, %102 : vector<8x4xf32>
    %105 = arith.addf %66, %104 : vector<8x4xf32>
    %cst_75 = arith.constant 1.000000e+00 : f32
    %106 = vector.broadcast %cst_75 : f32 to vector<1x1xf32>
    %107 = arith.mulf %106, %93 : vector<1x1xf32>
    %108 = vector.broadcast %89 : vector<8x1xf32> to vector<8x4xf32>
    %109 = vector.broadcast %92 : vector<1x4xf32> to vector<8x4xf32>
    %110 = arith.mulf %108, %109 : vector<8x4xf32>
    %111 = vector.broadcast %90 : vector<8x1xf32> to vector<8x4xf32>
    %112 = vector.broadcast %91 : vector<1x4xf32> to vector<8x4xf32>
    %113 = arith.mulf %111, %112 : vector<8x4xf32>
    %114 = arith.addf %110, %113 : vector<8x4xf32>
    %115 = vector.broadcast %107 : vector<1x1xf32> to vector<8x4xf32>
    %116 = arith.mulf %115, %114 : vector<8x4xf32>
    %117 = arith.addf %78, %116 : vector<8x4xf32>
    %cst_76 = arith.constant dense<0.000000e+00> : vector<4x4xf32>
    %118 = tpu.matmul %5, %9, %cst_76 {dimension_numbers = #tpu.dot_dimension_numbers<[1], [0], [0], [1], [0, 0, 1, 1], [], []>} : vector<4x8xf32>, vector<8x4xf32>, vector<4x4xf32> -> vector<4x4xf32>
    %cst_77 = arith.constant dense<0.000000e+00> : vector<4x4xf32>
    %119 = tpu.matmul %7, %11, %cst_77 {dimension_numbers = #tpu.dot_dimension_numbers<[1], [0], [0], [1], [0, 0, 1, 1], [], []>} : vector<4x8xf32>, vector<8x4xf32>, vector<4x4xf32> -> vector<4x4xf32>
    %cst_78 = arith.constant dense<0.000000e+00> : vector<4x4xf32>
    %120 = tpu.matmul %5, %11, %cst_78 {dimension_numbers = #tpu.dot_dimension_numbers<[1], [0], [0], [1], [0, 0, 1, 1], [], []>} : vector<4x8xf32>, vector<8x4xf32>, vector<4x4xf32> -> vector<4x4xf32>
    %cst_79 = arith.constant dense<0.000000e+00> : vector<4x4xf32>
    %121 = tpu.matmul %7, %9, %cst_79 {dimension_numbers = #tpu.dot_dimension_numbers<[1], [0], [0], [1], [0, 0, 1, 1], [], []>} : vector<4x8xf32>, vector<8x4xf32>, vector<4x4xf32> -> vector<4x4xf32>
    %122 = arith.subf %118, %119 : vector<4x4xf32>
    %123 = arith.addf %120, %121 : vector<4x4xf32>
    %124 = vector.broadcast %25 : vector<1x4xf32> to vector<8x4xf32>
    %125 = arith.mulf %1, %124 : vector<8x4xf32>
    %126 = vector.broadcast %25 : vector<1x4xf32> to vector<8x4xf32>
    %127 = arith.mulf %3, %126 : vector<8x4xf32>
    %cst_80 = arith.constant dense<0.000000e+00> : vector<8x4xf32>
    %128 = tpu.matmul %125, %122, %cst_80 {dimension_numbers = #tpu.dot_dimension_numbers<[1], [0], [0], [1], [0, 0, 1, 1], [], []>} : vector<8x4xf32>, vector<4x4xf32>, vector<8x4xf32> -> vector<8x4xf32>
    %cst_81 = arith.constant dense<0.000000e+00> : vector<8x4xf32>
    %129 = tpu.matmul %127, %123, %cst_81 {dimension_numbers = #tpu.dot_dimension_numbers<[1], [0], [0], [1], [0, 0, 1, 1], [], []>} : vector<8x4xf32>, vector<4x4xf32>, vector<8x4xf32> -> vector<8x4xf32>
    %cst_82 = arith.constant dense<0.000000e+00> : vector<8x4xf32>
    %130 = tpu.matmul %125, %123, %cst_82 {dimension_numbers = #tpu.dot_dimension_numbers<[1], [0], [0], [1], [0, 0, 1, 1], [], []>} : vector<8x4xf32>, vector<4x4xf32>, vector<8x4xf32> -> vector<8x4xf32>
    %cst_83 = arith.constant dense<0.000000e+00> : vector<8x4xf32>
    %131 = tpu.matmul %127, %122, %cst_83 {dimension_numbers = #tpu.dot_dimension_numbers<[1], [0], [0], [1], [0, 0, 1, 1], [], []>} : vector<8x4xf32>, vector<4x4xf32>, vector<8x4xf32> -> vector<8x4xf32>
    %132 = arith.subf %128, %129 : vector<8x4xf32>
    %133 = arith.addf %130, %131 : vector<8x4xf32>
    %134 = vector.broadcast %29 : vector<1x2xf32> to vector<4x2xf32>
    %135 = arith.mulf %13, %134 : vector<4x2xf32>
    %136 = vector.broadcast %29 : vector<1x2xf32> to vector<4x2xf32>
    %137 = arith.mulf %15, %136 : vector<4x2xf32>
    %cst_84 = arith.constant dense<0.000000e+00> : vector<4x4xf32>
    %138 = tpu.matmul %135, %13, %cst_84 {dimension_numbers = #tpu.dot_dimension_numbers<[1], [1], [0], [0], [0, 0, 1, 0], [], []>} : vector<4x2xf32>, vector<4x2xf32>, vector<4x4xf32> -> vector<4x4xf32>
    %cst_85 = arith.constant dense<0.000000e+00> : vector<4x4xf32>
    %139 = tpu.matmul %137, %15, %cst_85 {dimension_numbers = #tpu.dot_dimension_numbers<[1], [1], [0], [0], [0, 0, 1, 0], [], []>} : vector<4x2xf32>, vector<4x2xf32>, vector<4x4xf32> -> vector<4x4xf32>
    %cst_86 = arith.constant dense<0.000000e+00> : vector<4x4xf32>
    %140 = tpu.matmul %135, %15, %cst_86 {dimension_numbers = #tpu.dot_dimension_numbers<[1], [1], [0], [0], [0, 0, 1, 0], [], []>} : vector<4x2xf32>, vector<4x2xf32>, vector<4x4xf32> -> vector<4x4xf32>
    %cst_87 = arith.constant dense<0.000000e+00> : vector<4x4xf32>
    %141 = tpu.matmul %137, %13, %cst_87 {dimension_numbers = #tpu.dot_dimension_numbers<[1], [1], [0], [0], [0, 0, 1, 0], [], []>} : vector<4x2xf32>, vector<4x2xf32>, vector<4x4xf32> -> vector<4x4xf32>
    %142 = arith.addf %138, %139 : vector<4x4xf32>
    %143 = arith.subf %141, %140 : vector<4x4xf32>
    %cst_88 = arith.constant 0.000000e+00 : f32
    %144 = vector.broadcast %cst_88 : f32 to vector<8x4xf32>
    %cst_89 = arith.constant 0.000000e+00 : f32
    %145 = vector.broadcast %cst_89 : f32 to vector<8x4xf32>
    %c0_90 = arith.constant 0 : index
    %c0_91 = arith.constant 0 : index
    %c0_92 = arith.constant 0 : index
    %c0_93 = arith.constant 0 : index
    %146 = vector.load %arg4[%c0_90, %c0_91, %c0_92, %c0_93] : memref<1x2x12x8xf32, #tpu.memory_space<vmem>>, vector<1x1x4x8xf32>
    %147 = vector.shape_cast %146 : vector<1x1x4x8xf32> to vector<4x8xf32>
    %c0_94 = arith.constant 0 : index
    %c1_95 = arith.constant 1 : index
    %c0_96 = arith.constant 0 : index
    %c0_97 = arith.constant 0 : index
    %148 = vector.load %arg4[%c0_94, %c1_95, %c0_96, %c0_97] : memref<1x2x12x8xf32, #tpu.memory_space<vmem>>, vector<1x1x4x8xf32>
    %149 = vector.shape_cast %148 : vector<1x1x4x8xf32> to vector<4x8xf32>
    %c0_98 = arith.constant 0 : index
    %c0_99 = arith.constant 0 : index
    %c0_100 = arith.constant 0 : index
    %c0_101 = arith.constant 0 : index
    %150 = vector.load %arg5[%c0_98, %c0_99, %c0_100, %c0_101] : memref<1x2x24x4xf32, #tpu.memory_space<vmem>>, vector<1x1x8x4xf32>
    %151 = vector.shape_cast %150 : vector<1x1x8x4xf32> to vector<8x4xf32>
    %c0_102 = arith.constant 0 : index
    %c1_103 = arith.constant 1 : index
    %c0_104 = arith.constant 0 : index
    %c0_105 = arith.constant 0 : index
    %152 = vector.load %arg5[%c0_102, %c1_103, %c0_104, %c0_105] : memref<1x2x24x4xf32, #tpu.memory_space<vmem>>, vector<1x1x8x4xf32>
    %153 = vector.shape_cast %152 : vector<1x1x8x4xf32> to vector<8x4xf32>
    %cst_106 = arith.constant dense<0.000000e+00> : vector<4x4xf32>
    %154 = tpu.matmul %147, %9, %cst_106 {dimension_numbers = #tpu.dot_dimension_numbers<[1], [0], [0], [1], [0, 0, 1, 1], [], []>} : vector<4x8xf32>, vector<8x4xf32>, vector<4x4xf32> -> vector<4x4xf32>
    %cst_107 = arith.constant dense<0.000000e+00> : vector<4x4xf32>
    %155 = tpu.matmul %149, %11, %cst_107 {dimension_numbers = #tpu.dot_dimension_numbers<[1], [0], [0], [1], [0, 0, 1, 1], [], []>} : vector<4x8xf32>, vector<8x4xf32>, vector<4x4xf32> -> vector<4x4xf32>
    %cst_108 = arith.constant dense<0.000000e+00> : vector<4x4xf32>
    %156 = tpu.matmul %147, %11, %cst_108 {dimension_numbers = #tpu.dot_dimension_numbers<[1], [0], [0], [1], [0, 0, 1, 1], [], []>} : vector<4x8xf32>, vector<8x4xf32>, vector<4x4xf32> -> vector<4x4xf32>
    %cst_109 = arith.constant dense<0.000000e+00> : vector<4x4xf32>
    %157 = tpu.matmul %149, %9, %cst_109 {dimension_numbers = #tpu.dot_dimension_numbers<[1], [0], [0], [1], [0, 0, 1, 1], [], []>} : vector<4x8xf32>, vector<8x4xf32>, vector<4x4xf32> -> vector<4x4xf32>
    %158 = arith.subf %154, %155 : vector<4x4xf32>
    %159 = arith.addf %156, %157 : vector<4x4xf32>
    %cst_110 = arith.constant dense<0.000000e+00> : vector<4x4xf32>
    %160 = tpu.matmul %142, %158, %cst_110 {dimension_numbers = #tpu.dot_dimension_numbers<[1], [0], [0], [1], [0, 0, 1, 1], [], []>} : vector<4x4xf32>, vector<4x4xf32>, vector<4x4xf32> -> vector<4x4xf32>
    %cst_111 = arith.constant dense<0.000000e+00> : vector<4x4xf32>
    %161 = tpu.matmul %143, %159, %cst_111 {dimension_numbers = #tpu.dot_dimension_numbers<[1], [0], [0], [1], [0, 0, 1, 1], [], []>} : vector<4x4xf32>, vector<4x4xf32>, vector<4x4xf32> -> vector<4x4xf32>
    %cst_112 = arith.constant dense<0.000000e+00> : vector<4x4xf32>
    %162 = tpu.matmul %142, %159, %cst_112 {dimension_numbers = #tpu.dot_dimension_numbers<[1], [0], [0], [1], [0, 0, 1, 1], [], []>} : vector<4x4xf32>, vector<4x4xf32>, vector<4x4xf32> -> vector<4x4xf32>
    %cst_113 = arith.constant dense<0.000000e+00> : vector<4x4xf32>
    %163 = tpu.matmul %143, %158, %cst_113 {dimension_numbers = #tpu.dot_dimension_numbers<[1], [0], [0], [1], [0, 0, 1, 1], [], []>} : vector<4x4xf32>, vector<4x4xf32>, vector<4x4xf32> -> vector<4x4xf32>
    %164 = arith.subf %160, %161 : vector<4x4xf32>
    %165 = arith.addf %162, %163 : vector<4x4xf32>
    %cst_114 = arith.constant dense<0.000000e+00> : vector<8x4xf32>
    %166 = tpu.matmul %151, %164, %cst_114 {dimension_numbers = #tpu.dot_dimension_numbers<[1], [0], [0], [1], [0, 0, 1, 1], [], []>} : vector<8x4xf32>, vector<4x4xf32>, vector<8x4xf32> -> vector<8x4xf32>
    %cst_115 = arith.constant dense<0.000000e+00> : vector<8x4xf32>
    %167 = tpu.matmul %153, %165, %cst_115 {dimension_numbers = #tpu.dot_dimension_numbers<[1], [0], [0], [1], [0, 0, 1, 1], [], []>} : vector<8x4xf32>, vector<4x4xf32>, vector<8x4xf32> -> vector<8x4xf32>
    %cst_116 = arith.constant dense<0.000000e+00> : vector<8x4xf32>
    %168 = tpu.matmul %151, %165, %cst_116 {dimension_numbers = #tpu.dot_dimension_numbers<[1], [0], [0], [1], [0, 0, 1, 1], [], []>} : vector<8x4xf32>, vector<4x4xf32>, vector<8x4xf32> -> vector<8x4xf32>
    %cst_117 = arith.constant dense<0.000000e+00> : vector<8x4xf32>
    %169 = tpu.matmul %153, %164, %cst_117 {dimension_numbers = #tpu.dot_dimension_numbers<[1], [0], [0], [1], [0, 0, 1, 1], [], []>} : vector<8x4xf32>, vector<4x4xf32>, vector<8x4xf32> -> vector<8x4xf32>
    %170 = arith.subf %166, %167 : vector<8x4xf32>
    %171 = arith.addf %168, %169 : vector<8x4xf32>
    %172 = arith.addf %144, %170 : vector<8x4xf32>
    %173 = arith.addf %145, %171 : vector<8x4xf32>
    %c0_118 = arith.constant 0 : index
    %c0_119 = arith.constant 0 : index
    %c4_120 = arith.constant 4 : index
    %c0_121 = arith.constant 0 : index
    %174 = vector.load %arg4[%c0_118, %c0_119, %c4_120, %c0_121] : memref<1x2x12x8xf32, #tpu.memory_space<vmem>>, vector<1x1x4x8xf32>
    %175 = vector.shape_cast %174 : vector<1x1x4x8xf32> to vector<4x8xf32>
    %c0_122 = arith.constant 0 : index
    %c1_123 = arith.constant 1 : index
    %c4_124 = arith.constant 4 : index
    %c0_125 = arith.constant 0 : index
    %176 = vector.load %arg4[%c0_122, %c1_123, %c4_124, %c0_125] : memref<1x2x12x8xf32, #tpu.memory_space<vmem>>, vector<1x1x4x8xf32>
    %177 = vector.shape_cast %176 : vector<1x1x4x8xf32> to vector<4x8xf32>
    %c0_126 = arith.constant 0 : index
    %c0_127 = arith.constant 0 : index
    %c8_128 = arith.constant 8 : index
    %c0_129 = arith.constant 0 : index
    %178 = vector.load %arg5[%c0_126, %c0_127, %c8_128, %c0_129] : memref<1x2x24x4xf32, #tpu.memory_space<vmem>>, vector<1x1x8x4xf32>
    %179 = vector.shape_cast %178 : vector<1x1x8x4xf32> to vector<8x4xf32>
    %c0_130 = arith.constant 0 : index
    %c1_131 = arith.constant 1 : index
    %c8_132 = arith.constant 8 : index
    %c0_133 = arith.constant 0 : index
    %180 = vector.load %arg5[%c0_130, %c1_131, %c8_132, %c0_133] : memref<1x2x24x4xf32, #tpu.memory_space<vmem>>, vector<1x1x8x4xf32>
    %181 = vector.shape_cast %180 : vector<1x1x8x4xf32> to vector<8x4xf32>
    %cst_134 = arith.constant dense<0.000000e+00> : vector<4x4xf32>
    %182 = tpu.matmul %175, %9, %cst_134 {dimension_numbers = #tpu.dot_dimension_numbers<[1], [0], [0], [1], [0, 0, 1, 1], [], []>} : vector<4x8xf32>, vector<8x4xf32>, vector<4x4xf32> -> vector<4x4xf32>
    %cst_135 = arith.constant dense<0.000000e+00> : vector<4x4xf32>
    %183 = tpu.matmul %177, %11, %cst_135 {dimension_numbers = #tpu.dot_dimension_numbers<[1], [0], [0], [1], [0, 0, 1, 1], [], []>} : vector<4x8xf32>, vector<8x4xf32>, vector<4x4xf32> -> vector<4x4xf32>
    %cst_136 = arith.constant dense<0.000000e+00> : vector<4x4xf32>
    %184 = tpu.matmul %175, %11, %cst_136 {dimension_numbers = #tpu.dot_dimension_numbers<[1], [0], [0], [1], [0, 0, 1, 1], [], []>} : vector<4x8xf32>, vector<8x4xf32>, vector<4x4xf32> -> vector<4x4xf32>
    %cst_137 = arith.constant dense<0.000000e+00> : vector<4x4xf32>
    %185 = tpu.matmul %177, %9, %cst_137 {dimension_numbers = #tpu.dot_dimension_numbers<[1], [0], [0], [1], [0, 0, 1, 1], [], []>} : vector<4x8xf32>, vector<8x4xf32>, vector<4x4xf32> -> vector<4x4xf32>
    %186 = arith.subf %182, %183 : vector<4x4xf32>
    %187 = arith.addf %184, %185 : vector<4x4xf32>
    %cst_138 = arith.constant dense<0.000000e+00> : vector<4x4xf32>
    %188 = tpu.matmul %142, %186, %cst_138 {dimension_numbers = #tpu.dot_dimension_numbers<[1], [0], [0], [1], [0, 0, 1, 1], [], []>} : vector<4x4xf32>, vector<4x4xf32>, vector<4x4xf32> -> vector<4x4xf32>
    %cst_139 = arith.constant dense<0.000000e+00> : vector<4x4xf32>
    %189 = tpu.matmul %143, %187, %cst_139 {dimension_numbers = #tpu.dot_dimension_numbers<[1], [0], [0], [1], [0, 0, 1, 1], [], []>} : vector<4x4xf32>, vector<4x4xf32>, vector<4x4xf32> -> vector<4x4xf32>
    %cst_140 = arith.constant dense<0.000000e+00> : vector<4x4xf32>
    %190 = tpu.matmul %142, %187, %cst_140 {dimension_numbers = #tpu.dot_dimension_numbers<[1], [0], [0], [1], [0, 0, 1, 1], [], []>} : vector<4x4xf32>, vector<4x4xf32>, vector<4x4xf32> -> vector<4x4xf32>
    %cst_141 = arith.constant dense<0.000000e+00> : vector<4x4xf32>
    %191 = tpu.matmul %143, %186, %cst_141 {dimension_numbers = #tpu.dot_dimension_numbers<[1], [0], [0], [1], [0, 0, 1, 1], [], []>} : vector<4x4xf32>, vector<4x4xf32>, vector<4x4xf32> -> vector<4x4xf32>
    %192 = arith.subf %188, %189 : vector<4x4xf32>
    %193 = arith.addf %190, %191 : vector<4x4xf32>
    %cst_142 = arith.constant dense<0.000000e+00> : vector<8x4xf32>
    %194 = tpu.matmul %179, %192, %cst_142 {dimension_numbers = #tpu.dot_dimension_numbers<[1], [0], [0], [1], [0, 0, 1, 1], [], []>} : vector<8x4xf32>, vector<4x4xf32>, vector<8x4xf32> -> vector<8x4xf32>
    %cst_143 = arith.constant dense<0.000000e+00> : vector<8x4xf32>
    %195 = tpu.matmul %181, %193, %cst_143 {dimension_numbers = #tpu.dot_dimension_numbers<[1], [0], [0], [1], [0, 0, 1, 1], [], []>} : vector<8x4xf32>, vector<4x4xf32>, vector<8x4xf32> -> vector<8x4xf32>
    %cst_144 = arith.constant dense<0.000000e+00> : vector<8x4xf32>
    %196 = tpu.matmul %179, %193, %cst_144 {dimension_numbers = #tpu.dot_dimension_numbers<[1], [0], [0], [1], [0, 0, 1, 1], [], []>} : vector<8x4xf32>, vector<4x4xf32>, vector<8x4xf32> -> vector<8x4xf32>
    %cst_145 = arith.constant dense<0.000000e+00> : vector<8x4xf32>
    %197 = tpu.matmul %181, %192, %cst_145 {dimension_numbers = #tpu.dot_dimension_numbers<[1], [0], [0], [1], [0, 0, 1, 1], [], []>} : vector<8x4xf32>, vector<4x4xf32>, vector<8x4xf32> -> vector<8x4xf32>
    %198 = arith.subf %194, %195 : vector<8x4xf32>
    %199 = arith.addf %196, %197 : vector<8x4xf32>
    %200 = arith.addf %172, %198 : vector<8x4xf32>
    %201 = arith.addf %173, %199 : vector<8x4xf32>
    %c0_146 = arith.constant 0 : index
    %c0_147 = arith.constant 0 : index
    %c8_148 = arith.constant 8 : index
    %c0_149 = arith.constant 0 : index
    %202 = vector.load %arg4[%c0_146, %c0_147, %c8_148, %c0_149] : memref<1x2x12x8xf32, #tpu.memory_space<vmem>>, vector<1x1x4x8xf32>
    %203 = vector.shape_cast %202 : vector<1x1x4x8xf32> to vector<4x8xf32>
    %c0_150 = arith.constant 0 : index
    %c1_151 = arith.constant 1 : index
    %c8_152 = arith.constant 8 : index
    %c0_153 = arith.constant 0 : index
    %204 = vector.load %arg4[%c0_150, %c1_151, %c8_152, %c0_153] : memref<1x2x12x8xf32, #tpu.memory_space<vmem>>, vector<1x1x4x8xf32>
    %205 = vector.shape_cast %204 : vector<1x1x4x8xf32> to vector<4x8xf32>
    %c0_154 = arith.constant 0 : index
    %c0_155 = arith.constant 0 : index
    %c16 = arith.constant 16 : index
    %c0_156 = arith.constant 0 : index
    %206 = vector.load %arg5[%c0_154, %c0_155, %c16, %c0_156] : memref<1x2x24x4xf32, #tpu.memory_space<vmem>>, vector<1x1x8x4xf32>
    %207 = vector.shape_cast %206 : vector<1x1x8x4xf32> to vector<8x4xf32>
    %c0_157 = arith.constant 0 : index
    %c1_158 = arith.constant 1 : index
    %c16_159 = arith.constant 16 : index
    %c0_160 = arith.constant 0 : index
    %208 = vector.load %arg5[%c0_157, %c1_158, %c16_159, %c0_160] : memref<1x2x24x4xf32, #tpu.memory_space<vmem>>, vector<1x1x8x4xf32>
    %209 = vector.shape_cast %208 : vector<1x1x8x4xf32> to vector<8x4xf32>
    %cst_161 = arith.constant dense<0.000000e+00> : vector<4x4xf32>
    %210 = tpu.matmul %203, %9, %cst_161 {dimension_numbers = #tpu.dot_dimension_numbers<[1], [0], [0], [1], [0, 0, 1, 1], [], []>} : vector<4x8xf32>, vector<8x4xf32>, vector<4x4xf32> -> vector<4x4xf32>
    %cst_162 = arith.constant dense<0.000000e+00> : vector<4x4xf32>
    %211 = tpu.matmul %205, %11, %cst_162 {dimension_numbers = #tpu.dot_dimension_numbers<[1], [0], [0], [1], [0, 0, 1, 1], [], []>} : vector<4x8xf32>, vector<8x4xf32>, vector<4x4xf32> -> vector<4x4xf32>
    %cst_163 = arith.constant dense<0.000000e+00> : vector<4x4xf32>
    %212 = tpu.matmul %203, %11, %cst_163 {dimension_numbers = #tpu.dot_dimension_numbers<[1], [0], [0], [1], [0, 0, 1, 1], [], []>} : vector<4x8xf32>, vector<8x4xf32>, vector<4x4xf32> -> vector<4x4xf32>
    %cst_164 = arith.constant dense<0.000000e+00> : vector<4x4xf32>
    %213 = tpu.matmul %205, %9, %cst_164 {dimension_numbers = #tpu.dot_dimension_numbers<[1], [0], [0], [1], [0, 0, 1, 1], [], []>} : vector<4x8xf32>, vector<8x4xf32>, vector<4x4xf32> -> vector<4x4xf32>
    %214 = arith.subf %210, %211 : vector<4x4xf32>
    %215 = arith.addf %212, %213 : vector<4x4xf32>
    %cst_165 = arith.constant dense<0.000000e+00> : vector<4x4xf32>
    %216 = tpu.matmul %142, %214, %cst_165 {dimension_numbers = #tpu.dot_dimension_numbers<[1], [0], [0], [1], [0, 0, 1, 1], [], []>} : vector<4x4xf32>, vector<4x4xf32>, vector<4x4xf32> -> vector<4x4xf32>
    %cst_166 = arith.constant dense<0.000000e+00> : vector<4x4xf32>
    %217 = tpu.matmul %143, %215, %cst_166 {dimension_numbers = #tpu.dot_dimension_numbers<[1], [0], [0], [1], [0, 0, 1, 1], [], []>} : vector<4x4xf32>, vector<4x4xf32>, vector<4x4xf32> -> vector<4x4xf32>
    %cst_167 = arith.constant dense<0.000000e+00> : vector<4x4xf32>
    %218 = tpu.matmul %142, %215, %cst_167 {dimension_numbers = #tpu.dot_dimension_numbers<[1], [0], [0], [1], [0, 0, 1, 1], [], []>} : vector<4x4xf32>, vector<4x4xf32>, vector<4x4xf32> -> vector<4x4xf32>
    %cst_168 = arith.constant dense<0.000000e+00> : vector<4x4xf32>
    %219 = tpu.matmul %143, %214, %cst_168 {dimension_numbers = #tpu.dot_dimension_numbers<[1], [0], [0], [1], [0, 0, 1, 1], [], []>} : vector<4x4xf32>, vector<4x4xf32>, vector<4x4xf32> -> vector<4x4xf32>
    %220 = arith.subf %216, %217 : vector<4x4xf32>
    %221 = arith.addf %218, %219 : vector<4x4xf32>
    %cst_169 = arith.constant dense<0.000000e+00> : vector<8x4xf32>
    %222 = tpu.matmul %207, %220, %cst_169 {dimension_numbers = #tpu.dot_dimension_numbers<[1], [0], [0], [1], [0, 0, 1, 1], [], []>} : vector<8x4xf32>, vector<4x4xf32>, vector<8x4xf32> -> vector<8x4xf32>
    %cst_170 = arith.constant dense<0.000000e+00> : vector<8x4xf32>
    %223 = tpu.matmul %209, %221, %cst_170 {dimension_numbers = #tpu.dot_dimension_numbers<[1], [0], [0], [1], [0, 0, 1, 1], [], []>} : vector<8x4xf32>, vector<4x4xf32>, vector<8x4xf32> -> vector<8x4xf32>
    %cst_171 = arith.constant dense<0.000000e+00> : vector<8x4xf32>
    %224 = tpu.matmul %207, %221, %cst_171 {dimension_numbers = #tpu.dot_dimension_numbers<[1], [0], [0], [1], [0, 0, 1, 1], [], []>} : vector<8x4xf32>, vector<4x4xf32>, vector<8x4xf32> -> vector<8x4xf32>
    %cst_172 = arith.constant dense<0.000000e+00> : vector<8x4xf32>
    %225 = tpu.matmul %209, %220, %cst_172 {dimension_numbers = #tpu.dot_dimension_numbers<[1], [0], [0], [1], [0, 0, 1, 1], [], []>} : vector<8x4xf32>, vector<4x4xf32>, vector<8x4xf32> -> vector<8x4xf32>
    %226 = arith.subf %222, %223 : vector<8x4xf32>
    %227 = arith.addf %224, %225 : vector<8x4xf32>
    %228 = arith.addf %200, %226 : vector<8x4xf32>
    %229 = arith.addf %201, %227 : vector<8x4xf32>
    %cst_173 = arith.constant 1.000000e+00 : f32
    %230 = vector.broadcast %cst_173 : f32 to vector<8x4xf32>
    %231 = arith.mulf %230, %228 : vector<8x4xf32>
    %232 = arith.addf %132, %231 : vector<8x4xf32>
    %233 = arith.subf %232, %105 : vector<8x4xf32>
    %cst_174 = arith.constant 1.000000e+00 : f32
    %234 = vector.broadcast %cst_174 : f32 to vector<8x4xf32>
    %235 = arith.mulf %234, %229 : vector<8x4xf32>
    %236 = arith.addf %133, %235 : vector<8x4xf32>
    %237 = arith.subf %236, %117 : vector<8x4xf32>
    %238 = arith.mulf %233, %233 : vector<8x4xf32>
    %239 = arith.mulf %237, %237 : vector<8x4xf32>
    %240 = arith.addf %238, %239 : vector<8x4xf32>
    %241 = vector.shape_cast %240 : vector<8x4xf32> to vector<1x8x4xf32>
    %cst_175 = arith.constant dense<0.000000e+00> : vector<1xf32>
    %242 = vector.multi_reduction <add>, %241, %cst_175 [1, 2] : vector<1x8x4xf32> to vector<1xf32>
    %243 = vector.shape_cast %242 : vector<1xf32> to vector<1x1x1xf32>
    %244 = vector.extract %243[0, 0, 0] : f32 from vector<1x1x1xf32>
    %245 = vector.broadcast %244 : f32 to vector<1x1xf32>
    %246 = math.sqrt %245 : vector<1x1xf32>
    %cst_176 = arith.constant 9.99999993E-9 : f32
    %247 = vector.broadcast %cst_176 : f32 to vector<1x1xf32>
    %248 = arith.maximumf %246, %247 : vector<1x1xf32>
    %cst_177 = arith.constant 1.000000e+00 : f32
    %249 = vector.broadcast %cst_177 : f32 to vector<1x1xf32>
    %250 = arith.divf %249, %248 : vector<1x1xf32>
    %251 = vector.broadcast %250 : vector<1x1xf32> to vector<8x4xf32>
    %252 = arith.mulf %233, %251 : vector<8x4xf32>
    %253 = vector.broadcast %250 : vector<1x1xf32> to vector<8x4xf32>
    %254 = arith.mulf %237, %253 : vector<8x4xf32>
    %c0_178 = arith.constant 0 : index
    %255 = memref.load %arg1[%c0_178] : memref<2xf32, #tpu.memory_space<smem>>
    %256 = vector.broadcast %255 : f32 to vector<8x4xf32>
    %257 = arith.mulf %256, %252 : vector<8x4xf32>
    %258 = arith.subf %9, %257 : vector<8x4xf32>
    %259 = vector.broadcast %255 : f32 to vector<8x4xf32>
    %260 = arith.mulf %259, %254 : vector<8x4xf32>
    %261 = arith.subf %11, %260 : vector<8x4xf32>
    %262 = arith.mulf %258, %258 : vector<8x4xf32>
    %263 = arith.mulf %261, %261 : vector<8x4xf32>
    %264 = arith.addf %262, %263 : vector<8x4xf32>
    %cst_179 = arith.constant dense<0.000000e+00> : vector<8xf32>
    %265 = vector.multi_reduction <add>, %264, %cst_179 [1] : vector<8x4xf32> to vector<8xf32>
    %266 = vector.shape_cast %265 : vector<8xf32> to vector<8x1xf32>
    %cst_180 = arith.constant 1.250000e-01 : f32
    %267 = vector.broadcast %cst_180 : f32 to vector<8x1xf32>
    %268 = arith.divf %267, %266 : vector<8x1xf32>
    %269 = math.sqrt %268 : vector<8x1xf32>
    %270 = vector.broadcast %269 : vector<8x1xf32> to vector<8x4xf32>
    %271 = arith.mulf %258, %270 : vector<8x4xf32>
    %272 = vector.broadcast %269 : vector<8x1xf32> to vector<8x4xf32>
    %273 = arith.mulf %261, %272 : vector<8x4xf32>
    %c1_181 = arith.constant 1 : index
    %274 = memref.load %arg1[%c1_181] : memref<2xf32, #tpu.memory_space<smem>>
    %275 = vector.broadcast %274 : f32 to vector<8x4xf32>
    %276 = arith.mulf %275, %252 : vector<8x4xf32>
    %277 = arith.subf %271, %276 : vector<8x4xf32>
    %278 = vector.broadcast %274 : f32 to vector<8x4xf32>
    %279 = arith.mulf %278, %254 : vector<8x4xf32>
    %280 = arith.subf %273, %279 : vector<8x4xf32>
    %281 = arith.mulf %277, %277 : vector<8x4xf32>
    %282 = arith.mulf %280, %280 : vector<8x4xf32>
    %283 = arith.addf %281, %282 : vector<8x4xf32>
    %cst_182 = arith.constant dense<0.000000e+00> : vector<8xf32>
    %284 = vector.multi_reduction <add>, %283, %cst_182 [1] : vector<8x4xf32> to vector<8xf32>
    %285 = vector.shape_cast %284 : vector<8xf32> to vector<8x1xf32>
    %cst_183 = arith.constant 1.250000e-01 : f32
    %286 = vector.broadcast %cst_183 : f32 to vector<8x1xf32>
    %287 = arith.divf %286, %285 : vector<8x1xf32>
    %288 = math.sqrt %287 : vector<8x1xf32>
    %289 = vector.broadcast %288 : vector<8x1xf32> to vector<8x4xf32>
    %290 = arith.mulf %277, %289 : vector<8x4xf32>
    %291 = vector.broadcast %288 : vector<8x1xf32> to vector<8x4xf32>
    %292 = arith.mulf %280, %291 : vector<8x4xf32>
    %c0_184 = arith.constant 0 : index
    %c0_185 = arith.constant 0 : index
    %c0_186 = arith.constant 0 : index
    %c0_187 = arith.constant 0 : index
    %293 = vector.load %arg11[%c0_184, %c0_185, %c0_186, %c0_187] : memref<1x2x8x4xf32, #tpu.memory_space<vmem>>, vector<1x1x8x4xf32>
    %294 = vector.shape_cast %293 : vector<1x1x8x4xf32> to vector<8x4xf32>
    %295 = vector.shape_cast %290 : vector<8x4xf32> to vector<1x1x8x4xf32>
    tpu.vector_store %arg11[%c0_184, %c0_185, %c0_186, %c0_187], %295 {strides = array<i32>} : memref<1x2x8x4xf32, #tpu.memory_space<vmem>>, vector<1x1x8x4xf32>,
    %c0_188 = arith.constant 0 : index
    %c1_189 = arith.constant 1 : index
    %c0_190 = arith.constant 0 : index
    %c0_191 = arith.constant 0 : index
    %296 = vector.load %arg11[%c0_188, %c1_189, %c0_190, %c0_191] : memref<1x2x8x4xf32, #tpu.memory_space<vmem>>, vector<1x1x8x4xf32>
    %297 = vector.shape_cast %296 : vector<1x1x8x4xf32> to vector<8x4xf32>
    %298 = vector.shape_cast %292 : vector<8x4xf32> to vector<1x1x8x4xf32>
    tpu.vector_store %arg11[%c0_188, %c1_189, %c0_190, %c0_191], %298 {strides = array<i32>} : memref<1x2x8x4xf32, #tpu.memory_space<vmem>>, vector<1x1x8x4xf32>,
    return
  }
  func.func @transform_0(%arg0: i32) -> i32 {
    %c0_i32 = arith.constant 0 : i32
    %c0_i32_0 = arith.constant 0 : i32
    return %c0_i32 : i32
  }
  func.func @transform_1(%arg0: i32) -> (i32, i32, i32, i32) {
    %c0_i32 = arith.constant 0 : i32
    %c0_i32_0 = arith.constant 0 : i32
    %c0_i32_1 = arith.constant 0 : i32
    %c0_i32_2 = arith.constant 0 : i32
    return %arg0, %c0_i32, %c0_i32_0, %c0_i32_1 : i32, i32, i32, i32
  }
  func.func @transform_2(%arg0: i32) -> (i32, i32, i32, i32) {
    %c0_i32 = arith.constant 0 : i32
    %c0_i32_0 = arith.constant 0 : i32
    %c0_i32_1 = arith.constant 0 : i32
    %c0_i32_2 = arith.constant 0 : i32
    return %arg0, %c0_i32, %c0_i32_0, %c0_i32_1 : i32, i32, i32, i32
  }
  func.func @transform_3(%arg0: i32) -> (i32, i32, i32, i32) {
    %c0_i32 = arith.constant 0 : i32
    %c0_i32_0 = arith.constant 0 : i32
    %c0_i32_1 = arith.constant 0 : i32
    %c0_i32_2 = arith.constant 0 : i32
    return %arg0, %c0_i32, %c0_i32_0, %c0_i32_1 : i32, i32, i32, i32
  }
  func.func @transform_4(%arg0: i32) -> (i32, i32, i32, i32) {
    %c0_i32 = arith.constant 0 : i32
    %c0_i32_0 = arith.constant 0 : i32
    %c0_i32_1 = arith.constant 0 : i32
    %c0_i32_2 = arith.constant 0 : i32
    return %arg0, %c0_i32, %c0_i32_0, %c0_i32_1 : i32, i32, i32, i32
  }
  func.func @transform_5(%arg0: i32) -> (i32, i32, i32, i32) {
    %c0_i32 = arith.constant 0 : i32
    %c0_i32_0 = arith.constant 0 : i32
    %c0_i32_1 = arith.constant 0 : i32
    %c0_i32_2 = arith.constant 0 : i32
    return %arg0, %c0_i32, %c0_i32_0, %c0_i32_1 : i32, i32, i32, i32
  }
  func.func @transform_6(%arg0: i32) -> (i32, i32, i32, i32) {
    %c0_i32 = arith.constant 0 : i32
    %c0_i32_0 = arith.constant 0 : i32
    %c0_i32_1 = arith.constant 0 : i32
    %c0_i32_2 = arith.constant 0 : i32
    return %arg0, %c0_i32, %c0_i32_0, %c0_i32_1 : i32, i32, i32, i32
  }
  func.func @transform_7(%arg0: i32) -> (i32, i32, i32, i32) {
    %c0_i32 = arith.constant 0 : i32
    %c0_i32_0 = arith.constant 0 : i32
    %c0_i32_1 = arith.constant 0 : i32
    %c0_i32_2 = arith.constant 0 : i32
    return %arg0, %c0_i32, %c0_i32_0, %c0_i32_1 : i32, i32, i32, i32
  }
  func.func @transform_8(%arg0: i32) -> (i32, i32, i32, i32) {
    %c0_i32 = arith.constant 0 : i32
    %c0_i32_0 = arith.constant 0 : i32
    %c0_i32_1 = arith.constant 0 : i32
    %c0_i32_2 = arith.constant 0 : i32
    return %arg0, %c0_i32, %c0_i32_0, %c0_i32_1 : i32, i32, i32, i32
  }
  func.func @transform_9(%arg0: i32) -> (i32, i32, i32) {
    %c0_i32 = arith.constant 0 : i32
    %c0_i32_0 = arith.constant 0 : i32
    %c0_i32_1 = arith.constant 0 : i32
    return %arg0, %c0_i32, %c0_i32_0 : i32, i32, i32
  }
  func.func @transform_10(%arg0: i32) -> (i32, i32, i32, i32) {
    %c0_i32 = arith.constant 0 : i32
    %c0_i32_0 = arith.constant 0 : i32
    %c0_i32_1 = arith.constant 0 : i32
    %c0_i32_2 = arith.constant 0 : i32
    return %arg0, %c0_i32, %c0_i32_0, %c0_i32_1 : i32, i32, i32, i32
  }
}

module attributes {stable_mosaic.version = 11 : i64} {
  func.func @_pre_kernel(%arg0: i32, %arg1: memref<1x2x4x8xf32, #tpu.memory_space<vmem>>, %arg2: memref<1x2x8x4xf32, #tpu.memory_space<vmem>>, %arg3: memref<1x2x12x8xf32, #tpu.memory_space<vmem>>, %arg4: memref<1x2x8x8xf32, #tpu.memory_space<vmem>>, %arg5: memref<1x2x2x4xf32, #tpu.memory_space<vmem>>, %arg6: memref<1x14x1xf32, #tpu.memory_space<vmem>>, %arg7: memref<1x2x2x4xf32, #tpu.memory_space<vmem>>, %arg8: memref<1x2x4x2xf32, #tpu.memory_space<vmem>>, %arg9: memref<1x2x4x4xf32, #tpu.memory_space<vmem>>) attributes {dimension_semantics = [#tpu.dimension_semantics<parallel>], iteration_bounds = array<i64: 2>, scalar_prefetch = 0 : i64, scratch_operands = 0 : i64, tpu.core_type = #tpu.core_type<tc>, window_params = [{transform_indices = @transform_0, window_bounds = array<i64: 1, 2, 4, 8>}, {transform_indices = @transform_1, window_bounds = array<i64: 1, 2, 8, 4>}, {transform_indices = @transform_2, window_bounds = array<i64: 1, 2, 12, 8>}, {transform_indices = @transform_3, window_bounds = array<i64: 1, 2, 8, 8>}, {transform_indices = @transform_4, window_bounds = array<i64: 1, 2, 2, 4>}, {transform_indices = @transform_5, window_bounds = array<i64: 1, 14, 1>}, {transform_indices = @transform_6, window_bounds = array<i64: 1, 2, 2, 4>}, {transform_indices = @transform_7, window_bounds = array<i64: 1, 2, 4, 2>}, {transform_indices = @transform_8, window_bounds = array<i64: 1, 2, 4, 4>}]} {
    %c0 = arith.constant 0 : index
    %c0_0 = arith.constant 0 : index
    %c0_1 = arith.constant 0 : index
    %c0_2 = arith.constant 0 : index
    %0 = vector.load %arg1[%c0, %c0_0, %c0_1, %c0_2] : memref<1x2x4x8xf32, #tpu.memory_space<vmem>>, vector<1x1x4x8xf32>
    %1 = vector.shape_cast %0 : vector<1x1x4x8xf32> to vector<4x8xf32>
    %c0_3 = arith.constant 0 : index
    %c1 = arith.constant 1 : index
    %c0_4 = arith.constant 0 : index
    %c0_5 = arith.constant 0 : index
    %2 = vector.load %arg1[%c0_3, %c1, %c0_4, %c0_5] : memref<1x2x4x8xf32, #tpu.memory_space<vmem>>, vector<1x1x4x8xf32>
    %3 = vector.shape_cast %2 : vector<1x1x4x8xf32> to vector<4x8xf32>
    %c0_6 = arith.constant 0 : index
    %c0_7 = arith.constant 0 : index
    %c0_8 = arith.constant 0 : index
    %c0_9 = arith.constant 0 : index
    %4 = vector.load %arg2[%c0_6, %c0_7, %c0_8, %c0_9] : memref<1x2x8x4xf32, #tpu.memory_space<vmem>>, vector<1x1x8x4xf32>
    %5 = vector.shape_cast %4 : vector<1x1x8x4xf32> to vector<8x4xf32>
    %c0_10 = arith.constant 0 : index
    %c1_11 = arith.constant 1 : index
    %c0_12 = arith.constant 0 : index
    %c0_13 = arith.constant 0 : index
    %6 = vector.load %arg2[%c0_10, %c1_11, %c0_12, %c0_13] : memref<1x2x8x4xf32, #tpu.memory_space<vmem>>, vector<1x1x8x4xf32>
    %7 = vector.shape_cast %6 : vector<1x1x8x4xf32> to vector<8x4xf32>
    %c0_14 = arith.constant 0 : index
    %c0_15 = arith.constant 0 : index
    %c0_16 = arith.constant 0 : index
    %c0_17 = arith.constant 0 : index
    %8 = vector.load %arg5[%c0_14, %c0_15, %c0_16, %c0_17] : memref<1x2x2x4xf32, #tpu.memory_space<vmem>>, vector<1x1x2x4xf32>
    %9 = vector.shape_cast %8 : vector<1x1x2x4xf32> to vector<2x4xf32>
    %c0_18 = arith.constant 0 : index
    %c1_19 = arith.constant 1 : index
    %c0_20 = arith.constant 0 : index
    %c0_21 = arith.constant 0 : index
    %10 = vector.load %arg5[%c0_18, %c1_19, %c0_20, %c0_21] : memref<1x2x2x4xf32, #tpu.memory_space<vmem>>, vector<1x1x2x4xf32>
    %11 = vector.shape_cast %10 : vector<1x1x2x4xf32> to vector<2x4xf32>
    %cst = arith.constant dense<0.000000e+00> : vector<4x4xf32>
    %12 = tpu.matmul %1, %5, %cst {dimension_numbers = #tpu.dot_dimension_numbers<[1], [0], [0], [1], [0, 0, 1, 1], [], []>} : vector<4x8xf32>, vector<8x4xf32>, vector<4x4xf32> -> vector<4x4xf32>
    %cst_22 = arith.constant dense<0.000000e+00> : vector<4x4xf32>
    %13 = tpu.matmul %3, %7, %cst_22 {dimension_numbers = #tpu.dot_dimension_numbers<[1], [0], [0], [1], [0, 0, 1, 1], [], []>} : vector<4x8xf32>, vector<8x4xf32>, vector<4x4xf32> -> vector<4x4xf32>
    %cst_23 = arith.constant dense<0.000000e+00> : vector<4x4xf32>
    %14 = tpu.matmul %1, %7, %cst_23 {dimension_numbers = #tpu.dot_dimension_numbers<[1], [0], [0], [1], [0, 0, 1, 1], [], []>} : vector<4x8xf32>, vector<8x4xf32>, vector<4x4xf32> -> vector<4x4xf32>
    %cst_24 = arith.constant dense<0.000000e+00> : vector<4x4xf32>
    %15 = tpu.matmul %3, %5, %cst_24 {dimension_numbers = #tpu.dot_dimension_numbers<[1], [0], [0], [1], [0, 0, 1, 1], [], []>} : vector<4x8xf32>, vector<8x4xf32>, vector<4x4xf32> -> vector<4x4xf32>
    %16 = arith.subf %12, %13 : vector<4x4xf32>
    %17 = arith.addf %14, %15 : vector<4x4xf32>
    %18 = arith.mulf %16, %16 : vector<4x4xf32>
    %19 = arith.mulf %17, %17 : vector<4x4xf32>
    %20 = arith.addf %18, %19 : vector<4x4xf32>
    %cst_25 = arith.constant dense<0.000000e+00> : vector<4xf32>
    %21 = vector.multi_reduction <add>, %20, %cst_25 [1] : vector<4x4xf32> to vector<4xf32>
    %22 = vector.shape_cast %21 : vector<4xf32> to vector<4x1xf32>
    %cst_26 = arith.constant 1.000000e-01 : f32
    %23 = vector.broadcast %cst_26 : f32 to vector<4x1xf32>
    %24 = arith.addf %22, %23 : vector<4x1xf32>
    %25 = tpu.iota {dimensions = array<i32: 0>} : vector<4x4xi32>
    %26 = tpu.iota {dimensions = array<i32: 1>} : vector<4x4xi32>
    %27 = arith.cmpi eq, %25, %26 : vector<4x4xi32>
    %28 = arith.extui %27 : vector<4x4xi1> to vector<4x4xi32>
    %29 = arith.sitofp %28 : vector<4x4xi32> to vector<4x4xf32>
    %30 = arith.mulf %16, %29 : vector<4x4xf32>
    %cst_27 = arith.constant dense<0.000000e+00> : vector<4xf32>
    %31 = vector.multi_reduction <add>, %30, %cst_27 [1] : vector<4x4xf32> to vector<4xf32>
    %32 = vector.shape_cast %31 : vector<4xf32> to vector<4x1xf32>
    %33 = arith.mulf %17, %29 : vector<4x4xf32>
    %cst_28 = arith.constant dense<0.000000e+00> : vector<4xf32>
    %34 = vector.multi_reduction <add>, %33, %cst_28 [1] : vector<4x4xf32> to vector<4xf32>
    %35 = vector.shape_cast %34 : vector<4xf32> to vector<4x1xf32>
    %36 = arith.mulf %32, %32 : vector<4x1xf32>
    %37 = arith.mulf %35, %35 : vector<4x1xf32>
    %38 = arith.addf %36, %37 : vector<4x1xf32>
    %39 = arith.subf %24, %38 : vector<4x1xf32>
    %40 = arith.divf %24, %39 : vector<4x1xf32>
    %cst_29 = arith.constant 1.000000e+00 : f32
    %41 = vector.broadcast %cst_29 : f32 to vector<4x1xf32>
    %42 = arith.subf %40, %41 : vector<4x1xf32>
    %cst_30 = arith.constant 1.000000e+00 : f32
    %43 = vector.broadcast %cst_30 : f32 to vector<4x1xf32>
    %44 = arith.addf %43, %42 : vector<4x1xf32>
    %45 = math.sqrt %44 : vector<4x1xf32>
    %46 = arith.divf %45, %24 : vector<4x1xf32>
    %c0_31 = arith.constant 0 : index
    %c0_32 = arith.constant 0 : index
    %c0_33 = arith.constant 0 : index
    %47 = vector.load %arg6[%c0_31, %c0_32, %c0_33] : memref<1x14x1xf32, #tpu.memory_space<vmem>>, vector<1x4x1xf32>
    %48 = vector.shape_cast %47 : vector<1x4x1xf32> to vector<4x1xf32>
    %49 = vector.shape_cast %42 : vector<4x1xf32> to vector<1x4x1xf32>
    tpu.vector_store %arg6[%c0_31, %c0_32, %c0_33], %49 {strides = array<i32>} : memref<1x14x1xf32, #tpu.memory_space<vmem>>, vector<1x4x1xf32>,
    %50 = arith.mulf %46, %32 : vector<4x1xf32>
    %c0_34 = arith.constant 0 : index
    %c4 = arith.constant 4 : index
    %c0_35 = arith.constant 0 : index
    %51 = vector.load %arg6[%c0_34, %c4, %c0_35] : memref<1x14x1xf32, #tpu.memory_space<vmem>>, vector<1x4x1xf32>
    %52 = vector.shape_cast %51 : vector<1x4x1xf32> to vector<4x1xf32>
    %53 = vector.shape_cast %50 : vector<4x1xf32> to vector<1x4x1xf32>
    tpu.vector_store %arg6[%c0_34, %c4, %c0_35], %53 {strides = array<i32>} : memref<1x14x1xf32, #tpu.memory_space<vmem>>, vector<1x4x1xf32>,
    %54 = arith.mulf %46, %35 : vector<4x1xf32>
    %c0_36 = arith.constant 0 : index
    %c8 = arith.constant 8 : index
    %c0_37 = arith.constant 0 : index
    %55 = vector.load %arg6[%c0_36, %c8, %c0_37] : memref<1x14x1xf32, #tpu.memory_space<vmem>>, vector<1x4x1xf32>
    %56 = vector.shape_cast %55 : vector<1x4x1xf32> to vector<4x1xf32>
    %57 = vector.shape_cast %54 : vector<4x1xf32> to vector<1x4x1xf32>
    tpu.vector_store %arg6[%c0_36, %c8, %c0_37], %57 {strides = array<i32>} : memref<1x14x1xf32, #tpu.memory_space<vmem>>, vector<1x4x1xf32>,
    %58 = arith.mulf %9, %9 : vector<2x4xf32>
    %59 = arith.mulf %11, %11 : vector<2x4xf32>
    %60 = arith.addf %58, %59 : vector<2x4xf32>
    %cst_38 = arith.constant dense<0.000000e+00> : vector<2xf32>
    %61 = vector.multi_reduction <add>, %60, %cst_38 [1] : vector<2x4xf32> to vector<2xf32>
    %62 = vector.shape_cast %61 : vector<2xf32> to vector<2x1xf32>
    %cst_39 = arith.constant 4.000000e-01 : f32
    %63 = vector.broadcast %cst_39 : f32 to vector<2x1xf32>
    %64 = arith.mulf %63, %62 : vector<2x1xf32>
    %65 = tpu.iota {dimensions = array<i32: 0>} : vector<4x4xi32>
    %66 = tpu.iota {dimensions = array<i32: 1>} : vector<4x4xi32>
    %67 = arith.cmpi eq, %65, %66 : vector<4x4xi32>
    %68 = arith.extui %67 : vector<4x4xi1> to vector<4x4xi32>
    %69 = arith.sitofp %68 : vector<4x4xi32> to vector<4x4xf32>
    %cst_40 = arith.constant 4.000000e-01 : f32
    %70 = vector.broadcast %cst_40 : f32 to vector<4x4xf32>
    %71 = arith.mulf %70, %69 : vector<4x4xf32>
    %cst_41 = arith.constant 0.000000e+00 : f32
    %72 = vector.broadcast %cst_41 : f32 to vector<4x4xf32>
    %c0_42 = arith.constant 0 : index
    %c0_43 = arith.constant 0 : index
    %c0_44 = arith.constant 0 : index
    %c0_45 = arith.constant 0 : index
    %73 = vector.load %arg3[%c0_42, %c0_43, %c0_44, %c0_45] : memref<1x2x12x8xf32, #tpu.memory_space<vmem>>, vector<1x1x4x8xf32>
    %74 = vector.shape_cast %73 : vector<1x1x4x8xf32> to vector<4x8xf32>
    %c0_46 = arith.constant 0 : index
    %c1_47 = arith.constant 1 : index
    %c0_48 = arith.constant 0 : index
    %c0_49 = arith.constant 0 : index
    %75 = vector.load %arg3[%c0_46, %c1_47, %c0_48, %c0_49] : memref<1x2x12x8xf32, #tpu.memory_space<vmem>>, vector<1x1x4x8xf32>
    %76 = vector.shape_cast %75 : vector<1x1x4x8xf32> to vector<4x8xf32>
    %cst_50 = arith.constant dense<0.000000e+00> : vector<4x4xf32>
    %77 = tpu.matmul %74, %5, %cst_50 {dimension_numbers = #tpu.dot_dimension_numbers<[1], [0], [0], [1], [0, 0, 1, 1], [], []>} : vector<4x8xf32>, vector<8x4xf32>, vector<4x4xf32> -> vector<4x4xf32>
    %cst_51 = arith.constant dense<0.000000e+00> : vector<4x4xf32>
    %78 = tpu.matmul %76, %7, %cst_51 {dimension_numbers = #tpu.dot_dimension_numbers<[1], [0], [0], [1], [0, 0, 1, 1], [], []>} : vector<4x8xf32>, vector<8x4xf32>, vector<4x4xf32> -> vector<4x4xf32>
    %cst_52 = arith.constant dense<0.000000e+00> : vector<4x4xf32>
    %79 = tpu.matmul %74, %7, %cst_52 {dimension_numbers = #tpu.dot_dimension_numbers<[1], [0], [0], [1], [0, 0, 1, 1], [], []>} : vector<4x8xf32>, vector<8x4xf32>, vector<4x4xf32> -> vector<4x4xf32>
    %cst_53 = arith.constant dense<0.000000e+00> : vector<4x4xf32>
    %80 = tpu.matmul %76, %5, %cst_53 {dimension_numbers = #tpu.dot_dimension_numbers<[1], [0], [0], [1], [0, 0, 1, 1], [], []>} : vector<4x8xf32>, vector<8x4xf32>, vector<4x4xf32> -> vector<4x4xf32>
    %81 = arith.subf %77, %78 : vector<4x4xf32>
    %82 = arith.addf %79, %80 : vector<4x4xf32>
    %cst_54 = arith.constant dense<0.000000e+00> : vector<2x4xf32>
    %83 = tpu.matmul %9, %81, %cst_54 {dimension_numbers = #tpu.dot_dimension_numbers<[1], [0], [0], [1], [0, 0, 1, 1], [], []>} : vector<2x4xf32>, vector<4x4xf32>, vector<2x4xf32> -> vector<2x4xf32>
    %cst_55 = arith.constant dense<0.000000e+00> : vector<2x4xf32>
    %84 = tpu.matmul %11, %82, %cst_55 {dimension_numbers = #tpu.dot_dimension_numbers<[1], [0], [0], [1], [0, 0, 1, 1], [], []>} : vector<2x4xf32>, vector<4x4xf32>, vector<2x4xf32> -> vector<2x4xf32>
    %cst_56 = arith.constant dense<0.000000e+00> : vector<2x4xf32>
    %85 = tpu.matmul %9, %82, %cst_56 {dimension_numbers = #tpu.dot_dimension_numbers<[1], [0], [0], [1], [0, 0, 1, 1], [], []>} : vector<2x4xf32>, vector<4x4xf32>, vector<2x4xf32> -> vector<2x4xf32>
    %cst_57 = arith.constant dense<0.000000e+00> : vector<2x4xf32>
    %86 = tpu.matmul %11, %81, %cst_57 {dimension_numbers = #tpu.dot_dimension_numbers<[1], [0], [0], [1], [0, 0, 1, 1], [], []>} : vector<2x4xf32>, vector<4x4xf32>, vector<2x4xf32> -> vector<2x4xf32>
    %87 = arith.subf %83, %84 : vector<2x4xf32>
    %88 = arith.addf %85, %86 : vector<2x4xf32>
    %89 = arith.mulf %87, %87 : vector<2x4xf32>
    %90 = arith.mulf %88, %88 : vector<2x4xf32>
    %91 = arith.addf %89, %90 : vector<2x4xf32>
    %cst_58 = arith.constant dense<0.000000e+00> : vector<2xf32>
    %92 = vector.multi_reduction <add>, %91, %cst_58 [1] : vector<2x4xf32> to vector<2xf32>
    %93 = vector.shape_cast %92 : vector<2xf32> to vector<2x1xf32>
    %94 = arith.addf %64, %93 : vector<2x1xf32>
    %cst_59 = arith.constant dense<0.000000e+00> : vector<4x4xf32>
    %95 = tpu.matmul %81, %81, %cst_59 {dimension_numbers = #tpu.dot_dimension_numbers<[1], [1], [0], [0], [0, 0, 1, 0], [], []>} : vector<4x4xf32>, vector<4x4xf32>, vector<4x4xf32> -> vector<4x4xf32>
    %cst_60 = arith.constant dense<0.000000e+00> : vector<4x4xf32>
    %96 = tpu.matmul %82, %82, %cst_60 {dimension_numbers = #tpu.dot_dimension_numbers<[1], [1], [0], [0], [0, 0, 1, 0], [], []>} : vector<4x4xf32>, vector<4x4xf32>, vector<4x4xf32> -> vector<4x4xf32>
    %cst_61 = arith.constant dense<0.000000e+00> : vector<4x4xf32>
    %97 = tpu.matmul %81, %82, %cst_61 {dimension_numbers = #tpu.dot_dimension_numbers<[1], [1], [0], [0], [0, 0, 1, 0], [], []>} : vector<4x4xf32>, vector<4x4xf32>, vector<4x4xf32> -> vector<4x4xf32>
    %cst_62 = arith.constant dense<0.000000e+00> : vector<4x4xf32>
    %98 = tpu.matmul %82, %81, %cst_62 {dimension_numbers = #tpu.dot_dimension_numbers<[1], [1], [0], [0], [0, 0, 1, 0], [], []>} : vector<4x4xf32>, vector<4x4xf32>, vector<4x4xf32> -> vector<4x4xf32>
    %99 = arith.addf %95, %96 : vector<4x4xf32>
    %100 = arith.subf %98, %97 : vector<4x4xf32>
    %101 = arith.addf %71, %99 : vector<4x4xf32>
    %102 = arith.addf %72, %100 : vector<4x4xf32>
    %c0_63 = arith.constant 0 : index
    %c0_64 = arith.constant 0 : index
    %c4_65 = arith.constant 4 : index
    %c0_66 = arith.constant 0 : index
    %103 = vector.load %arg3[%c0_63, %c0_64, %c4_65, %c0_66] : memref<1x2x12x8xf32, #tpu.memory_space<vmem>>, vector<1x1x4x8xf32>
    %104 = vector.shape_cast %103 : vector<1x1x4x8xf32> to vector<4x8xf32>
    %c0_67 = arith.constant 0 : index
    %c1_68 = arith.constant 1 : index
    %c4_69 = arith.constant 4 : index
    %c0_70 = arith.constant 0 : index
    %105 = vector.load %arg3[%c0_67, %c1_68, %c4_69, %c0_70] : memref<1x2x12x8xf32, #tpu.memory_space<vmem>>, vector<1x1x4x8xf32>
    %106 = vector.shape_cast %105 : vector<1x1x4x8xf32> to vector<4x8xf32>
    %cst_71 = arith.constant dense<0.000000e+00> : vector<4x4xf32>
    %107 = tpu.matmul %104, %5, %cst_71 {dimension_numbers = #tpu.dot_dimension_numbers<[1], [0], [0], [1], [0, 0, 1, 1], [], []>} : vector<4x8xf32>, vector<8x4xf32>, vector<4x4xf32> -> vector<4x4xf32>
    %cst_72 = arith.constant dense<0.000000e+00> : vector<4x4xf32>
    %108 = tpu.matmul %106, %7, %cst_72 {dimension_numbers = #tpu.dot_dimension_numbers<[1], [0], [0], [1], [0, 0, 1, 1], [], []>} : vector<4x8xf32>, vector<8x4xf32>, vector<4x4xf32> -> vector<4x4xf32>
    %cst_73 = arith.constant dense<0.000000e+00> : vector<4x4xf32>
    %109 = tpu.matmul %104, %7, %cst_73 {dimension_numbers = #tpu.dot_dimension_numbers<[1], [0], [0], [1], [0, 0, 1, 1], [], []>} : vector<4x8xf32>, vector<8x4xf32>, vector<4x4xf32> -> vector<4x4xf32>
    %cst_74 = arith.constant dense<0.000000e+00> : vector<4x4xf32>
    %110 = tpu.matmul %106, %5, %cst_74 {dimension_numbers = #tpu.dot_dimension_numbers<[1], [0], [0], [1], [0, 0, 1, 1], [], []>} : vector<4x8xf32>, vector<8x4xf32>, vector<4x4xf32> -> vector<4x4xf32>
    %111 = arith.subf %107, %108 : vector<4x4xf32>
    %112 = arith.addf %109, %110 : vector<4x4xf32>
    %cst_75 = arith.constant dense<0.000000e+00> : vector<2x4xf32>
    %113 = tpu.matmul %9, %111, %cst_75 {dimension_numbers = #tpu.dot_dimension_numbers<[1], [0], [0], [1], [0, 0, 1, 1], [], []>} : vector<2x4xf32>, vector<4x4xf32>, vector<2x4xf32> -> vector<2x4xf32>
    %cst_76 = arith.constant dense<0.000000e+00> : vector<2x4xf32>
    %114 = tpu.matmul %11, %112, %cst_76 {dimension_numbers = #tpu.dot_dimension_numbers<[1], [0], [0], [1], [0, 0, 1, 1], [], []>} : vector<2x4xf32>, vector<4x4xf32>, vector<2x4xf32> -> vector<2x4xf32>
    %cst_77 = arith.constant dense<0.000000e+00> : vector<2x4xf32>
    %115 = tpu.matmul %9, %112, %cst_77 {dimension_numbers = #tpu.dot_dimension_numbers<[1], [0], [0], [1], [0, 0, 1, 1], [], []>} : vector<2x4xf32>, vector<4x4xf32>, vector<2x4xf32> -> vector<2x4xf32>
    %cst_78 = arith.constant dense<0.000000e+00> : vector<2x4xf32>
    %116 = tpu.matmul %11, %111, %cst_78 {dimension_numbers = #tpu.dot_dimension_numbers<[1], [0], [0], [1], [0, 0, 1, 1], [], []>} : vector<2x4xf32>, vector<4x4xf32>, vector<2x4xf32> -> vector<2x4xf32>
    %117 = arith.subf %113, %114 : vector<2x4xf32>
    %118 = arith.addf %115, %116 : vector<2x4xf32>
    %119 = arith.mulf %117, %117 : vector<2x4xf32>
    %120 = arith.mulf %118, %118 : vector<2x4xf32>
    %121 = arith.addf %119, %120 : vector<2x4xf32>
    %cst_79 = arith.constant dense<0.000000e+00> : vector<2xf32>
    %122 = vector.multi_reduction <add>, %121, %cst_79 [1] : vector<2x4xf32> to vector<2xf32>
    %123 = vector.shape_cast %122 : vector<2xf32> to vector<2x1xf32>
    %124 = arith.addf %94, %123 : vector<2x1xf32>
    %cst_80 = arith.constant dense<0.000000e+00> : vector<4x4xf32>
    %125 = tpu.matmul %111, %111, %cst_80 {dimension_numbers = #tpu.dot_dimension_numbers<[1], [1], [0], [0], [0, 0, 1, 0], [], []>} : vector<4x4xf32>, vector<4x4xf32>, vector<4x4xf32> -> vector<4x4xf32>
    %cst_81 = arith.constant dense<0.000000e+00> : vector<4x4xf32>
    %126 = tpu.matmul %112, %112, %cst_81 {dimension_numbers = #tpu.dot_dimension_numbers<[1], [1], [0], [0], [0, 0, 1, 0], [], []>} : vector<4x4xf32>, vector<4x4xf32>, vector<4x4xf32> -> vector<4x4xf32>
    %cst_82 = arith.constant dense<0.000000e+00> : vector<4x4xf32>
    %127 = tpu.matmul %111, %112, %cst_82 {dimension_numbers = #tpu.dot_dimension_numbers<[1], [1], [0], [0], [0, 0, 1, 0], [], []>} : vector<4x4xf32>, vector<4x4xf32>, vector<4x4xf32> -> vector<4x4xf32>
    %cst_83 = arith.constant dense<0.000000e+00> : vector<4x4xf32>
    %128 = tpu.matmul %112, %111, %cst_83 {dimension_numbers = #tpu.dot_dimension_numbers<[1], [1], [0], [0], [0, 0, 1, 0], [], []>} : vector<4x4xf32>, vector<4x4xf32>, vector<4x4xf32> -> vector<4x4xf32>
    %129 = arith.addf %125, %126 : vector<4x4xf32>
    %130 = arith.subf %128, %127 : vector<4x4xf32>
    %131 = arith.addf %101, %129 : vector<4x4xf32>
    %132 = arith.addf %102, %130 : vector<4x4xf32>
    %c0_84 = arith.constant 0 : index
    %c0_85 = arith.constant 0 : index
    %c8_86 = arith.constant 8 : index
    %c0_87 = arith.constant 0 : index
    %133 = vector.load %arg3[%c0_84, %c0_85, %c8_86, %c0_87] : memref<1x2x12x8xf32, #tpu.memory_space<vmem>>, vector<1x1x4x8xf32>
    %134 = vector.shape_cast %133 : vector<1x1x4x8xf32> to vector<4x8xf32>
    %c0_88 = arith.constant 0 : index
    %c1_89 = arith.constant 1 : index
    %c8_90 = arith.constant 8 : index
    %c0_91 = arith.constant 0 : index
    %135 = vector.load %arg3[%c0_88, %c1_89, %c8_90, %c0_91] : memref<1x2x12x8xf32, #tpu.memory_space<vmem>>, vector<1x1x4x8xf32>
    %136 = vector.shape_cast %135 : vector<1x1x4x8xf32> to vector<4x8xf32>
    %cst_92 = arith.constant dense<0.000000e+00> : vector<4x4xf32>
    %137 = tpu.matmul %134, %5, %cst_92 {dimension_numbers = #tpu.dot_dimension_numbers<[1], [0], [0], [1], [0, 0, 1, 1], [], []>} : vector<4x8xf32>, vector<8x4xf32>, vector<4x4xf32> -> vector<4x4xf32>
    %cst_93 = arith.constant dense<0.000000e+00> : vector<4x4xf32>
    %138 = tpu.matmul %136, %7, %cst_93 {dimension_numbers = #tpu.dot_dimension_numbers<[1], [0], [0], [1], [0, 0, 1, 1], [], []>} : vector<4x8xf32>, vector<8x4xf32>, vector<4x4xf32> -> vector<4x4xf32>
    %cst_94 = arith.constant dense<0.000000e+00> : vector<4x4xf32>
    %139 = tpu.matmul %134, %7, %cst_94 {dimension_numbers = #tpu.dot_dimension_numbers<[1], [0], [0], [1], [0, 0, 1, 1], [], []>} : vector<4x8xf32>, vector<8x4xf32>, vector<4x4xf32> -> vector<4x4xf32>
    %cst_95 = arith.constant dense<0.000000e+00> : vector<4x4xf32>
    %140 = tpu.matmul %136, %5, %cst_95 {dimension_numbers = #tpu.dot_dimension_numbers<[1], [0], [0], [1], [0, 0, 1, 1], [], []>} : vector<4x8xf32>, vector<8x4xf32>, vector<4x4xf32> -> vector<4x4xf32>
    %141 = arith.subf %137, %138 : vector<4x4xf32>
    %142 = arith.addf %139, %140 : vector<4x4xf32>
    %cst_96 = arith.constant dense<0.000000e+00> : vector<2x4xf32>
    %143 = tpu.matmul %9, %141, %cst_96 {dimension_numbers = #tpu.dot_dimension_numbers<[1], [0], [0], [1], [0, 0, 1, 1], [], []>} : vector<2x4xf32>, vector<4x4xf32>, vector<2x4xf32> -> vector<2x4xf32>
    %cst_97 = arith.constant dense<0.000000e+00> : vector<2x4xf32>
    %144 = tpu.matmul %11, %142, %cst_97 {dimension_numbers = #tpu.dot_dimension_numbers<[1], [0], [0], [1], [0, 0, 1, 1], [], []>} : vector<2x4xf32>, vector<4x4xf32>, vector<2x4xf32> -> vector<2x4xf32>
    %cst_98 = arith.constant dense<0.000000e+00> : vector<2x4xf32>
    %145 = tpu.matmul %9, %142, %cst_98 {dimension_numbers = #tpu.dot_dimension_numbers<[1], [0], [0], [1], [0, 0, 1, 1], [], []>} : vector<2x4xf32>, vector<4x4xf32>, vector<2x4xf32> -> vector<2x4xf32>
    %cst_99 = arith.constant dense<0.000000e+00> : vector<2x4xf32>
    %146 = tpu.matmul %11, %141, %cst_99 {dimension_numbers = #tpu.dot_dimension_numbers<[1], [0], [0], [1], [0, 0, 1, 1], [], []>} : vector<2x4xf32>, vector<4x4xf32>, vector<2x4xf32> -> vector<2x4xf32>
    %147 = arith.subf %143, %144 : vector<2x4xf32>
    %148 = arith.addf %145, %146 : vector<2x4xf32>
    %149 = arith.mulf %147, %147 : vector<2x4xf32>
    %150 = arith.mulf %148, %148 : vector<2x4xf32>
    %151 = arith.addf %149, %150 : vector<2x4xf32>
    %cst_100 = arith.constant dense<0.000000e+00> : vector<2xf32>
    %152 = vector.multi_reduction <add>, %151, %cst_100 [1] : vector<2x4xf32> to vector<2xf32>
    %153 = vector.shape_cast %152 : vector<2xf32> to vector<2x1xf32>
    %154 = arith.addf %124, %153 : vector<2x1xf32>
    %cst_101 = arith.constant dense<0.000000e+00> : vector<4x4xf32>
    %155 = tpu.matmul %141, %141, %cst_101 {dimension_numbers = #tpu.dot_dimension_numbers<[1], [1], [0], [0], [0, 0, 1, 0], [], []>} : vector<4x4xf32>, vector<4x4xf32>, vector<4x4xf32> -> vector<4x4xf32>
    %cst_102 = arith.constant dense<0.000000e+00> : vector<4x4xf32>
    %156 = tpu.matmul %142, %142, %cst_102 {dimension_numbers = #tpu.dot_dimension_numbers<[1], [1], [0], [0], [0, 0, 1, 0], [], []>} : vector<4x4xf32>, vector<4x4xf32>, vector<4x4xf32> -> vector<4x4xf32>
    %cst_103 = arith.constant dense<0.000000e+00> : vector<4x4xf32>
    %157 = tpu.matmul %141, %142, %cst_103 {dimension_numbers = #tpu.dot_dimension_numbers<[1], [1], [0], [0], [0, 0, 1, 0], [], []>} : vector<4x4xf32>, vector<4x4xf32>, vector<4x4xf32> -> vector<4x4xf32>
    %cst_104 = arith.constant dense<0.000000e+00> : vector<4x4xf32>
    %158 = tpu.matmul %142, %141, %cst_104 {dimension_numbers = #tpu.dot_dimension_numbers<[1], [1], [0], [0], [0, 0, 1, 0], [], []>} : vector<4x4xf32>, vector<4x4xf32>, vector<4x4xf32> -> vector<4x4xf32>
    %159 = arith.addf %155, %156 : vector<4x4xf32>
    %160 = arith.subf %158, %157 : vector<4x4xf32>
    %161 = arith.addf %131, %159 : vector<4x4xf32>
    %162 = arith.addf %132, %160 : vector<4x4xf32>
    %c0_105 = arith.constant 0 : index
    %c0_106 = arith.constant 0 : index
    %c0_107 = arith.constant 0 : index
    %c0_108 = arith.constant 0 : index
    %163 = vector.load %arg9[%c0_105, %c0_106, %c0_107, %c0_108] : memref<1x2x4x4xf32, #tpu.memory_space<vmem>>, vector<1x1x4x4xf32>
    %164 = vector.shape_cast %163 : vector<1x1x4x4xf32> to vector<4x4xf32>
    %165 = vector.shape_cast %161 : vector<4x4xf32> to vector<1x1x4x4xf32>
    tpu.vector_store %arg9[%c0_105, %c0_106, %c0_107, %c0_108], %165 {strides = array<i32>} : memref<1x2x4x4xf32, #tpu.memory_space<vmem>>, vector<1x1x4x4xf32>,
    %c0_109 = arith.constant 0 : index
    %c1_110 = arith.constant 1 : index
    %c0_111 = arith.constant 0 : index
    %c0_112 = arith.constant 0 : index
    %166 = vector.load %arg9[%c0_109, %c1_110, %c0_111, %c0_112] : memref<1x2x4x4xf32, #tpu.memory_space<vmem>>, vector<1x1x4x4xf32>
    %167 = vector.shape_cast %166 : vector<1x1x4x4xf32> to vector<4x4xf32>
    %168 = vector.shape_cast %162 : vector<4x4xf32> to vector<1x1x4x4xf32>
    tpu.vector_store %arg9[%c0_109, %c1_110, %c0_111, %c0_112], %168 {strides = array<i32>} : memref<1x2x4x4xf32, #tpu.memory_space<vmem>>, vector<1x1x4x4xf32>,
    %c0_113 = arith.constant 0 : index
    %c0_114 = arith.constant 0 : index
    %c0_115 = arith.constant 0 : index
    %c0_116 = arith.constant 0 : index
    %169 = vector.load %arg4[%c0_113, %c0_114, %c0_115, %c0_116] : memref<1x2x8x8xf32, #tpu.memory_space<vmem>>, vector<1x1x4x8xf32>
    %170 = vector.shape_cast %169 : vector<1x1x4x8xf32> to vector<4x8xf32>
    %c0_117 = arith.constant 0 : index
    %c1_118 = arith.constant 1 : index
    %c0_119 = arith.constant 0 : index
    %c0_120 = arith.constant 0 : index
    %171 = vector.load %arg4[%c0_117, %c1_118, %c0_119, %c0_120] : memref<1x2x8x8xf32, #tpu.memory_space<vmem>>, vector<1x1x4x8xf32>
    %172 = vector.shape_cast %171 : vector<1x1x4x8xf32> to vector<4x8xf32>
    %cst_121 = arith.constant dense<0.000000e+00> : vector<4x4xf32>
    %173 = tpu.matmul %170, %5, %cst_121 {dimension_numbers = #tpu.dot_dimension_numbers<[1], [0], [0], [1], [0, 0, 1, 1], [], []>} : vector<4x8xf32>, vector<8x4xf32>, vector<4x4xf32> -> vector<4x4xf32>
    %cst_122 = arith.constant dense<0.000000e+00> : vector<4x4xf32>
    %174 = tpu.matmul %172, %7, %cst_122 {dimension_numbers = #tpu.dot_dimension_numbers<[1], [0], [0], [1], [0, 0, 1, 1], [], []>} : vector<4x8xf32>, vector<8x4xf32>, vector<4x4xf32> -> vector<4x4xf32>
    %cst_123 = arith.constant dense<0.000000e+00> : vector<4x4xf32>
    %175 = tpu.matmul %170, %7, %cst_123 {dimension_numbers = #tpu.dot_dimension_numbers<[1], [0], [0], [1], [0, 0, 1, 1], [], []>} : vector<4x8xf32>, vector<8x4xf32>, vector<4x4xf32> -> vector<4x4xf32>
    %cst_124 = arith.constant dense<0.000000e+00> : vector<4x4xf32>
    %176 = tpu.matmul %172, %5, %cst_124 {dimension_numbers = #tpu.dot_dimension_numbers<[1], [0], [0], [1], [0, 0, 1, 1], [], []>} : vector<4x8xf32>, vector<8x4xf32>, vector<4x4xf32> -> vector<4x4xf32>
    %177 = arith.subf %173, %174 : vector<4x4xf32>
    %178 = arith.addf %175, %176 : vector<4x4xf32>
    %179 = vector.extract_strided_slice %9 {offsets = [0, 0], sizes = [1, 4], strides = [1, 1]} : vector<2x4xf32> to vector<1x4xf32>
    %180 = vector.extract_strided_slice %11 {offsets = [0, 0], sizes = [1, 4], strides = [1, 1]} : vector<2x4xf32> to vector<1x4xf32>
    %cst_125 = arith.constant dense<0.000000e+00> : vector<1x4xf32>
    %181 = tpu.matmul %179, %177, %cst_125 {dimension_numbers = #tpu.dot_dimension_numbers<[1], [0], [0], [1], [0, 0, 1, 1], [], []>} : vector<1x4xf32>, vector<4x4xf32>, vector<1x4xf32> -> vector<1x4xf32>
    %cst_126 = arith.constant dense<0.000000e+00> : vector<1x4xf32>
    %182 = tpu.matmul %180, %178, %cst_126 {dimension_numbers = #tpu.dot_dimension_numbers<[1], [0], [0], [1], [0, 0, 1, 1], [], []>} : vector<1x4xf32>, vector<4x4xf32>, vector<1x4xf32> -> vector<1x4xf32>
    %cst_127 = arith.constant dense<0.000000e+00> : vector<1x4xf32>
    %183 = tpu.matmul %179, %178, %cst_127 {dimension_numbers = #tpu.dot_dimension_numbers<[1], [0], [0], [1], [0, 0, 1, 1], [], []>} : vector<1x4xf32>, vector<4x4xf32>, vector<1x4xf32> -> vector<1x4xf32>
    %cst_128 = arith.constant dense<0.000000e+00> : vector<1x4xf32>
    %184 = tpu.matmul %180, %177, %cst_128 {dimension_numbers = #tpu.dot_dimension_numbers<[1], [0], [0], [1], [0, 0, 1, 1], [], []>} : vector<1x4xf32>, vector<4x4xf32>, vector<1x4xf32> -> vector<1x4xf32>
    %185 = arith.subf %181, %182 : vector<1x4xf32>
    %186 = arith.addf %183, %184 : vector<1x4xf32>
    %187 = arith.mulf %185, %185 : vector<1x4xf32>
    %188 = arith.mulf %186, %186 : vector<1x4xf32>
    %189 = arith.addf %187, %188 : vector<1x4xf32>
    %cst_129 = arith.constant dense<0.000000e+00> : vector<1xf32>
    %190 = vector.multi_reduction <add>, %189, %cst_129 [1] : vector<1x4xf32> to vector<1xf32>
    %191 = vector.shape_cast %190 : vector<1xf32> to vector<1x1xf32>
    %192 = vector.extract_strided_slice %154 {offsets = [0, 0], sizes = [1, 1], strides = [1, 1]} : vector<2x1xf32> to vector<1x1xf32>
    %193 = arith.subf %192, %191 : vector<1x1xf32>
    %194 = arith.divf %191, %193 : vector<1x1xf32>
    %c0_130 = arith.constant 0 : index
    %c12 = arith.constant 12 : index
    %c0_131 = arith.constant 0 : index
    %195 = vector.load %arg6[%c0_130, %c12, %c0_131] : memref<1x14x1xf32, #tpu.memory_space<vmem>>, vector<1x1x1xf32>
    %196 = vector.shape_cast %195 : vector<1x1x1xf32> to vector<1x1xf32>
    %197 = vector.shape_cast %194 : vector<1x1xf32> to vector<1x1x1xf32>
    tpu.vector_store %arg6[%c0_130, %c12, %c0_131], %197 {strides = array<i32>} : memref<1x14x1xf32, #tpu.memory_space<vmem>>, vector<1x1x1xf32>,
    %cst_132 = arith.constant 1.000000e+00 : f32
    %198 = vector.broadcast %cst_132 : f32 to vector<1x1xf32>
    %199 = arith.addf %198, %194 : vector<1x1xf32>
    %200 = math.sqrt %199 : vector<1x1xf32>
    %201 = arith.divf %200, %192 : vector<1x1xf32>
    %202 = vector.broadcast %201 : vector<1x1xf32> to vector<1x4xf32>
    %203 = arith.mulf %185, %202 : vector<1x4xf32>
    %204 = vector.broadcast %201 : vector<1x1xf32> to vector<1x4xf32>
    %205 = arith.mulf %186, %204 : vector<1x4xf32>
    %c0_133 = arith.constant 0 : index
    %c0_134 = arith.constant 0 : index
    %c0_135 = arith.constant 0 : index
    %c0_136 = arith.constant 0 : index
    %206 = vector.load %arg7[%c0_133, %c0_134, %c0_135, %c0_136] : memref<1x2x2x4xf32, #tpu.memory_space<vmem>>, vector<1x1x1x4xf32>
    %207 = vector.shape_cast %206 : vector<1x1x1x4xf32> to vector<1x4xf32>
    %208 = vector.shape_cast %203 : vector<1x4xf32> to vector<1x1x1x4xf32>
    tpu.vector_store %arg7[%c0_133, %c0_134, %c0_135, %c0_136], %208 {strides = array<i32>} : memref<1x2x2x4xf32, #tpu.memory_space<vmem>>, vector<1x1x1x4xf32>,
    %c0_137 = arith.constant 0 : index
    %c1_138 = arith.constant 1 : index
    %c0_139 = arith.constant 0 : index
    %c0_140 = arith.constant 0 : index
    %209 = vector.load %arg7[%c0_137, %c1_138, %c0_139, %c0_140] : memref<1x2x2x4xf32, #tpu.memory_space<vmem>>, vector<1x1x1x4xf32>
    %210 = vector.shape_cast %209 : vector<1x1x1x4xf32> to vector<1x4xf32>
    %211 = vector.shape_cast %205 : vector<1x4xf32> to vector<1x1x1x4xf32>
    tpu.vector_store %arg7[%c0_137, %c1_138, %c0_139, %c0_140], %211 {strides = array<i32>} : memref<1x2x2x4xf32, #tpu.memory_space<vmem>>, vector<1x1x1x4xf32>,
    %212 = arith.mulf %203, %203 : vector<1x4xf32>
    %213 = arith.mulf %205, %205 : vector<1x4xf32>
    %214 = arith.addf %212, %213 : vector<1x4xf32>
    %cst_141 = arith.constant dense<0.000000e+00> : vector<1xf32>
    %215 = vector.multi_reduction <add>, %214, %cst_141 [1] : vector<1x4xf32> to vector<1xf32>
    %216 = vector.shape_cast %215 : vector<1xf32> to vector<1x1xf32>
    %cst_142 = arith.constant 1.000000e+00 : f32
    %217 = vector.broadcast %cst_142 : f32 to vector<1x1xf32>
    %218 = arith.addf %217, %194 : vector<1x1xf32>
    %219 = math.sqrt %218 : vector<1x1xf32>
    %220 = arith.divf %219, %216 : vector<1x1xf32>
    %cst_143 = arith.constant dense<0.000000e+00> : vector<4x1xf32>
    %221 = tpu.matmul %177, %203, %cst_143 {dimension_numbers = #tpu.dot_dimension_numbers<[1], [1], [0], [0], [0, 0, 1, 0], [], []>} : vector<4x4xf32>, vector<1x4xf32>, vector<4x1xf32> -> vector<4x1xf32>
    %cst_144 = arith.constant dense<0.000000e+00> : vector<4x1xf32>
    %222 = tpu.matmul %178, %205, %cst_144 {dimension_numbers = #tpu.dot_dimension_numbers<[1], [1], [0], [0], [0, 0, 1, 0], [], []>} : vector<4x4xf32>, vector<1x4xf32>, vector<4x1xf32> -> vector<4x1xf32>
    %cst_145 = arith.constant dense<0.000000e+00> : vector<4x1xf32>
    %223 = tpu.matmul %177, %205, %cst_145 {dimension_numbers = #tpu.dot_dimension_numbers<[1], [1], [0], [0], [0, 0, 1, 0], [], []>} : vector<4x4xf32>, vector<1x4xf32>, vector<4x1xf32> -> vector<4x1xf32>
    %cst_146 = arith.constant dense<0.000000e+00> : vector<4x1xf32>
    %224 = tpu.matmul %178, %203, %cst_146 {dimension_numbers = #tpu.dot_dimension_numbers<[1], [1], [0], [0], [0, 0, 1, 0], [], []>} : vector<4x4xf32>, vector<1x4xf32>, vector<4x1xf32> -> vector<4x1xf32>
    %225 = arith.addf %221, %222 : vector<4x1xf32>
    %226 = arith.subf %224, %223 : vector<4x1xf32>
    %227 = vector.broadcast %220 : vector<1x1xf32> to vector<4x1xf32>
    %228 = arith.mulf %227, %225 : vector<4x1xf32>
    %c0_147 = arith.constant 0 : index
    %c0_148 = arith.constant 0 : index
    %c0_149 = arith.constant 0 : index
    %c0_150 = arith.constant 0 : index
    %229 = vector.load %arg8[%c0_147, %c0_148, %c0_149, %c0_150] : memref<1x2x4x2xf32, #tpu.memory_space<vmem>>, vector<1x1x4x1xf32>
    %230 = vector.shape_cast %229 : vector<1x1x4x1xf32> to vector<4x1xf32>
    %231 = vector.shape_cast %228 : vector<4x1xf32> to vector<1x1x4x1xf32>
    tpu.vector_store %arg8[%c0_147, %c0_148, %c0_149, %c0_150], %231 {strides = array<i32>} : memref<1x2x4x2xf32, #tpu.memory_space<vmem>>, vector<1x1x4x1xf32>,
    %232 = vector.broadcast %220 : vector<1x1xf32> to vector<4x1xf32>
    %233 = arith.mulf %232, %226 : vector<4x1xf32>
    %c0_151 = arith.constant 0 : index
    %c1_152 = arith.constant 1 : index
    %c0_153 = arith.constant 0 : index
    %c0_154 = arith.constant 0 : index
    %234 = vector.load %arg8[%c0_151, %c1_152, %c0_153, %c0_154] : memref<1x2x4x2xf32, #tpu.memory_space<vmem>>, vector<1x1x4x1xf32>
    %235 = vector.shape_cast %234 : vector<1x1x4x1xf32> to vector<4x1xf32>
    %236 = vector.shape_cast %233 : vector<4x1xf32> to vector<1x1x4x1xf32>
    tpu.vector_store %arg8[%c0_151, %c1_152, %c0_153, %c0_154], %236 {strides = array<i32>} : memref<1x2x4x2xf32, #tpu.memory_space<vmem>>, vector<1x1x4x1xf32>,
    %c0_155 = arith.constant 0 : index
    %c0_156 = arith.constant 0 : index
    %c4_157 = arith.constant 4 : index
    %c0_158 = arith.constant 0 : index
    %237 = vector.load %arg4[%c0_155, %c0_156, %c4_157, %c0_158] : memref<1x2x8x8xf32, #tpu.memory_space<vmem>>, vector<1x1x4x8xf32>
    %238 = vector.shape_cast %237 : vector<1x1x4x8xf32> to vector<4x8xf32>
    %c0_159 = arith.constant 0 : index
    %c1_160 = arith.constant 1 : index
    %c4_161 = arith.constant 4 : index
    %c0_162 = arith.constant 0 : index
    %239 = vector.load %arg4[%c0_159, %c1_160, %c4_161, %c0_162] : memref<1x2x8x8xf32, #tpu.memory_space<vmem>>, vector<1x1x4x8xf32>
    %240 = vector.shape_cast %239 : vector<1x1x4x8xf32> to vector<4x8xf32>
    %cst_163 = arith.constant dense<0.000000e+00> : vector<4x4xf32>
    %241 = tpu.matmul %238, %5, %cst_163 {dimension_numbers = #tpu.dot_dimension_numbers<[1], [0], [0], [1], [0, 0, 1, 1], [], []>} : vector<4x8xf32>, vector<8x4xf32>, vector<4x4xf32> -> vector<4x4xf32>
    %cst_164 = arith.constant dense<0.000000e+00> : vector<4x4xf32>
    %242 = tpu.matmul %240, %7, %cst_164 {dimension_numbers = #tpu.dot_dimension_numbers<[1], [0], [0], [1], [0, 0, 1, 1], [], []>} : vector<4x8xf32>, vector<8x4xf32>, vector<4x4xf32> -> vector<4x4xf32>
    %cst_165 = arith.constant dense<0.000000e+00> : vector<4x4xf32>
    %243 = tpu.matmul %238, %7, %cst_165 {dimension_numbers = #tpu.dot_dimension_numbers<[1], [0], [0], [1], [0, 0, 1, 1], [], []>} : vector<4x8xf32>, vector<8x4xf32>, vector<4x4xf32> -> vector<4x4xf32>
    %cst_166 = arith.constant dense<0.000000e+00> : vector<4x4xf32>
    %244 = tpu.matmul %240, %5, %cst_166 {dimension_numbers = #tpu.dot_dimension_numbers<[1], [0], [0], [1], [0, 0, 1, 1], [], []>} : vector<4x8xf32>, vector<8x4xf32>, vector<4x4xf32> -> vector<4x4xf32>
    %245 = arith.subf %241, %242 : vector<4x4xf32>
    %246 = arith.addf %243, %244 : vector<4x4xf32>
    %247 = vector.extract_strided_slice %9 {offsets = [1, 0], sizes = [1, 4], strides = [1, 1]} : vector<2x4xf32> to vector<1x4xf32>
    %248 = vector.extract_strided_slice %11 {offsets = [1, 0], sizes = [1, 4], strides = [1, 1]} : vector<2x4xf32> to vector<1x4xf32>
    %cst_167 = arith.constant dense<0.000000e+00> : vector<1x4xf32>
    %249 = tpu.matmul %247, %245, %cst_167 {dimension_numbers = #tpu.dot_dimension_numbers<[1], [0], [0], [1], [0, 0, 1, 1], [], []>} : vector<1x4xf32>, vector<4x4xf32>, vector<1x4xf32> -> vector<1x4xf32>
    %cst_168 = arith.constant dense<0.000000e+00> : vector<1x4xf32>
    %250 = tpu.matmul %248, %246, %cst_168 {dimension_numbers = #tpu.dot_dimension_numbers<[1], [0], [0], [1], [0, 0, 1, 1], [], []>} : vector<1x4xf32>, vector<4x4xf32>, vector<1x4xf32> -> vector<1x4xf32>
    %cst_169 = arith.constant dense<0.000000e+00> : vector<1x4xf32>
    %251 = tpu.matmul %247, %246, %cst_169 {dimension_numbers = #tpu.dot_dimension_numbers<[1], [0], [0], [1], [0, 0, 1, 1], [], []>} : vector<1x4xf32>, vector<4x4xf32>, vector<1x4xf32> -> vector<1x4xf32>
    %cst_170 = arith.constant dense<0.000000e+00> : vector<1x4xf32>
    %252 = tpu.matmul %248, %245, %cst_170 {dimension_numbers = #tpu.dot_dimension_numbers<[1], [0], [0], [1], [0, 0, 1, 1], [], []>} : vector<1x4xf32>, vector<4x4xf32>, vector<1x4xf32> -> vector<1x4xf32>
    %253 = arith.subf %249, %250 : vector<1x4xf32>
    %254 = arith.addf %251, %252 : vector<1x4xf32>
    %255 = arith.mulf %253, %253 : vector<1x4xf32>
    %256 = arith.mulf %254, %254 : vector<1x4xf32>
    %257 = arith.addf %255, %256 : vector<1x4xf32>
    %cst_171 = arith.constant dense<0.000000e+00> : vector<1xf32>
    %258 = vector.multi_reduction <add>, %257, %cst_171 [1] : vector<1x4xf32> to vector<1xf32>
    %259 = vector.shape_cast %258 : vector<1xf32> to vector<1x1xf32>
    %260 = vector.extract_strided_slice %154 {offsets = [1, 0], sizes = [1, 1], strides = [1, 1]} : vector<2x1xf32> to vector<1x1xf32>
    %261 = arith.subf %260, %259 : vector<1x1xf32>
    %262 = arith.divf %259, %261 : vector<1x1xf32>
    %c0_172 = arith.constant 0 : index
    %c13 = arith.constant 13 : index
    %c0_173 = arith.constant 0 : index
    %263 = vector.load %arg6[%c0_172, %c13, %c0_173] : memref<1x14x1xf32, #tpu.memory_space<vmem>>, vector<1x1x1xf32>
    %264 = vector.shape_cast %263 : vector<1x1x1xf32> to vector<1x1xf32>
    %265 = vector.shape_cast %262 : vector<1x1xf32> to vector<1x1x1xf32>
    tpu.vector_store %arg6[%c0_172, %c13, %c0_173], %265 {strides = array<i32>} : memref<1x14x1xf32, #tpu.memory_space<vmem>>, vector<1x1x1xf32>,
    %cst_174 = arith.constant 1.000000e+00 : f32
    %266 = vector.broadcast %cst_174 : f32 to vector<1x1xf32>
    %267 = arith.addf %266, %262 : vector<1x1xf32>
    %268 = math.sqrt %267 : vector<1x1xf32>
    %269 = arith.divf %268, %260 : vector<1x1xf32>
    %270 = vector.broadcast %269 : vector<1x1xf32> to vector<1x4xf32>
    %271 = arith.mulf %253, %270 : vector<1x4xf32>
    %272 = vector.broadcast %269 : vector<1x1xf32> to vector<1x4xf32>
    %273 = arith.mulf %254, %272 : vector<1x4xf32>
    %c0_175 = arith.constant 0 : index
    %c0_176 = arith.constant 0 : index
    %c1_177 = arith.constant 1 : index
    %c0_178 = arith.constant 0 : index
    %274 = vector.load %arg7[%c0_175, %c0_176, %c1_177, %c0_178] : memref<1x2x2x4xf32, #tpu.memory_space<vmem>>, vector<1x1x1x4xf32>
    %275 = vector.shape_cast %274 : vector<1x1x1x4xf32> to vector<1x4xf32>
    %276 = vector.shape_cast %271 : vector<1x4xf32> to vector<1x1x1x4xf32>
    tpu.vector_store %arg7[%c0_175, %c0_176, %c1_177, %c0_178], %276 {strides = array<i32>} : memref<1x2x2x4xf32, #tpu.memory_space<vmem>>, vector<1x1x1x4xf32>,
    %c0_179 = arith.constant 0 : index
    %c1_180 = arith.constant 1 : index
    %c1_181 = arith.constant 1 : index
    %c0_182 = arith.constant 0 : index
    %277 = vector.load %arg7[%c0_179, %c1_180, %c1_181, %c0_182] : memref<1x2x2x4xf32, #tpu.memory_space<vmem>>, vector<1x1x1x4xf32>
    %278 = vector.shape_cast %277 : vector<1x1x1x4xf32> to vector<1x4xf32>
    %279 = vector.shape_cast %273 : vector<1x4xf32> to vector<1x1x1x4xf32>
    tpu.vector_store %arg7[%c0_179, %c1_180, %c1_181, %c0_182], %279 {strides = array<i32>} : memref<1x2x2x4xf32, #tpu.memory_space<vmem>>, vector<1x1x1x4xf32>,
    %280 = arith.mulf %271, %271 : vector<1x4xf32>
    %281 = arith.mulf %273, %273 : vector<1x4xf32>
    %282 = arith.addf %280, %281 : vector<1x4xf32>
    %cst_183 = arith.constant dense<0.000000e+00> : vector<1xf32>
    %283 = vector.multi_reduction <add>, %282, %cst_183 [1] : vector<1x4xf32> to vector<1xf32>
    %284 = vector.shape_cast %283 : vector<1xf32> to vector<1x1xf32>
    %cst_184 = arith.constant 1.000000e+00 : f32
    %285 = vector.broadcast %cst_184 : f32 to vector<1x1xf32>
    %286 = arith.addf %285, %262 : vector<1x1xf32>
    %287 = math.sqrt %286 : vector<1x1xf32>
    %288 = arith.divf %287, %284 : vector<1x1xf32>
    %cst_185 = arith.constant dense<0.000000e+00> : vector<4x1xf32>
    %289 = tpu.matmul %245, %271, %cst_185 {dimension_numbers = #tpu.dot_dimension_numbers<[1], [1], [0], [0], [0, 0, 1, 0], [], []>} : vector<4x4xf32>, vector<1x4xf32>, vector<4x1xf32> -> vector<4x1xf32>
    %cst_186 = arith.constant dense<0.000000e+00> : vector<4x1xf32>
    %290 = tpu.matmul %246, %273, %cst_186 {dimension_numbers = #tpu.dot_dimension_numbers<[1], [1], [0], [0], [0, 0, 1, 0], [], []>} : vector<4x4xf32>, vector<1x4xf32>, vector<4x1xf32> -> vector<4x1xf32>
    %cst_187 = arith.constant dense<0.000000e+00> : vector<4x1xf32>
    %291 = tpu.matmul %245, %273, %cst_187 {dimension_numbers = #tpu.dot_dimension_numbers<[1], [1], [0], [0], [0, 0, 1, 0], [], []>} : vector<4x4xf32>, vector<1x4xf32>, vector<4x1xf32> -> vector<4x1xf32>
    %cst_188 = arith.constant dense<0.000000e+00> : vector<4x1xf32>
    %292 = tpu.matmul %246, %271, %cst_188 {dimension_numbers = #tpu.dot_dimension_numbers<[1], [1], [0], [0], [0, 0, 1, 0], [], []>} : vector<4x4xf32>, vector<1x4xf32>, vector<4x1xf32> -> vector<4x1xf32>
    %293 = arith.addf %289, %290 : vector<4x1xf32>
    %294 = arith.subf %292, %291 : vector<4x1xf32>
    %295 = vector.broadcast %288 : vector<1x1xf32> to vector<4x1xf32>
    %296 = arith.mulf %295, %293 : vector<4x1xf32>
    %c0_189 = arith.constant 0 : index
    %c0_190 = arith.constant 0 : index
    %c0_191 = arith.constant 0 : index
    %c1_192 = arith.constant 1 : index
    %297 = vector.load %arg8[%c0_189, %c0_190, %c0_191, %c1_192] : memref<1x2x4x2xf32, #tpu.memory_space<vmem>>, vector<1x1x4x1xf32>
    %298 = vector.shape_cast %297 : vector<1x1x4x1xf32> to vector<4x1xf32>
    %299 = vector.shape_cast %296 : vector<4x1xf32> to vector<1x1x4x1xf32>
    tpu.vector_store %arg8[%c0_189, %c0_190, %c0_191, %c1_192], %299 {strides = array<i32>} : memref<1x2x4x2xf32, #tpu.memory_space<vmem>>, vector<1x1x4x1xf32>,
    %300 = vector.broadcast %288 : vector<1x1xf32> to vector<4x1xf32>
    %301 = arith.mulf %300, %294 : vector<4x1xf32>
    %c0_193 = arith.constant 0 : index
    %c1_194 = arith.constant 1 : index
    %c0_195 = arith.constant 0 : index
    %c1_196 = arith.constant 1 : index
    %302 = vector.load %arg8[%c0_193, %c1_194, %c0_195, %c1_196] : memref<1x2x4x2xf32, #tpu.memory_space<vmem>>, vector<1x1x4x1xf32>
    %303 = vector.shape_cast %302 : vector<1x1x4x1xf32> to vector<4x1xf32>
    %304 = vector.shape_cast %301 : vector<4x1xf32> to vector<1x1x4x1xf32>
    tpu.vector_store %arg8[%c0_193, %c1_194, %c0_195, %c1_196], %304 {strides = array<i32>} : memref<1x2x4x2xf32, #tpu.memory_space<vmem>>, vector<1x1x4x1xf32>,
    return
  }
  func.func @transform_0(%arg0: i32) -> (i32, i32, i32, i32) {
    %c0_i32 = arith.constant 0 : i32
    %c0_i32_0 = arith.constant 0 : i32
    %c0_i32_1 = arith.constant 0 : i32
    %c0_i32_2 = arith.constant 0 : i32
    return %arg0, %c0_i32, %c0_i32_0, %c0_i32_1 : i32, i32, i32, i32
  }
  func.func @transform_1(%arg0: i32) -> (i32, i32, i32, i32) {
    %c0_i32 = arith.constant 0 : i32
    %c0_i32_0 = arith.constant 0 : i32
    %c0_i32_1 = arith.constant 0 : i32
    %c0_i32_2 = arith.constant 0 : i32
    return %arg0, %c0_i32, %c0_i32_0, %c0_i32_1 : i32, i32, i32, i32
  }
  func.func @transform_2(%arg0: i32) -> (i32, i32, i32, i32) {
    %c0_i32 = arith.constant 0 : i32
    %c0_i32_0 = arith.constant 0 : i32
    %c0_i32_1 = arith.constant 0 : i32
    %c0_i32_2 = arith.constant 0 : i32
    return %arg0, %c0_i32, %c0_i32_0, %c0_i32_1 : i32, i32, i32, i32
  }
  func.func @transform_3(%arg0: i32) -> (i32, i32, i32, i32) {
    %c0_i32 = arith.constant 0 : i32
    %c0_i32_0 = arith.constant 0 : i32
    %c0_i32_1 = arith.constant 0 : i32
    %c0_i32_2 = arith.constant 0 : i32
    return %arg0, %c0_i32, %c0_i32_0, %c0_i32_1 : i32, i32, i32, i32
  }
  func.func @transform_4(%arg0: i32) -> (i32, i32, i32, i32) {
    %c0_i32 = arith.constant 0 : i32
    %c0_i32_0 = arith.constant 0 : i32
    %c0_i32_1 = arith.constant 0 : i32
    %c0_i32_2 = arith.constant 0 : i32
    return %arg0, %c0_i32, %c0_i32_0, %c0_i32_1 : i32, i32, i32, i32
  }
  func.func @transform_5(%arg0: i32) -> (i32, i32, i32) {
    %c0_i32 = arith.constant 0 : i32
    %c0_i32_0 = arith.constant 0 : i32
    %c0_i32_1 = arith.constant 0 : i32
    return %arg0, %c0_i32, %c0_i32_0 : i32, i32, i32
  }
  func.func @transform_6(%arg0: i32) -> (i32, i32, i32, i32) {
    %c0_i32 = arith.constant 0 : i32
    %c0_i32_0 = arith.constant 0 : i32
    %c0_i32_1 = arith.constant 0 : i32
    %c0_i32_2 = arith.constant 0 : i32
    return %arg0, %c0_i32, %c0_i32_0, %c0_i32_1 : i32, i32, i32, i32
  }
  func.func @transform_7(%arg0: i32) -> (i32, i32, i32, i32) {
    %c0_i32 = arith.constant 0 : i32
    %c0_i32_0 = arith.constant 0 : i32
    %c0_i32_1 = arith.constant 0 : i32
    %c0_i32_2 = arith.constant 0 : i32
    return %arg0, %c0_i32, %c0_i32_0, %c0_i32_1 : i32, i32, i32, i32
  }
  func.func @transform_8(%arg0: i32) -> (i32, i32, i32, i32) {
    %c0_i32 = arith.constant 0 : i32
    %c0_i32_0 = arith.constant 0 : i32
    %c0_i32_1 = arith.constant 0 : i32
    %c0_i32_2 = arith.constant 0 : i32
    return %arg0, %c0_i32, %c0_i32_0, %c0_i32_1 : i32, i32, i32, i32
  }
}

</mosaic_0001>

<bundles_post_ra>
// kernel: custom-call.5
= control target key start
LH: loop header
LB: loop body
LE: loop exit
PB: predicated region body
PF: predicated region fallthrough
CT: control target
= control target key end

     0   :  { %s61_s0 = inlined_call_operand.vmem [shape: c64[2,12,8], index: 0, kind: input, shape index: {}]   ;;  %s62_s1 = inlined_call_operand.vmem [shape: f32[2,12,8], index: 1, kind: output, shape index: {}]  }
   0x1   :  { %v20_v0 = vld [vmem:[%s61_s0 + $0x20] sm:$0xff]  ;;  %v21_v1 = vld [vmem:[%s61_s0 + $0x28] sm:$0xff]  ;;  %v23_v2 = vld [vmem:[%s61_s0 + $0x30] sm:$0xff] }
   0x2   :  { %4 = vst [vmem:[%s62_s1] sm:$0xff] %v20_v0  ;;  %22 = vst [vmem:[%s62_s1 + $0x8] sm:$0xff] %v21_v1  ;;  %v25_v3 = vld [vmem:[%s61_s0 + $0x38] sm:$0xff] }
   0x3   :  { %24 = vst [vmem:[%s62_s1 + $0x10] sm:$0xff] %v23_v2  ;;  %26 = vst [vmem:[%s62_s1 + $0x18] sm:$0xff] %v25_v3 }

// kernel: custom-call.4
= control target key start
LH: loop header
LB: loop body
LE: loop exit
PB: predicated region body
PF: predicated region fallthrough
CT: control target
= control target key end

     0   :  { %s56_s0 = inlined_call_operand.vmem [shape: c64[2,12,8], index: 0, kind: input, shape index: {}]   ;;  %s57_s1 = inlined_call_operand.vmem [shape: f32[2,12,8], index: 1, kind: output, shape index: {}]  }
   0x1   :  { %v2_v0 = vld [vmem:[%s56_s0] sm:$0xff]  ;;  %v16_v1 = vld [vmem:[%s56_s0 + $0x8] sm:$0xff]  ;;  %v18_v2 = vld [vmem:[%s56_s0 + $0x10] sm:$0xff] }
   0x2   :  { %3 = vst [vmem:[%s57_s1] sm:$0xff] %v2_v0  ;;  %17 = vst [vmem:[%s57_s1 + $0x8] sm:$0xff] %v16_v1  ;;  %v20_v3 = vld [vmem:[%s56_s0 + $0x18] sm:$0xff] }
   0x3   :  { %19 = vst [vmem:[%s57_s1 + $0x10] sm:$0xff] %v18_v2  ;;  %21 = vst [vmem:[%s57_s1 + $0x18] sm:$0xff] %v20_v3 }

// kernel: custom-call
= control target key start
LH: loop header
LB: loop body
LE: loop exit
PB: predicated region body
PF: predicated region fallthrough
CT: control target
= control target key end

     0   :  { %2 = vsyncpa [#allocation0], 0  ;;  %s61_s0 = inlined_call_operand.hbm [shape: c64[2,8,4], index: 0, kind: input, shape index: {}]   ;;  %s62_s1 = inlined_call_operand.vmem [shape: f32[2,8,4], index: 1, kind: output, shape index: {}]  }
   0x1   :  { %s3_s8 = sshll.u32 %s62_s1, 4  ;;  %s9_s11 = scalar_lea.hbm %s61_s0, 128  ;;  %s4_s8 = int_to_ptr.vmem [resolvable:$true] %s3_s8 }
   0x2   :  { %p10_p0 = scmp.ne.s32.totalorder %s61_s0, %s9_s11  ;;  %s11_s16 = scalar_lea.hbm %s61_s0, 256 }
   0x3   :  { %p12_p1 = scmp.lt.u32.totalorder %s11_s16, %s9_s11  ;;  %p13_p2 = scmp.lt.u32.totalorder %s9_s11, %s61_s0 }
   0x5   :  { %p14_p3 = por %p13_p2, %p12_p1 }
   0x7   :  { %p15_p4 = pnand %p14_p3, %p10_p0 }
   0x9   :  { %18 = shalt.err (!%p15_p4)  }
   0xa   :  { %s19_s1 = scalar_lea.vmem %s4_s8, 128  ;;  %p24_p6 = scmp.lt.s32.totalorder %s4_s8, %s4_s8 }
   0xb   :  { %p20_p5 = scmp.ne.s32.totalorder %s4_s8, %s19_s1  ;;  %p25_p7 = scmp.lt.s32.totalorder %s19_s1, %s19_s1 }
   0xd   :  { %p26_p8 = por %p25_p7, %p24_p6 }
   0xf   :  { %p27_p9 = pnand %p26_p8, %p20_p5 }
  0x11   :  { %30 = shalt.err (!%p27_p9)  }
  0x12   :  { %6 = dma.hbm_to_vmem [thread:$0]  %s61_s0, 128, %s4_s8, [#allocation0] }
  0x13   :  { %31 = dma.done.wait [#allocation0], 128  }
  0x14   :  { %32 = vsyncadd [#allocation0], 4294967168 }
  0x15   :  { %8 = vsyncpa [#allocation0], 1 }

// kernel: custom-call.1
= control target key start
LH: loop header
LB: loop body
LE: loop exit
PB: predicated region body
PF: predicated region fallthrough
CT: control target
= control target key end

     0   :  { %s59_s0 = inlined_call_operand.hbm [shape: c64[2,8,4], index: 0, kind: input, shape index: {}]   ;;  %s60_s1 = inlined_call_operand.vmem [shape: f32[2,8,4], index: 1, kind: output, shape index: {}]  }
   0x1   :  { %s2_s8 = scalar_lea.hbm %s59_s0, 128 }
   0x2   :  { %3 = vsyncpa [#allocation0], 0  ;;  %s4_s11 = sshll.u32 %s60_s1, 4  ;;  %s34_s14 = scalar_lea.hbm %s59_s0, 256  ;;  %s5_s11 = int_to_ptr.vmem [resolvable:$true] %s4_s11 }
   0x3   :  { %p11_p0 = scmp.ne.s32.totalorder %s2_s8, %s34_s14  ;;  %p13_p1 = scmp.lt.u32.totalorder %s2_s8, %s59_s0 }
   0x4   :  { %p14_p2 = scmp.lt.u32.totalorder %s34_s14, %s34_s14  ;;  %p16_p4 = scmp.lt.u32.totalorder %s34_s14, %s2_s8 }
   0x6   :  { %p15_p3 = por %p14_p2, %p13_p1 }
   0x8   :  { %p17_p5 = por %p16_p4, %p15_p3 }
   0xa   :  { %p18_p6 = pnand %p17_p5, %p11_p0 }
   0xc   :  { %21 = shalt.err (!%p18_p6)  }
   0xd   :  { %s22_s17 = scalar_lea.vmem %s5_s11, 128  ;;  %p27_p8 = scmp.lt.s32.totalorder %s5_s11, %s5_s11 }
   0xe   :  { %p23_p7 = scmp.ne.s32.totalorder %s5_s11, %s22_s17  ;;  %p28_p9 = scmp.lt.s32.totalorder %s22_s17, %s22_s17 }
  0x10   :  { %p29_p10 = por %p28_p9, %p27_p8 }
  0x12   :  { %p30_p11 = pnand %p29_p10, %p23_p7 }
  0x14   :  { %33 = shalt.err (!%p30_p11)  }
  0x15   :  { %7 = dma.hbm_to_vmem [thread:$0]  %s2_s8, 128, %s5_s11, [#allocation0] }
  0x16   :  { %35 = dma.done.wait [#allocation0], 128  }
  0x17   :  { %36 = vsyncadd [#allocation0], 4294967168 }
  0x18   :  { %9 = vsyncpa [#allocation0], 1 }

// kernel: custom-call.6
= control target key start
LH: loop header
LB: loop body
LE: loop exit
PB: predicated region body
PF: predicated region fallthrough
CT: control target
= control target key end

     0   :  { %2 = vsyncpa [#allocation0], 0  ;;  %s61_s0 = inlined_call_operand.hbm [shape: c64[2,4,8,2], index: 0, kind: input, shape index: {}]   ;;  %s62_s1 = inlined_call_operand.vmem [shape: f32[2,4,8,2], index: 1, kind: output, shape index: {}]  }
   0x1   :  { %s3_s8 = sshll.u32 %s62_s1, 4  ;;  %s9_s11 = scalar_lea.hbm %s61_s0, 256  ;;  %s4_s8 = int_to_ptr.vmem [resolvable:$true] %s3_s8 }
   0x2   :  { %p10_p0 = scmp.ne.s32.totalorder %s61_s0, %s9_s11  ;;  %s11_s16 = scalar_lea.hbm %s61_s0, 512 }
   0x3   :  { %p12_p1 = scmp.lt.u32.totalorder %s11_s16, %s9_s11  ;;  %p13_p2 = scmp.lt.u32.totalorder %s9_s11, %s61_s0 }
   0x5   :  { %p14_p3 = por %p13_p2, %p12_p1 }
   0x7   :  { %p15_p4 = pnand %p14_p3, %p10_p0 }
   0x9   :  { %18 = shalt.err (!%p15_p4)  }
   0xa   :  { %s19_s1 = scalar_lea.vmem %s4_s8, 256  ;;  %p24_p6 = scmp.lt.s32.totalorder %s4_s8, %s4_s8 }
   0xb   :  { %p20_p5 = scmp.ne.s32.totalorder %s4_s8, %s19_s1  ;;  %p25_p7 = scmp.lt.s32.totalorder %s19_s1, %s19_s1 }
   0xd   :  { %p26_p8 = por %p25_p7, %p24_p6 }
   0xf   :  { %p27_p9 = pnand %p26_p8, %p20_p5 }
  0x11   :  { %30 = shalt.err (!%p27_p9)  }
  0x12   :  { %6 = dma.hbm_to_vmem [thread:$0]  %s61_s0, 256, %s4_s8, [#allocation0] }
  0x13   :  { %31 = dma.done.wait [#allocation0], 256  }
  0x14   :  { %32 = vsyncadd [#allocation0], 4294967040 }
  0x15   :  { %8 = vsyncpa [#allocation0], 1 }

// kernel: custom-call.7
= control target key start
LH: loop header
LB: loop body
LE: loop exit
PB: predicated region body
PF: predicated region fallthrough
CT: control target
= control target key end

     0   :  { %s59_s0 = inlined_call_operand.hbm [shape: c64[2,4,8,2], index: 0, kind: input, shape index: {}]   ;;  %s60_s1 = inlined_call_operand.vmem [shape: f32[2,4,8,2], index: 1, kind: output, shape index: {}]  }
   0x1   :  { %s2_s8 = scalar_lea.hbm %s59_s0, 256 }
   0x2   :  { %3 = vsyncpa [#allocation0], 0  ;;  %s4_s11 = sshll.u32 %s60_s1, 4  ;;  %s34_s14 = scalar_lea.hbm %s59_s0, 512  ;;  %s5_s11 = int_to_ptr.vmem [resolvable:$true] %s4_s11 }
   0x3   :  { %p11_p0 = scmp.ne.s32.totalorder %s2_s8, %s34_s14  ;;  %p13_p1 = scmp.lt.u32.totalorder %s2_s8, %s59_s0 }
   0x4   :  { %p14_p2 = scmp.lt.u32.totalorder %s34_s14, %s34_s14  ;;  %p16_p4 = scmp.lt.u32.totalorder %s34_s14, %s2_s8 }
   0x6   :  { %p15_p3 = por %p14_p2, %p13_p1 }
   0x8   :  { %p17_p5 = por %p16_p4, %p15_p3 }
   0xa   :  { %p18_p6 = pnand %p17_p5, %p11_p0 }
   0xc   :  { %21 = shalt.err (!%p18_p6)  }
   0xd   :  { %s22_s17 = scalar_lea.vmem %s5_s11, 256  ;;  %p27_p8 = scmp.lt.s32.totalorder %s5_s11, %s5_s11 }
   0xe   :  { %p23_p7 = scmp.ne.s32.totalorder %s5_s11, %s22_s17  ;;  %p28_p9 = scmp.lt.s32.totalorder %s22_s17, %s22_s17 }
  0x10   :  { %p29_p10 = por %p28_p9, %p27_p8 }
  0x12   :  { %p30_p11 = pnand %p29_p10, %p23_p7 }
  0x14   :  { %33 = shalt.err (!%p30_p11)  }
  0x15   :  { %7 = dma.hbm_to_vmem [thread:$0]  %s2_s8, 256, %s5_s11, [#allocation0] }
  0x16   :  { %35 = dma.done.wait [#allocation0], 256  }
  0x17   :  { %36 = vsyncadd [#allocation0], 4294967040 }
  0x18   :  { %9 = vsyncpa [#allocation0], 1 }

// kernel: custom-call.9
= control target key start
LH: loop header
LB: loop body
LE: loop exit
PB: predicated region body
PF: predicated region fallthrough
CT: control target
= control target key end

     0   :  { %s59_s0 = inlined_call_operand.hbm [shape: c64[2,4,2], index: 0, kind: input, shape index: {}]   ;;  %s60_s1 = inlined_call_operand.vmem [shape: f32[2,4,2], index: 1, kind: output, shape index: {}]  }
   0x1   :  { %s2_s8 = scalar_lea.hbm %s59_s0, 64 }
   0x2   :  { %3 = vsyncpa [#allocation0], 0  ;;  %s4_s11 = sshll.u32 %s60_s1, 4  ;;  %s34_s14 = scalar_lea.hbm %s59_s0, 128  ;;  %s5_s11 = int_to_ptr.vmem [resolvable:$true] %s4_s11 }
   0x3   :  { %p11_p0 = scmp.ne.s32.totalorder %s2_s8, %s34_s14  ;;  %p13_p1 = scmp.lt.u32.totalorder %s2_s8, %s59_s0 }
   0x4   :  { %p14_p2 = scmp.lt.u32.totalorder %s34_s14, %s34_s14  ;;  %p16_p4 = scmp.lt.u32.totalorder %s34_s14, %s2_s8 }
   0x6   :  { %p15_p3 = por %p14_p2, %p13_p1 }
   0x8   :  { %p17_p5 = por %p16_p4, %p15_p3 }
   0xa   :  { %p18_p6 = pnand %p17_p5, %p11_p0 }
   0xc   :  { %21 = shalt.err (!%p18_p6)  }
   0xd   :  { %s22_s17 = scalar_lea.vmem %s5_s11, 64  ;;  %p27_p8 = scmp.lt.s32.totalorder %s5_s11, %s5_s11 }
   0xe   :  { %p23_p7 = scmp.ne.s32.totalorder %s5_s11, %s22_s17  ;;  %p28_p9 = scmp.lt.s32.totalorder %s22_s17, %s22_s17 }
  0x10   :  { %p29_p10 = por %p28_p9, %p27_p8 }
  0x12   :  { %p30_p11 = pnand %p29_p10, %p23_p7 }
  0x14   :  { %33 = shalt.err (!%p30_p11)  }
  0x15   :  { %7 = dma.hbm_to_vmem [thread:$0]  %s2_s8, 64, %s5_s11, [#allocation0] }
  0x16   :  { %35 = dma.done.wait [#allocation0], 64  }
  0x17   :  { %36 = vsyncadd [#allocation0], 4294967232 }
  0x18   :  { %9 = vsyncpa [#allocation0], 1 }

// kernel: custom-call.8
= control target key start
LH: loop header
LB: loop body
LE: loop exit
PB: predicated region body
PF: predicated region fallthrough
CT: control target
= control target key end

     0   :  { %2 = vsyncpa [#allocation0], 0  ;;  %s61_s0 = inlined_call_operand.hbm [shape: c64[2,4,2], index: 0, kind: input, shape index: {}]   ;;  %s62_s1 = inlined_call_operand.vmem [shape: f32[2,4,2], index: 1, kind: output, shape index: {}]  }
   0x1   :  { %s3_s8 = sshll.u32 %s62_s1, 4  ;;  %s9_s11 = scalar_lea.hbm %s61_s0, 64  ;;  %s4_s8 = int_to_ptr.vmem [resolvable:$true] %s3_s8 }
   0x2   :  { %p10_p0 = scmp.ne.s32.totalorder %s61_s0, %s9_s11  ;;  %s11_s16 = scalar_lea.hbm %s61_s0, 128 }
   0x3   :  { %p12_p1 = scmp.lt.u32.totalorder %s11_s16, %s9_s11  ;;  %p13_p2 = scmp.lt.u32.totalorder %s9_s11, %s61_s0 }
   0x5   :  { %p14_p3 = por %p13_p2, %p12_p1 }
   0x7   :  { %p15_p4 = pnand %p14_p3, %p10_p0 }
   0x9   :  { %18 = shalt.err (!%p15_p4)  }
   0xa   :  { %s19_s1 = scalar_lea.vmem %s4_s8, 64  ;;  %p24_p6 = scmp.lt.s32.totalorder %s4_s8, %s4_s8 }
   0xb   :  { %p20_p5 = scmp.ne.s32.totalorder %s4_s8, %s19_s1  ;;  %p25_p7 = scmp.lt.s32.totalorder %s19_s1, %s19_s1 }
   0xd   :  { %p26_p8 = por %p25_p7, %p24_p6 }
   0xf   :  { %p27_p9 = pnand %p26_p8, %p20_p5 }
  0x11   :  { %30 = shalt.err (!%p27_p9)  }
  0x12   :  { %6 = dma.hbm_to_vmem [thread:$0]  %s61_s0, 64, %s4_s8, [#allocation0] }
  0x13   :  { %31 = dma.done.wait [#allocation0], 64  }
  0x14   :  { %32 = vsyncadd [#allocation0], 4294967232 }
  0x15   :  { %8 = vsyncpa [#allocation0], 1 }

// kernel: custom-call.10
= control target key start
LH: loop header
LB: loop body
LE: loop exit
PB: predicated region body
PF: predicated region fallthrough
CT: control target
= control target key end

     0   :  { %5 = vsyncpa [#allocation4], 0  ;;  %s888_s0 = inlined_call_operand.vmem [shape: f32[2,8,8], index: 0, kind: input, shape index: {}]   ;;  %s889_s1 = inlined_call_operand.vmem [shape: f32[2,8,8], index: 1, kind: output, shape index: {0}]   ;;  %s890_s2 = inlined_call_operand.hbm [shape: s32[2,8], index: 2, kind: output, shape index: {1}]   ;;  %s891_s3 = inlined_call_operand.vmem [shape: s32[2,8], index: 3, kind: output, shape index: {2}]  }
   0x1   :  { %7 = vsyncpa [#allocation4 + $0x1], 0  ;;  %s707_s12 = smov 0   ;;  %s709_s13 = smov 0  }
   0x2   :  { %s711_s14 = smov 0   ;;  %s713_s15 = smov 0  }
   0x3 LB: > { %s728_s16 = sadd.s32 4294967295, %s679_s15   ;;  %s542_s17 = sadd.s32 4294967294, %s679_s15   ;;  %s679_s15 = sphi %s713_s15, %s899_s15   ;;  %s675_s14 = sphi %s711_s14, %s898_s14   ;;  %s671_s13 = sphi %s709_s13, %s897_s13   ;;  %s667_s12 = sphi %s707_s12, %s896_s12  }
   0x4   : > { %s732_s18 = sadd.s32 1, %s679_s15   ;;  %s17_s19 = sshrl.u32 %s679_s15, 3 }
   0x5   : > { %s18_s20 = sshrl.u32 %s732_s18, 3  ;;  %s22_s21 = sadd.s32 1, %s675_s14 }
   0x6   : > { %s19_s22 = ssub.s32 %s17_s19, %s18_s20  ;;  %p32_p0 = scmp.ne.s32.totalorder %s675_s14, %s671_s13 }
   0x7   : > { %p20_p1 = scmp.eq.s32.totalorder %s19_s22, 0  ;;  %p33_p2 = scmp.eq.s32.totalorder %s728_s16, 1 }
   0x8   : > { %p38_p3 = scmp.ne.s32.totalorder %s671_s13, %s667_s12  ;;  %p39_p4 = scmp.eq.s32.totalorder %s542_s17, 1 }
   0x9   : > { %s743_s23 = scalar_select %p20_p1, %s675_s14, %s22_s21  }
   0xa   : > { %p745_p5 = por %p33_p2, %p32_p0  ;;  %p749_p6 = por %p39_p4, %p38_p3 }
   0xb   : > { %p544_p7 = scmp.ge.s32.totalorder %s679_s15, 2 }
   0xc   : > { %s85_s26 = sand.u32 (!%p544_p7), 1, %s679_s15   ;;  %s546_s27 = sshll.u32 (!%p544_p7), %s679_s15, 3 }
   0xd   : > { %83 = sbr.rel (%p544_p7) target bundleno = 20 (0x14), region = 16  ;;  %s545_s28 = sshll.u32 (!%p544_p7), %s85_s26, 3 }
   0xe   : > { %s89_s4 = scalar_lea.vmem (!%p544_p7), %s888_s0, %s546_s27  ;;  %s87_s5 = scalar_lea.vmem (!%p544_p7), [#allocation0], %s545_s28 }
   0xf   : > { %v117_v0 = vld [vmem:[%s89_s4] sm:$0xff] (!%p544_p7) }
  0x10   : > { %118 = vst [vmem:[%s87_s5] sm:$0xff] (!%p544_p7), %v117_v0 }
  0x14 PF: > { %p547_p8 = scmp.ge.s32.totalorder %s679_s15, 1  ;;  %p123_p9 = scmp.lt.s32.totalorder %s679_s15, 3 }
  0x16   : > { %p124_p10 = pnand %p547_p8, %p123_p9 }
  0x18   : > { %127 = sbr.rel (%p124_p10) target bundleno = 441 (0x1b9), region = 54 }
  0x1f   : > { %s130_s6 = sand.u32 1, %s728_s16   ;;  %s145_s7 = sand.u32 1, %s671_s13   ;;  %v163_v1 = vlaneseq  ;;  %v685_v4 = vmov 0  }
  0x20   : > { %s548_s8 = sshll.u32 %s130_s6, 3  ;;  %s767_s9 = sshll.u32 %s145_s7, 1 }
  0x21   : > { %v770_v2 = vshrl.u32 %v163_v1, 7  ;;  %s132_s10 = scalar_lea.vmem [#allocation0], %s548_s8  ;;  %s772_s11 = scalar_lea.vmem [#allocation1], %s548_s8 }
  0x22   : > { %v156_v3 = vld [vmem:[%s132_s10] sm:$0xff]  ;;  %s158_s17 = sand.u32 7, %s728_s16   ;;  %s147_s20 = scalar_lea.vmem [#allocation3], %s767_s9 }
  0x23   : > { %157 = vst [vmem:[%s772_s11] sm:$0xff] %v156_v3  ;;  %167 = vst [vmem:[#allocation7] sm:$0xff] %v770_v2  ;;  %s777_s19 = scalar_lea.vmem [#allocation2], %s158_s17  ;;  %s153_s21 = scalar_lea.vmem [#allocation6], %s767_s9 }
  0x24   : > { %162 = vst [vmem:[%s777_s19] sm:$0x1] %v685_v4  ;;  %s782_s22 = scalar_lea.vmem [#allocation5], %s158_s17  ;;  %s784_s26 = smov 0  }
  0x25 LB: >> { %v791_v7 = vstv %s683_s26  ;;  %s224_s27 = ssub.s32 128, %s683_s26  ;;  %v230_v37 = vand.u32 127, %v163_v1  ;;  %s236_s28 = scalar_lea.vmem %s772_s11, %s683_s26 [#allocation1]  ;;  %s683_s26 = sphi %s784_s26, %s173_s26  }
  0x26   : >> { %vm182_vm0 = vcmp.ge.s32.totalorder %v770_v2, %v791_v7  ;;  %s242_s30 = scalar_lea.vmem [#allocation7], %s683_s26  ;;  %vm262_vm13 = vcmp.gt.s32.totalorder %v770_v2, %v791_v7  ;;  %s173_s26 = sadd.s32 1, %s683_s26  }
  0x27   : >> { %vm254_vm10 = vcmp.gt.s32.totalorder %v230_v37, %v791_v7  ;;  %vm231_vm11 = vcmp.eq.s32.totalorder %v230_v37, %v791_v7  ;;  %p170_p11 = scmp.ge.s32.totalorder %s173_s26, 8  }
  0x28   : >> { %vm266_vm15 = vmand %vm262_vm13, %vm231_vm11  ;;  %s892_s6 = sshrl.u32 (%p170_p11), %s728_s16, 3  ;;  %s556_s8 = sshll.u32 (%p170_p11), %s728_s16, 3 }
  0x29   : > { %s557_s10 = sshll.u32 (%p170_p11), %s892_s6, 5  ;;  %s686_s6 = smov (%p170_p11), [#allocation3]  }
  0x2a   : >> { %v178_v5 = vld [vmem:[%s772_s11] sm:$0xff]  ;;  %v238_v40 = vld [vmem:[%s236_s28] ss:$0 sm:$0xff]  ;;  %s617_s17 = sshll.u32 (%p170_p11), %s686_s6, 4  ;;  %s618_s17 = int_to_ptr.vmem [resolvable:$false] %s617_s17 }
  0x2b   : >> { %v179_v6 = vand.u32 2147483647, %v178_v5  ;;  %v233_v39 = vld [vmem:[%s777_s19] ss:$0 sm:$0xff] }
  0x2c   : >> { %v244_v41 = vld [vmem:[%s242_s30] ss:$0 sm:$0xff] }
  0x2d   : >> { %vm552_vm1 = vcmp.gt.f32.partialorder %v179_v6, -inf }
  0x2e   : >> { %vm186_vm2 = vmand %vm182_vm0, %vm552_vm1 }
  0x2f   : >> { %v187_v8 = vsel %vm186_vm2, %v770_v2, %v791_v7  ;;  %v188_v9 = vsel %vm186_vm2, %v179_v6, -inf }
  0x30   : >> { %v189_v10 = vrot.slane %v188_v9, 1  ;;  %v190_v11 = vrot.slane %v187_v8, 1 }
  0x32   : >> { %vm191_vm3 = vcmp.ge.f32.partialorder %v189_v10, %v188_v9  ;;  %v194_v12 = vrot.slane %v189_v10, 1  ;;  %v195_v13 = vrot.slane %v190_v11, 1 }
  0x33   : >> { %v192_v14 = vsel %vm191_vm3, %v189_v10, %v188_v9  ;;  %v193_v15 = vsel %vm191_vm3, %v190_v11, %v187_v8 }
  0x34   : >> { %vm196_vm4 = vcmp.ge.f32.partialorder %v194_v12, %v192_v14  ;;  %v199_v16 = vrot.slane %v194_v12, 1  ;;  %v200_v17 = vrot.slane %v195_v13, 1 }
  0x35   : >> { %v197_v18 = vsel %vm196_vm4, %v194_v12, %v192_v14  ;;  %v198_v19 = vsel %vm196_vm4, %v195_v13, %v193_v15 }
  0x36   : >> { %vm201_vm5 = vcmp.ge.f32.partialorder %v199_v16, %v197_v18  ;;  %v204_v20 = vrot.slane %v199_v16, 1  ;;  %v205_v21 = vrot.slane %v200_v17, 1 }
  0x37   : >> { %v202_v22 = vsel %vm201_vm5, %v199_v16, %v197_v18  ;;  %v203_v23 = vsel %vm201_vm5, %v200_v17, %v198_v19 }
  0x38   : >> { %vm206_vm6 = vcmp.ge.f32.partialorder %v204_v20, %v202_v22  ;;  %v209_v24 = vrot.slane %v204_v20, 1  ;;  %v210_v25 = vrot.slane %v205_v21, 1 }
  0x39   : >> { %v207_v26 = vsel %vm206_vm6, %v204_v20, %v202_v22  ;;  %v208_v27 = vsel %vm206_vm6, %v205_v21, %v203_v23 }
  0x3a   : >> { %vm211_vm7 = vcmp.ge.f32.partialorder %v209_v24, %v207_v26  ;;  %v214_v28 = vrot.slane %v209_v24, 1  ;;  %v215_v29 = vrot.slane %v210_v25, 1 }
  0x3b   : >> { %v212_v30 = vsel %vm211_vm7, %v209_v24, %v207_v26  ;;  %v213_v31 = vsel %vm211_vm7, %v210_v25, %v208_v27 }
  0x3c   : >> { %vm216_vm8 = vcmp.ge.f32.partialorder %v214_v28, %v212_v30  ;;  %v219_v32 = vrot.slane %v214_v28, 1  ;;  %v220_v33 = vrot.slane %v215_v29, 1 }
  0x3d   : >> { %v217_v34 = vsel %vm216_vm8, %v214_v28, %v212_v30  ;;  %v218_v35 = vsel %vm216_vm8, %v215_v29, %v213_v31 }
  0x3e   : >> { %vm221_vm9 = vcmp.ge.f32.partialorder %v219_v32, %v217_v34 }
  0x3f   : >> { %v223_v36 = vsel %vm221_vm9, %v220_v33, %v218_v35 }
  0x40   : >> { %225 = vrot.lane.b32.xlu0 %v223_v36, %s224_s27 }
  0xb2   : >> { %v226_v38 = vpop.permute.xlu0 %225 }
  0xb3   : >> { %561 = vpush %v226_v38 }
  0xe4   : >> { %s562_s29 = spop %561 }
  0xe5   : >> { %v232_v42 = vstv %s562_s29  ;;  %s237_s4 = scalar_lea.vmem %s772_s11, %s562_s29 [#allocation1]  ;;  %s243_s5 = scalar_lea.vmem [#allocation7], %s562_s29 }
  0xe6   : >> { %v239_v43 = vld [vmem:[%s237_s4] ss:$0 sm:$0xff]  ;;  %v234_v45 = vsel %vm231_vm11, %v232_v42, %v233_v39  ;;  %s835_s29 = scalar_lea.hbm (%p170_p11), %s890_s2, %s557_s10 }
  0xe7   : >> { %v245_v44 = vld [vmem:[%s243_s5] ss:$0 sm:$0xff]  ;;  %240 = vst [vmem:[%s237_s4] sm:$0x1] %v238_v40  ;;  %vm248_vm12 = vcmp.ne.f32.partialorder %v239_v43, 0.0  ;;  %235 = vst [vmem:[%s777_s19] sm:$0x1] %v234_v45  ;;  %v255_v52 = vsel %vm254_vm10, %v239_v43, 0.0  ;;  %s348_s19 = scalar_lea.vmem (%p170_p11), %s889_s1, %s556_s8 }
  0xe8   : >> { %246 = vst [vmem:[%s243_s5] sm:$0x1] %v244_v41  ;;  %241 = vst [vmem:[%s236_s28] sm:$0x1] %v239_v43  ;;  %s339_s4 = scalar_lea.sflag (%p170_p11), [#allocation4], %s145_s7 }
  0xe9   : >> { %247 = vst [vmem:[%s242_s30] sm:$0x1] %v245_v44  ;;  %vm249_vm14 = vmand %vm231_vm11, %vm248_vm12  ;;  %s391_s30 = sshll.u32 (%p170_p11), %s147_s20, 4  ;;  %s392_s30 = int_to_ptr.vmem [resolvable:$true] %s391_s30 }
  0xea   : >> { %v250_v46 = vsel %vm249_vm14, %v239_v43, 1.0  ;;  %s613_s5 = scalar_lea.vmem (%p170_p11), %s392_s30, 32  ;;  %p620_p1 = scmp.lt.s32.totalorder (%p170_p11), %s392_s30, %s618_s17 }
  0xeb   : >> { %v263_v47 = vsel %vm262_vm13, %v250_v46, 1.0  ;;  %p614_p12 = scmp.ne.s32.totalorder (%p170_p11), %s392_s30, %s613_s5 }
  0xec   : >> { %611 = vrcp.f32 %v263_v47 }
  0xed   : > { %p615_p13 = pnand (%p170_p11), %p614_p12, %p745_p5 }
  0xee   : > { %v325_v57 = vld [vmem:[#allocation2] sm:$0x3] (%p170_p11) }
  0xef   : >> { %v259_v49 = vld [vmem:[%s772_s11] sm:$0xff]  ;;  %327 = vst [vmem:[%s147_s20] sm:$0x3] (%p170_p11), %v325_v57  ;;  %p616_p0 = pneg (%p170_p11), %p615_p13 }
  0xf0   : > { %v273_v56 = vld [vmem:[#allocation7] sm:$0xff] (%p170_p11) }
  0xf6   : >> { %v612_v48 = vpop.eup %611 }
  0xf7   : >> { %v265_v50 = vmul.f32 %v612_v48, %v259_v49 }
  0xf9   : >> { %v267_v51 = vsel %vm266_vm15, %v265_v50, 0.0 }
  0xfa   : >> { %268 = vadd.xlane.f32.xlu0 %v267_v51 }
 0x127   : > { %289 = vxpose.xlu0.b32.start.end [1/1] (short) (narrow) (%p170_p11), %v273_v56, 8 }
 0x186   : > { %172 = sbr.rel (!%p170_p11) target bundleno = 37 (0x25), region = 210 }
 0x187   : >> { %v269_v53 = vpop.xlane.xlu0 %268 }
 0x188   : >> { %v270_v54 = vmul.f32 %v269_v53, %v255_v52 }
 0x18a   : >> { %v271_v55 = vsub.f32 %v265_v50, %v270_v54 }
 0x18c   : >> { %272 = vst [vmem:[%s772_s11] sm:$0xff] %v271_v55 }
 0x193   : > { %v376_v58 = vld [vmem:[%s772_s11] sm:$0xff]  ;;  %s619_s11 = scalar_lea.vmem %s618_s17, 64 }
 0x194   : > { %377 = vst [vmem:[%s348_s19] sm:$0xff] %v376_v58  ;;  %p621_p2 = scmp.lt.s32.totalorder %s619_s11, %s613_s5 }
 0x196   : > { %p622_p3 = por %p621_p2, %p620_p1 }
 0x198   : > { %p623_p4 = pnand %p622_p3, %p616_p0 }
 0x19a   : > { %626 = shalt.err (!%p623_p4)
}
 0x19b   : > { %s627_s7 = scalar_lea.hbm %s835_s29, 32  ;;  %s631_s6 = scalar_lea.hbm %s890_s2, 32 }
 0x19c   : > { %p628_p8 = scmp.ne.s32.totalorder %s835_s29, %s627_s7  ;;  %p632_p11 = scmp.lt.u32.totalorder %s835_s29, %s890_s2 }
 0x19d   : > { %p633_p12 = scmp.lt.u32.totalorder %s631_s6, %s627_s7  ;;  %p635_p0 = scmp.lt.u32.totalorder %s627_s7, %s835_s29 }
 0x19e   : > { %p629_p9 = pnand %p628_p8, %p745_p5 }
 0x19f   : > { %p634_p13 = por %p633_p12, %p632_p11 }
 0x1a0   : > { %p630_p10 = pneg %p629_p9 }
 0x1a1   : > { %p636_p1 = por %p635_p0, %p634_p13 }
 0x1a3   : > { %p637_p2 = pnand %p636_p1, %p630_p10 }
 0x1a5   : > { %640 = shalt.err (!%p637_p2)
}
 0x1a6   : > { %563 = dma.vmem_to_hbm [thread:$0]  (%p745_p5), %s392_s30, 32, %s835_s29, %s339_s4  }
 0x1a7   : > { %v305_v59 = vpop.trf.xlu0  ;;  %s895_s19 = sshrl.u32 (%p745_p5), %s728_s16, 3 }
 0x1a8   : > { %321 = vst [vmem:[%s782_s22] sm:$0x1] %v305_v59  ;;  %s558_s27 = sshll.u32 (%p745_p5), %s895_s19, 1 }
 0x1a9   : > { %s400_s17 = scalar_lea.vmem (%p745_p5), %s891_s3, %s558_s27 }
 0x1aa   : > { %397 = sbr.rel (!%p745_p5) target bundleno = 441 (0x1b9), region = 104 }
 0x1af   : > { %v331_v60 = vld [vmem:[#allocation5] sm:$0x3] }
 0x1b0   : > { %333 = vst [vmem:[%s153_s21] sm:$0x3] %v331_v60 }
 0x1b7   : > { %v416_v61 = vld [vmem:[%s153_s21] sm:$0x3] }
 0x1b8   : > { %417 = vst [vmem:[%s400_s17] sm:$0x3] %v416_v61 }
 0x1b9 PF: > { %s444_s22 = sand.u32 1, %s667_s12   ;;  %p566_p5 = pnand %p544_p7, %p749_p6 }
 0x1ba   : > { %s445_s24 = scalar_lea.sflag [#allocation4], %s444_s22 }
 0x1bb   : > { %662 = dma.done.wait (!%p566_p5), %s445_s24, 32  }
 0x1bc   : > { %664 = vsyncadd (!%p566_p5), %s445_s24, 4294967264  ;;  %p10_p3 = scmp.ge.s32.totalorder %s732_s18, 4   ;;  %s896_s12 = smov %s671_s13 }
 0x1bd   : > { %s897_s13 = smov %s675_s14  ;;  %s898_s14 = smov %s743_s23 }
 0x1be   : > { %s899_s15 = smov %s732_s18  ;;  %12 = sbr.rel (!%p10_p3) target bundleno = 3 (0x3), region = 221 }
 0x1c5   :  { %457 = vsyncpa [#allocation4], 1 }
 0x1c6   :  { %459 = vsyncpa [#allocation4 + $0x1], 1 }

// kernel: custom-call.12
= control target key start
LH: loop header
LB: loop body
LE: loop exit
PB: predicated region body
PF: predicated region fallthrough
CT: control target
= control target key end

     0   :  { %s385_s6 = smov 0   ;;  %s387_s7 = smov 0   ;;  %s443_s0 = inlined_call_operand.vmem [shape: f32[2,1,8,8], index: 0, kind: input, shape index: {}]   ;;  %s444_s1 = inlined_call_operand.vmem [shape: f32[2,1,8,8], index: 1, kind: output, shape index: {}]  }
   0x1   :  { %s389_s8 = smov 0  }
   0x2 LB: > { %s311_s9 = sadd.s32 4294967295, %s372_s8   ;;  %s33_s10 = sadd.s32 1, %s368_s7  ;;  %s372_s8 = sphi %s389_s8, %s7_s8   ;;  %s368_s7 = sphi %s387_s7, %s446_s7   ;;  %s364_s6 = sphi %s385_s6, %s445_s6  }
   0x3   : > { %p35_p0 = scmp.ge.s32.totalorder %s33_s10, 2  ;;  %p313_p1 = scmp.ge.s32.totalorder %s372_s8, 2 }
   0x4   : > { %s49_s11 = sand.u32 (!%p313_p1), 1, %s372_s8   ;;  %s315_s12 = sshll.u32 (!%p313_p1), %s368_s7, 3 }
   0x5   : > { %s448_s10 = smov (%p35_p0, %s33_s10), 0  ;;  %47 = sbr.rel (%p313_p1) target bundleno = 12 (0xc), region = 16 }
   0x6   : > { %s314_s13 = sshll.u32 (!%p313_p1), %s49_s11, 3  ;;  %s56_s16 = scalar_lea.vmem (!%p313_p1), %s443_s0, %s315_s12 }
   0x7   : > { %v84_v0 = vld [vmem:[%s56_s16] sm:$0xff] (!%p313_p1)  ;;  %s51_s17 = scalar_lea.vmem (!%p313_p1), [#allocation0], %s314_s13 }
   0x8   : > { %85 = vst [vmem:[%s51_s17] sm:$0xff] (!%p313_p1), %v84_v0 }
   0xc PF: > { %p316_p2 = scmp.ge.s32.totalorder %s372_s8, 1  ;;  %p90_p3 = scmp.lt.s32.totalorder %s372_s8, 3 }
   0xe   : > { %p91_p4 = pnand %p316_p2, %p90_p3 }
  0x10   : > { %94 = sbr.rel (%p91_p4) target bundleno = 1213 (0x4bd), region = 54 }
  0x17   : > { %s97_s18 = sand.u32 1, %s311_s9   ;;  %v108_v1 = vlaneseq  ;;  %v374_v10 = vmov -1.0   ;;  %s320_s21 = sshll.u32 %s364_s6, 3 }
  0x18   : > { %s317_s19 = sshll.u32 %s97_s18, 3  ;;  %s219_s24 = scalar_lea.vmem %s444_s1, %s320_s21 }
  0x19   : > { %v412_v2 = vand.u32 127, %v108_v1  ;;  %v112_v3 = vshrl.u32 %v108_v1, 7  ;;  %s99_s20 = scalar_lea.vmem [#allocation0], %s317_s19 }
  0x1a   : > { %v115_v4 = vld [vmem:[%s99_s20] sm:$0xff] }
  0x1b   : > { %vm110_vm0 = vcmp.lt.s32.totalorder %v412_v2, 8  ;;  %vm114_vm1 = vcmp.eq.s32.totalorder %v112_v3, %v412_v2  ;;  %vm119_vm2 = vcmp.ge.s32.totalorder %v112_v3, %v412_v2  ;;  %vm133_vm4 = vcmp.eq.s32.totalorder %v412_v2, 0 }
  0x1c   : > { %v116_v5 = vsel %vm114_vm1, %v115_v4, 0.0  ;;  %vm120_vm3 = vmand %vm119_vm2, %vm110_vm0  ;;  %vm130_vm5 = vcmp.eq.s32.totalorder %v412_v2, %v112_v3  ;;  %v134_v11 = vsel %vm133_vm4, 1.0, %v374_v10  ;;  %vm141_vm6 = vcmp.eq.s32.totalorder %v412_v2, 1 }
  0x1d   : > { %v121_v6 = vsel %vm120_vm3, %v115_v4, 0.0  ;;  %117 = vadd.xlane.f32.xlu0 %v116_v5  ;;  %v135_v12 = vsel %vm130_vm5, %v134_v11, 0.0  ;;  %vm151_vm7 = vcmp.eq.s32.totalorder %v412_v2, 2  ;;  %vm161_vm8 = vcmp.eq.s32.totalorder %v412_v2, 3 }
  0x1e   : > { %vm171_vm9 = vcmp.eq.s32.totalorder %v412_v2, 4  ;;  %vm181_vm10 = vcmp.eq.s32.totalorder %v412_v2, 5  ;;  %vm191_vm11 = vcmp.eq.s32.totalorder %v412_v2, 6  ;;  %vm201_vm12 = vcmp.eq.s32.totalorder %v412_v2, 7 }
  0xaa   : > { %v417_v7 = vpop.xlane.xlu0 %117 }
  0xab   : > { %348 = vrcp.f32 %v417_v7  ;;  %vm208_vm13 = vweird.f32 %v417_v7 }
  0xb5   : > { %v349_v8 = vpop.eup %348 }
  0xb6   : > { %v123_v9 = vmul.f32 %v349_v8, %v121_v6 }
  0xb8   : > { %124 = vst [vmem:[#allocation2] sm:$0xff] %v123_v9 }
  0xbf   : > { %v137_v13 = vld [vmem:[#allocation2 + $0x1] ss:$0 sm:$0xff]  ;;  %v147_v16 = vld [vmem:[#allocation2 + $0x2] ss:$0 sm:$0xff]  ;;  %v157_v21 = vld [vmem:[#allocation2 + $0x3] ss:$0 sm:$0xff] }
  0xc0   : > { %v138_v14 = vxor.u32 2147483648, %v137_v13  ;;  %v148_v18 = vxor.u32 2147483648, %v147_v16  ;;  %v158_v23 = vxor.u32 2147483648, %v157_v21  ;;  %v167_v26 = vld [vmem:[#allocation2 + $0x4] ss:$0 sm:$0xff] }
  0xc1   : > { %v168_v28 = vxor.u32 2147483648, %v167_v26  ;;  %v177_v31 = vld [vmem:[#allocation2 + $0x5] ss:$0 sm:$0xff]  ;;  %v187_v36 = vld [vmem:[#allocation2 + $0x6] ss:$0 sm:$0xff] }
  0xc2   : > { %v142_v15 = vmul.f32 %v138_v14, %v135_v12  ;;  %v178_v33 = vxor.u32 2147483648, %v177_v31  ;;  %v188_v38 = vxor.u32 2147483648, %v187_v36  ;;  %v197_v41 = vld [vmem:[#allocation2 + $0x7] ss:$0 sm:$0xff] }
  0xc3   : > { %v198_v43 = vxor.u32 2147483648, %v197_v41 }
  0xc4   : > { %143 = vadd.xlane.f32.xlu0 %v142_v15 }
 0x151   : > { %v144_v17 = vpop.xlane.xlu0 %143 }
 0x152   : > { %v145_v19 = vsel %vm141_vm6, %v144_v17, %v135_v12 }
 0x153   : > { %v152_v20 = vmul.f32 %v148_v18, %v145_v19 }
 0x155   : > { %153 = vadd.xlane.f32.xlu1 %v152_v20 }
 0x1e2   : > { %v154_v22 = vpop.xlane.xlu1 %153 }
 0x1e3   : > { %v155_v24 = vsel %vm151_vm7, %v154_v22, %v145_v19 }
 0x1e4   : > { %v162_v25 = vmul.f32 %v158_v23, %v155_v24 }
 0x1e6   : > { %163 = vadd.xlane.f32.xlu1 %v162_v25 }
 0x273   : > { %v164_v27 = vpop.xlane.xlu1 %163 }
 0x274   : > { %v165_v29 = vsel %vm161_vm8, %v164_v27, %v155_v24 }
 0x275   : > { %v172_v30 = vmul.f32 %v168_v28, %v165_v29 }
 0x277   : > { %173 = vadd.xlane.f32.xlu0 %v172_v30 }
 0x304   : > { %v174_v32 = vpop.xlane.xlu0 %173 }
 0x305   : > { %v175_v34 = vsel %vm171_vm9, %v174_v32, %v165_v29 }
 0x306   : > { %v182_v35 = vmul.f32 %v178_v33, %v175_v34 }
 0x308   : > { %183 = vadd.xlane.f32.xlu1 %v182_v35 }
 0x395   : > { %v184_v37 = vpop.xlane.xlu1 %183 }
 0x396   : > { %v185_v39 = vsel %vm181_vm10, %v184_v37, %v175_v34 }
 0x397   : > { %v192_v40 = vmul.f32 %v188_v38, %v185_v39 }
 0x399   : > { %193 = vadd.xlane.f32.xlu0 %v192_v40 }
 0x426   : > { %v194_v42 = vpop.xlane.xlu0 %193 }
 0x427   : > { %v195_v44 = vsel %vm191_vm11, %v194_v42, %v185_v39 }
 0x428   : > { %v202_v45 = vmul.f32 %v198_v43, %v195_v44 }
 0x42a   : > { %203 = vadd.xlane.f32.xlu1 %v202_v45 }
 0x4b7   : > { %v204_v46 = vpop.xlane.xlu1 %203 }
 0x4b8   : > { %v205_v47 = vsel %vm201_vm12, %v204_v46, %v195_v44 }
 0x4b9   : > { %v207_v48 = vmul.f32 %v349_v8, %v205_v47 }
 0x4bb   : > { %v209_v49 = vsel %vm208_vm13, %v205_v47, %v207_v48 }
 0x4bc   : > { %248 = vst [vmem:[%s219_s24] sm:$0xff] %v209_v49 }
 0x4bd PF: > { %s7_s8 = sadd.s32 1, %s372_s8   ;;  %s445_s6 = smov %s368_s7 }
 0x4be   : > { %p4_p5 = scmp.ge.s32.totalorder %s7_s8, 4   ;;  %s446_s7 = smov %s448_s10 }
 0x4c0   :  { %6 = sbr.rel (!%p4_p5) target bundleno = 2 (0x2), region = 125 }

// kernel: custom-call.11
= control target key start
LH: loop header
LB: loop body
LE: loop exit
PB: predicated region body
PF: predicated region fallthrough
CT: control target
= control target key end

     0   :  { %s384_s6 = smov 0   ;;  %s386_s7 = smov 0   ;;  %s442_s0 = inlined_call_operand.vmem [shape: f32[2,1,8,8], index: 0, kind: input, shape index: {}]   ;;  %s443_s1 = inlined_call_operand.vmem [shape: f32[2,1,8,8], index: 1, kind: output, shape index: {}]  }
   0x1   :  { %s388_s8 = smov 0  }
   0x2 LB: > { %s310_s9 = sadd.s32 4294967295, %s371_s8   ;;  %s33_s10 = sadd.s32 1, %s367_s7  ;;  %s371_s8 = sphi %s388_s8, %s7_s8   ;;  %s367_s7 = sphi %s386_s7, %s445_s7   ;;  %s363_s6 = sphi %s384_s6, %s444_s6  }
   0x3   : > { %p35_p0 = scmp.ge.s32.totalorder %s33_s10, 2  ;;  %p312_p1 = scmp.ge.s32.totalorder %s371_s8, 2 }
   0x4   : > { %s49_s11 = sand.u32 (!%p312_p1), 1, %s371_s8   ;;  %s314_s12 = sshll.u32 (!%p312_p1), %s367_s7, 3 }
   0x5   : > { %s447_s10 = smov (%p35_p0, %s33_s10), 0  ;;  %47 = sbr.rel (%p312_p1) target bundleno = 12 (0xc), region = 16 }
   0x6   : > { %s313_s13 = sshll.u32 (!%p312_p1), %s49_s11, 3  ;;  %s56_s16 = scalar_lea.vmem (!%p312_p1), %s442_s0, %s314_s12 }
   0x7   : > { %v84_v0 = vld [vmem:[%s56_s16] sm:$0xff] (!%p312_p1)  ;;  %s51_s17 = scalar_lea.vmem (!%p312_p1), [#allocation0], %s313_s13 }
   0x8   : > { %85 = vst [vmem:[%s51_s17] sm:$0xff] (!%p312_p1), %v84_v0 }
   0xc PF: > { %p315_p2 = scmp.ge.s32.totalorder %s371_s8, 1  ;;  %p90_p3 = scmp.lt.s32.totalorder %s371_s8, 3 }
   0xe   : > { %p91_p4 = pnand %p315_p2, %p90_p3 }
  0x10   : > { %94 = sbr.rel (%p91_p4) target bundleno = 1213 (0x4bd), region = 54 }
  0x17   : > { %s97_s18 = sand.u32 1, %s310_s9   ;;  %v108_v1 = vlaneseq  ;;  %v373_v10 = vmov -1.0   ;;  %s319_s21 = sshll.u32 %s363_s6, 3 }
  0x18   : > { %s316_s19 = sshll.u32 %s97_s18, 3  ;;  %s218_s24 = scalar_lea.vmem %s443_s1, %s319_s21 }
  0x19   : > { %v411_v2 = vand.u32 127, %v108_v1  ;;  %v112_v3 = vshrl.u32 %v108_v1, 7  ;;  %s99_s20 = scalar_lea.vmem [#allocation0], %s316_s19 }
  0x1a   : > { %v115_v4 = vld [vmem:[%s99_s20] sm:$0xff] }
  0x1b   : > { %vm110_vm0 = vcmp.lt.s32.totalorder %v411_v2, 8  ;;  %vm114_vm1 = vcmp.eq.s32.totalorder %v112_v3, %v411_v2  ;;  %vm119_vm2 = vcmp.le.s32.totalorder %v112_v3, %v411_v2  ;;  %vm133_vm4 = vcmp.eq.s32.totalorder %v411_v2, 7 }
  0x1c   : > { %v116_v5 = vsel %vm114_vm1, %v115_v4, 0.0  ;;  %vm120_vm3 = vmand %vm119_vm2, %vm110_vm0  ;;  %vm130_vm5 = vcmp.eq.s32.totalorder %v411_v2, %v112_v3  ;;  %v134_v11 = vsel %vm133_vm4, 1.0, %v373_v10  ;;  %vm141_vm6 = vcmp.eq.s32.totalorder %v411_v2, 6 }
  0x1d   : > { %v121_v6 = vsel %vm120_vm3, %v115_v4, 0.0  ;;  %117 = vadd.xlane.f32.xlu0 %v116_v5  ;;  %v135_v12 = vsel %vm130_vm5, %v134_v11, 0.0  ;;  %vm151_vm7 = vcmp.eq.s32.totalorder %v411_v2, 5  ;;  %vm161_vm8 = vcmp.eq.s32.totalorder %v411_v2, 4 }
  0x1e   : > { %vm171_vm9 = vcmp.eq.s32.totalorder %v411_v2, 3  ;;  %vm181_vm10 = vcmp.eq.s32.totalorder %v411_v2, 2  ;;  %vm191_vm11 = vcmp.eq.s32.totalorder %v411_v2, 1  ;;  %vm200_vm12 = vcmp.eq.s32.totalorder %v411_v2, 0 }
  0xaa   : > { %v416_v7 = vpop.xlane.xlu0 %117 }
  0xab   : > { %347 = vrcp.f32 %v416_v7  ;;  %vm207_vm13 = vweird.f32 %v416_v7 }
  0xb5   : > { %v348_v8 = vpop.eup %347 }
  0xb6   : > { %v123_v9 = vmul.f32 %v348_v8, %v121_v6 }
  0xb8   : > { %124 = vst [vmem:[#allocation2] sm:$0xff] %v123_v9 }
  0xbf   : > { %v137_v13 = vld [vmem:[#allocation2 + $0x6] ss:$0 sm:$0xff]  ;;  %v147_v16 = vld [vmem:[#allocation2 + $0x5] ss:$0 sm:$0xff]  ;;  %v157_v21 = vld [vmem:[#allocation2 + $0x4] ss:$0 sm:$0xff] }
  0xc0   : > { %v138_v14 = vxor.u32 2147483648, %v137_v13  ;;  %v148_v18 = vxor.u32 2147483648, %v147_v16  ;;  %v158_v23 = vxor.u32 2147483648, %v157_v21  ;;  %v167_v26 = vld [vmem:[#allocation2 + $0x3] ss:$0 sm:$0xff] }
  0xc1   : > { %v168_v28 = vxor.u32 2147483648, %v167_v26  ;;  %v177_v31 = vld [vmem:[#allocation2 + $0x2] ss:$0 sm:$0xff]  ;;  %v187_v36 = vld [vmem:[#allocation2 + $0x1] ss:$0 sm:$0xff] }
  0xc2   : > { %v142_v15 = vmul.f32 %v138_v14, %v135_v12  ;;  %v178_v33 = vxor.u32 2147483648, %v177_v31  ;;  %v188_v38 = vxor.u32 2147483648, %v187_v36  ;;  %v196_v41 = vld [vmem:[#allocation2] ss:$0 sm:$0xff] }
  0xc3   : > { %v197_v43 = vxor.u32 2147483648, %v196_v41 }
  0xc4   : > { %143 = vadd.xlane.f32.xlu0 %v142_v15 }
 0x151   : > { %v144_v17 = vpop.xlane.xlu0 %143 }
 0x152   : > { %v145_v19 = vsel %vm141_vm6, %v144_v17, %v135_v12 }
 0x153   : > { %v152_v20 = vmul.f32 %v148_v18, %v145_v19 }
 0x155   : > { %153 = vadd.xlane.f32.xlu1 %v152_v20 }
 0x1e2   : > { %v154_v22 = vpop.xlane.xlu1 %153 }
 0x1e3   : > { %v155_v24 = vsel %vm151_vm7, %v154_v22, %v145_v19 }
 0x1e4   : > { %v162_v25 = vmul.f32 %v158_v23, %v155_v24 }
 0x1e6   : > { %163 = vadd.xlane.f32.xlu1 %v162_v25 }
 0x273   : > { %v164_v27 = vpop.xlane.xlu1 %163 }
 0x274   : > { %v165_v29 = vsel %vm161_vm8, %v164_v27, %v155_v24 }
 0x275   : > { %v172_v30 = vmul.f32 %v168_v28, %v165_v29 }
 0x277   : > { %173 = vadd.xlane.f32.xlu0 %v172_v30 }
 0x304   : > { %v174_v32 = vpop.xlane.xlu0 %173 }
 0x305   : > { %v175_v34 = vsel %vm171_vm9, %v174_v32, %v165_v29 }
 0x306   : > { %v182_v35 = vmul.f32 %v178_v33, %v175_v34 }
 0x308   : > { %183 = vadd.xlane.f32.xlu1 %v182_v35 }
 0x395   : > { %v184_v37 = vpop.xlane.xlu1 %183 }
 0x396   : > { %v185_v39 = vsel %vm181_vm10, %v184_v37, %v175_v34 }
 0x397   : > { %v192_v40 = vmul.f32 %v188_v38, %v185_v39 }
 0x399   : > { %193 = vadd.xlane.f32.xlu0 %v192_v40 }
 0x426   : > { %v194_v42 = vpop.xlane.xlu0 %193 }
 0x427   : > { %v195_v44 = vsel %vm191_vm11, %v194_v42, %v185_v39 }
 0x428   : > { %v201_v45 = vmul.f32 %v197_v43, %v195_v44 }
 0x42a   : > { %202 = vadd.xlane.f32.xlu1 %v201_v45 }
 0x4b7   : > { %v203_v46 = vpop.xlane.xlu1 %202 }
 0x4b8   : > { %v204_v47 = vsel %vm200_vm12, %v203_v46, %v195_v44 }
 0x4b9   : > { %v206_v48 = vmul.f32 %v348_v8, %v204_v47 }
 0x4bb   : > { %v208_v49 = vsel %vm207_vm13, %v204_v47, %v206_v48 }
 0x4bc   : > { %247 = vst [vmem:[%s218_s24] sm:$0xff] %v208_v49 }
 0x4bd PF: > { %s7_s8 = sadd.s32 1, %s371_s8   ;;  %s444_s6 = smov %s367_s7 }
 0x4be   : > { %p4_p5 = scmp.ge.s32.totalorder %s7_s8, 4   ;;  %s445_s7 = smov %s447_s10 }
 0x4c0   :  { %6 = sbr.rel (!%p4_p5) target bundleno = 2 (0x2), region = 124 }

// kernel: mul.16
= control target key start
LH: loop header
LB: loop body
LE: loop exit
PB: predicated region body
PF: predicated region fallthrough
CT: control target
= control target key end

     0   :  { %s34_s0 = inlined_call_operand.vmem [shape: f32[2,2], index: 0, kind: input, shape index: {}]   ;;  %s35_s1 = inlined_call_operand.vmem [shape: f32[2,2], index: 1, kind: input, shape index: {}]   ;;  %s36_s2 = inlined_call_operand.vmem [shape: f32[2,2], index: 2, kind: output, shape index: {}]  }
   0x1   :  { %v3_v0 = vld [vmem:[%s34_s0] sm:$0x3] }
   0x2   :  { %v4_v1 = vld [vmem:[%s35_s1] sm:$0x3] }
   0x3   :  { %v7_v2 = vmul.f32 %v4_v1, %v3_v0 }
   0x5   :  { %9 = vst [vmem:[%s36_s2] sm:$0x3] %v7_v2 }

// kernel: neg.5
= control target key start
LH: loop header
LB: loop body
LE: loop exit
PB: predicated region body
PF: predicated region fallthrough
CT: control target
= control target key end

     0   :  { %s72_s0 = inlined_call_operand.vmem [shape: f32[2,12,8], index: 0, kind: input, shape index: {}]   ;;  %s73_s1 = inlined_call_operand.vmem [shape: f32[2,12,8], index: 1, kind: output, shape index: {}]  }
   0x1   :  { %v2_v0 = vld [vmem:[%s72_s0] sm:$0xff]  ;;  %v32_v1 = vld [vmem:[%s72_s0 + $0x10] sm:$0xff]  ;;  %v34_v2 = vld [vmem:[%s72_s0 + $0x8] sm:$0xff] }
   0x2   :  { %v5_v3 = vxor.u32 2147483648, %v2_v0  ;;  %v12_v4 = vxor.u32 2147483648, %v32_v1  ;;  %v20_v5 = vxor.u32 2147483648, %v34_v2  ;;  %v36_v6 = vld [vmem:[%s72_s0 + $0x18] sm:$0xff] }
   0x3   :  { %v28_v7 = vxor.u32 2147483648, %v36_v6 }
   0x4   :  { %7 = vst [vmem:[%s73_s1] sm:$0xff] %v5_v3  ;;  %33 = vst [vmem:[%s73_s1 + $0x10] sm:$0xff] %v12_v4 }
   0x5   :  { %35 = vst [vmem:[%s73_s1 + $0x8] sm:$0xff] %v20_v5  ;;  %37 = vst [vmem:[%s73_s1 + $0x18] sm:$0xff] %v28_v7 }

// kernel: _lambda_.3
= control target key start
LH: loop header
LB: loop body
LE: loop exit
PB: predicated region body
PF: predicated region fallthrough
CT: control target
= control target key end

     0   :  { %s5572_s27 = smov 0   ;;  %s6086_s0 = inlined_call_operand.vmem [shape: f32[2,2,4,8], index: 0, kind: input, shape index: {}]   ;;  %s6087_s1 = inlined_call_operand.vmem [shape: f32[2,2,8,4], index: 1, kind: input, shape index: {}]   ;;  %s6088_s2 = inlined_call_operand.vmem [shape: f32[2,2,12,8], index: 2, kind: input, shape index: {}]   ;;  %s6089_s3 = inlined_call_operand.vmem [shape: f32[2,2,8,8], index: 3, kind: input, shape index: {}]   ;;  %s6090_s4 = inlined_call_operand.vmem [shape: f32[2,2,2,4], index: 4, kind: input, shape index: {}]   ;;  %s6091_s5 = inlined_call_operand.vmem [shape: f32[2,14,1], index: 5, kind: output, shape index: {0}]   ;;  %s6092_s6 = inlined_call_operand.vmem [shape: f32[2,2,2,4], index: 6, kind: output, shape index: {1}]   ;;  %s6093_s7 = inlined_call_operand.vmem [shape: f32[2,2,4,2], index: 7, kind: output, shape index: {2}]   ;;  %s6094_s8 = inlined_call_operand.vmem [shape: f32[2,2,4,4], index: 8, kind: output, shape index: {3}]  }
   0x1 LB: > { %s4917_s28 = sadd.s32 4294967295, %s5521_s27   ;;  %p4921_p0 = scmp.ge.s32.totalorder %s5521_s27, 1  ;;  %s5521_s27 = sphi %s5572_s27, %s19_s27  }
   0x2   : > { %p309_p1 = scmp.lt.s32.totalorder %s5521_s27, 3 }
   0x4   : > { %p310_p2 = pnand %p4921_p0, %p309_p1 }
   0x5   : > { %p378_p3 = scmp.lt.s32.totalorder (!%p310_p2), %s4917_s28, 1  ;;  %v5523_v0 = vmov (!%p310_p2), 0.0   ;;  %vm5524_vm0 = vmmov (!%p310_p2), 0   ;;  %vm432_vm1 = vcmask (!%p310_p2), 64512   ;;  %vm1069_vm2 = vcmask (!%p310_p2), 1043456  }
   0x6   : > { %313 = sbr.rel (%p310_p2) target bundleno = 2008 (0x7d8), region = 40  ;;  %5166 = vmatprep.subr.mxu1 (!%p310_p2), %v5523_v0  ;;  %5176 = vmatprep.subr.mxu0 (!%p310_p2), %v5523_v0  ;;  %vm1065_vm3 = vcmask (!%p310_p2), 31744   ;;  %vm769_vm4 = vcmask (!%p310_p2), 25600   ;;  %vm723_vm6 = vcmask (!%p310_p2), 27648   ;;  %vm3977_vm7 = vcmask (!%p310_p2), 24576  }
   0x7   : > { %5168 = vmatprep.mubr.msk.f32.mxu1 (!%p310_p2), %vm5524_vm0, %v5523_v0  ;;  %5178 = vmatprep.mubr.msk.f32.mxu0 (!%p310_p2), %vm5524_vm0, %v5523_v0  ;;  %vm3984_vm8 = vcmask (!%p310_p2), 0   ;;  %vm760_vm13 = vcmask (!%p310_p2), 3072  }
   0xd   : > { %s6096_s28 = smov (!%p378_p3, %s4917_s28), 1 }
   0xe   : > { %s5589_s29 = sshll.u32 %s6096_s28, 4  ;;  %s5592_s30 = sshll.u32 %s6096_s28, 3 }
   0xf   : > { %s387_s11 = scalar_lea.vmem %s6087_s1, %s5589_s29  ;;  %s382_s14 = scalar_lea.vmem %s6086_s0, %s5592_s30 }
  0x10   : > { %v5602_v1 = vld [vmem:[%s387_s11] sm:$0xff]  ;;  %v5606_v4 = vld [vmem:[%s387_s11 + $0x8] sm:$0xff]  ;;  %s5047_s15 = sshll.u32 %s6096_s28, 5  ;;  %s5049_s19 = sshll.u32 %s6096_s28, 2 }
  0x11   : > { %v423_v2 = vld [vmem:[%s382_s14] sm:$0xf]  ;;  %v4940_v3 = vld [vmem:[%s382_s14 + $0x4] sm:$0xf]  ;;  %5167 = vmatpush3.msra.mxu1 %v5602_v1  ;;  %5177 = vmatpush3.msra.mxu0 %v5602_v1  ;;  %s5619_s18 = scalar_lea.vmem %s6088_s2, %s5047_s15  ;;  %s402_s22 = scalar_lea.vmem %s6090_s4, %s5049_s19 }
  0x12   : > { %5169 = vmatmul.mubr.msk.f32.vlgmr.msra.gmra.mrb[0].mxu1 %vm432_vm1, %v423_v2  ;;  %5179 = vmatmul.mubr.msk.f32.vlgmr.msra.gmra.mrb[0].mxu0 %vm432_vm1, %v4940_v3  ;;  %v775_v5 = vld [vmem:[%s5619_s18] sm:$0xf]  ;;  %v4949_v6 = vld [vmem:[%s5619_s18 + $0x10] sm:$0xf]  ;;  %v1654_v26 = vld [vmem:[%s5619_s18 + $0x4] sm:$0xf]  ;;  %s5855_s25 = scalar_lea.vmem %s6089_s3, %s5589_s29  ;;  %s422_s10 = scalar_lea.vmem %s6094_s8, %s5592_s30 }
  0x13   : > { %5171 = vmatprep.subr.mxu1 %v5523_v0  ;;  %5173 = vmatprep.mubr.msk.f32.mxu1 %vm5524_vm0, %v5523_v0  ;;  %v5670_v22 = vld [vmem:[%s402_s22 + $0x2] sm:$0x3]  ;;  %v5672_v23 = vld [vmem:[%s402_s22] sm:$0x3]  ;;  %v4970_v27 = vld [vmem:[%s5619_s18 + $0x14] sm:$0xf]  ;;  %s6011_s13 = scalar_lea.vmem %s6091_s5, %s5589_s29  ;;  %s412_s15 = scalar_lea.vmem %s6092_s6, %s5049_s19 }
  0x14   : > { %5172 = vmatpush3.msra.mxu1 %v5606_v4  ;;  %5181 = vmatprep.subr.mxu0 %v5523_v0  ;;  %v766_v28 = vmul.f32 %v5672_v23, %v5672_v23  ;;  %v767_v29 = vmul.f32 %v5670_v22, %v5670_v22  ;;  %v2524_v55 = vld [vmem:[%s5619_s18 + $0x8] sm:$0xf]  ;;  %v4991_v56 = vld [vmem:[%s5619_s18 + $0x18] sm:$0xf]  ;;  %s5526_s28 = smov 1   ;;  %s417_s18 = scalar_lea.vmem %s6093_s7, %s5592_s30 }
  0x15   : > { %5182 = vmatpush3.msra.mxu0 %v5606_v4  ;;  %5186 = vmatprep.subr.mxu1 %v5523_v0 }
  0x16   : > { %5174 = vmatmul.mubr.msk.f32.vlgmr.msra.gmra.mrb[2].mxu1 %vm432_vm1, %v4940_v3  ;;  %5183 = vmatprep.mubr.msk.f32.mxu0 %vm5524_vm0, %v5523_v0  ;;  %v768_v30 = vadd.f32 %v767_v29, %v766_v28 }
  0x17   : > { %5187 = vmatpush3.msra.mxu1 %v5602_v1  ;;  %5188 = vmatprep.mubr.msk.f32.mxu1 %vm5524_vm0, %v5523_v0 }
  0x18   : > { %5191 = vmatprep.subr.mxu1 %v5523_v0  ;;  %5196 = vmatprep.subr.mxu0 %v5523_v0  ;;  %v770_v31 = vsel %vm769_vm4, %v768_v30, 0.0  ;;  %v728_v30 = vlaneseq }
  0x19   : > { %771 = vadd.xlane.f32.xlu0 %v770_v31 }
  0x1a   : > { %5184 = vmatmul.mubr.msk.f32.vlgmr.msra.gmra.mrb[0].mxu0 %vm432_vm1, %v423_v2  ;;  %5189 = vmatmul.mubr.msk.f32.vlgmr.msra.gmra.mrb[4].mxu1 %vm432_vm1, %v775_v5 }
  0x1b   : > { %5192 = vmatpush3.msra.mxu1 %v5606_v4  ;;  %5193 = vmatprep.mubr.msk.f32.mxu1 %vm5524_vm0, %v5523_v0 }
  0x1c   : > { %5197 = vmatpush3.msra.mxu0 %v5602_v1  ;;  %5198 = vmatprep.mubr.msk.f32.mxu0 %vm5524_vm0, %v5523_v0 }
  0x1d   : > { %5201 = vmatprep.subr.mxu0 %v5523_v0  ;;  %5206 = vmatprep.subr.mxu1 %v5523_v0 }
  0x1e   : > { %5194 = vmatmul.mubr.msk.f32.vlgmr.msra.gmra.mrb[6].mxu1 %vm432_vm1, %v4949_v6  ;;  %5199 = vmatmul.mubr.msk.f32.vlgmr.msra.gmra.mrb[2].mxu0 %vm432_vm1, %v4949_v6 }
  0x1f   : > { %5202 = vmatpush3.msra.mxu0 %v5606_v4  ;;  %5203 = vmatprep.mubr.msk.f32.mxu0 %vm5524_vm0, %v5523_v0 }
  0x20   : > { %5216 = vmatprep.subr.mxu0 %v5523_v0  ;;  %5208 = vmatprep.mubr.msk.f32.mxu1 %vm5524_vm0, %v5523_v0 }
  0x26   : > { %5204 = vmatmul.mubr.msk.f32.vlgmr.msra.gmra.mrb[2].mxu0 %vm432_vm1, %v775_v5 }
  0x27   : > { %5218 = vmatprep.mubr.msk.f32.mxu0 %vm5524_vm0, %v5523_v0 }
  0xe5   : > { %v502_v7 = vpop.f32.mrb[0].mxu1 }
  0xe6   : > { %v5170_v8 = vpop.f32.mrb[1].mxu1 }
  0xe9   : > { %v575_v9 = vpop.f32.mrb[2].mxu1 }
  0xea   : > { %v5654_v10 = vsub.f32 %v502_v7, %v575_v9  ;;  %v5175_v11 = vpop.f32.mrb[3].mxu1 }
  0xec   : > { %v720_v14 = vmul.f32 %v5654_v10, %v5654_v10 }
  0xed   : > { %v5657_v12 = vpop.f32.mrb[0].mxu0  ;;  %v847_v13 = vpop.f32.mrb[4].mxu1 }
  0xee   : > { %v721_v15 = vmul.f32 %v5657_v12, %v5657_v12  ;;  %v5185_v16 = vpop.f32.mrb[1].mxu0  ;;  %v5190_v17 = vpop.f32.mrb[5].mxu1 }
  0xf0   : > { %v5668_v18 = vadd.f32 %v721_v15, %v720_v14 }
  0xf1   : > { %v920_v19 = vpop.f32.mrb[6].mxu1 }
  0xf2   : > { %v994_v20 = vsub.f32 %v847_v13, %v920_v19  ;;  %v5195_v21 = vpop.f32.mrb[7].mxu1 }
  0xf4   : > { %5207 = vmatpush3.msk.msra.mxu1 %vm1069_vm2, %v994_v20  ;;  %5217 = vmatpush3.msk.msra.mxu0 %vm1069_vm2, %v994_v20 }
  0xf5   : > { %5219 = vmatmul.mubr.msk.f32.vlgmr.msra.gmra.mrb[4].mxu0 %vm1065_vm3, %v5670_v22  ;;  %5209 = vmatmul.mubr.msk.f32.vlgmr.msra.gmra.mrb[8].mxu1 %vm1065_vm3, %v5672_v23 }
  0xf6   : > { %5211 = vmatprep.subr.mxu1 %v5523_v0  ;;  %5221 = vmatprep.subr.mxu0 %v5523_v0 }
  0xf7   : > { %5213 = vmatprep.mubr.msk.f32.mxu1 %vm5524_vm0, %v5523_v0  ;;  %5223 = vmatprep.mubr.msk.f32.mxu0 %vm5524_vm0, %v5523_v0 }
  0xf9   : > { %v1061_v24 = vpop.f32.mrb[2].mxu0 }
  0xfa   : > { %v5205_v25 = vpop.f32.mrb[3].mxu0  ;;  %5212 = vmatpush3.msk.msra.mxu1 %vm1069_vm2, %v1061_v24  ;;  %5222 = vmatpush3.msk.msra.mxu0 %vm1069_vm2, %v1061_v24 }
  0xfb   : > { %5214 = vmatmul.mubr.msk.f32.vlgmr.msra.gmra.mrb[10].mxu1 %vm1065_vm3, %v5670_v22  ;;  %5226 = vmatprep.subr.mxu1 %v5523_v0  ;;  %v3397_v25 = vld [vmem:[%s5855_s25] sm:$0xf] }
  0xfc   : > { %5236 = vmatprep.subr.mxu0 %v5523_v0  ;;  %5228 = vmatprep.mubr.msk.f32.mxu1 %vm5524_vm0, %v5523_v0 }
  0xfd   : > { %5224 = vmatmul.mubr.msk.f32.vlgmr.msra.gmra.mrb[4].mxu0 %vm1065_vm3, %v5672_v23 }
  0xfe   : > { %5238 = vmatprep.mubr.msk.f32.mxu0 %vm5524_vm0, %v5523_v0 }
 0x101   : > { %5227 = vmatpush3.xpose.msk.msra.mxu1 %vm1065_vm3, %v1061_v24  ;;  %5237 = vmatpush3.xpose.msk.msra.mxu0 %vm1065_vm3, %v994_v20 }
 0x102   : > { %5231 = vmatprep.subr.mxu1 %v5523_v0  ;;  %5246 = vmatprep.subr.mxu0 %v5523_v0 }
 0x104   : > { %5229 = vmatmul.mubr.msk.f32.vlgmr.msra.gmra.mrb[12].mxu1 %vm1065_vm3, %v1061_v24  ;;  %5239 = vmatmul.mubr.msk.f32.vlgmr.msra.gmra.mrb[6].mxu0 %vm1065_vm3, %v1061_v24 }
 0x105   : > { %5232 = vmatpush3.xpose.msk.msra.mxu1 %vm1065_vm3, %v1061_v24  ;;  %5233 = vmatprep.mubr.msk.f32.mxu1 %vm5524_vm0, %v5523_v0 }
 0x106   : > { %5247 = vmatpush3.msra.mxu0 %v5602_v1  ;;  %5248 = vmatprep.mubr.msk.f32.mxu0 %vm5524_vm0, %v5523_v0 }
 0x107   : > { %5241 = vmatprep.subr.mxu1 %v5523_v0  ;;  %5256 = vmatprep.subr.mxu0 %v5523_v0 }
 0x108   : > { %5234 = vmatmul.mubr.msk.f32.vlgmr.msra.gmra.mrb[14].mxu1 %vm1065_vm3, %v994_v20  ;;  %5249 = vmatmul.mubr.msk.f32.vlgmr.msra.gmra.mrb[8].mxu0 %vm432_vm1, %v1654_v26 }
 0x109   : > { %5242 = vmatpush3.xpose.msk.msra.mxu1 %vm1065_vm3, %v994_v20  ;;  %5243 = vmatprep.mubr.msk.f32.mxu1 %vm5524_vm0, %v5523_v0 }
 0x10a   : > { %5257 = vmatpush3.msra.mxu0 %v5602_v1  ;;  %5258 = vmatprep.mubr.msk.f32.mxu0 %vm5524_vm0, %v5523_v0 }
 0x10b   : > { %5251 = vmatprep.subr.mxu1 %v5523_v0  ;;  %5261 = vmatprep.subr.mxu0 %v5523_v0 }
 0x10c   : > { %5244 = vmatmul.mubr.msk.f32.vlgmr.msra.gmra.mrb[12].mxu1 %vm1065_vm3, %v994_v20  ;;  %5259 = vmatmul.mubr.msk.f32.vlgmr.msra.gmra.mrb[10].mxu0 %vm432_vm1, %v4970_v27 }
 0x10d   : > { %5252 = vmatpush3.msra.mxu1 %v5606_v4  ;;  %5253 = vmatprep.mubr.msk.f32.mxu1 %vm5524_vm0, %v5523_v0 }
 0x10e   : > { %5262 = vmatpush3.msra.mxu0 %v5606_v4  ;;  %5263 = vmatprep.mubr.msk.f32.mxu0 %vm5524_vm0, %v5523_v0 }
 0x10f   : > { %5266 = vmatprep.subr.mxu1 %v5523_v0  ;;  %5276 = vmatprep.subr.mxu0 %v5523_v0 }
 0x110   : > { %5254 = vmatmul.mubr.msk.f32.vlgmr.msra.gmra.mrb[16].mxu1 %vm432_vm1, %v4970_v27 }
 0x111   : > { %5268 = vmatprep.mubr.msk.f32.mxu1 %vm5524_vm0, %v5523_v0 }
 0x114   : > { %5264 = vmatmul.mubr.msk.f32.vlgmr.msra.gmra.mrb[10].mxu0 %vm432_vm1, %v1654_v26  ;;  %v5013_v26 = vld [vmem:[%s5855_s25 + $0x8] sm:$0xf] }
 0x115   : > { %5278 = vmatprep.mubr.msk.f32.mxu0 %vm5524_vm0, %v5523_v0 }
 0x1c8   : > { %v1139_v32 = vpop.f32.mrb[8].mxu1 }
 0x1c9   : > { %v5210_v33 = vpop.f32.mrb[9].mxu1 }
 0x1ce   : > { %v1215_v34 = vpop.f32.mrb[10].mxu1 }
 0x1cf   : > { %v1289_v35 = vsub.f32 %v1139_v32, %v1215_v34  ;;  %v5215_v36 = vpop.f32.mrb[11].mxu1  ;;  %v5896_v34 = vshrl.u32 %v728_v30, 7 }
 0x1d0   : > { %v1356_v37 = vpop.f32.mrb[4].mxu0 }
 0x1d1   : > { %v1360_v38 = vmul.f32 %v1289_v35, %v1289_v35  ;;  %v1361_v39 = vmul.f32 %v1356_v37, %v1356_v37  ;;  %v5225_v40 = vpop.f32.mrb[5].mxu0  ;;  %v731_v35 = vand.u32 127, %v728_v30 }
 0x1d3   : > { %v1362_v41 = vadd.f32 %v1361_v39, %v1360_v38  ;;  %vm732_vm5 = vcmp.eq.s32.totalorder %v5896_v34, %v731_v35 }
 0x1d5   : > { %v1363_v42 = vsel %vm769_vm4, %v1362_v41, 0.0 }
 0x1d6   : > { %1364 = vadd.xlane.f32.xlu0 %v1363_v42 }
 0x1d7   : > { %v5746_v43 = vpop.f32.mrb[6].mxu0 }
 0x1d8   : > { %v5240_v44 = vpop.f32.mrb[7].mxu0 }
 0x1db   : > { %v5748_v45 = vpop.f32.mrb[14].mxu1  ;;  %v1725_v46 = vpop.f32.mrb[8].mxu0 }
 0x1dc   : > { %v1651_v47 = vsub.f32 %v5746_v43, %v5748_v45  ;;  %v5235_v48 = vpop.f32.mrb[15].mxu1  ;;  %v5250_v49 = vpop.f32.mrb[9].mxu0  ;;  %v5901_v43 = vsel %vm732_vm5, 1.0, %v5523_v0 }
 0x1dd   : > { %v774_v48 = vmul.f32 0.4, %v5901_v43 }
 0x1e3   : > { %v1798_v50 = vpop.f32.mrb[16].mxu1 }
 0x1e4   : > { %v1872_v51 = vsub.f32 %v1725_v46, %v1798_v50  ;;  %v5255_v52 = vpop.f32.mrb[17].mxu1 }
 0x1e6   : > { %5267 = vmatpush3.msk.msra.mxu1 %vm1069_vm2, %v1872_v51  ;;  %5277 = vmatpush3.msk.msra.mxu0 %vm1069_vm2, %v1872_v51 }
 0x1e7   : > { %v1939_v53 = vpop.f32.mrb[10].mxu0  ;;  %5269 = vmatmul.mubr.msk.f32.vlgmr.msra.gmra.mrb[18].mxu1 %vm1065_vm3, %v5672_v23  ;;  %5271 = vmatprep.subr.mxu1 %v5523_v0 }
 0x1e8   : > { %5279 = vmatmul.mubr.msk.f32.vlgmr.msra.gmra.mrb[12].mxu0 %vm1065_vm3, %v5670_v22  ;;  %5281 = vmatprep.subr.mxu0 %v5523_v0  ;;  %v5265_v54 = vpop.f32.mrb[11].mxu0 }
 0x1e9   : > { %5272 = vmatpush3.msk.msra.mxu1 %vm1069_vm2, %v1939_v53  ;;  %5282 = vmatpush3.msk.msra.mxu0 %vm1069_vm2, %v1939_v53 }
 0x1ea   : > { %5273 = vmatprep.mubr.msk.f32.mxu1 %vm5524_vm0, %v5523_v0  ;;  %5283 = vmatprep.mubr.msk.f32.mxu0 %vm5524_vm0, %v5523_v0 }
 0x1eb   : > { %5274 = vmatmul.mubr.msk.f32.vlgmr.msra.gmra.mrb[20].mxu1 %vm1065_vm3, %v5670_v22  ;;  %5286 = vmatprep.subr.mxu1 %v5523_v0 }
 0x1ec   : > { %5296 = vmatprep.subr.mxu0 %v5523_v0  ;;  %5288 = vmatprep.mubr.msk.f32.mxu1 %vm5524_vm0, %v5523_v0 }
 0x1f0   : > { %5284 = vmatmul.mubr.msk.f32.vlgmr.msra.gmra.mrb[12].mxu0 %vm1065_vm3, %v5672_v23  ;;  %5287 = vmatpush3.xpose.msk.msra.mxu1 %vm1065_vm3, %v1939_v53 }
 0x1f1   : > { %5297 = vmatpush3.xpose.msk.msra.mxu0 %vm1065_vm3, %v1872_v51  ;;  %5291 = vmatprep.subr.mxu1 %v5523_v0 }
 0x1f2   : > { %5298 = vmatprep.mubr.msk.f32.mxu0 %vm5524_vm0, %v5523_v0  ;;  %5306 = vmatprep.subr.mxu0 %v5523_v0 }
 0x1f3   : > { %5289 = vmatmul.mubr.msk.f32.vlgmr.msra.gmra.mrb[12].mxu1 %vm1065_vm3, %v1939_v53 }
 0x1f4   : > { %5292 = vmatpush3.xpose.msk.msra.mxu1 %vm1065_vm3, %v1939_v53  ;;  %5299 = vmatmul.mubr.msk.f32.vlgmr.msra.gmra.mrb[14].mxu0 %vm1065_vm3, %v1939_v53 }
 0x1f5   : > { %5293 = vmatprep.mubr.msk.f32.mxu1 %vm5524_vm0, %v5523_v0  ;;  %5301 = vmatprep.subr.mxu1 %v5523_v0 }
 0x1f6   : > { %5307 = vmatpush3.msra.mxu0 %v5602_v1  ;;  %5308 = vmatprep.mubr.msk.f32.mxu0 %vm5524_vm0, %v5523_v0 }
 0x1f7   : > { %5294 = vmatmul.mubr.msk.f32.vlgmr.msra.gmra.mrb[22].mxu1 %vm1065_vm3, %v1872_v51  ;;  %5316 = vmatprep.subr.mxu0 %v5523_v0 }
 0x1f8   : > { %5302 = vmatpush3.xpose.msk.msra.mxu1 %vm1065_vm3, %v1872_v51  ;;  %5309 = vmatmul.mubr.msk.f32.vlgmr.msra.gmra.mrb[16].mxu0 %vm432_vm1, %v2524_v55 }
 0x1f9   : > { %5303 = vmatprep.mubr.msk.f32.mxu1 %vm5524_vm0, %v5523_v0  ;;  %5317 = vmatpush3.msra.mxu0 %v5602_v1 }
 0x1fa   : > { %5318 = vmatprep.mubr.msk.f32.mxu0 %vm5524_vm0, %v5523_v0  ;;  %5311 = vmatprep.subr.mxu1 %v5523_v0 }
 0x1fb   : > { %5304 = vmatmul.mubr.msk.f32.vlgmr.msra.gmra.mrb[12].mxu1 %vm1065_vm3, %v1872_v51  ;;  %5321 = vmatprep.subr.mxu0 %v5523_v0 }
 0x1fc   : > { %5319 = vmatmul.mubr.msk.f32.vlgmr.msra.gmra.mrb[18].mxu0 %vm432_vm1, %v4991_v56  ;;  %5312 = vmatpush3.msra.mxu1 %v5606_v4 }
 0x1fd   : > { %5313 = vmatprep.mubr.msk.f32.mxu1 %vm5524_vm0, %v5523_v0  ;;  %5322 = vmatpush3.msra.mxu0 %v5606_v4 }
 0x1fe   : > { %5323 = vmatprep.mubr.msk.f32.mxu0 %vm5524_vm0, %v5523_v0  ;;  %5326 = vmatprep.subr.mxu1 %v5523_v0 }
 0x1ff   : > { %5314 = vmatmul.mubr.msk.f32.vlgmr.msra.gmra.mrb[24].mxu1 %vm432_vm1, %v4991_v56  ;;  %5336 = vmatprep.subr.mxu0 %v5523_v0 }
 0x200   : > { %5328 = vmatprep.mubr.msk.f32.mxu1 %vm5524_vm0, %v5523_v0 }
 0x204   : > { %5324 = vmatmul.mubr.msk.f32.vlgmr.msra.gmra.mrb[18].mxu0 %vm432_vm1, %v2524_v55 }
 0x205   : > { %5338 = vmatprep.mubr.msk.f32.mxu0 %vm5524_vm0, %v5523_v0 }
 0x2ba   : > { %v2012_v57 = vpop.f32.mrb[18].mxu1 }
 0x2bb   : > { %v5270_v58 = vpop.f32.mrb[19].mxu1 }
 0x2be   : > { %v2085_v59 = vpop.f32.mrb[20].mxu1 }
 0x2bf   : > { %v2159_v60 = vsub.f32 %v2012_v57, %v2085_v59  ;;  %v5275_v61 = vpop.f32.mrb[21].mxu1  ;;  %v4044_v59 = vld [vmem:[%s5855_s25 + $0x4] sm:$0xf] }
 0x2c1   : > { %v2230_v63 = vmul.f32 %v2159_v60, %v2159_v60  ;;  %v5028_v60 = vld [vmem:[%s5855_s25 + $0xc] sm:$0xf] }
 0x2c3   : > { %v2226_v62 = vpop.f32.mrb[12].mxu0 }
 0x2c4   : > { %v2231_v2 = vmul.f32 %v2226_v62, %v2226_v62  ;;  %v5285_v3 = vpop.f32.mrb[13].mxu0 }
 0x2c6   : > { %v2232_v5 = vadd.f32 %v2231_v2, %v2230_v63 }
 0x2c7   : > { %v2447_v6 = vpop.f32.mrb[14].mxu0 }
 0x2c8   : > { %v5300_v7 = vpop.f32.mrb[15].mxu0  ;;  %v2233_v8 = vsel %vm769_vm4, %v2232_v5, 0.0 }
 0x2c9   : > { %2234 = vadd.xlane.f32.xlu1 %v2233_v8  ;;  %v4409_v8 = vrot.slane %v5670_v22, 1 }
 0x2ca   : > { %v2377_v9 = vpop.f32.mrb[22].mxu1 }
 0x2cb   : > { %v2521_v11 = vsub.f32 %v2447_v6, %v2377_v9  ;;  %v5295_v13 = vpop.f32.mrb[23].mxu1  ;;  %v2595_v14 = vpop.f32.mrb[16].mxu0  ;;  %v4333_v9 = vrot.slane %v5672_v23, 1 }
 0x2cc   : > { %v5310_v15 = vpop.f32.mrb[17].mxu0 }
 0x2cd   : > { %v5822_v16 = vadd.f32 %v2521_v11, %v1651_v47 }
 0x2d2   : > { %v2668_v17 = vpop.f32.mrb[24].mxu1 }
 0x2d3   : > { %v2742_v19 = vsub.f32 %v2595_v14, %v2668_v17  ;;  %v5315_v20 = vpop.f32.mrb[25].mxu1 }
 0x2d5   : > { %5327 = vmatpush3.msk.msra.mxu1 %vm1069_vm2, %v2742_v19  ;;  %5337 = vmatpush3.msk.msra.mxu0 %vm1069_vm2, %v2742_v19 }
 0x2d6   : > { %5329 = vmatmul.mubr.msk.f32.vlgmr.msra.gmra.mrb[26].mxu1 %vm1065_vm3, %v5672_v23  ;;  %5339 = vmatmul.mubr.msk.f32.vlgmr.msra.gmra.mrb[20].mxu0 %vm1065_vm3, %v5670_v22 }
 0x2d7   : > { %v2809_v21 = vpop.f32.mrb[18].mxu0  ;;  %5331 = vmatprep.subr.mxu1 %v5523_v0  ;;  %5341 = vmatprep.subr.mxu0 %v5523_v0 }
 0x2d8   : > { %v5325_v24 = vpop.f32.mrb[19].mxu0  ;;  %5332 = vmatpush3.msk.msra.mxu1 %vm1069_vm2, %v2809_v21  ;;  %5342 = vmatpush3.msk.msra.mxu0 %vm1069_vm2, %v2809_v21 }
 0x2d9   : > { %5333 = vmatprep.mubr.msk.f32.mxu1 %vm5524_vm0, %v5523_v0  ;;  %5343 = vmatprep.mubr.msk.f32.mxu0 %vm5524_vm0, %v5523_v0 }
 0x2da   : > { %5334 = vmatmul.mubr.msk.f32.vlgmr.msra.gmra.mrb[28].mxu1 %vm1065_vm3, %v5670_v22  ;;  %5346 = vmatprep.subr.mxu1 %v5523_v0 }
 0x2db   : > { %5356 = vmatprep.subr.mxu0 %v5523_v0  ;;  %5348 = vmatprep.mubr.msk.f32.mxu1 %vm5524_vm0, %v5523_v0 }
 0x2de   : > { %5344 = vmatmul.mubr.msk.f32.vlgmr.msra.gmra.mrb[20].mxu0 %vm1065_vm3, %v5672_v23 }
 0x2df   : > { %5347 = vmatpush3.xpose.msk.msra.mxu1 %vm1065_vm3, %v2809_v21  ;;  %5357 = vmatpush3.xpose.msk.msra.mxu0 %vm1065_vm3, %v2742_v19 }
 0x2e0   : > { %5358 = vmatprep.mubr.msk.f32.mxu0 %vm5524_vm0, %v5523_v0  ;;  %5351 = vmatprep.subr.mxu1 %v5523_v0 }
 0x2e1   : > { %5366 = vmatprep.subr.mxu0 %v5523_v0 }
 0x2e2   : > { %5349 = vmatmul.mubr.msk.f32.vlgmr.msra.gmra.mrb[12].mxu1 %vm1065_vm3, %v2809_v21  ;;  %5359 = vmatmul.mubr.msk.f32.vlgmr.msra.gmra.mrb[22].mxu0 %vm1065_vm3, %v2809_v21 }
 0x2e3   : > { %5352 = vmatpush3.xpose.msk.msra.mxu1 %vm1065_vm3, %v2809_v21  ;;  %5353 = vmatprep.mubr.msk.f32.mxu1 %vm5524_vm0, %v5523_v0 }
 0x2e4   : > { %5367 = vmatpush3.msra.mxu0 %v5602_v1  ;;  %5368 = vmatprep.mubr.msk.f32.mxu0 %vm5524_vm0, %v5523_v0 }
 0x2e5   : > { %5361 = vmatprep.subr.mxu1 %v5523_v0  ;;  %5376 = vmatprep.subr.mxu0 %v5523_v0 }
 0x2e6   : > { %5354 = vmatmul.mubr.msk.f32.vlgmr.msra.gmra.mrb[30].mxu1 %vm1065_vm3, %v2742_v19  ;;  %5369 = vmatmul.mubr.msk.f32.vlgmr.msra.gmra.mrb[24].mxu0 %vm432_vm1, %v3397_v25 }
 0x2e7   : > { %5362 = vmatpush3.xpose.msk.msra.mxu1 %vm1065_vm3, %v2742_v19  ;;  %5363 = vmatprep.mubr.msk.f32.mxu1 %vm5524_vm0, %v5523_v0 }
 0x2e8   : > { %5377 = vmatpush3.msra.mxu0 %v5602_v1  ;;  %5378 = vmatprep.mubr.msk.f32.mxu0 %vm5524_vm0, %v5523_v0 }
 0x2e9   : > { %5371 = vmatprep.subr.mxu1 %v5523_v0  ;;  %5381 = vmatprep.subr.mxu0 %v5523_v0 }
 0x2ea   : > { %5364 = vmatmul.mubr.msk.f32.vlgmr.msra.gmra.mrb[12].mxu1 %vm1065_vm3, %v2742_v19  ;;  %5379 = vmatmul.mubr.msk.f32.vlgmr.msra.gmra.mrb[26].mxu0 %vm432_vm1, %v5013_v26 }
 0x2eb   : > { %5372 = vmatpush3.msra.mxu1 %v5606_v4  ;;  %5373 = vmatprep.mubr.msk.f32.mxu1 %vm5524_vm0, %v5523_v0 }
 0x2ec   : > { %5382 = vmatpush3.msra.mxu0 %v5606_v4  ;;  %5383 = vmatprep.mubr.msk.f32.mxu0 %vm5524_vm0, %v5523_v0 }
 0x2ed   : > { %5386 = vmatprep.subr.mxu1 %v5523_v0  ;;  %5396 = vmatprep.subr.mxu0 %v5523_v0 }
 0x2ee   : > { %5374 = vmatmul.mubr.msk.f32.vlgmr.msra.gmra.mrb[32].mxu1 %vm432_vm1, %v5013_v26 }
 0x2ef   : > { %5388 = vmatprep.mubr.msk.f32.mxu1 %vm5524_vm0, %v5523_v0 }
 0x2f2   : > { %5384 = vmatmul.mubr.msk.f32.vlgmr.msra.gmra.mrb[26].mxu0 %vm432_vm1, %v3397_v25 }
 0x2f3   : > { %5398 = vmatprep.mubr.msk.f32.mxu0 %vm5524_vm0, %v5523_v0 }
 0x3a9   : > { %v2882_v27 = vpop.f32.mrb[26].mxu1 }
 0x3aa   : > { %v5330_v28 = vpop.f32.mrb[27].mxu1 }
 0x3ad   : > { %v2955_v29 = vpop.f32.mrb[28].mxu1 }
 0x3ae   : > { %v3029_v31 = vsub.f32 %v2882_v27, %v2955_v29  ;;  %v5335_v32 = vpop.f32.mrb[29].mxu1 }
 0x3af   : > { %v772_v32 = vpop.xlane.xlu0 %771 }
 0x3b0   : > { %v3100_v36 = vmul.f32 %v3029_v31, %v3029_v31  ;;  %v5525_v31 = vmov 0  }
 0x3b1   : > { %v3096_v33 = vpop.f32.mrb[20].mxu0  ;;  %5491 = vset.pattern.permute.xlu1 %v5525_v31  ;;  %5492 = vset.pattern.permute.xlu0 %v5525_v31 }
 0x3b2   : > { %v3101_v37 = vmul.f32 %v3096_v33, %v3096_v33  ;;  %v5345_v38 = vpop.f32.mrb[21].mxu0  ;;  %v773_v33 = vmul.f32 0.4, %v772_v32 }
 0x3b3   : > { %v1365_v35 = vpop.xlane.xlu0 %1364 }
 0x3b4   : > { %v3102_v39 = vadd.f32 %v3101_v37, %v3100_v36  ;;  %v2235_v36 = vpop.xlane.xlu1 %2234  ;;  %v1366_v37 = vadd.f32 %v1365_v35, %v773_v33 }
 0x3b5   : > { %v3317_v40 = vpop.f32.mrb[22].mxu0 }
 0x3b6   : > { %v5360_v41 = vpop.f32.mrb[23].mxu0  ;;  %v3103_v42 = vsel %vm769_vm4, %v3102_v39, 0.0  ;;  %v2236_v39 = vadd.f32 %v2235_v36, %v1366_v37 }
 0x3b7   : > { %3104 = vadd.xlane.f32.xlu1 %v3103_v42 }
 0x3b9   : > { %v3247_v44 = vpop.f32.mrb[30].mxu1  ;;  %v3469_v45 = vpop.f32.mrb[24].mxu0 }
 0x3ba   : > { %v3391_v46 = vsub.f32 %v3317_v40, %v3247_v44  ;;  %v5355_v47 = vpop.f32.mrb[31].mxu1  ;;  %v5370_v49 = vpop.f32.mrb[25].mxu0 }
 0x3bc   : > { %v3393_v50 = vadd.f32 %v3391_v46, %v5822_v16 }
 0x3bd   : > { %v3387_v51 = vpop.f32.mrb[12].mxu1 }
 0x3be   : > { %5012 = vst.msk [vmem:[%s422_s10 + $0x4] sm:$0xf] %vm723_vm6, %v3393_v50  ;;  %v5446_v52 = vadd.f32 %v3387_v51, %v774_v48  ;;  %v5365_v53 = vpop.f32.mrb[13].mxu1 }
 0x3c0   : > { %3394 = vst.msk [vmem:[%s422_s10] sm:$0xf] %vm723_vm6, %v5446_v52 }
 0x3c1   : > { %v3542_v54 = vpop.f32.mrb[32].mxu1 }
 0x3c2   : > { %v5911_v55 = vsub.f32 %v3469_v45, %v3542_v54  ;;  %v5375_v56 = vpop.f32.mrb[33].mxu1 }
 0x3c4   : > { %5387 = vmatpush3.msk.msra.mxu1 %vm1069_vm2, %v5911_v55  ;;  %5397 = vmatpush3.msk.msra.mxu0 %vm1069_vm2, %v5911_v55 }
 0x3c5   : > { %v5917_v57 = vpop.f32.mrb[26].mxu0  ;;  %5389 = vmatmul.mubr.msk.f32.vlgmr.msra.gmra.mrb[34].mxu1 %vm1065_vm3, %v5672_v23  ;;  %5391 = vmatprep.subr.mxu1 %v5523_v0 }
 0x3c6   : > { %5399 = vmatmul.mubr.msk.f32.vlgmr.msra.gmra.mrb[28].mxu0 %vm1065_vm3, %v5670_v22  ;;  %5401 = vmatprep.subr.mxu0 %v5523_v0  ;;  %v5385_v58 = vpop.f32.mrb[27].mxu0 }
 0x3c7   : > { %5392 = vmatpush3.msk.msra.mxu1 %vm1069_vm2, %v5917_v57  ;;  %5402 = vmatpush3.msk.msra.mxu0 %vm1069_vm2, %v5917_v57 }
 0x3c8   : > { %5393 = vmatprep.mubr.msk.f32.mxu1 %vm5524_vm0, %v5523_v0  ;;  %5406 = vmatprep.subr.mxu1 %v5523_v0 }
 0x3c9   : > { %5394 = vmatmul.mubr.msk.f32.vlgmr.msra.gmra.mrb[36].mxu1 %vm1065_vm3, %v5670_v22  ;;  %5403 = vmatprep.mubr.msk.f32.mxu0 %vm5524_vm0, %v5523_v0 }
 0x3ca   : > { %5407 = vmatpush3.msra.mxu1 %v5602_v1  ;;  %5408 = vmatprep.mubr.msk.f32.mxu1 %vm5524_vm0, %v5523_v0 }
 0x3cb   : > { %5411 = vmatprep.subr.mxu1 %v5523_v0  ;;  %5416 = vmatprep.subr.mxu0 %v5523_v0 }
 0x3cd   : > { %5409 = vmatmul.mubr.msk.f32.vlgmr.msra.gmra.mrb[38].mxu1 %vm432_vm1, %v4044_v59 }
 0x3ce   : > { %5404 = vmatmul.mubr.msk.f32.vlgmr.msra.gmra.mrb[28].mxu0 %vm1065_vm3, %v5672_v23  ;;  %5412 = vmatpush3.msra.mxu1 %v5606_v4 }
 0x3cf   : > { %5413 = vmatprep.mubr.msk.f32.mxu1 %vm5524_vm0, %v5523_v0  ;;  %5417 = vmatpush3.msra.mxu0 %v5602_v1 }
 0x3d0   : > { %5418 = vmatprep.mubr.msk.f32.mxu0 %vm5524_vm0, %v5523_v0  ;;  %5421 = vmatprep.subr.mxu0 %v5523_v0 }
 0x3d1   : > { %5414 = vmatmul.mubr.msk.f32.vlgmr.msra.gmra.mrb[40].mxu1 %vm432_vm1, %v5028_v60  ;;  %5426 = vmatprep.subr.mxu1 %v5523_v0 }
 0x3d2   : > { %5419 = vmatmul.mubr.msk.f32.vlgmr.msra.gmra.mrb[30].mxu0 %vm432_vm1, %v5028_v60  ;;  %5428 = vmatprep.mubr.msk.f32.mxu1 %vm5524_vm0, %v5523_v0 }
 0x3d3   : > { %5422 = vmatpush3.msra.mxu0 %v5606_v4  ;;  %5423 = vmatprep.mubr.msk.f32.mxu0 %vm5524_vm0, %v5523_v0 }
 0x3d4   : > { %5436 = vmatprep.subr.mxu0 %v5523_v0 }
 0x3da   : > { %5424 = vmatmul.mubr.msk.f32.vlgmr.msra.gmra.mrb[30].mxu0 %vm432_vm1, %v4044_v59 }
 0x3db   : > { %5438 = vmatprep.mubr.msk.f32.mxu0 %vm5524_vm0, %v5523_v0 }
 0x444   : > { %v3105_v38 = vpop.xlane.xlu1 %3104 }
 0x445   : > { %v3106_v41 = vadd.f32 %v3105_v38, %v2236_v39  ;;  %v739_v38 = vmul.f32 %v5901_v43, %v5657_v12 }
 0x447   : > { %v4651_v54 = vrot.slane %v3106_v41, 1 }
 0x498   : > { %v3756_v1 = vpop.f32.mrb[34].mxu1 }
 0x499   : > { %v5390_v61 = vpop.f32.mrb[35].mxu1 }
 0x49c   : > { %v3829_v62 = vpop.f32.mrb[36].mxu1 }
 0x49d   : > { %v5965_v63 = vsub.f32 %v3756_v1, %v3829_v62  ;;  %v5395_v2 = vpop.f32.mrb[37].mxu1 }
 0x49f   : > { %v3974_v26 = vmul.f32 %v5965_v63, %v5965_v63 }
 0x4a0   : > { %v4115_v3 = vpop.f32.mrb[38].mxu1 }
 0x4a1   : > { %v5967_v5 = vpop.f32.mrb[28].mxu0  ;;  %v5410_v4 = vpop.f32.mrb[39].mxu1 }
 0x4a2   : > { %v5405_v6 = vpop.f32.mrb[29].mxu0  ;;  %v3975_v24 = vmul.f32 %v5967_v5, %v5967_v5 }
 0x4a4   : > { %v4188_v7 = vpop.f32.mrb[40].mxu1  ;;  %v3976_v29 = vadd.f32 %v3975_v24, %v3974_v26 }
 0x4a5   : > { %v5971_v11 = vsub.f32 %v4115_v3, %v4188_v7  ;;  %v5415_v13 = vpop.f32.mrb[41].mxu1 }
 0x4a6   : > { %v3978_v30 = vsel %vm3977_vm7, %v3976_v29, 0.0 }
 0x4a7   : > { %5427 = vmatpush3.msk.msra.mxu1 %vm1069_vm2, %v5971_v11  ;;  %5437 = vmatpush3.msk.msra.mxu0 %vm1069_vm2, %v5971_v11 }
 0x4a8   : > { %5439 = vmatmul.mubr.msk.f32.vlgmr.msra.gmra.mrb[32].mxu0 %vm1065_vm3, %v4409_v8  ;;  %5429 = vmatmul.mubr.msk.f32.vlgmr.msra.gmra.mrb[42].mxu1 %vm1065_vm3, %v4333_v9 }
 0x4a9   : > { %5431 = vmatprep.subr.mxu1 %v5523_v0  ;;  %5441 = vmatprep.subr.mxu0 %v5523_v0 }
 0x4aa   : > { %5433 = vmatprep.mubr.msk.f32.mxu1 %vm5524_vm0, %v5523_v0  ;;  %5443 = vmatprep.mubr.msk.f32.mxu0 %vm5524_vm0, %v5523_v0  ;;  %vm4707_vm0 = vcmask 11272  }
 0x4ad   : > { %v5985_v22 = vpop.f32.mrb[30].mxu0 }
 0x4ae   : > { %v5425_v23 = vpop.f32.mrb[31].mxu0  ;;  %5432 = vmatpush3.msk.msra.mxu1 %vm1069_vm2, %v5985_v22  ;;  %5442 = vmatpush3.msk.msra.mxu0 %vm1069_vm2, %v5985_v22 }
 0x4af   : > { %5434 = vmatmul.mubr.msk.f32.vlgmr.msra.gmra.mrb[44].mxu1 %vm1065_vm3, %v4409_v8 }
 0x4b0   : > { %5444 = vmatmul.mubr.msk.f32.vlgmr.msra.gmra.mrb[32].mxu0 %vm1065_vm3, %v4333_v9  ;;  %v6021_v9 = vsub.s32 0, %v5896_v34 }
 0x57b   : > { %v4405_v14 = vpop.f32.mrb[42].mxu1 }
 0x57c   : > { %v5430_v15 = vpop.f32.mrb[43].mxu1 }
 0x582   : > { %v4481_v16 = vpop.f32.mrb[44].mxu1 }
 0x583   : > { %v5993_v17 = vsub.f32 %v4405_v14, %v4481_v16  ;;  %v5995_v19 = vpop.f32.mrb[32].mxu0  ;;  %v5435_v0 = vpop.f32.mrb[45].mxu1 }
 0x584   : > { %v4627_v20 = vmul.f32 %v5995_v19, %v5995_v19  ;;  %v5445_v21 = vpop.f32.mrb[33].mxu0 }
 0x585   : > { %v4626_v25 = vmul.f32 %v5993_v17, %v5993_v17 }
 0x587   : > { %v4628_v27 = vadd.f32 %v4627_v20, %v4626_v25 }
 0x589   : > { %v4629_v28 = vsel %vm3977_vm7, %v4628_v27, 0.0 }
 0x58a   : > { %4630 = vadd.xlane.f32.xlu0 %v4629_v28 }
 0x58e   : > { %3979 = vadd.xlane.f32.xlu0 %v3978_v30 }
 0x617   : > { %v4631_v40 = vpop.xlane.xlu0 %4630 }
 0x618   : > { %v4633_v42 = vrot.slane %v4631_v40, 7 }
 0x61a   : > { %v4635_v44 = vsub.f32 %v3106_v41, %v4633_v42 }
 0x61b   : > { %v3980_v45 = vpop.xlane.xlu0 %3979 }
 0x61c   : > { %v4637_v46 = vrot.slane %v4635_v44, 1  ;;  %v3981_v47 = vsub.f32 %v3106_v41, %v3980_v45 }
 0x61e   : > { %5493 = vrcp.f32 %v4637_v46 }
 0x61f   : > { %5495 = vrcp.f32 %v3981_v47 }
 0x628   : > { %v5494_v48 = vpop.eup %5493 }
 0x629   : > { %v5496_v49 = vpop.eup %5495  ;;  %v4640_v50 = vmul.f32 %v5494_v48, %v4631_v40  ;;  %v740_v40 = vsel %vm723_vm6, %v739_v38, 0.0 }
 0x62a   : > { %v3983_v51 = vmul.f32 %v5496_v49, %v3980_v45 }
 0x62b   : > { %4641 = vst.msk [vmem:[%s6011_s13 + $0xd] sm:$0x1] %vm3984_vm8, %v4640_v50  ;;  %v4642_v52 = vadd.f32 1.0, %v4640_v50 }
 0x62c   : > { %3985 = vst.msk [vmem:[%s6011_s13 + $0xc] sm:$0x1] %vm3984_vm8, %v3983_v51  ;;  %v3986_v53 = vadd.f32 1.0, %v3983_v51 }
 0x62d   : > { %5497 = vrsqrt.f32 %v4642_v52  ;;  %vm4645_vm9 = vcmp.eq.f32.partialorder %v4642_v52, inf  ;;  %v4648_v60 = vand.u32 2147483648, %v4642_v52  ;;  %vm4647_vm10 = vcmp.eq.f32.partialorder %v4642_v52, 0.0 }
 0x62e   : > { %5499 = vrsqrt.f32 %v3986_v53  ;;  %vm3989_vm11 = vcmp.eq.f32.partialorder %v3986_v53, inf  ;;  %v3992_v62 = vand.u32 2147483648, %v3986_v53  ;;  %vm3991_vm12 = vcmp.eq.f32.partialorder %v3986_v53, 0.0 }
 0x62f   : > { %5501 = vrcp.f32 %v4651_v54 }
 0x630   : > { %5503 = vrcp.f32 %v3106_v41  ;;  %v724_v41 = vsel %vm723_vm6, %v5668_v18, 0.0 }
 0x637   : > { %v5498_v56 = vpop.eup %5497 }
 0x638   : > { %v5500_v58 = vpop.eup %5499  ;;  %v4644_v59 = vmul.f32 %v5498_v56, %v4642_v52 }
 0x639   : > { %v3988_v1 = vmul.f32 %v5500_v58, %v3986_v53  ;;  %v5502_v2 = vpop.eup %5501 }
 0x63a   : > { %v4646_v61 = vsel %vm4645_vm9, %v4642_v52, %v4644_v59  ;;  %v5504_v6 = vpop.eup %5503 }
 0x63b   : > { %v6015_v3 = vsel %vm4647_vm10, %v4648_v60, %v4646_v61  ;;  %v3990_v4 = vsel %vm3989_vm11, %v3986_v53, %v3988_v1 }
 0x63c   : > { %v4654_v7 = vmul.f32 %v5502_v2, %v6015_v3  ;;  %v6018_v8 = vsel %vm3991_vm12, %v3992_v62, %v3990_v4 }
 0x63d   : > { %v3995_v13 = vmul.f32 %v5504_v6, %v6018_v8 }
 0x63e   : > { %4657 = vperm.xlu1 %5491, %v4654_v7  }
 0x63f   : > { %v3996_v23 = vmul.f32 %v3995_v13, %v5965_v63  ;;  %v3997_v14 = vmul.f32 %v3995_v13, %v5967_v5 }
 0x641   : > { %5026 = vst.msk [vmem:[%s412_s15 + $0x2] sm:$0x1] %vm3977_vm7, %v3997_v14  ;;  %v4001_v15 = vmul.f32 %v3996_v23, %v3996_v23  ;;  %v4002_v16 = vmul.f32 %v3997_v14, %v3997_v14  ;;  %3998 = vst.msk [vmem:[%s412_s15] sm:$0x1] %vm3977_vm7, %v3996_v23  ;;  %v4012_v34 = vrot.slane %v3997_v14, %v6021_v9 }
 0x642   : > { %v4024_v0 = vrot.slane %v3996_v23, %v6021_v9 }
 0x643   : > { %v4003_v20 = vadd.f32 %v4002_v16, %v4001_v15  ;;  %v4013_v21 = vmul.f32 %v4012_v34, %v5917_v57 }
 0x644   : > { %v4025_v24 = vmul.f32 %v4024_v0, %v5917_v57  ;;  %v4029_v44 = vmul.f32 %v4024_v0, %v5911_v55 }
 0x645   : > { %v4014_v42 = vsel %vm723_vm6, %v4013_v21, 0.0 }
 0x646   : > { %v4030_v45 = vsel %vm723_vm6, %v4029_v44, 0.0 }
 0x6bd   : > { %v4658_v25 = vpop.permute.xlu1 %4657 }
 0x6be   : > { %v4660_v63 = vmul.f32 %v4658_v25, %v5993_v17  ;;  %v4661_v5 = vmul.f32 %v4658_v25, %v5995_v19 }
 0x6c0   : > { %4662 = vst.msk [vmem:[%s412_s15 + $0x1] sm:$0x1] %vm3977_vm7, %v4660_v63  ;;  %5041 = vst.msk [vmem:[%s412_s15 + $0x3] sm:$0x1] %vm3977_vm7, %v4661_v5  ;;  %v4687_v26 = vrot.slane %v4660_v63, %v6021_v9  ;;  %v4664_v27 = vmul.f32 %v4660_v63, %v4660_v63  ;;  %v4665_v28 = vmul.f32 %v4661_v5, %v4661_v5 }
 0x6c1   : > { %v4675_v29 = vrot.slane %v4661_v5, %v6021_v9 }
 0x6c2   : > { %v4688_v30 = vmul.f32 %v4687_v26, %v5985_v22  ;;  %v4666_v31 = vadd.f32 %v4665_v28, %v4664_v27  ;;  %v4692_v36 = vmul.f32 %v4687_v26, %v5971_v11 }
 0x6c3   : > { %v4676_v57 = vmul.f32 %v4675_v29, %v5985_v22  ;;  %v4680_v33 = vmul.f32 %v4675_v29, %v5971_v11  ;;  %v735_v22 = vmul.f32 %v5901_v43, %v5654_v10  ;;  %v4004_v11 = vsel %vm3977_vm7, %v4003_v20, 0.0 }
 0x6c4   : > { %v4689_v32 = vsel %vm723_vm6, %v4688_v30, 0.0  ;;  %v4667_v17 = vsel %vm3977_vm7, %v4666_v31, 0.0  ;;  %v4693_v37 = vsel %vm723_vm6, %v4692_v36, 0.0  ;;  %v4017_v10 = vmul.f32 %v4012_v34, %v5911_v55 }
 0x6c5   : > { %4690 = vadd.xlane.f32.xlu1 %v4689_v32  ;;  %4668 = vadd.xlane.f32.xlu0 %v4667_v17  ;;  %v4677_v19 = vsel %vm723_vm6, %v4676_v57, 0.0  ;;  %v4681_v35 = vsel %vm723_vm6, %v4680_v33, 0.0  ;;  %v736_v39 = vsel %vm723_vm6, %v735_v22, 0.0  ;;  %v4026_v43 = vsel %vm723_vm6, %v4025_v24, 0.0 }
 0x6c6   : > { %v4018_v12 = vsel %vm723_vm6, %v4017_v10, 0.0 }
 0x6c9   : > { %4678 = vadd.xlane.f32.xlu0 %v4677_v19 }
 0x6cd   : > { %4682 = vadd.xlane.f32.xlu0 %v4681_v35 }
 0x6d1   : > { %4694 = vadd.xlane.f32.xlu0 %v4693_v37 }
 0x6d5   : > { %737 = vadd.xlane.f32.xlu0 %v736_v39 }
 0x6d9   : > { %741 = vadd.xlane.f32.xlu0 %v740_v40 }
 0x6dd   : > { %725 = vadd.xlane.f32.xlu0 %v724_v41 }
 0x6e1   : > { %4005 = vadd.xlane.f32.xlu0 %v4004_v11 }
 0x6e5   : > { %4015 = vadd.xlane.f32.xlu0 %v4014_v42 }
 0x6e9   : > { %4019 = vadd.xlane.f32.xlu0 %v4018_v12 }
 0x6ed   : > { %4027 = vadd.xlane.f32.xlu0 %v4026_v43 }
 0x6f1   : > { %4031 = vadd.xlane.f32.xlu0 %v4030_v45 }
 0x752   : > { %v4669_v18 = vpop.xlane.xlu0 %4668  ;;  %v4691_v51 = vpop.xlane.xlu1 %4690 }
 0x753   : > { %5505 = vrcp.f32 %v4669_v18 }
 0x756   : > { %v4679_v46 = vpop.xlane.xlu0 %4678 }
 0x75a   : > { %v4683_v47 = vpop.xlane.xlu0 %4682 }
 0x75b   : > { %v4697_v54 = vsub.f32 %v4691_v51, %v4683_v47 }
 0x75d   : > { %v5506_v48 = vpop.eup %5505 }
 0x75e   : > { %v4671_v49 = vmul.f32 %v5506_v48, %v6015_v3  ;;  %v4695_v50 = vpop.xlane.xlu0 %4694 }
 0x75f   : > { %v4696_v52 = vadd.f32 %v4695_v50, %v4679_v46 }
 0x760   : > { %v4701_v53 = vrot.slane %v4671_v49, %v6021_v9 }
 0x762   : > { %v4709_v56 = vmul.f32 %v4701_v53, %v4697_v54  ;;  %v4702_v58 = vmul.f32 %v4701_v53, %v4696_v52  ;;  %v738_v55 = vpop.xlane.xlu0 %737 }
 0x763   : > { %v743_v1 = vmul.f32 %v738_v55, %v738_v55 }
 0x764   : > { %4711 = vrot.lane.b32.xlu0 %v4709_v56, %s5526_s28  ;;  %4704 = vrot.lane.b32.xlu1 %v4702_v58, %s5526_s28 }
 0x766   : > { %v742_v59 = vpop.xlane.xlu0 %741 }
 0x767   : > { %v744_v60 = vmul.f32 %v742_v59, %v742_v59 }
 0x769   : > { %v745_v62 = vadd.f32 %v744_v60, %v743_v1 }
 0x76a   : > { %v726_v61 = vpop.xlane.xlu0 %725 }
 0x76b   : > { %v727_v2 = vadd.f32 0.1, %v726_v61 }
 0x76d   : > { %v746_v3 = vsub.f32 %v727_v2, %v745_v62 }
 0x76e   : > { %v4006_v4 = vpop.xlane.xlu0 %4005 }
 0x76f   : > { %5507 = vrcp.f32 %v746_v3 }
 0x770   : > { %5509 = vrcp.f32 %v4006_v4 }
 0x772   : > { %v4016_v6 = vpop.xlane.xlu0 %4015 }
 0x776   : > { %v4020_v7 = vpop.xlane.xlu0 %4019 }
 0x779   : > { %v5508_v13 = vpop.eup %5507 }
 0x77a   : > { %v5510_v23 = vpop.eup %5509  ;;  %v748_v14 = vmul.f32 %v5508_v13, %v727_v2  ;;  %v4028_v15 = vpop.xlane.xlu0 %4027 }
 0x77b   : > { %v4008_v16 = vmul.f32 %v5510_v23, %v6018_v8  ;;  %v4034_v34 = vsub.f32 %v4028_v15, %v4020_v7 }
 0x77c   : > { %v4948_v0 = vadd.f32 -1.0, %v748_v14 }
 0x77d   : > { %v4038_v20 = vrot.slane %v4008_v16, %v6021_v9 }
 0x77e   : > { %v750_v21 = vadd.f32 1.0, %v4948_v0  ;;  %761 = vst.msk [vmem:[%s6011_s13] sm:$0xf] %vm760_vm13, %v4948_v0  ;;  %v4032_v24 = vpop.xlane.xlu0 %4031 }
 0x77f   : > { %v4041_v25 = vmul.f32 %v4038_v20, %v4034_v34  ;;  %v4033_v63 = vadd.f32 %v4032_v24, %v4016_v6 }
 0x780   : > { %5511 = vrsqrt.f32 %v750_v21  ;;  %vm753_vm14 = vcmp.eq.f32.partialorder %v750_v21, inf  ;;  %v756_v26 = vand.u32 2147483648, %v750_v21  ;;  %vm755_vm15 = vcmp.eq.f32.partialorder %v750_v21, 0.0 }
 0x781   : > { %5027 = vst.msk [vmem:[%s417_s18 + $0x4] sm:$0xf] %vm760_vm13, %v4041_v25  ;;  %v4039_v8 = vmul.f32 %v4038_v20, %v4033_v63  ;;  %5513 = vrcp.f32 %v727_v2 }
 0x783   : > { %4040 = vst.msk [vmem:[%s417_s18] sm:$0xf] %vm760_vm13, %v4039_v8 }
 0x78a   : > { %v5512_v9 = vpop.eup %5511 }
 0x78b   : > { %v752_v5 = vmul.f32 %v5512_v9, %v750_v21  ;;  %v5514_v28 = vpop.eup %5513 }
 0x78d   : > { %v754_v27 = vsel %vm753_vm14, %v750_v21, %v752_v5 }
 0x78e   : > { %v757_v29 = vsel %vm755_vm15, %v756_v26, %v754_v27 }
 0x78f   : > { %v759_v30 = vmul.f32 %v5514_v28, %v757_v29 }
 0x791   : > { %v762_v31 = vmul.f32 %v759_v30, %v738_v55  ;;  %v764_v57 = vmul.f32 %v759_v30, %v742_v59 }
 0x793   : > { %763 = vst.msk [vmem:[%s6011_s13 + $0x4] sm:$0xf] %vm760_vm13, %v762_v31  ;;  %765 = vst.msk [vmem:[%s6011_s13 + $0x8] sm:$0xf] %vm760_vm13, %v764_v57 }
 0x7d6   : > { %v4705_v32 = vpop.permute.xlu1 %4704  ;;  %v4712_v17 = vpop.permute.xlu0 %4711 }
 0x7d7   : > { %4708 = vst.msk [vmem:[%s417_s18] sm:$0xf] %vm4707_vm0, %v4705_v32  ;;  %5042 = vst.msk [vmem:[%s417_s18 + $0x4] sm:$0xf] %vm4707_vm0, %v4712_v17 }
 0x7d8 PF: > { %s19_s27 = sadd.s32 1, %s5521_s27  }
 0x7d9   : > { %p16_p4 = scmp.ge.s32.totalorder %s19_s27, 4  }
 0x7db   :  { %18 = sbr.rel (!%p16_p4) target bundleno = 1 (0x1), region = 126 }

// kernel: _lambda_.5
= control target key start
LH: loop header
LB: loop body
LE: loop exit
PB: predicated region body
PF: predicated region fallthrough
CT: control target
= control target key end

     0   :  { %s6478_s0 = inlined_call_operand.vmem [shape: f32[2,2,4,8], index: 0, kind: input, shape index: {}]   ;;  %s6479_s1 = inlined_call_operand.vmem [shape: f32[2,2,8,4], index: 1, kind: input, shape index: {}]   ;;  %s6480_s2 = inlined_call_operand.vmem [shape: f32[2,2,12,8], index: 2, kind: input, shape index: {}]   ;;  %s6481_s3 = inlined_call_operand.vmem [shape: f32[2,2,8,8], index: 3, kind: input, shape index: {}]   ;;  %s6482_s4 = inlined_call_operand.vmem [shape: f32[2,2,2,4], index: 4, kind: input, shape index: {}]   ;;  %s6483_s5 = inlined_call_operand.vmem [shape: f32[2,14,1], index: 5, kind: output, shape index: {0}]   ;;  %s6484_s6 = inlined_call_operand.hbm [shape: f32[2,2,2,4], index: 6, kind: output, shape index: {1}]   ;;  %s6485_s7 = inlined_call_operand.hbm [shape: f32[2,2,4,2], index: 7, kind: output, shape index: {2}]   ;;  %s6486_s8 = inlined_call_operand.hbm [shape: f32[2,2,4,4], index: 8, kind: output, shape index: {3}]  }
   0x1   :  { %6489 = sst [smem:[#allocation9_spill]] %s6478_s0 }
   0x2   :  { %14 = vsyncpa [#allocation3], 0 }
   0x3   :  { %16 = vsyncpa [#allocation3 + $0x1], 0 }
   0x4   :  { %17 = vsyncpa [#allocation5], 0 }
   0x5   :  { %19 = vsyncpa [#allocation5 + $0x1], 0  ;;  %s5794_s27 = smov 0   ;;  %s5796_s28 = smov 0  }
   0x6   :  { %s5798_s29 = smov 0   ;;  %s5800_s30 = smov 0  }
   0x7 LB: > { %s5815_s9 = sadd.s32 4294967295, %s5736_s30   ;;  %s6487_s10 = sadd.s32 4294967294, %s5736_s30   ;;  %s5736_s30 = sphi %s5800_s30, %s6499_s30   ;;  %s5732_s29 = sphi %s5798_s29, %s6498_s29   ;;  %s5728_s28 = sphi %s5796_s28, %s6497_s28   ;;  %s5724_s27 = sphi %s5794_s27, %s6496_s27  }
   0x8   : > { %s5819_s11 = sadd.s32 1, %s5736_s30   ;;  %s188_s12 = sadd.s32 1, %s5732_s29 }
   0x9   : > { %s185_s13 = ssub.s32 %s5736_s30, %s5819_s11  ;;  %p198_p0 = scmp.ne.s32.totalorder %s5732_s29, %s5728_s28 }
   0xa   : > { %p186_p1 = scmp.eq.s32.totalorder %s185_s13, 0  ;;  %p199_p2 = scmp.eq.s32.totalorder %s5815_s9, 1 }
   0xb   : > { %p204_p3 = scmp.ne.s32.totalorder %s5728_s28, %s5724_s27  ;;  %p205_p4 = scmp.eq.s32.totalorder %s6487_s10, 1 }
   0xc   : > { %s5832_s14 = scalar_select %p186_p1, %s5732_s29, %s188_s12  }
   0xd   : > { %p5834_p5 = por %p199_p2, %p198_p0  ;;  %p5838_p6 = por %p205_p4, %p204_p3 }
   0xe   : > { %p4969_p7 = scmp.ge.s32.totalorder %s5736_s30, 1  ;;  %p315_p8 = scmp.lt.s32.totalorder %s5736_s30, 3 }
  0x10   : > { %p316_p9 = pnand %p4969_p7, %p315_p8 }
  0x11   : > { %p384_p10 = scmp.lt.s32.totalorder (!%p316_p9), %s5815_s9, 1  ;;  %v5738_v0 = vmov (!%p316_p9), 0.0   ;;  %vm5739_vm0 = vmmov (!%p316_p9), 0   ;;  %s6492_s0 = sld [smem:[#allocation9_spill]] (!%p316_p9)  ;;  %vm423_vm1 = vcmask (!%p316_p9), 64512   ;;  %vm1060_vm2 = vcmask (!%p316_p9), 1043456  }
  0x12   : > { %319 = sbr.rel (%p316_p9) target bundleno = 2069 (0x815), region = 40  ;;  %5220 = vmatprep.subr.mxu1 (!%p316_p9), %v5738_v0  ;;  %5230 = vmatprep.subr.mxu0 (!%p316_p9), %v5738_v0  ;;  %vm1056_vm3 = vcmask (!%p316_p9), 31744   ;;  %vm760_vm4 = vcmask (!%p316_p9), 25600   ;;  %vm714_vm6 = vcmask (!%p316_p9), 27648   ;;  %vm3968_vm7 = vcmask (!%p316_p9), 24576  }
  0x13   : > { %5222 = vmatprep.mubr.msk.f32.mxu1 (!%p316_p9), %vm5739_vm0, %v5738_v0  ;;  %5232 = vmatprep.mubr.msk.f32.mxu0 (!%p316_p9), %vm5739_vm0, %v5738_v0  ;;  %vm3975_vm8 = vcmask (!%p316_p9), 0  }
  0x19   : > { %s5848_s17 = scalar_select %p384_p10, %s5815_s9, 1 }
  0x1b   : > { %s5855_s18 = sshll.u32 %s5848_s17, 4  ;;  %s5099_s19 = sshll.u32 %s5848_s17, 3 }
  0x1c   : > { %s393_s22 = scalar_lea.vmem %s6479_s1, %s5855_s18  ;;  %s388_s25 = scalar_lea.vmem %s6492_s0, %s5099_s19 }
  0x1d   : > { %v5865_v1 = vld [vmem:[%s393_s22] sm:$0xff]  ;;  %v5869_v4 = vld [vmem:[%s393_s22 + $0x8] sm:$0xff]  ;;  %s5101_s26 = sshll.u32 %s5848_s17, 5  ;;  %s5103_s20 = sshll.u32 %s5848_s17, 2 }
  0x1e   : > { %v414_v2 = vld [vmem:[%s388_s25] sm:$0xf]  ;;  %v4985_v3 = vld [vmem:[%s388_s25 + $0x4] sm:$0xf]  ;;  %5221 = vmatpush3.msra.mxu1 %v5865_v1  ;;  %5231 = vmatpush3.msra.mxu0 %v5865_v1  ;;  %s5882_s19 = scalar_lea.vmem %s6480_s2, %s5101_s26  ;;  %s408_s23 = scalar_lea.vmem %s6482_s4, %s5103_s20 }
  0x1f   : > { %5223 = vmatmul.mubr.msk.f32.vlgmr.msra.gmra.mrb[0].mxu1 %vm423_vm1, %v414_v2  ;;  %5233 = vmatmul.mubr.msk.f32.vlgmr.msra.gmra.mrb[0].mxu0 %vm423_vm1, %v4985_v3  ;;  %v766_v5 = vld [vmem:[%s5882_s19] sm:$0xf]  ;;  %v4994_v6 = vld [vmem:[%s5882_s19 + $0x10] sm:$0xf]  ;;  %v1645_v26 = vld [vmem:[%s5882_s19 + $0x4] sm:$0xf]  ;;  %s6116_s25 = scalar_lea.vmem %s6481_s3, %s5855_s18  ;;  %s6278_s21 = scalar_lea.vmem %s6483_s5, %s5855_s18 }
  0x20   : > { %5225 = vmatprep.subr.mxu1 %v5738_v0  ;;  %5227 = vmatprep.mubr.msk.f32.mxu1 %vm5739_vm0, %v5738_v0  ;;  %v5931_v22 = vld [vmem:[%s408_s23 + $0x2] sm:$0x3]  ;;  %v5933_v23 = vld [vmem:[%s408_s23] sm:$0x3]  ;;  %v5015_v27 = vld [vmem:[%s5882_s19 + $0x14] sm:$0xf] }
  0x21   : > { %5226 = vmatpush3.msra.mxu1 %v5869_v4  ;;  %5235 = vmatprep.subr.mxu0 %v5738_v0  ;;  %v757_v28 = vmul.f32 %v5933_v23, %v5933_v23  ;;  %v758_v29 = vmul.f32 %v5931_v22, %v5931_v22  ;;  %v2515_v55 = vld [vmem:[%s5882_s19 + $0x8] sm:$0xf]  ;;  %v5036_v56 = vld [vmem:[%s5882_s19 + $0x18] sm:$0xf]  ;;  %s6160_s26 = sand.u32 1, %s5728_s28   ;;  %s5105_s17 = sshll.u32 %s5815_s9, 6 }
  0x22   : > { %5236 = vmatpush3.msra.mxu0 %v5869_v4  ;;  %5240 = vmatprep.subr.mxu1 %v5738_v0  ;;  %s6488_s12 = sshll.u32 %s6160_s26, 3  ;;  %s4970_s18 = sshll.u32 %s6160_s26, 2 }
  0x23   : > { %5228 = vmatmul.mubr.msk.f32.vlgmr.msra.gmra.mrb[2].mxu1 %vm423_vm1, %v4985_v3  ;;  %5237 = vmatprep.mubr.msk.f32.mxu0 %vm5739_vm0, %v5738_v0  ;;  %v759_v30 = vadd.f32 %v758_v29, %v757_v28  ;;  %s6172_s13 = scalar_lea.vmem [#allocation6], %s6488_s12  ;;  %s6294_s22 = scalar_lea.vmem [#allocation2], %s4970_s18 }
  0x24   : > { %5241 = vmatpush3.msra.mxu1 %v5865_v1  ;;  %5242 = vmatprep.mubr.msk.f32.mxu1 %vm5739_vm0, %v5738_v0  ;;  %s4738_s23 = sshll.u32 %s6294_s22, 4  ;;  %s6343_s19 = scalar_lea.hbm %s6484_s6, %s5105_s17  ;;  %s6337_s23 = int_to_ptr.vmem [resolvable:$true] %s4738_s23 }
  0x25   : > { %5245 = vmatprep.subr.mxu1 %v5738_v0  ;;  %5250 = vmatprep.subr.mxu0 %v5738_v0  ;;  %v761_v31 = vsel %vm760_vm4, %v759_v30, 0.0  ;;  %v719_v30 = vlaneseq  ;;  %s5614_s18 = scalar_lea.vmem %s6337_s23, 64 }
  0x26   : > { %762 = vadd.xlane.f32.xlu0 %v761_v31  ;;  %p5615_p11 = scmp.ne.s32.totalorder %s6337_s23, %s5614_s18 }
  0x27   : > { %5238 = vmatmul.mubr.msk.f32.vlgmr.msra.gmra.mrb[0].mxu0 %vm423_vm1, %v414_v2  ;;  %5243 = vmatmul.mubr.msk.f32.vlgmr.msra.gmra.mrb[4].mxu1 %vm423_vm1, %v766_v5 }
  0x28   : > { %5246 = vmatpush3.msra.mxu1 %v5869_v4  ;;  %5247 = vmatprep.mubr.msk.f32.mxu1 %vm5739_vm0, %v5738_v0  ;;  %p5616_p12 = pnand %p5615_p11, %p5834_p5 }
  0x29   : > { %5251 = vmatpush3.msra.mxu0 %v5865_v1  ;;  %5252 = vmatprep.mubr.msk.f32.mxu0 %vm5739_vm0, %v5738_v0 }
  0x2a   : > { %5255 = vmatprep.subr.mxu0 %v5738_v0  ;;  %5260 = vmatprep.subr.mxu1 %v5738_v0  ;;  %p5617_p13 = pneg %p5616_p12 }
  0x2b   : > { %5248 = vmatmul.mubr.msk.f32.vlgmr.msra.gmra.mrb[6].mxu1 %vm423_vm1, %v4994_v6  ;;  %5253 = vmatmul.mubr.msk.f32.vlgmr.msra.gmra.mrb[2].mxu0 %vm423_vm1, %v4994_v6 }
  0x2c   : > { %5256 = vmatpush3.msra.mxu0 %v5869_v4  ;;  %5257 = vmatprep.mubr.msk.f32.mxu0 %vm5739_vm0, %v5738_v0 }
  0x2d   : > { %5270 = vmatprep.subr.mxu0 %v5738_v0  ;;  %5262 = vmatprep.mubr.msk.f32.mxu1 %vm5739_vm0, %v5738_v0 }
  0x33   : > { %5258 = vmatmul.mubr.msk.f32.vlgmr.msra.gmra.mrb[2].mxu0 %vm423_vm1, %v766_v5 }
  0x34   : > { %5272 = vmatprep.mubr.msk.f32.mxu0 %vm5739_vm0, %v5738_v0 }
  0xf2   : > { %v493_v7 = vpop.f32.mrb[0].mxu1 }
  0xf3   : > { %v5224_v8 = vpop.f32.mrb[1].mxu1 }
  0xf6   : > { %v566_v9 = vpop.f32.mrb[2].mxu1 }
  0xf7   : > { %v5917_v10 = vsub.f32 %v493_v7, %v566_v9  ;;  %v5229_v11 = vpop.f32.mrb[3].mxu1 }
  0xf9   : > { %v711_v14 = vmul.f32 %v5917_v10, %v5917_v10 }
  0xfa   : > { %v5920_v12 = vpop.f32.mrb[0].mxu0  ;;  %v838_v13 = vpop.f32.mrb[4].mxu1 }
  0xfb   : > { %v712_v15 = vmul.f32 %v5920_v12, %v5920_v12  ;;  %v5239_v16 = vpop.f32.mrb[1].mxu0  ;;  %v5244_v17 = vpop.f32.mrb[5].mxu1 }
  0xfd   : > { %v5929_v18 = vadd.f32 %v712_v15, %v711_v14 }
  0xfe   : > { %v911_v19 = vpop.f32.mrb[6].mxu1 }
  0xff   : > { %v985_v20 = vsub.f32 %v838_v13, %v911_v19  ;;  %v5249_v21 = vpop.f32.mrb[7].mxu1 }
 0x101   : > { %5261 = vmatpush3.msk.msra.mxu1 %vm1060_vm2, %v985_v20  ;;  %5271 = vmatpush3.msk.msra.mxu0 %vm1060_vm2, %v985_v20 }
 0x102   : > { %5273 = vmatmul.mubr.msk.f32.vlgmr.msra.gmra.mrb[4].mxu0 %vm1056_vm3, %v5931_v22  ;;  %5263 = vmatmul.mubr.msk.f32.vlgmr.msra.gmra.mrb[8].mxu1 %vm1056_vm3, %v5933_v23 }
 0x103   : > { %5265 = vmatprep.subr.mxu1 %v5738_v0  ;;  %5275 = vmatprep.subr.mxu0 %v5738_v0 }
 0x104   : > { %5267 = vmatprep.mubr.msk.f32.mxu1 %vm5739_vm0, %v5738_v0  ;;  %5277 = vmatprep.mubr.msk.f32.mxu0 %vm5739_vm0, %v5738_v0 }
 0x106   : > { %v1052_v24 = vpop.f32.mrb[2].mxu0 }
 0x107   : > { %v5259_v25 = vpop.f32.mrb[3].mxu0  ;;  %5266 = vmatpush3.msk.msra.mxu1 %vm1060_vm2, %v1052_v24  ;;  %5276 = vmatpush3.msk.msra.mxu0 %vm1060_vm2, %v1052_v24 }
 0x108   : > { %5268 = vmatmul.mubr.msk.f32.vlgmr.msra.gmra.mrb[10].mxu1 %vm1056_vm3, %v5931_v22  ;;  %5280 = vmatprep.subr.mxu1 %v5738_v0  ;;  %v3388_v25 = vld [vmem:[%s6116_s25] sm:$0xf] }
 0x109   : > { %5290 = vmatprep.subr.mxu0 %v5738_v0  ;;  %5282 = vmatprep.mubr.msk.f32.mxu1 %vm5739_vm0, %v5738_v0 }
 0x10a   : > { %5278 = vmatmul.mubr.msk.f32.vlgmr.msra.gmra.mrb[4].mxu0 %vm1056_vm3, %v5933_v23 }
 0x10b   : > { %5292 = vmatprep.mubr.msk.f32.mxu0 %vm5739_vm0, %v5738_v0 }
 0x10e   : > { %5281 = vmatpush3.xpose.msk.msra.mxu1 %vm1056_vm3, %v1052_v24  ;;  %5291 = vmatpush3.xpose.msk.msra.mxu0 %vm1056_vm3, %v985_v20 }
 0x10f   : > { %5285 = vmatprep.subr.mxu1 %v5738_v0  ;;  %5300 = vmatprep.subr.mxu0 %v5738_v0 }
 0x111   : > { %5283 = vmatmul.mubr.msk.f32.vlgmr.msra.gmra.mrb[12].mxu1 %vm1056_vm3, %v1052_v24  ;;  %5293 = vmatmul.mubr.msk.f32.vlgmr.msra.gmra.mrb[6].mxu0 %vm1056_vm3, %v1052_v24 }
 0x112   : > { %5286 = vmatpush3.xpose.msk.msra.mxu1 %vm1056_vm3, %v1052_v24  ;;  %5287 = vmatprep.mubr.msk.f32.mxu1 %vm5739_vm0, %v5738_v0 }
 0x113   : > { %5301 = vmatpush3.msra.mxu0 %v5865_v1  ;;  %5302 = vmatprep.mubr.msk.f32.mxu0 %vm5739_vm0, %v5738_v0 }
 0x114   : > { %5295 = vmatprep.subr.mxu1 %v5738_v0  ;;  %5310 = vmatprep.subr.mxu0 %v5738_v0 }
 0x115   : > { %5288 = vmatmul.mubr.msk.f32.vlgmr.msra.gmra.mrb[14].mxu1 %vm1056_vm3, %v985_v20  ;;  %5303 = vmatmul.mubr.msk.f32.vlgmr.msra.gmra.mrb[8].mxu0 %vm423_vm1, %v1645_v26 }
 0x116   : > { %5296 = vmatpush3.xpose.msk.msra.mxu1 %vm1056_vm3, %v985_v20  ;;  %5297 = vmatprep.mubr.msk.f32.mxu1 %vm5739_vm0, %v5738_v0 }
 0x117   : > { %5311 = vmatpush3.msra.mxu0 %v5865_v1  ;;  %5312 = vmatprep.mubr.msk.f32.mxu0 %vm5739_vm0, %v5738_v0 }
 0x118   : > { %5305 = vmatprep.subr.mxu1 %v5738_v0  ;;  %5315 = vmatprep.subr.mxu0 %v5738_v0 }
 0x119   : > { %5298 = vmatmul.mubr.msk.f32.vlgmr.msra.gmra.mrb[12].mxu1 %vm1056_vm3, %v985_v20  ;;  %5313 = vmatmul.mubr.msk.f32.vlgmr.msra.gmra.mrb[10].mxu0 %vm423_vm1, %v5015_v27 }
 0x11a   : > { %5306 = vmatpush3.msra.mxu1 %v5869_v4  ;;  %5307 = vmatprep.mubr.msk.f32.mxu1 %vm5739_vm0, %v5738_v0 }
 0x11b   : > { %5316 = vmatpush3.msra.mxu0 %v5869_v4  ;;  %5317 = vmatprep.mubr.msk.f32.mxu0 %vm5739_vm0, %v5738_v0 }
 0x11c   : > { %5320 = vmatprep.subr.mxu1 %v5738_v0  ;;  %5330 = vmatprep.subr.mxu0 %v5738_v0 }
 0x11d   : > { %5308 = vmatmul.mubr.msk.f32.vlgmr.msra.gmra.mrb[16].mxu1 %vm423_vm1, %v5015_v27 }
 0x11e   : > { %5322 = vmatprep.mubr.msk.f32.mxu1 %vm5739_vm0, %v5738_v0 }
 0x121   : > { %5318 = vmatmul.mubr.msk.f32.vlgmr.msra.gmra.mrb[10].mxu0 %vm423_vm1, %v1645_v26  ;;  %v5058_v26 = vld [vmem:[%s6116_s25 + $0x8] sm:$0xf] }
 0x122   : > { %5332 = vmatprep.mubr.msk.f32.mxu0 %vm5739_vm0, %v5738_v0 }
 0x1d5   : > { %v1130_v32 = vpop.f32.mrb[8].mxu1 }
 0x1d6   : > { %v5264_v33 = vpop.f32.mrb[9].mxu1 }
 0x1db   : > { %v1206_v34 = vpop.f32.mrb[10].mxu1 }
 0x1dc   : > { %v1280_v35 = vsub.f32 %v1130_v32, %v1206_v34  ;;  %v5269_v36 = vpop.f32.mrb[11].mxu1  ;;  %v6157_v34 = vshrl.u32 %v719_v30, 7 }
 0x1dd   : > { %v1347_v37 = vpop.f32.mrb[4].mxu0 }
 0x1de   : > { %v1351_v38 = vmul.f32 %v1280_v35, %v1280_v35  ;;  %v1352_v39 = vmul.f32 %v1347_v37, %v1347_v37  ;;  %v5279_v40 = vpop.f32.mrb[5].mxu0  ;;  %v722_v35 = vand.u32 127, %v719_v30 }
 0x1e0   : > { %v1353_v41 = vadd.f32 %v1352_v39, %v1351_v38  ;;  %vm723_vm5 = vcmp.eq.s32.totalorder %v6157_v34, %v722_v35 }
 0x1e2   : > { %v1354_v42 = vsel %vm760_vm4, %v1353_v41, 0.0 }
 0x1e3   : > { %1355 = vadd.xlane.f32.xlu0 %v1354_v42 }
 0x1e4   : > { %v6007_v43 = vpop.f32.mrb[6].mxu0 }
 0x1e5   : > { %v5294_v44 = vpop.f32.mrb[7].mxu0 }
 0x1e8   : > { %v6009_v45 = vpop.f32.mrb[14].mxu1  ;;  %v1716_v46 = vpop.f32.mrb[8].mxu0 }
 0x1e9   : > { %v1642_v47 = vsub.f32 %v6007_v43, %v6009_v45  ;;  %v5289_v48 = vpop.f32.mrb[15].mxu1  ;;  %v5304_v49 = vpop.f32.mrb[9].mxu0  ;;  %v6166_v43 = vsel %vm723_vm5, 1.0, %v5738_v0 }
 0x1ea   : > { %v765_v48 = vmul.f32 0.4, %v6166_v43 }
 0x1f0   : > { %v1789_v50 = vpop.f32.mrb[16].mxu1 }
 0x1f1   : > { %v1863_v51 = vsub.f32 %v1716_v46, %v1789_v50  ;;  %v5309_v52 = vpop.f32.mrb[17].mxu1 }
 0x1f3   : > { %5321 = vmatpush3.msk.msra.mxu1 %vm1060_vm2, %v1863_v51  ;;  %5331 = vmatpush3.msk.msra.mxu0 %vm1060_vm2, %v1863_v51 }
 0x1f4   : > { %v1930_v53 = vpop.f32.mrb[10].mxu0  ;;  %5323 = vmatmul.mubr.msk.f32.vlgmr.msra.gmra.mrb[18].mxu1 %vm1056_vm3, %v5933_v23  ;;  %5325 = vmatprep.subr.mxu1 %v5738_v0 }
 0x1f5   : > { %5333 = vmatmul.mubr.msk.f32.vlgmr.msra.gmra.mrb[12].mxu0 %vm1056_vm3, %v5931_v22  ;;  %5335 = vmatprep.subr.mxu0 %v5738_v0  ;;  %v5319_v54 = vpop.f32.mrb[11].mxu0 }
 0x1f6   : > { %5326 = vmatpush3.msk.msra.mxu1 %vm1060_vm2, %v1930_v53  ;;  %5336 = vmatpush3.msk.msra.mxu0 %vm1060_vm2, %v1930_v53 }
 0x1f7   : > { %5327 = vmatprep.mubr.msk.f32.mxu1 %vm5739_vm0, %v5738_v0  ;;  %5337 = vmatprep.mubr.msk.f32.mxu0 %vm5739_vm0, %v5738_v0 }
 0x1f8   : > { %5328 = vmatmul.mubr.msk.f32.vlgmr.msra.gmra.mrb[20].mxu1 %vm1056_vm3, %v5931_v22  ;;  %5340 = vmatprep.subr.mxu1 %v5738_v0 }
 0x1f9   : > { %5350 = vmatprep.subr.mxu0 %v5738_v0  ;;  %5342 = vmatprep.mubr.msk.f32.mxu1 %vm5739_vm0, %v5738_v0 }
 0x1fd   : > { %5338 = vmatmul.mubr.msk.f32.vlgmr.msra.gmra.mrb[12].mxu0 %vm1056_vm3, %v5933_v23  ;;  %5341 = vmatpush3.xpose.msk.msra.mxu1 %vm1056_vm3, %v1930_v53 }
 0x1fe   : > { %5351 = vmatpush3.xpose.msk.msra.mxu0 %vm1056_vm3, %v1863_v51  ;;  %5345 = vmatprep.subr.mxu1 %v5738_v0 }
 0x1ff   : > { %5352 = vmatprep.mubr.msk.f32.mxu0 %vm5739_vm0, %v5738_v0  ;;  %5360 = vmatprep.subr.mxu0 %v5738_v0 }
 0x200   : > { %5343 = vmatmul.mubr.msk.f32.vlgmr.msra.gmra.mrb[12].mxu1 %vm1056_vm3, %v1930_v53 }
 0x201   : > { %5346 = vmatpush3.xpose.msk.msra.mxu1 %vm1056_vm3, %v1930_v53  ;;  %5353 = vmatmul.mubr.msk.f32.vlgmr.msra.gmra.mrb[14].mxu0 %vm1056_vm3, %v1930_v53 }
 0x202   : > { %5347 = vmatprep.mubr.msk.f32.mxu1 %vm5739_vm0, %v5738_v0  ;;  %5355 = vmatprep.subr.mxu1 %v5738_v0 }
 0x203   : > { %5361 = vmatpush3.msra.mxu0 %v5865_v1  ;;  %5362 = vmatprep.mubr.msk.f32.mxu0 %vm5739_vm0, %v5738_v0 }
 0x204   : > { %5348 = vmatmul.mubr.msk.f32.vlgmr.msra.gmra.mrb[22].mxu1 %vm1056_vm3, %v1863_v51  ;;  %5370 = vmatprep.subr.mxu0 %v5738_v0 }
 0x205   : > { %5356 = vmatpush3.xpose.msk.msra.mxu1 %vm1056_vm3, %v1863_v51  ;;  %5363 = vmatmul.mubr.msk.f32.vlgmr.msra.gmra.mrb[16].mxu0 %vm423_vm1, %v2515_v55 }
 0x206   : > { %5357 = vmatprep.mubr.msk.f32.mxu1 %vm5739_vm0, %v5738_v0  ;;  %5371 = vmatpush3.msra.mxu0 %v5865_v1 }
 0x207   : > { %5372 = vmatprep.mubr.msk.f32.mxu0 %vm5739_vm0, %v5738_v0  ;;  %5365 = vmatprep.subr.mxu1 %v5738_v0 }
 0x208   : > { %5358 = vmatmul.mubr.msk.f32.vlgmr.msra.gmra.mrb[12].mxu1 %vm1056_vm3, %v1863_v51  ;;  %5375 = vmatprep.subr.mxu0 %v5738_v0 }
 0x209   : > { %5373 = vmatmul.mubr.msk.f32.vlgmr.msra.gmra.mrb[18].mxu0 %vm423_vm1, %v5036_v56  ;;  %5366 = vmatpush3.msra.mxu1 %v5869_v4 }
 0x20a   : > { %5367 = vmatprep.mubr.msk.f32.mxu1 %vm5739_vm0, %v5738_v0  ;;  %5376 = vmatpush3.msra.mxu0 %v5869_v4 }
 0x20b   : > { %5377 = vmatprep.mubr.msk.f32.mxu0 %vm5739_vm0, %v5738_v0  ;;  %5380 = vmatprep.subr.mxu1 %v5738_v0 }
 0x20c   : > { %5368 = vmatmul.mubr.msk.f32.vlgmr.msra.gmra.mrb[24].mxu1 %vm423_vm1, %v5036_v56  ;;  %5390 = vmatprep.subr.mxu0 %v5738_v0 }
 0x20d   : > { %5382 = vmatprep.mubr.msk.f32.mxu1 %vm5739_vm0, %v5738_v0 }
 0x211   : > { %5378 = vmatmul.mubr.msk.f32.vlgmr.msra.gmra.mrb[18].mxu0 %vm423_vm1, %v2515_v55 }
 0x212   : > { %5392 = vmatprep.mubr.msk.f32.mxu0 %vm5739_vm0, %v5738_v0 }
 0x2c7   : > { %v2003_v57 = vpop.f32.mrb[18].mxu1 }
 0x2c8   : > { %v5324_v58 = vpop.f32.mrb[19].mxu1 }
 0x2cb   : > { %v2076_v59 = vpop.f32.mrb[20].mxu1 }
 0x2cc   : > { %v2150_v60 = vsub.f32 %v2003_v57, %v2076_v59  ;;  %v5329_v61 = vpop.f32.mrb[21].mxu1  ;;  %v4035_v59 = vld [vmem:[%s6116_s25 + $0x4] sm:$0xf] }
 0x2ce   : > { %v2221_v63 = vmul.f32 %v2150_v60, %v2150_v60  ;;  %v5073_v60 = vld [vmem:[%s6116_s25 + $0xc] sm:$0xf] }
 0x2d0   : > { %v2217_v62 = vpop.f32.mrb[12].mxu0 }
 0x2d1   : > { %v2222_v2 = vmul.f32 %v2217_v62, %v2217_v62  ;;  %v5339_v3 = vpop.f32.mrb[13].mxu0 }
 0x2d3   : > { %v2223_v5 = vadd.f32 %v2222_v2, %v2221_v63 }
 0x2d4   : > { %v2438_v6 = vpop.f32.mrb[14].mxu0 }
 0x2d5   : > { %v5354_v7 = vpop.f32.mrb[15].mxu0  ;;  %v2224_v8 = vsel %vm760_vm4, %v2223_v5, 0.0 }
 0x2d6   : > { %2225 = vadd.xlane.f32.xlu1 %v2224_v8  ;;  %v4400_v8 = vrot.slane %v5931_v22, 1 }
 0x2d7   : > { %v2368_v9 = vpop.f32.mrb[22].mxu1 }
 0x2d8   : > { %v2512_v11 = vsub.f32 %v2438_v6, %v2368_v9  ;;  %v5349_v13 = vpop.f32.mrb[23].mxu1  ;;  %v2586_v14 = vpop.f32.mrb[16].mxu0  ;;  %v4324_v9 = vrot.slane %v5933_v23, 1 }
 0x2d9   : > { %v5364_v15 = vpop.f32.mrb[17].mxu0 }
 0x2da   : > { %v6083_v16 = vadd.f32 %v2512_v11, %v1642_v47 }
 0x2df   : > { %v2659_v17 = vpop.f32.mrb[24].mxu1 }
 0x2e0   : > { %v2733_v19 = vsub.f32 %v2586_v14, %v2659_v17  ;;  %v5369_v20 = vpop.f32.mrb[25].mxu1 }
 0x2e2   : > { %5381 = vmatpush3.msk.msra.mxu1 %vm1060_vm2, %v2733_v19  ;;  %5391 = vmatpush3.msk.msra.mxu0 %vm1060_vm2, %v2733_v19 }
 0x2e3   : > { %5383 = vmatmul.mubr.msk.f32.vlgmr.msra.gmra.mrb[26].mxu1 %vm1056_vm3, %v5933_v23  ;;  %5393 = vmatmul.mubr.msk.f32.vlgmr.msra.gmra.mrb[20].mxu0 %vm1056_vm3, %v5931_v22 }
 0x2e4   : > { %v2800_v21 = vpop.f32.mrb[18].mxu0  ;;  %5385 = vmatprep.subr.mxu1 %v5738_v0  ;;  %5395 = vmatprep.subr.mxu0 %v5738_v0 }
 0x2e5   : > { %v5379_v24 = vpop.f32.mrb[19].mxu0  ;;  %5386 = vmatpush3.msk.msra.mxu1 %vm1060_vm2, %v2800_v21  ;;  %5396 = vmatpush3.msk.msra.mxu0 %vm1060_vm2, %v2800_v21 }
 0x2e6   : > { %5387 = vmatprep.mubr.msk.f32.mxu1 %vm5739_vm0, %v5738_v0  ;;  %5397 = vmatprep.mubr.msk.f32.mxu0 %vm5739_vm0, %v5738_v0 }
 0x2e7   : > { %5388 = vmatmul.mubr.msk.f32.vlgmr.msra.gmra.mrb[28].mxu1 %vm1056_vm3, %v5931_v22  ;;  %5400 = vmatprep.subr.mxu1 %v5738_v0 }
 0x2e8   : > { %5410 = vmatprep.subr.mxu0 %v5738_v0  ;;  %5402 = vmatprep.mubr.msk.f32.mxu1 %vm5739_vm0, %v5738_v0 }
 0x2eb   : > { %5398 = vmatmul.mubr.msk.f32.vlgmr.msra.gmra.mrb[20].mxu0 %vm1056_vm3, %v5933_v23 }
 0x2ec   : > { %5401 = vmatpush3.xpose.msk.msra.mxu1 %vm1056_vm3, %v2800_v21  ;;  %5411 = vmatpush3.xpose.msk.msra.mxu0 %vm1056_vm3, %v2733_v19 }
 0x2ed   : > { %5412 = vmatprep.mubr.msk.f32.mxu0 %vm5739_vm0, %v5738_v0  ;;  %5405 = vmatprep.subr.mxu1 %v5738_v0 }
 0x2ee   : > { %5420 = vmatprep.subr.mxu0 %v5738_v0 }
 0x2ef   : > { %5403 = vmatmul.mubr.msk.f32.vlgmr.msra.gmra.mrb[12].mxu1 %vm1056_vm3, %v2800_v21  ;;  %5413 = vmatmul.mubr.msk.f32.vlgmr.msra.gmra.mrb[22].mxu0 %vm1056_vm3, %v2800_v21 }
 0x2f0   : > { %5406 = vmatpush3.xpose.msk.msra.mxu1 %vm1056_vm3, %v2800_v21  ;;  %5407 = vmatprep.mubr.msk.f32.mxu1 %vm5739_vm0, %v5738_v0 }
 0x2f1   : > { %5421 = vmatpush3.msra.mxu0 %v5865_v1  ;;  %5422 = vmatprep.mubr.msk.f32.mxu0 %vm5739_vm0, %v5738_v0 }
 0x2f2   : > { %5415 = vmatprep.subr.mxu1 %v5738_v0  ;;  %5430 = vmatprep.subr.mxu0 %v5738_v0 }
 0x2f3   : > { %5408 = vmatmul.mubr.msk.f32.vlgmr.msra.gmra.mrb[30].mxu1 %vm1056_vm3, %v2733_v19  ;;  %5423 = vmatmul.mubr.msk.f32.vlgmr.msra.gmra.mrb[24].mxu0 %vm423_vm1, %v3388_v25 }
 0x2f4   : > { %5416 = vmatpush3.xpose.msk.msra.mxu1 %vm1056_vm3, %v2733_v19  ;;  %5417 = vmatprep.mubr.msk.f32.mxu1 %vm5739_vm0, %v5738_v0 }
 0x2f5   : > { %5431 = vmatpush3.msra.mxu0 %v5865_v1  ;;  %5432 = vmatprep.mubr.msk.f32.mxu0 %vm5739_vm0, %v5738_v0 }
 0x2f6   : > { %5425 = vmatprep.subr.mxu1 %v5738_v0  ;;  %5435 = vmatprep.subr.mxu0 %v5738_v0 }
 0x2f7   : > { %5418 = vmatmul.mubr.msk.f32.vlgmr.msra.gmra.mrb[12].mxu1 %vm1056_vm3, %v2733_v19  ;;  %5433 = vmatmul.mubr.msk.f32.vlgmr.msra.gmra.mrb[26].mxu0 %vm423_vm1, %v5058_v26 }
 0x2f8   : > { %5426 = vmatpush3.msra.mxu1 %v5869_v4  ;;  %5427 = vmatprep.mubr.msk.f32.mxu1 %vm5739_vm0, %v5738_v0 }
 0x2f9   : > { %5436 = vmatpush3.msra.mxu0 %v5869_v4  ;;  %5437 = vmatprep.mubr.msk.f32.mxu0 %vm5739_vm0, %v5738_v0 }
 0x2fa   : > { %5440 = vmatprep.subr.mxu1 %v5738_v0  ;;  %5450 = vmatprep.subr.mxu0 %v5738_v0 }
 0x2fb   : > { %5428 = vmatmul.mubr.msk.f32.vlgmr.msra.gmra.mrb[32].mxu1 %vm423_vm1, %v5058_v26 }
 0x2fc   : > { %5442 = vmatprep.mubr.msk.f32.mxu1 %vm5739_vm0, %v5738_v0 }
 0x2ff   : > { %5438 = vmatmul.mubr.msk.f32.vlgmr.msra.gmra.mrb[26].mxu0 %vm423_vm1, %v3388_v25 }
 0x300   : > { %5452 = vmatprep.mubr.msk.f32.mxu0 %vm5739_vm0, %v5738_v0 }
 0x3b6   : > { %v2873_v27 = vpop.f32.mrb[26].mxu1 }
 0x3b7   : > { %v5384_v28 = vpop.f32.mrb[27].mxu1 }
 0x3ba   : > { %v2946_v29 = vpop.f32.mrb[28].mxu1 }
 0x3bb   : > { %v3020_v31 = vsub.f32 %v2873_v27, %v2946_v29  ;;  %v5389_v32 = vpop.f32.mrb[29].mxu1 }
 0x3bc   : > { %v763_v32 = vpop.xlane.xlu0 %762 }
 0x3bd   : > { %v3091_v36 = vmul.f32 %v3020_v31, %v3020_v31  ;;  %v5740_v31 = vmov 0  }
 0x3be   : > { %v3087_v33 = vpop.f32.mrb[20].mxu0  ;;  %5590 = vset.pattern.permute.xlu1 %v5740_v31  ;;  %5591 = vset.pattern.permute.xlu0 %v5740_v31 }
 0x3bf   : > { %v3092_v37 = vmul.f32 %v3087_v33, %v3087_v33  ;;  %v5399_v38 = vpop.f32.mrb[21].mxu0  ;;  %v764_v33 = vmul.f32 0.4, %v763_v32 }
 0x3c0   : > { %v1356_v35 = vpop.xlane.xlu0 %1355 }
 0x3c1   : > { %v3093_v39 = vadd.f32 %v3092_v37, %v3091_v36  ;;  %v2226_v36 = vpop.xlane.xlu1 %2225  ;;  %v1357_v37 = vadd.f32 %v1356_v35, %v764_v33 }
 0x3c2   : > { %v3308_v40 = vpop.f32.mrb[22].mxu0 }
 0x3c3   : > { %v5414_v41 = vpop.f32.mrb[23].mxu0  ;;  %v3094_v42 = vsel %vm760_vm4, %v3093_v39, 0.0  ;;  %v2227_v39 = vadd.f32 %v2226_v36, %v1357_v37 }
 0x3c4   : > { %3095 = vadd.xlane.f32.xlu1 %v3094_v42 }
 0x3c6   : > { %v3238_v44 = vpop.f32.mrb[30].mxu1  ;;  %v3460_v45 = vpop.f32.mrb[24].mxu0 }
 0x3c7   : > { %v3382_v46 = vsub.f32 %v3308_v40, %v3238_v44  ;;  %v5409_v47 = vpop.f32.mrb[31].mxu1  ;;  %v5424_v49 = vpop.f32.mrb[25].mxu0 }
 0x3c9   : > { %v3384_v50 = vadd.f32 %v3382_v46, %v6083_v16 }
 0x3ca   : > { %v3378_v51 = vpop.f32.mrb[12].mxu1 }
 0x3cb   : > { %5057 = vst.msk [vmem:[%s6172_s13 + $0x4] sm:$0xf] %vm714_vm6, %v3384_v50  ;;  %v5500_v52 = vadd.f32 %v3378_v51, %v765_v48  ;;  %v5419_v53 = vpop.f32.mrb[13].mxu1 }
 0x3cd   : > { %3385 = vst.msk [vmem:[%s6172_s13] sm:$0xf] %vm714_vm6, %v5500_v52 }
 0x3ce   : > { %v3533_v54 = vpop.f32.mrb[32].mxu1 }
 0x3cf   : > { %v6178_v55 = vsub.f32 %v3460_v45, %v3533_v54  ;;  %v5429_v56 = vpop.f32.mrb[33].mxu1 }
 0x3d1   : > { %5441 = vmatpush3.msk.msra.mxu1 %vm1060_vm2, %v6178_v55  ;;  %5451 = vmatpush3.msk.msra.mxu0 %vm1060_vm2, %v6178_v55 }
 0x3d2   : > { %v6184_v57 = vpop.f32.mrb[26].mxu0  ;;  %5443 = vmatmul.mubr.msk.f32.vlgmr.msra.gmra.mrb[34].mxu1 %vm1056_vm3, %v5933_v23  ;;  %5445 = vmatprep.subr.mxu1 %v5738_v0 }
 0x3d3   : > { %5453 = vmatmul.mubr.msk.f32.vlgmr.msra.gmra.mrb[28].mxu0 %vm1056_vm3, %v5931_v22  ;;  %5455 = vmatprep.subr.mxu0 %v5738_v0  ;;  %v5439_v58 = vpop.f32.mrb[27].mxu0 }
 0x3d4   : > { %5446 = vmatpush3.msk.msra.mxu1 %vm1060_vm2, %v6184_v57  ;;  %5456 = vmatpush3.msk.msra.mxu0 %vm1060_vm2, %v6184_v57 }
 0x3d5   : > { %5447 = vmatprep.mubr.msk.f32.mxu1 %vm5739_vm0, %v5738_v0  ;;  %5460 = vmatprep.subr.mxu1 %v5738_v0 }
 0x3d6   : > { %5448 = vmatmul.mubr.msk.f32.vlgmr.msra.gmra.mrb[36].mxu1 %vm1056_vm3, %v5931_v22  ;;  %5457 = vmatprep.mubr.msk.f32.mxu0 %vm5739_vm0, %v5738_v0 }
 0x3d7   : > { %5461 = vmatpush3.msra.mxu1 %v5865_v1  ;;  %5462 = vmatprep.mubr.msk.f32.mxu1 %vm5739_vm0, %v5738_v0 }
 0x3d8   : > { %5465 = vmatprep.subr.mxu1 %v5738_v0  ;;  %5470 = vmatprep.subr.mxu0 %v5738_v0 }
 0x3da   : > { %5463 = vmatmul.mubr.msk.f32.vlgmr.msra.gmra.mrb[38].mxu1 %vm423_vm1, %v4035_v59 }
 0x3db   : > { %5458 = vmatmul.mubr.msk.f32.vlgmr.msra.gmra.mrb[28].mxu0 %vm1056_vm3, %v5933_v23  ;;  %5466 = vmatpush3.msra.mxu1 %v5869_v4 }
 0x3dc   : > { %5467 = vmatprep.mubr.msk.f32.mxu1 %vm5739_vm0, %v5738_v0  ;;  %5471 = vmatpush3.msra.mxu0 %v5865_v1 }
 0x3dd   : > { %5472 = vmatprep.mubr.msk.f32.mxu0 %vm5739_vm0, %v5738_v0  ;;  %5475 = vmatprep.subr.mxu0 %v5738_v0 }
 0x3de   : > { %5468 = vmatmul.mubr.msk.f32.vlgmr.msra.gmra.mrb[40].mxu1 %vm423_vm1, %v5073_v60  ;;  %5480 = vmatprep.subr.mxu1 %v5738_v0 }
 0x3df   : > { %5473 = vmatmul.mubr.msk.f32.vlgmr.msra.gmra.mrb[30].mxu0 %vm423_vm1, %v5073_v60  ;;  %5482 = vmatprep.mubr.msk.f32.mxu1 %vm5739_vm0, %v5738_v0 }
 0x3e0   : > { %5476 = vmatpush3.msra.mxu0 %v5869_v4  ;;  %5477 = vmatprep.mubr.msk.f32.mxu0 %vm5739_vm0, %v5738_v0 }
 0x3e1   : > { %5490 = vmatprep.subr.mxu0 %v5738_v0 }
 0x3e7   : > { %5478 = vmatmul.mubr.msk.f32.vlgmr.msra.gmra.mrb[30].mxu0 %vm423_vm1, %v4035_v59 }
 0x3e8   : > { %5492 = vmatprep.mubr.msk.f32.mxu0 %vm5739_vm0, %v5738_v0 }
 0x451   : > { %v3096_v38 = vpop.xlane.xlu1 %3095 }
 0x452   : > { %v3097_v41 = vadd.f32 %v3096_v38, %v2227_v39  ;;  %v730_v38 = vmul.f32 %v6166_v43, %v5920_v12 }
 0x454   : > { %v4642_v54 = vrot.slane %v3097_v41, 1 }
 0x4a5   : > { %v3747_v1 = vpop.f32.mrb[34].mxu1 }
 0x4a6   : > { %v5444_v61 = vpop.f32.mrb[35].mxu1 }
 0x4a9   : > { %v3820_v62 = vpop.f32.mrb[36].mxu1 }
 0x4aa   : > { %v6232_v63 = vsub.f32 %v3747_v1, %v3820_v62  ;;  %v5449_v2 = vpop.f32.mrb[37].mxu1 }
 0x4ac   : > { %v3965_v26 = vmul.f32 %v6232_v63, %v6232_v63 }
 0x4ad   : > { %v4106_v3 = vpop.f32.mrb[38].mxu1 }
 0x4ae   : > { %v6234_v5 = vpop.f32.mrb[28].mxu0  ;;  %v5464_v4 = vpop.f32.mrb[39].mxu1 }
 0x4af   : > { %v5459_v6 = vpop.f32.mrb[29].mxu0  ;;  %v3966_v24 = vmul.f32 %v6234_v5, %v6234_v5 }
 0x4b1   : > { %v4179_v7 = vpop.f32.mrb[40].mxu1  ;;  %v3967_v29 = vadd.f32 %v3966_v24, %v3965_v26 }
 0x4b2   : > { %v6238_v11 = vsub.f32 %v4106_v3, %v4179_v7  ;;  %v5469_v13 = vpop.f32.mrb[41].mxu1 }
 0x4b3   : > { %v3969_v30 = vsel %vm3968_vm7, %v3967_v29, 0.0 }
 0x4b4   : > { %5481 = vmatpush3.msk.msra.mxu1 %vm1060_vm2, %v6238_v11  ;;  %5491 = vmatpush3.msk.msra.mxu0 %vm1060_vm2, %v6238_v11 }
 0x4b5   : > { %5493 = vmatmul.mubr.msk.f32.vlgmr.msra.gmra.mrb[32].mxu0 %vm1056_vm3, %v4400_v8  ;;  %5483 = vmatmul.mubr.msk.f32.vlgmr.msra.gmra.mrb[42].mxu1 %vm1056_vm3, %v4324_v9 }
 0x4b6   : > { %5485 = vmatprep.subr.mxu1 %v5738_v0  ;;  %5495 = vmatprep.subr.mxu0 %v5738_v0 }
 0x4b7   : > { %5487 = vmatprep.mubr.msk.f32.mxu1 %vm5739_vm0, %v5738_v0  ;;  %5497 = vmatprep.mubr.msk.f32.mxu0 %vm5739_vm0, %v5738_v0 }
 0x4ba   : > { %v6252_v22 = vpop.f32.mrb[30].mxu0 }
 0x4bb   : > { %v5479_v23 = vpop.f32.mrb[31].mxu0  ;;  %5486 = vmatpush3.msk.msra.mxu1 %vm1060_vm2, %v6252_v22  ;;  %5496 = vmatpush3.msk.msra.mxu0 %vm1060_vm2, %v6252_v22 }
 0x4bc   : > { %5488 = vmatmul.mubr.msk.f32.vlgmr.msra.gmra.mrb[44].mxu1 %vm1056_vm3, %v4400_v8 }
 0x4bd   : > { %5498 = vmatmul.mubr.msk.f32.vlgmr.msra.gmra.mrb[32].mxu0 %vm1056_vm3, %v4324_v9  ;;  %v6289_v9 = vsub.s32 0, %v6157_v34 }
 0x588   : > { %v4396_v14 = vpop.f32.mrb[42].mxu1 }
 0x589   : > { %v5484_v15 = vpop.f32.mrb[43].mxu1 }
 0x58f   : > { %v4472_v16 = vpop.f32.mrb[44].mxu1 }
 0x590   : > { %v6260_v17 = vsub.f32 %v4396_v14, %v4472_v16  ;;  %v6262_v19 = vpop.f32.mrb[32].mxu0  ;;  %v5489_v0 = vpop.f32.mrb[45].mxu1 }
 0x591   : > { %v4618_v20 = vmul.f32 %v6262_v19, %v6262_v19  ;;  %v5499_v21 = vpop.f32.mrb[33].mxu0 }
 0x592   : > { %v4617_v25 = vmul.f32 %v6260_v17, %v6260_v17 }
 0x594   : > { %v4619_v27 = vadd.f32 %v4618_v20, %v4617_v25 }
 0x596   : > { %v4620_v28 = vsel %vm3968_vm7, %v4619_v27, 0.0 }
 0x597   : > { %4621 = vadd.xlane.f32.xlu0 %v4620_v28 }
 0x59b   : > { %3970 = vadd.xlane.f32.xlu0 %v3969_v30 }
 0x624   : > { %v4622_v40 = vpop.xlane.xlu0 %4621 }
 0x625   : > { %v4624_v42 = vrot.slane %v4622_v40, 7 }
 0x627   : > { %v4626_v44 = vsub.f32 %v3097_v41, %v4624_v42 }
 0x628   : > { %v3971_v45 = vpop.xlane.xlu0 %3970 }
 0x629   : > { %v4628_v46 = vrot.slane %v4626_v44, 1  ;;  %v3972_v47 = vsub.f32 %v3097_v41, %v3971_v45 }
 0x62b   : > { %5592 = vrcp.f32 %v4628_v46 }
 0x62c   : > { %5594 = vrcp.f32 %v3972_v47 }
 0x635   : > { %v5593_v48 = vpop.eup %5592 }
 0x636   : > { %v5595_v49 = vpop.eup %5594  ;;  %v4631_v50 = vmul.f32 %v5593_v48, %v4622_v40  ;;  %v731_v40 = vsel %vm714_vm6, %v730_v38, 0.0 }
 0x637   : > { %v3974_v51 = vmul.f32 %v5595_v49, %v3971_v45 }
 0x638   : > { %4632 = vst.msk [vmem:[%s6278_s21 + $0xd] sm:$0x1] %vm3975_vm8, %v4631_v50  ;;  %v4633_v52 = vadd.f32 1.0, %v4631_v50 }
 0x639   : > { %3976 = vst.msk [vmem:[%s6278_s21 + $0xc] sm:$0x1] %vm3975_vm8, %v3974_v51  ;;  %v3977_v53 = vadd.f32 1.0, %v3974_v51 }
 0x63a   : > { %5596 = vrsqrt.f32 %v4633_v52  ;;  %vm4636_vm9 = vcmp.eq.f32.partialorder %v4633_v52, inf  ;;  %v4639_v60 = vand.u32 2147483648, %v4633_v52  ;;  %vm4638_vm10 = vcmp.eq.f32.partialorder %v4633_v52, 0.0 }
 0x63b   : > { %5598 = vrsqrt.f32 %v3977_v53  ;;  %vm3980_vm11 = vcmp.eq.f32.partialorder %v3977_v53, inf  ;;  %v3983_v62 = vand.u32 2147483648, %v3977_v53  ;;  %vm3982_vm12 = vcmp.eq.f32.partialorder %v3977_v53, 0.0 }
 0x63c   : > { %5600 = vrcp.f32 %v4642_v54 }
 0x63d   : > { %5602 = vrcp.f32 %v3097_v41  ;;  %v715_v41 = vsel %vm714_vm6, %v5929_v18, 0.0 }
 0x644   : > { %v5597_v56 = vpop.eup %5596 }
 0x645   : > { %v5599_v58 = vpop.eup %5598  ;;  %v4635_v59 = vmul.f32 %v5597_v56, %v4633_v52 }
 0x646   : > { %v3979_v1 = vmul.f32 %v5599_v58, %v3977_v53  ;;  %v5601_v2 = vpop.eup %5600 }
 0x647   : > { %v4637_v61 = vsel %vm4636_vm9, %v4633_v52, %v4635_v59  ;;  %v5603_v6 = vpop.eup %5602 }
 0x648   : > { %v6282_v3 = vsel %vm4638_vm10, %v4639_v60, %v4637_v61  ;;  %v3981_v4 = vsel %vm3980_vm11, %v3977_v53, %v3979_v1 }
 0x649   : > { %v4645_v7 = vmul.f32 %v5601_v2, %v6282_v3  ;;  %v6286_v8 = vsel %vm3982_vm12, %v3983_v62, %v3981_v4 }
 0x64a   : > { %v3986_v13 = vmul.f32 %v5603_v6, %v6286_v8 }
 0x64b   : > { %4648 = vperm.xlu1 %5590, %v4645_v7  }
 0x64c   : > { %v3987_v23 = vmul.f32 %v3986_v13, %v6232_v63  ;;  %v3988_v14 = vmul.f32 %v3986_v13, %v6234_v5 }
 0x64e   : > { %v3992_v15 = vmul.f32 %v3987_v23, %v3987_v23  ;;  %v3993_v16 = vmul.f32 %v3988_v14, %v3988_v14  ;;  %3989 = vst.msk [vmem:[%s6294_s22] sm:$0x1] %vm3968_vm7, %v3987_v23  ;;  %5071 = vst.msk [vmem:[%s6294_s22 + $0x2] sm:$0x1] %vm3968_vm7, %v3988_v14  ;;  %v4003_v34 = vrot.slane %v3988_v14, %v6289_v9 }
 0x64f   : > { %v4015_v0 = vrot.slane %v3987_v23, %v6289_v9 }
 0x650   : > { %v3994_v20 = vadd.f32 %v3993_v16, %v3992_v15  ;;  %v4004_v63 = vmul.f32 %v4003_v34, %v6184_v57  ;;  %v4008_v42 = vmul.f32 %v4003_v34, %v6178_v55 }
 0x651   : > { %v4016_v5 = vmul.f32 %v4015_v0, %v6184_v57  ;;  %v4020_v44 = vmul.f32 %v4015_v0, %v6178_v55 }
 0x652   : > { %v4009_v12 = vsel %vm714_vm6, %v4008_v42, 0.0 }
 0x653   : > { %v4021_v18 = vsel %vm714_vm6, %v4020_v44, 0.0 }
 0x6ca   : > { %v4649_v21 = vpop.permute.xlu1 %4648 }
 0x6cb   : > { %v4651_v24 = vmul.f32 %v4649_v21, %v6260_v17  ;;  %v4652_v25 = vmul.f32 %v4649_v21, %v6262_v19 }
 0x6cd   : > { %4653 = vst.msk [vmem:[%s6294_s22 + $0x1] sm:$0x1] %vm3968_vm7, %v4651_v24  ;;  %5086 = vst.msk [vmem:[%s6294_s22 + $0x3] sm:$0x1] %vm3968_vm7, %v4652_v25  ;;  %v4678_v26 = vrot.slane %v4651_v24, %v6289_v9  ;;  %v4655_v27 = vmul.f32 %v4651_v24, %v4651_v24  ;;  %v4656_v28 = vmul.f32 %v4652_v25, %v4652_v25  ;;  %s5741_s22 = smov [#allocation2]  }
 0x6ce   : > { %v4666_v29 = vrot.slane %v4652_v25, %v6289_v9  ;;  %s5618_s10 = sshll.u32 %s5741_s22, 4  ;;  %s5619_s10 = int_to_ptr.vmem [resolvable:$false] %s5618_s10 }
 0x6cf   : > { %v4679_v30 = vmul.f32 %v4678_v26, %v6252_v22  ;;  %v4657_v31 = vadd.f32 %v4656_v28, %v4655_v27  ;;  %v4683_v36 = vmul.f32 %v4678_v26, %v6238_v11  ;;  %s5620_s12 = scalar_lea.vmem %s5619_s10, 128  ;;  %p5621_p0 = scmp.lt.s32.totalorder %s6337_s23, %s5619_s10 }
 0x6d0   : > { %v4667_v57 = vmul.f32 %v4666_v29, %v6252_v22  ;;  %v4671_v33 = vmul.f32 %v4666_v29, %v6238_v11  ;;  %v726_v22 = vmul.f32 %v6166_v43, %v5917_v10  ;;  %v3995_v11 = vsel %vm3968_vm7, %v3994_v20, 0.0  ;;  %p5622_p1 = scmp.lt.s32.totalorder %s5620_s12, %s5614_s18 }
 0x6d1   : > { %v4680_v32 = vsel %vm714_vm6, %v4679_v30, 0.0  ;;  %v4658_v17 = vsel %vm3968_vm7, %v4657_v31, 0.0  ;;  %v4684_v37 = vsel %vm714_vm6, %v4683_v36, 0.0  ;;  %v4005_v10 = vsel %vm714_vm6, %v4004_v63, 0.0 }
 0x6d2   : > { %4681 = vadd.xlane.f32.xlu1 %v4680_v32  ;;  %4659 = vadd.xlane.f32.xlu0 %v4658_v17  ;;  %v4668_v19 = vsel %vm714_vm6, %v4667_v57, 0.0  ;;  %v4672_v35 = vsel %vm714_vm6, %v4671_v33, 0.0  ;;  %v727_v39 = vsel %vm714_vm6, %v726_v22, 0.0  ;;  %v4017_v43 = vsel %vm714_vm6, %v4016_v5, 0.0  ;;  %p5623_p2 = por %p5622_p1, %p5621_p0 }
 0x6d4   : > { %p5624_p3 = pnand %p5623_p2, %p5617_p13 }
 0x6d6   : > { %4669 = vadd.xlane.f32.xlu0 %v4668_v19 }
 0x6da   : > { %4673 = vadd.xlane.f32.xlu0 %v4672_v35 }
 0x6de   : > { %4685 = vadd.xlane.f32.xlu0 %v4684_v37 }
 0x6e2   : > { %728 = vadd.xlane.f32.xlu0 %v727_v39 }
 0x6e6   : > { %732 = vadd.xlane.f32.xlu0 %v731_v40 }
 0x6ea   : > { %716 = vadd.xlane.f32.xlu0 %v715_v41 }
 0x6ee   : > { %3996 = vadd.xlane.f32.xlu0 %v3995_v11 }
 0x6f2   : > { %4006 = vadd.xlane.f32.xlu0 %v4005_v10 }
 0x6f6   : > { %4010 = vadd.xlane.f32.xlu0 %v4009_v12 }
 0x6fa   : > { %4018 = vadd.xlane.f32.xlu0 %v4017_v43 }
 0x6fe   : > { %4022 = vadd.xlane.f32.xlu0 %v4021_v18 }
 0x75f   : > { %v4660_v45 = vpop.xlane.xlu0 %4659 }
 0x760   : > { %5604 = vrcp.f32 %v4660_v45 }
 0x763   : > { %v4670_v46 = vpop.xlane.xlu0 %4669 }
 0x767   : > { %v4674_v47 = vpop.xlane.xlu0 %4673 }
 0x76a   : > { %v5605_v55 = vpop.eup %5604 }
 0x76b   : > { %v4662_v48 = vmul.f32 %v5605_v55, %v6282_v3  ;;  %v4686_v49 = vpop.xlane.xlu0 %4685 }
 0x76c   : > { %5627 = shalt.err (!%p5624_p3)
}
 0x76d   : > { %s5628_s17 = scalar_lea.hbm %s6343_s19, 64  ;;  %s5632_s22 = scalar_lea.hbm %s6484_s6, 128 }
 0x76e   : > { %p5629_p4 = scmp.ne.s32.totalorder %s6343_s19, %s5628_s17  ;;  %p5633_p9 = scmp.lt.u32.totalorder %s6343_s19, %s6484_s6 }
 0x76f   : > { %p5634_p10 = scmp.lt.u32.totalorder %s5632_s22, %s5628_s17  ;;  %p5636_p12 = scmp.lt.u32.totalorder %s5628_s17, %s6343_s19 }
 0x770   : > { %p5630_p7 = pnand %p5629_p4, %p5834_p5 }
 0x771   : > { %p5635_p11 = por %p5634_p10, %p5633_p9 }
 0x772   : > { %p5631_p8 = pneg %p5630_p7 }
 0x773   : > { %p5637_p13 = por %p5636_p12, %p5635_p11 }
 0x775   : > { %p5638_p0 = pnand %p5637_p13, %p5631_p8 }
 0x777   : > { %5641 = shalt.err (!%p5638_p0)
}
 0x778   : > { %s5742_s12 = smov 32   ;;  %s5743_s18 = smov 2   ;;  %v4682_v50 = vpop.xlane.xlu1 %4681  ;;  %v4687_v51 = vadd.f32 %v4686_v49, %v4670_v46  ;;  %v4692_v52 = vrot.slane %v4662_v48, %v6289_v9  ;;  %v729_v58 = vpop.xlane.xlu0 %728  ;;  %vm751_vm13 = vcmask 3072   ;;  %vm4698_vm0 = vcmask 11272  }
 0x779   : > { %s6493_s0 = scalar_lea.sflag [#allocation3], %s6160_s26  ;;  %v4688_v53 = vsub.f32 %v4682_v50, %v4674_v47  ;;  %s5744_s20 = smov 1   ;;  %v734_v1 = vmul.f32 %v729_v58, %v729_v58 }
 0x77a   : > { %5533 = dma.vmem_to_hbm [thread:$0]  (%p5834_p5), %s6337_s23, 64, %s6343_s19, %s6493_s0, %s5742_s12, %s5742_s12, %s5743_s18   ;;  %v4693_v56 = vmul.f32 %v4692_v52, %v4687_v51 }
 0x77b   : > { %v4700_v54 = vmul.f32 %v4692_v52, %v4688_v53  ;;  %s6494_s0 = sshll.u32 %s6160_s26, 3  ;;  %s4716_s26 = sand.u32 1, %s5815_s9  }
 0x77c   : > { %4695 = vrot.lane.b32.xlu1 %v4693_v56, %s5744_s20  ;;  %v733_v59 = vpop.xlane.xlu0 %732  ;;  %s6377_s23 = scalar_lea.vmem [#allocation4], %s6494_s0  ;;  %s5106_s19 = sshll.u32 %s5815_s9, 7 }
 0x77d   : > { %4702 = vrot.lane.b32.xlu0 %v4700_v54, %s5744_s20  ;;  %v735_v60 = vmul.f32 %v733_v59, %v733_v59  ;;  %s4754_s17 = sshll.u32 %s6377_s23, 4  ;;  %s4770_s24 = sshll.u32 %s6172_s13, 4  ;;  %s6396_s17 = int_to_ptr.vmem [resolvable:$true] %s4754_s17  ;;  %s6398_s24 = int_to_ptr.vmem [resolvable:$true] %s4770_s24 }
 0x77e   : > { %s6394_s10 = scalar_lea.hbm %s6485_s7, %s5106_s19  ;;  %s6403_s9 = scalar_lea.hbm %s6486_s8, %s5106_s19 }
 0x77f   : > { %v736_v62 = vadd.f32 %v735_v60, %v734_v1  ;;  %s6407_s13 = scalar_lea.sflag [#allocation5], %s4716_s26  ;;  %s5642_s18 = scalar_lea.vmem %s6396_s17, 128 }
 0x780   : > { %v717_v61 = vpop.xlane.xlu0 %716  ;;  %p5643_p1 = scmp.ne.s32.totalorder %s6396_s17, %s5642_s18  ;;  %s5745_s20 = smov [#allocation4]  }
 0x781   : > { %v718_v2 = vadd.f32 0.1, %v717_v61  ;;  %s5646_s0 = sshll.u32 %s5745_s20, 4  ;;  %s5647_s0 = int_to_ptr.vmem [resolvable:$false] %s5646_s0 }
 0x782   : > { %p5644_p2 = pnand %p5643_p1, %p5834_p5  ;;  %s5648_s25 = scalar_lea.vmem %s5647_s0, 256 }
 0x783   : > { %v737_v3 = vsub.f32 %v718_v2, %v736_v62  ;;  %p5649_p4 = scmp.lt.s32.totalorder %s6396_s17, %s5647_s0  ;;  %p5650_p7 = scmp.lt.s32.totalorder %s5648_s25, %s5642_s18 }
 0x784   : > { %v3997_v4 = vpop.xlane.xlu0 %3996  ;;  %p5645_p3 = pneg %p5644_p2 }
 0x785   : > { %5606 = vrcp.f32 %v737_v3  ;;  %p5651_p8 = por %p5650_p7, %p5649_p4 }
 0x786   : > { %5608 = vrcp.f32 %v3997_v4 }
 0x787   : > { %p5652_p9 = pnand %p5651_p8, %p5645_p3 }
 0x788   : > { %v4007_v6 = vpop.xlane.xlu0 %4006 }
 0x78c   : > { %v4011_v7 = vpop.xlane.xlu0 %4010 }
 0x78f   : > { %v5607_v13 = vpop.eup %5606 }
 0x790   : > { %v5609_v23 = vpop.eup %5608  ;;  %v739_v14 = vmul.f32 %v5607_v13, %v718_v2  ;;  %v4019_v15 = vpop.xlane.xlu0 %4018 }
 0x791   : > { %v3999_v16 = vmul.f32 %v5609_v23, %v6286_v8  ;;  %v4025_v34 = vsub.f32 %v4019_v15, %v4011_v7 }
 0x792   : > { %v4993_v0 = vadd.f32 -1.0, %v739_v14 }
 0x793   : > { %v4029_v20 = vrot.slane %v3999_v16, %v6289_v9 }
 0x794   : > { %v741_v63 = vadd.f32 1.0, %v4993_v0  ;;  %752 = vst.msk [vmem:[%s6278_s21] sm:$0xf] %vm751_vm13, %v4993_v0  ;;  %v4023_v5 = vpop.xlane.xlu0 %4022 }
 0x795   : > { %v4032_v21 = vmul.f32 %v4029_v20, %v4025_v34  ;;  %v4024_v24 = vadd.f32 %v4023_v5, %v4007_v6 }
 0x796   : > { %5610 = vrsqrt.f32 %v741_v63  ;;  %vm744_vm14 = vcmp.eq.f32.partialorder %v741_v63, inf  ;;  %v747_v26 = vand.u32 2147483648, %v741_v63  ;;  %vm746_vm15 = vcmp.eq.f32.partialorder %v741_v63, 0.0 }
 0x797   : > { %5072 = vst.msk [vmem:[%s6377_s23 + $0x4] sm:$0xf] %vm751_vm13, %v4032_v21  ;;  %v4030_v8 = vmul.f32 %v4029_v20, %v4024_v24  ;;  %5612 = vrcp.f32 %v718_v2 }
 0x799   : > { %4031 = vst.msk [vmem:[%s6377_s23] sm:$0xf] %vm751_vm13, %v4030_v8 }
 0x7a0   : > { %v5611_v9 = vpop.eup %5610 }
 0x7a1   : > { %v743_v25 = vmul.f32 %v5611_v9, %v741_v63  ;;  %v5613_v28 = vpop.eup %5612 }
 0x7a3   : > { %v745_v27 = vsel %vm744_vm14, %v741_v63, %v743_v25 }
 0x7a4   : > { %v748_v29 = vsel %vm746_vm15, %v747_v26, %v745_v27 }
 0x7a5   : > { %v750_v30 = vmul.f32 %v5613_v28, %v748_v29 }
 0x7a7   : > { %v753_v31 = vmul.f32 %v750_v30, %v729_v58  ;;  %v755_v57 = vmul.f32 %v750_v30, %v733_v59 }
 0x7a9   : > { %754 = vst.msk [vmem:[%s6278_s21 + $0x4] sm:$0xf] %vm751_vm13, %v753_v31  ;;  %756 = vst.msk [vmem:[%s6278_s21 + $0x8] sm:$0xf] %vm751_vm13, %v755_v57 }
 0x7ee   : > { %v4696_v32 = vpop.permute.xlu1 %4695 }
 0x7ef   : > { %v4703_v17 = vpop.permute.xlu0 %4702  ;;  %4699 = vst.msk [vmem:[%s6377_s23] sm:$0xf] %vm4698_vm0, %v4696_v32 }
 0x7f0   : > { %5087 = vst.msk [vmem:[%s6377_s23 + $0x4] sm:$0xf] %vm4698_vm0, %v4703_v17 }
 0x7f1   : > { %5655 = shalt.err (!%p5652_p9)
}
 0x7f2   : > { %s5656_s23 = scalar_lea.hbm %s6394_s10, 128  ;;  %s5660_s22 = scalar_lea.hbm %s6485_s7, 256 }
 0x7f3   : > { %p5657_p10 = scmp.ne.s32.totalorder %s6394_s10, %s5656_s23  ;;  %p5661_p13 = scmp.lt.u32.totalorder %s6394_s10, %s6485_s7 }
 0x7f4   : > { %p5662_p0 = scmp.lt.u32.totalorder %s5660_s22, %s5656_s23  ;;  %p5664_p2 = scmp.lt.u32.totalorder %s5656_s23, %s6394_s10 }
 0x7f5   : > { %p5658_p11 = pnand %p5657_p10, %p5834_p5 }
 0x7f6   : > { %p5663_p1 = por %p5662_p0, %p5661_p13 }
 0x7f7   : > { %p5659_p12 = pneg %p5658_p11 }
 0x7f8   : > { %p5665_p3 = por %p5664_p2, %p5663_p1 }
 0x7fa   : > { %p5666_p4 = pnand %p5665_p3, %p5659_p12 }
 0x7fc   : > { %5669 = shalt.err (!%p5666_p4)
}
 0x7fd   : > { %s5746_s18 = smov 64   ;;  %s5747_s20 = smov 4  }
 0x7fe   : > { %5534 = dma.vmem_to_hbm [thread:$0]  (%p5834_p5), %s6396_s17, 128, %s6394_s10, %s6407_s13, %s5746_s18, %s5746_s18, %s5747_s20  }
 0x7ff   : > { %s5670_s0 = scalar_lea.vmem %s6398_s24, 128  ;;  %s5748_s25 = smov [#allocation6]  }
 0x800   : > { %p5671_p7 = scmp.ne.s32.totalorder %s6398_s24, %s5670_s0  ;;  %s5674_s23 = sshll.u32 %s5748_s25, 4  ;;  %s5675_s23 = int_to_ptr.vmem [resolvable:$false] %s5674_s23 }
 0x801   : > { %s5676_s26 = scalar_lea.vmem %s5675_s23, 256  ;;  %p5677_p10 = scmp.lt.s32.totalorder %s6398_s24, %s5675_s23 }
 0x802   : > { %p5672_p8 = pnand %p5671_p7, %p5834_p5  ;;  %p5678_p11 = scmp.lt.s32.totalorder %s5676_s26, %s5670_s0 }
 0x804   : > { %p5673_p9 = pneg %p5672_p8  ;;  %p5679_p12 = por %p5678_p11, %p5677_p10 }
 0x806   : > { %p5680_p13 = pnand %p5679_p12, %p5673_p9 }
 0x808   : > { %5683 = shalt.err (!%p5680_p13)
}
 0x809   : > { %s5684_s17 = scalar_lea.hbm %s6403_s9, 128  ;;  %s5688_s22 = scalar_lea.hbm %s6486_s8, 256 }
 0x80a   : > { %p5685_p0 = scmp.ne.s32.totalorder %s6403_s9, %s5684_s17  ;;  %p5689_p3 = scmp.lt.u32.totalorder %s6403_s9, %s6486_s8 }
 0x80b   : > { %p5690_p4 = scmp.lt.u32.totalorder %s5688_s22, %s5684_s17  ;;  %p5692_p8 = scmp.lt.u32.totalorder %s5684_s17, %s6403_s9 }
 0x80c   : > { %p5686_p1 = pnand %p5685_p0, %p5834_p5 }
 0x80d   : > { %p5691_p7 = por %p5690_p4, %p5689_p3 }
 0x80e   : > { %p5687_p2 = pneg %p5686_p1 }
 0x80f   : > { %p5693_p9 = por %p5692_p8, %p5691_p7 }
 0x811   : > { %p5694_p10 = pnand %p5693_p9, %p5687_p2 }
 0x813   : > { %5697 = shalt.err (!%p5694_p10)
}
 0x814   : > { %5535 = dma.vmem_to_hbm [thread:$0]  (%p5834_p5), %s6398_s24, 128, %s6403_s9, %s6407_s13, %s5746_s18, %s5746_s18, %s5747_s20  }
 0x815 PF: > { %p5549_p11 = scmp.ge.s32.totalorder %s5736_s30, 2  ;;  %s4793_s0 = sand.u32 1, %s5724_s27  }
 0x816   : > { %s4794_s25 = scalar_lea.sflag [#allocation3], %s4793_s0 }
 0x817   : > { %p5540_p12 = pnand %p5549_p11, %p5838_p6 }
 0x819   : > { %5715 = dma.done.wait (!%p5540_p12), %s4794_s25, 64  }
 0x81a   : > { %5717 = vsyncadd (!%p5540_p12), %s4794_s25, 4294967232  ;;  %s6495_s15 = sadd.s32 4294967294, %s5736_s30  }
 0x81b   : > { %s4802_s23 = sand.u32 1, %s6495_s15  }
 0x81c   : > { %s4803_s26 = scalar_lea.sflag [#allocation5], %s4802_s23 }
 0x81d   : > { %5719 = dma.done.wait (!%p5540_p12), %s4803_s26, 256  }
 0x81e   : > { %5721 = vsyncadd (!%p5540_p12), %s4803_s26, 4294967040  ;;  %p22_p5 = scmp.ge.s32.totalorder %s5819_s11, 4   ;;  %s6496_s27 = smov %s5728_s28 }
 0x81f   : > { %s6497_s28 = smov %s5732_s29  ;;  %s6498_s29 = smov %s5832_s14 }
 0x820   : > { %s6499_s30 = smov %s5819_s11  ;;  %24 = sbr.rel (!%p22_p5) target bundleno = 7 (0x7), region = 139 }
 0x827   :  { %4817 = vsyncpa [#allocation3], 1 }
 0x828   :  { %4819 = vsyncpa [#allocation3 + $0x1], 1 }
 0x829   :  { %4820 = vsyncpa [#allocation5], 1 }
 0x82a   :  { %4822 = vsyncpa [#allocation5 + $0x1], 1 }

// kernel: _lambda_.4
= control target key start
LH: loop header
LB: loop body
LE: loop exit
PB: predicated region body
PF: predicated region fallthrough
CT: control target
= control target key end

     0   :  { %15 = vsyncpa [#allocation3], 0  ;;  %s5678_s13 = smov 0   ;;  %s6147_s0 = inlined_call_operand.vmem [shape: f32[2], index: 0, kind: input, shape index: {}]   ;;  %s6148_s1 = inlined_call_operand.vmem [shape: f32[2,2,8,4], index: 1, kind: input, shape index: {}]   ;;  %s6149_s2 = inlined_call_operand.vmem [shape: f32[2,2,4,8], index: 2, kind: input, shape index: {}]   ;;  %s6150_s3 = inlined_call_operand.vmem [shape: f32[2,2,12,8], index: 3, kind: input, shape index: {}]   ;;  %s6151_s4 = inlined_call_operand.vmem [shape: f32[2,2,24,4], index: 4, kind: input, shape index: {}]   ;;  %s6152_s5 = inlined_call_operand.vmem [shape: f32[2,2,16,4], index: 5, kind: input, shape index: {}]   ;;  %s6153_s6 = inlined_call_operand.vmem [shape: f32[2,2,4,2], index: 6, kind: input, shape index: {}]   ;;  %s6154_s7 = inlined_call_operand.vmem [shape: f32[2,2,8,4], index: 7, kind: input, shape index: {}]   ;;  %s6155_s8 = inlined_call_operand.vmem [shape: f32[2,2,2,4], index: 8, kind: input, shape index: {}]   ;;  %s6156_s9 = inlined_call_operand.vmem [shape: f32[2,1,16], index: 9, kind: input, shape index: {}]   ;;  %s6157_s10 = inlined_call_operand.vmem [shape: f32[2,2,8,4], index: 10, kind: output, shape index: {}]  }
   0x1 LB: > { %s5684_s14 = sadd.s32 4294967295, %s5611_s13   ;;  %p4969_p0 = scmp.ge.s32.totalorder %s5611_s13, 1  ;;  %s5611_s13 = sphi %s5678_s13, %s21_s13  }
   0x2   : > { %p307_p1 = scmp.lt.s32.totalorder %s5611_s13, 3  ;;  %s320_s17 = sshll.u32 %s6147_s0, 4  ;;  %s321_s17 = int_to_ptr.vmem [resolvable:$true] %s320_s17 }
   0x3   : > { %p5550_p3 = scmp.eq.s32.totalorder %s5684_s14, 0  ;;  %s5586_s19 = scalar_lea.vmem %s321_s17, 16 }
   0x4   : > { %p5691_p2 = pnand %p4969_p0, %p307_p1  ;;  %p5587_p6 = scmp.ne.s32.totalorder %s321_s17, %s5586_s19 }
   0x5   : > { %p5594_p10 = scmp.lt.s32.totalorder %s321_s17, %s321_s17  ;;  %p5595_p11 = scmp.lt.s32.totalorder %s5586_s19, %s5586_s19 }
   0x6   : > { %p5546_p4 = pneg %p5691_p2 }
   0x7   : > { %p5596_p12 = por %p5595_p11, %p5594_p10 }
   0x8   : > { %p5547_p5 = pnand %p5550_p3, %p5546_p4 }
   0xa   : > { %p5588_p7 = pneg %p5547_p5 }
   0xc   : > { %p5589_p8 = pnand %p5588_p7, %p5587_p6 }
   0xe   : > { %p5590_p9 = pneg %p5589_p8 }
  0x10   : > { %p5597_p13 = pnand %p5596_p12, %p5590_p9 }
  0x12   : > { %5600 = shalt.err (!%p5597_p13)
}
  0x13   : > { %s5613_s20 = smov [#allocation2]   ;;  %403 = sbr.rel (%p5691_p2) target bundleno = 2562 (0xa02), region = 60 }
  0x14   : > { %5549 = dma.vmem_to_smem (!%p5547_p5), %s321_s17, 16, %s5613_s20, [#allocation3]  }
  0x1a   : > { %5606 = dma.done.wait (%p5550_p3), [#allocation3], 16  }
  0x1b   : > { %5608 = vsyncadd (%p5550_p3), [#allocation3], 4294967280 }
  0x1c   : > { %409 = sfence }
  0x1d   : > { %p480_p0 = scmp.lt.s32.totalorder %s5684_s14, 1  ;;  %v5614_v0 = vmov 0.0   ;;  %vm5615_vm0 = vmmov 0   ;;  %vm566_vm1 = vcmask 1043456   ;;  %vm562_vm2 = vcmask 31744   ;;  %s5616_s29 = smov 127  }
  0x1e   : > { %5235 = vmatprep.subr.mxu0 %v5614_v0  ;;  %5237 = vmatprep.mubr.msk.f32.mxu0 %vm5615_vm0, %v5614_v0  ;;  %s5617_s15 = smov 120   ;;  %s5618_s16 = smov 114   ;;  %v5619_v6 = vmov 0   ;;  %vm1218_vm3 = vcmask 64512   ;;  %v5620_v34 = vmov 12   ;;  %v5621_v39 = vmov 13  }
  0x1f   : > { %s6160_s14 = smov (!%p480_p0, %s5684_s14), 1  ;;  %5225 = vmatprep.subr.mxu1 %v5614_v0  ;;  %5227 = vmatprep.mubr.msk.f32.mxu1 %vm5615_vm0, %v5614_v0  ;;  %vm1809_vm4 = vcmask 15360   ;;  %s4758_s24 = sld [smem:[#allocation2]] }
  0x20   : > { %s5106_s21 = sshll.u32 %s6160_s14, 3  ;;  %s5107_s22 = sshll.u32 %s6160_s14, 5  ;;  %5571 = vset.pattern.permute.xlu1 %v5619_v6  ;;  %5570 = vset.pattern.permute.xlu0 %v5619_v6 }
  0x21   : > { %s509_s25 = scalar_lea.vmem %s6153_s6, %s5106_s21  ;;  %s5730_s28 = scalar_lea.vmem %s6152_s5, %s5107_s22 }
  0x22   : > { %v5723_v1 = vld [vmem:[%s509_s25] sm:$0xf]  ;;  %v4997_v2 = vld [vmem:[%s5730_s28 + $0x10] sm:$0xff]  ;;  %v5737_v4 = vld [vmem:[%s509_s25 + $0x4] sm:$0xf]  ;;  %s522_s12 = scalar_lea.vmem %s6156_s9, %s6160_s14  ;;  %s5771_s17 = sshll.u32 %s6160_s14, 4 }
  0x23   : > { %891 = vrot.lane.b32.xlu0 %v5723_v1, %s5616_s29  ;;  %5236 = vmatpush3.msk.msra.mxu0 %vm566_vm1, %v5723_v1  ;;  %v559_v3 = vld [vmem:[%s5730_s28] sm:$0xff]  ;;  %v889_v7 = vld [vmem:[%s5730_s28 + $0x8] sm:$0xff]  ;;  %v5006_v8 = vld [vmem:[%s5730_s28 + $0x18] sm:$0xff]  ;;  %s514_s20 = scalar_lea.vmem %s6154_s7, %s5771_s17  ;;  %s489_s25 = scalar_lea.vmem %s6149_s2, %s5106_s21 }
  0x24   : > { %5238 = vmatmul.mubr.msk.f32.vlgmr.msra.gmra.mrb[0].mxu0 %vm562_vm2, %v4997_v2  ;;  %5226 = vmatpush3.msk.msra.mxu1 %vm566_vm1, %v5723_v1  ;;  %v5764_v5 = vld [vmem:[%s522_s12] ss:$0 sm:$0xff]  ;;  %v5805_v13 = vld [vmem:[%s514_s20 + $0x8] sm:$0xff]  ;;  %v4992_v14 = vld [vmem:[%s489_s25 + $0x4] sm:$0xf]  ;;  %s484_s27 = scalar_lea.vmem %s6148_s1, %s5771_s17  ;;  %s5622_s28 = smov 124  }
  0x25   : > { %5228 = vmatmul.mubr.msk.f32.vlgmr.msra.gmra.mrb[0].mxu1 %vm562_vm2, %v559_v3  ;;  %5230 = vmatprep.subr.mxu1 %v5614_v0  ;;  %v5789_v11 = vld [vmem:[%s514_s20] sm:$0xff]  ;;  %v5834_v33 = vld [vmem:[%s484_s27 + $0x8] sm:$0xff]  ;;  %s5871_s11 = scalar_lea.vmem %s6150_s3, %s5107_s22  ;;  %s5539_s22 = smul.u32 48, %s6160_s14 }
  0x26   : > { %5231 = vmatpush3.msk.msra.mxu1 %vm566_vm1, %v5737_v4  ;;  %5232 = vmatprep.mubr.msk.f32.mxu1 %vm5615_vm0, %v5614_v0  ;;  %v531_v12 = vld [vmem:[%s489_s25] sm:$0xf]  ;;  %v5035_v47 = vld [vmem:[%s5871_s11 + $0x10] sm:$0xf]  ;;  %s5111_s18 = sshll.u32 %s6160_s14, 2  ;;  %s5101_s25 = sld [smem:[#allocation2 + $0x1]] }
  0x27   : > { %968 = vrot.lane.b32.xlu0 %v5737_v4, %s5616_s29  ;;  %5240 = vmatprep.subr.mxu0 %v5614_v0  ;;  %v5832_v32 = vld [vmem:[%s484_s27] sm:$0xff]  ;;  %s519_s23 = scalar_lea.vmem %s6155_s8, %s5111_s18  ;;  %s527_s27 = scalar_lea.vmem %s6157_s10, %s5771_s17 }
  0x28   : > { %5241 = vmatpush3.msk.msra.mxu0 %vm566_vm1, %v5737_v4  ;;  %5242 = vmatprep.mubr.msk.f32.mxu0 %vm5615_vm0, %v5614_v0  ;;  %v2101_v45 = vld [vmem:[%s5871_s11] sm:$0xf] }
  0x29   : > { %5233 = vmatmul.mubr.msk.f32.vlgmr.msra.gmra.mrb[2].mxu1 %vm562_vm2, %v4997_v2  ;;  %5245 = vmatprep.subr.mxu1 %v5614_v0 }
  0x2a   : > { %5255 = vmatprep.subr.mxu0 %v5614_v0  ;;  %5247 = vmatprep.mubr.msk.f32.mxu1 %vm5615_vm0, %v5614_v0 }
  0x2b   : > { %1506 = vrot.lane.b32.xlu1 %v5764_v5, %s5617_s15 }
  0x2c   : > { %5243 = vmatmul.mubr.msk.f32.vlgmr.msra.gmra.mrb[0].mxu0 %vm562_vm2, %v559_v3 }
  0x2d   : > { %5257 = vmatprep.mubr.msk.f32.mxu0 %vm5615_vm0, %v5614_v0 }
  0x2f   : > { %1804 = vrot.lane.b32.xlu1 %v5764_v5, %s5618_s16  ;;  %s5954_s16 = scalar_lea.vmem %s6151_s4, %s5539_s22 }
  0x95   : > { %v892_v9 = vpop.permute.xlu0 %891 }
  0x96   : > { %5246 = vmatpush3.msk.msra.mxu1 %vm566_vm1, %v892_v9  ;;  %5256 = vmatpush3.msk.msra.mxu0 %vm566_vm1, %v892_v9 }
  0x97   : > { %5248 = vmatmul.mubr.msk.f32.vlgmr.msra.gmra.mrb[4].mxu1 %vm562_vm2, %v889_v7  ;;  %5258 = vmatmul.mubr.msk.f32.vlgmr.msra.gmra.mrb[2].mxu0 %vm562_vm2, %v5006_v8 }
  0x98   : > { %5250 = vmatprep.subr.mxu1 %v5614_v0  ;;  %5260 = vmatprep.subr.mxu0 %v5614_v0 }
  0x99   : > { %v969_v10 = vpop.permute.xlu0 %968  ;;  %5252 = vmatprep.mubr.msk.f32.mxu1 %vm5615_vm0, %v5614_v0  ;;  %5262 = vmatprep.mubr.msk.f32.mxu0 %vm5615_vm0, %v5614_v0 }
  0x9a   : > { %5251 = vmatpush3.msk.msra.mxu1 %vm566_vm1, %v969_v10  ;;  %5261 = vmatpush3.msk.msra.mxu0 %vm566_vm1, %v969_v10  ;;  %v2104_v10 = vld [vmem:[%s5954_s16] sm:$0xff] }
  0x9b   : > { %5253 = vmatmul.mubr.msk.f32.vlgmr.msra.gmra.mrb[6].mxu1 %vm562_vm2, %v5006_v8  ;;  %5265 = vmatprep.subr.mxu1 %v5614_v0 }
  0x9c   : > { %5266 = vmatpush3.msra.mxu1 %v5789_v11  ;;  %5267 = vmatprep.mubr.msk.f32.mxu1 %vm5615_vm0, %v5614_v0 }
  0x9d   : > { %5270 = vmatprep.subr.mxu1 %v5614_v0  ;;  %5275 = vmatprep.subr.mxu0 %v5614_v0  ;;  %v1507_v27 = vpop.permute.xlu1 %1506 }
  0x9e   : > { %v1509_v36 = vmul.f32 %v1507_v27, %v5832_v32  ;;  %v1510_v37 = vmul.f32 %v5834_v33, %v1507_v27 }
  0x9f   : > { %5263 = vmatmul.mubr.msk.f32.vlgmr.msra.gmra.mrb[2].mxu0 %vm562_vm2, %v889_v7  ;;  %5268 = vmatmul.mubr.msk.f32.vlgmr.msra.gmra.mrb[8].mxu1 %vm1218_vm3, %v531_v12 }
  0xa0   : > { %5271 = vmatpush3.msra.mxu1 %v5805_v13  ;;  %5272 = vmatprep.mubr.msk.f32.mxu1 %vm5615_vm0, %v5614_v0 }
  0xa1   : > { %5276 = vmatpush3.msra.mxu0 %v5789_v11  ;;  %5277 = vmatprep.mubr.msk.f32.mxu0 %vm5615_vm0, %v5614_v0  ;;  %v1805_v43 = vpop.permute.xlu1 %1804 }
  0xa2   : > { %5280 = vmatprep.subr.mxu0 %v5614_v0  ;;  %5285 = vmatprep.subr.mxu1 %v5614_v0  ;;  %v1808_v44 = vmul.f32 %v5737_v4, %v1805_v43  ;;  %v1807_v46 = vmul.f32 %v1805_v43, %v5723_v1 }
  0xa3   : > { %5273 = vmatmul.mubr.msk.f32.vlgmr.msra.gmra.mrb[10].mxu1 %vm1218_vm3, %v4992_v14  ;;  %5278 = vmatmul.mubr.msk.f32.vlgmr.msra.gmra.mrb[4].mxu0 %vm1218_vm3, %v4992_v14 }
  0xa4   : > { %5281 = vmatpush3.msra.mxu0 %v5805_v13  ;;  %5282 = vmatprep.mubr.msk.f32.mxu0 %vm5615_vm0, %v5614_v0 }
  0xa5   : > { %5295 = vmatprep.subr.mxu0 %v5614_v0  ;;  %5287 = vmatprep.mubr.msk.f32.mxu1 %vm5615_vm0, %v5614_v0 }
  0xab   : > { %5283 = vmatmul.mubr.msk.f32.vlgmr.msra.gmra.mrb[4].mxu0 %vm1218_vm3, %v531_v12  ;;  %v5036_v12 = vld [vmem:[%s5954_s16 + $0x18] sm:$0xff] }
  0xac   : > { %5297 = vmatprep.mubr.msk.f32.mxu0 %vm5615_vm0, %v5614_v0 }
  0xf8   : > { %v636_v15 = vpop.f32.mrb[0].mxu1 }
  0xf9   : > { %v5229_v16 = vpop.f32.mrb[1].mxu1 }
  0xfa   : > { %v2982_v16 = vld [vmem:[%s5871_s11 + $0x4] sm:$0xf] }
  0xfc   : > { %v712_v17 = vpop.f32.mrb[2].mxu1 }
  0xfd   : > { %v786_v18 = vsub.f32 %v636_v15, %v712_v17  ;;  %v5234_v19 = vpop.f32.mrb[3].mxu1  ;;  %v5057_v17 = vld [vmem:[%s5871_s11 + $0x14] sm:$0xf] }
  0xff   : > { %v853_v20 = vpop.f32.mrb[0].mxu0  ;;  %859 = vperm.xlu0 %5570, %v786_v18  }
 0x100   : > { %v5244_v21 = vpop.f32.mrb[1].mxu0  ;;  %869 = vperm.xlu1 %5571, %v853_v20  }
 0x16a   : > { %v964_v22 = vpop.f32.mrb[4].mxu1 }
 0x16b   : > { %v5249_v23 = vpop.f32.mrb[5].mxu1 }
 0x16e   : > { %v1041_v24 = vpop.f32.mrb[6].mxu1 }
 0x16f   : > { %v1115_v25 = vsub.f32 %v964_v22, %v1041_v24  ;;  %v5254_v26 = vpop.f32.mrb[7].mxu1 }
 0x171   : > { %1188 = vperm.xlu1 %5571, %v1115_v25  }
 0x172   : > { %v1182_v28 = vpop.f32.mrb[2].mxu0  ;;  %v1288_v29 = vpop.f32.mrb[8].mxu1 }
 0x173   : > { %v5264_v30 = vpop.f32.mrb[3].mxu0  ;;  %1198 = vperm.xlu0 %5570, %v1182_v28   ;;  %v5269_v31 = vpop.f32.mrb[9].mxu1 }
 0x175   : > { %5572 = vset.pattern.permute.xlu1 %v5620_v34 }
 0x176   : > { %879 = vperm.xlu1 %5572, %v5764_v5   ;;  %v1361_v35 = vpop.f32.mrb[10].mxu1 }
 0x177   : > { %v1435_v38 = vsub.f32 %v1288_v29, %v1361_v35  ;;  %5573 = vset.pattern.permute.xlu0 %v5621_v39  ;;  %v5274_v40 = vpop.f32.mrb[11].mxu1 }
 0x178   : > { %1208 = vperm.xlu0 %5573, %v5764_v5   ;;  %v5058_v40 = vld [vmem:[%s5954_s16 + $0x20] sm:$0xff] }
 0x179   : > { %5286 = vmatpush3.msk.msra.mxu1 %vm566_vm1, %v1435_v38  ;;  %5296 = vmatpush3.msk.msra.mxu0 %vm566_vm1, %v1435_v38  ;;  %v2984_v38 = vld [vmem:[%s5954_s16 + $0x8] sm:$0xff] }
 0x17a   : > { %5298 = vmatmul.mubr.msk.f32.vlgmr.msra.gmra.mrb[6].mxu0 %vm562_vm2, %v1510_v37  ;;  %5288 = vmatmul.mubr.msk.f32.vlgmr.msra.gmra.mrb[12].mxu1 %vm562_vm2, %v1509_v36 }
 0x17b   : > { %5290 = vmatprep.subr.mxu1 %v5614_v0  ;;  %5300 = vmatprep.subr.mxu0 %v5614_v0 }
 0x17c   : > { %5292 = vmatprep.mubr.msk.f32.mxu1 %vm5615_vm0, %v5614_v0  ;;  %5302 = vmatprep.mubr.msk.f32.mxu0 %vm5615_vm0, %v5614_v0 }
 0x17d   : > { %551 = vrot.lane.b32.xlu1 %v5764_v5, %s5622_s28 }
 0x17e   : > { %v1502_v41 = vpop.f32.mrb[4].mxu0 }
 0x17f   : > { %v5284_v42 = vpop.f32.mrb[5].mxu0  ;;  %5291 = vmatpush3.msk.msra.mxu1 %vm566_vm1, %v1502_v41  ;;  %5301 = vmatpush3.msk.msra.mxu0 %vm566_vm1, %v1502_v41  ;;  %v3855_v41 = vld [vmem:[%s5871_s11 + $0x8] sm:$0xf] }
 0x180   : > { %5293 = vmatmul.mubr.msk.f32.vlgmr.msra.gmra.mrb[14].mxu1 %vm562_vm2, %v1510_v37  ;;  %5305 = vmatprep.subr.mxu1 %v5614_v0  ;;  %v5079_v42 = vld [vmem:[%s5871_s11 + $0x18] sm:$0xf] }
 0x181   : > { %5315 = vmatprep.subr.mxu0 %v5614_v0  ;;  %5307 = vmatprep.mubr.msk.f32.mxu1 %vm5615_vm0, %v5614_v0 }
 0x182   : > { %5303 = vmatmul.mubr.msk.f32.vlgmr.msra.gmra.mrb[6].mxu0 %vm562_vm2, %v1509_v36 }
 0x183   : > { %5317 = vmatprep.mubr.msk.f32.mxu0 %vm5615_vm0, %v5614_v0 }
 0x186   : > { %5306 = vmatpush3.xpose.msk.msra.mxu1 %vm1809_vm4, %v5737_v4  ;;  %5316 = vmatpush3.xpose.msk.msra.mxu0 %vm1809_vm4, %v5723_v1 }
 0x187   : > { %5310 = vmatprep.subr.mxu1 %v5614_v0  ;;  %5325 = vmatprep.subr.mxu0 %v5614_v0 }
 0x189   : > { %5308 = vmatmul.mubr.msk.f32.vlgmr.msra.gmra.mrb[16].mxu1 %vm1809_vm4, %v1808_v44  ;;  %5318 = vmatmul.mubr.msk.f32.vlgmr.msra.gmra.mrb[8].mxu0 %vm1809_vm4, %v1808_v44 }
 0x18a   : > { %5311 = vmatpush3.xpose.msk.msra.mxu1 %vm1809_vm4, %v5737_v4  ;;  %5312 = vmatprep.mubr.msk.f32.mxu1 %vm5615_vm0, %v5614_v0 }
 0x18b   : > { %5326 = vmatpush3.msra.mxu0 %v5789_v11  ;;  %5327 = vmatprep.mubr.msk.f32.mxu0 %vm5615_vm0, %v5614_v0 }
 0x18c   : > { %5320 = vmatprep.subr.mxu1 %v5614_v0  ;;  %5335 = vmatprep.subr.mxu0 %v5614_v0 }
 0x18d   : > { %5313 = vmatmul.mubr.msk.f32.vlgmr.msra.gmra.mrb[18].mxu1 %vm1809_vm4, %v1807_v46  ;;  %5328 = vmatmul.mubr.msk.f32.vlgmr.msra.gmra.mrb[10].mxu0 %vm1218_vm3, %v2101_v45 }
 0x18e   : > { %5321 = vmatpush3.xpose.msk.msra.mxu1 %vm1809_vm4, %v5723_v1  ;;  %5322 = vmatprep.mubr.msk.f32.mxu1 %vm5615_vm0, %v5614_v0 }
 0x18f   : > { %5336 = vmatpush3.msra.mxu0 %v5789_v11  ;;  %5337 = vmatprep.mubr.msk.f32.mxu0 %vm5615_vm0, %v5614_v0 }
 0x190   : > { %5330 = vmatprep.subr.mxu1 %v5614_v0  ;;  %5340 = vmatprep.subr.mxu0 %v5614_v0 }
 0x191   : > { %5323 = vmatmul.mubr.msk.f32.vlgmr.msra.gmra.mrb[16].mxu1 %vm1809_vm4, %v1807_v46  ;;  %5338 = vmatmul.mubr.msk.f32.vlgmr.msra.gmra.mrb[12].mxu0 %vm1218_vm3, %v5035_v47 }
 0x192   : > { %5331 = vmatpush3.msra.mxu1 %v5805_v13  ;;  %5332 = vmatprep.mubr.msk.f32.mxu1 %vm5615_vm0, %v5614_v0 }
 0x193   : > { %5341 = vmatpush3.msra.mxu0 %v5805_v13  ;;  %5342 = vmatprep.mubr.msk.f32.mxu0 %vm5615_vm0, %v5614_v0 }
 0x194   : > { %5345 = vmatprep.subr.mxu1 %v5614_v0  ;;  %5355 = vmatprep.subr.mxu0 %v5614_v0 }
 0x195   : > { %5333 = vmatmul.mubr.msk.f32.vlgmr.msra.gmra.mrb[20].mxu1 %vm1218_vm3, %v5035_v47 }
 0x196   : > { %5347 = vmatprep.mubr.msk.f32.mxu1 %vm5615_vm0, %v5614_v0 }
 0x199   : > { %5343 = vmatmul.mubr.msk.f32.vlgmr.msra.gmra.mrb[12].mxu0 %vm1218_vm3, %v2101_v45 }
 0x19a   : > { %5357 = vmatprep.mubr.msk.f32.mxu0 %vm5615_vm0, %v5614_v0 }
 0x24d   : > { %v5916_v48 = vpop.f32.mrb[12].mxu1 }
 0x24e   : > { %v5289_v49 = vpop.f32.mrb[13].mxu1 }
 0x253   : > { %v5918_v50 = vpop.f32.mrb[14].mxu1 }
 0x254   : > { %v1733_v51 = vsub.f32 %v5916_v48, %v5918_v50  ;;  %v5294_v52 = vpop.f32.mrb[15].mxu1 }
 0x25c   : > { %v2026_v53 = vpop.f32.mrb[8].mxu0 }
 0x25d   : > { %v5319_v54 = vpop.f32.mrb[9].mxu0 }
 0x260   : > { %v1954_v55 = vpop.f32.mrb[18].mxu1  ;;  %v2176_v56 = vpop.f32.mrb[10].mxu0 }
 0x261   : > { %v5922_v57 = vsub.f32 %v2026_v53, %v1954_v55  ;;  %v5314_v58 = vpop.f32.mrb[19].mxu1  ;;  %v5329_v59 = vpop.f32.mrb[11].mxu0 }
 0x264   : > { %v5924_v60 = vpop.f32.mrb[16].mxu1 }
 0x265   : > { %v5324_v61 = vpop.f32.mrb[17].mxu1 }
 0x268   : > { %v2249_v62 = vpop.f32.mrb[20].mxu1 }
 0x269   : > { %v2323_v63 = vsub.f32 %v2176_v56, %v2249_v62  ;;  %v5334_v1 = vpop.f32.mrb[21].mxu1 }
 0x26b   : > { %5346 = vmatpush3.msk.msra.mxu1 %vm566_vm1, %v2323_v63  ;;  %5356 = vmatpush3.msk.msra.mxu0 %vm566_vm1, %v2323_v63 }
 0x26c   : > { %v2390_v2 = vpop.f32.mrb[12].mxu0  ;;  %5348 = vmatmul.mubr.msk.f32.vlgmr.msra.gmra.mrb[22].mxu1 %vm562_vm2, %v5924_v60  ;;  %5350 = vmatprep.subr.mxu1 %v5614_v0 }
 0x26d   : > { %5358 = vmatmul.mubr.msk.f32.vlgmr.msra.gmra.mrb[14].mxu0 %vm562_vm2, %v5922_v57  ;;  %5360 = vmatprep.subr.mxu0 %v5614_v0  ;;  %v5344_v3 = vpop.f32.mrb[13].mxu0 }
 0x26e   : > { %5351 = vmatpush3.msk.msra.mxu1 %vm566_vm1, %v2390_v2  ;;  %5361 = vmatpush3.msk.msra.mxu0 %vm566_vm1, %v2390_v2 }
 0x26f   : > { %5352 = vmatprep.mubr.msk.f32.mxu1 %vm5615_vm0, %v5614_v0  ;;  %5362 = vmatprep.mubr.msk.f32.mxu0 %vm5615_vm0, %v5614_v0 }
 0x270   : > { %5353 = vmatmul.mubr.msk.f32.vlgmr.msra.gmra.mrb[24].mxu1 %vm562_vm2, %v5922_v57  ;;  %5365 = vmatprep.subr.mxu1 %v5614_v0 }
 0x271   : > { %5375 = vmatprep.subr.mxu0 %v5614_v0  ;;  %5367 = vmatprep.mubr.msk.f32.mxu1 %vm5615_vm0, %v5614_v0 }
 0x275   : > { %5363 = vmatmul.mubr.msk.f32.vlgmr.msra.gmra.mrb[14].mxu0 %vm562_vm2, %v5924_v60 }
 0x276   : > { %5377 = vmatprep.mubr.msk.f32.mxu0 %vm5615_vm0, %v5614_v0 }
 0x33f   : > { %v2466_v4 = vpop.f32.mrb[22].mxu1 }
 0x340   : > { %v5349_v6 = vpop.f32.mrb[23].mxu1 }
 0x341   : > { %v5080_v6 = vld [vmem:[%s5954_s16 + $0x28] sm:$0xff] }
 0x343   : > { %v2542_v7 = vpop.f32.mrb[24].mxu1 }
 0x344   : > { %v2616_v8 = vsub.f32 %v2466_v4, %v2542_v7  ;;  %v5354_v9 = vpop.f32.mrb[25].mxu1  ;;  %v862_v7 = vlaneseq }
 0x346   : > { %5366 = vmatpush3.msk.msra.mxu1 %vm566_vm1, %v2616_v8  ;;  %5376 = vmatpush3.msk.msra.mxu0 %vm566_vm1, %v2616_v8  ;;  %v863_v9 = vshrl.u32 %v862_v7, 7 }
 0x347   : > { %5368 = vmatmul.mubr.msk.f32.vlgmr.msra.gmra.mrb[26].mxu1 %vm562_vm2, %v2104_v10  ;;  %5370 = vmatprep.subr.mxu1 %v5614_v0 }
 0x348   : > { %v2683_v14 = vpop.f32.mrb[14].mxu0  ;;  %5378 = vmatmul.mubr.msk.f32.vlgmr.msra.gmra.mrb[6].mxu0 %vm562_vm2, %v5036_v12  ;;  %5380 = vmatprep.subr.mxu0 %v5614_v0 }
 0x349   : > { %v5364_v15 = vpop.f32.mrb[15].mxu0  ;;  %5371 = vmatpush3.msk.msra.mxu1 %vm566_vm1, %v2683_v14  ;;  %5381 = vmatpush3.msk.msra.mxu0 %vm566_vm1, %v2683_v14  ;;  %v540_v14 = vld [vmem:[%s519_s23] sm:$0x3] }
 0x34a   : > { %5372 = vmatprep.mubr.msk.f32.mxu1 %vm5615_vm0, %v5614_v0  ;;  %5385 = vmatprep.subr.mxu1 %v5614_v0  ;;  %v4995_v15 = vld [vmem:[%s519_s23 + $0x2] sm:$0x3] }
 0x34b   : > { %5373 = vmatmul.mubr.msk.f32.vlgmr.msra.gmra.mrb[28].mxu1 %vm562_vm2, %v5036_v12  ;;  %5382 = vmatprep.mubr.msk.f32.mxu0 %vm5615_vm0, %v5614_v0  ;;  %v864_v12 = vsub.s32 0, %v863_v9 }
 0x34c   : > { %5386 = vmatpush3.msra.mxu1 %v5789_v11  ;;  %5387 = vmatprep.mubr.msk.f32.mxu1 %vm5615_vm0, %v5614_v0 }
 0x34d   : > { %5390 = vmatprep.subr.mxu1 %v5614_v0  ;;  %5395 = vmatprep.subr.mxu0 %v5614_v0 }
 0x34f   : > { %5388 = vmatmul.mubr.msk.f32.vlgmr.msra.gmra.mrb[30].mxu1 %vm1218_vm3, %v2982_v16 }
 0x350   : > { %5383 = vmatmul.mubr.msk.f32.vlgmr.msra.gmra.mrb[6].mxu0 %vm562_vm2, %v2104_v10  ;;  %5391 = vmatpush3.msra.mxu1 %v5805_v13 }
 0x351   : > { %5392 = vmatprep.mubr.msk.f32.mxu1 %vm5615_vm0, %v5614_v0  ;;  %5396 = vmatpush3.msra.mxu0 %v5789_v11 }
 0x352   : > { %5397 = vmatprep.mubr.msk.f32.mxu0 %vm5615_vm0, %v5614_v0  ;;  %5400 = vmatprep.subr.mxu0 %v5614_v0 }
 0x353   : > { %5393 = vmatmul.mubr.msk.f32.vlgmr.msra.gmra.mrb[32].mxu1 %vm1218_vm3, %v5057_v17  ;;  %5405 = vmatprep.subr.mxu1 %v5614_v0 }
 0x354   : > { %5398 = vmatmul.mubr.msk.f32.vlgmr.msra.gmra.mrb[16].mxu0 %vm1218_vm3, %v5057_v17  ;;  %5407 = vmatprep.mubr.msk.f32.mxu1 %vm5615_vm0, %v5614_v0  ;;  %v1193_v17 = vsub.s32 1, %v863_v9 }
 0x355   : > { %5401 = vmatpush3.msra.mxu0 %v5805_v13  ;;  %5402 = vmatprep.mubr.msk.f32.mxu0 %vm5615_vm0, %v5614_v0 }
 0x356   : > { %5415 = vmatprep.subr.mxu0 %v5614_v0 }
 0x35c   : > { %5403 = vmatmul.mubr.msk.f32.vlgmr.msra.gmra.mrb[16].mxu0 %vm1218_vm3, %v2982_v16  ;;  %v860_v16 = vpop.permute.xlu0 %859 }
 0x35d   : > { %5417 = vmatprep.mubr.msk.f32.mxu0 %vm5615_vm0, %v5614_v0 }
 0x41a   : > { %v6000_v18 = vpop.f32.mrb[26].mxu1 }
 0x41b   : > { %v5369_v19 = vpop.f32.mrb[27].mxu1 }
 0x41e   : > { %v6002_v20 = vpop.f32.mrb[28].mxu1 }
 0x41f   : > { %v2909_v21 = vsub.f32 %v6000_v18, %v6002_v20  ;;  %v5374_v22 = vpop.f32.mrb[29].mxu1  ;;  %v875_v18 = vrot.slane %v4995_v15, %v864_v12  ;;  %v1194_v20 = vrot.slane %v540_v14, %v1193_v17 }
 0x420   : > { %v1199_v22 = vpop.permute.xlu0 %1198 }
 0x422   : > { %v3055_v23 = vpop.f32.mrb[30].mxu1 }
 0x423   : > { %v5389_v24 = vpop.f32.mrb[31].mxu1 }
 0x424   : > { %v884_v24 = vmul.f32 %v875_v18, %v860_v16 }
 0x426   : > { %v3128_v25 = vpop.f32.mrb[32].mxu1 }
 0x427   : > { %v3202_v26 = vsub.f32 %v3055_v23, %v3128_v25  ;;  %v5394_v27 = vpop.f32.mrb[33].mxu1  ;;  %v556_v25 = vmul.f32 %v5764_v5, %v5834_v33 }
 0x429   : > { %5406 = vmatpush3.msk.msra.mxu1 %vm566_vm1, %v3202_v26  ;;  %5416 = vmatpush3.msk.msra.mxu0 %vm566_vm1, %v3202_v26 }
 0x42a   : > { %5408 = vmatmul.mubr.msk.f32.vlgmr.msra.gmra.mrb[34].mxu1 %vm562_vm2, %v5924_v60  ;;  %5418 = vmatmul.mubr.msk.f32.vlgmr.msra.gmra.mrb[18].mxu0 %vm562_vm2, %v5922_v57 }
 0x42b   : > { %5410 = vmatprep.subr.mxu1 %v5614_v0  ;;  %5420 = vmatprep.subr.mxu0 %v5614_v0 }
 0x42c   : > { %5412 = vmatprep.mubr.msk.f32.mxu1 %vm5615_vm0, %v5614_v0  ;;  %5422 = vmatprep.mubr.msk.f32.mxu0 %vm5615_vm0, %v5614_v0 }
 0x42f   : > { %v3269_v28 = vpop.f32.mrb[16].mxu0 }
 0x430   : > { %v5404_v29 = vpop.f32.mrb[17].mxu0  ;;  %5411 = vmatpush3.msk.msra.mxu1 %vm566_vm1, %v3269_v28  ;;  %5421 = vmatpush3.msk.msra.mxu0 %vm566_vm1, %v3269_v28 }
 0x431   : > { %5413 = vmatmul.mubr.msk.f32.vlgmr.msra.gmra.mrb[36].mxu1 %vm562_vm2, %v5922_v57  ;;  %5425 = vmatprep.subr.mxu1 %v5614_v0  ;;  %v550_v29 = vmul.f32 %v5764_v5, %v5832_v32 }
 0x432   : > { %5423 = vmatmul.mubr.msk.f32.vlgmr.msra.gmra.mrb[18].mxu0 %vm562_vm2, %v5924_v60  ;;  %5435 = vmatprep.subr.mxu0 %v5614_v0 }
 0x433   : > { %5427 = vmatprep.mubr.msk.f32.mxu1 %vm5615_vm0, %v5614_v0  ;;  %5437 = vmatprep.mubr.msk.f32.mxu0 %vm5615_vm0, %v5614_v0 }
 0x4fd   : > { %v3342_v30 = vpop.f32.mrb[34].mxu1 }
 0x4fe   : > { %v5409_v31 = vpop.f32.mrb[35].mxu1 }
 0x4ff   : > { %v1214_v31 = vmul.f32 %v1199_v22, %v1194_v20 }
 0x504   : > { %v3415_v34 = vpop.f32.mrb[36].mxu1 }
 0x505   : > { %v3489_v35 = vsub.f32 %v3342_v30, %v3415_v34  ;;  %v5414_v36 = vpop.f32.mrb[37].mxu1  ;;  %v3556_v37 = vpop.f32.mrb[18].mxu0 }
 0x506   : > { %v5424_v39 = vpop.f32.mrb[19].mxu0 }
 0x507   : > { %5426 = vmatpush3.msk.msra.mxu1 %vm566_vm1, %v3489_v35  ;;  %5436 = vmatpush3.msk.msra.mxu0 %vm566_vm1, %v3489_v35 }
 0x508   : > { %5428 = vmatmul.mubr.msk.f32.vlgmr.msra.gmra.mrb[38].mxu1 %vm562_vm2, %v2984_v38  ;;  %5430 = vmatprep.subr.mxu1 %v5614_v0 }
 0x509   : > { %5438 = vmatmul.mubr.msk.f32.vlgmr.msra.gmra.mrb[6].mxu0 %vm562_vm2, %v5058_v40  ;;  %5440 = vmatprep.subr.mxu0 %v5614_v0 }
 0x50a   : > { %5431 = vmatpush3.msk.msra.mxu1 %vm566_vm1, %v3556_v37  ;;  %5441 = vmatpush3.msk.msra.mxu0 %vm566_vm1, %v3556_v37 }
 0x50b   : > { %5432 = vmatprep.mubr.msk.f32.mxu1 %vm5615_vm0, %v5614_v0  ;;  %5445 = vmatprep.subr.mxu1 %v5614_v0 }
 0x50c   : > { %5433 = vmatmul.mubr.msk.f32.vlgmr.msra.gmra.mrb[40].mxu1 %vm562_vm2, %v5058_v40  ;;  %5442 = vmatprep.mubr.msk.f32.mxu0 %vm5615_vm0, %v5614_v0 }
 0x50d   : > { %5446 = vmatpush3.msra.mxu1 %v5789_v11  ;;  %5447 = vmatprep.mubr.msk.f32.mxu1 %vm5615_vm0, %v5614_v0 }
 0x50e   : > { %5450 = vmatprep.subr.mxu1 %v5614_v0  ;;  %5455 = vmatprep.subr.mxu0 %v5614_v0 }
 0x510   : > { %5448 = vmatmul.mubr.msk.f32.vlgmr.msra.gmra.mrb[42].mxu1 %vm1218_vm3, %v3855_v41 }
 0x511   : > { %5443 = vmatmul.mubr.msk.f32.vlgmr.msra.gmra.mrb[6].mxu0 %vm562_vm2, %v2984_v38  ;;  %5451 = vmatpush3.msra.mxu1 %v5805_v13 }
 0x512   : > { %5452 = vmatprep.mubr.msk.f32.mxu1 %vm5615_vm0, %v5614_v0  ;;  %5456 = vmatpush3.msra.mxu0 %v5789_v11 }
 0x513   : > { %5457 = vmatprep.mubr.msk.f32.mxu0 %vm5615_vm0, %v5614_v0  ;;  %5460 = vmatprep.subr.mxu0 %v5614_v0 }
 0x514   : > { %5453 = vmatmul.mubr.msk.f32.vlgmr.msra.gmra.mrb[44].mxu1 %vm1218_vm3, %v5079_v42  ;;  %5465 = vmatprep.subr.mxu1 %v5614_v0 }
 0x515   : > { %5458 = vmatmul.mubr.msk.f32.vlgmr.msra.gmra.mrb[20].mxu0 %vm1218_vm3, %v5079_v42  ;;  %5467 = vmatprep.mubr.msk.f32.mxu1 %vm5615_vm0, %v5614_v0 }
 0x516   : > { %5461 = vmatpush3.msra.mxu0 %v5805_v13  ;;  %5462 = vmatprep.mubr.msk.f32.mxu0 %vm5615_vm0, %v5614_v0 }
 0x517   : > { %5475 = vmatprep.subr.mxu0 %v5614_v0 }
 0x51d   : > { %5463 = vmatmul.mubr.msk.f32.vlgmr.msra.gmra.mrb[20].mxu0 %vm1218_vm3, %v3855_v41 }
 0x51e   : > { %5477 = vmatprep.mubr.msk.f32.mxu0 %vm5615_vm0, %v5614_v0 }
 0x5db   : > { %v3632_v43 = vpop.f32.mrb[38].mxu1 }
 0x5dc   : > { %v5429_v44 = vpop.f32.mrb[39].mxu1 }
 0x5df   : > { %v3708_v45 = vpop.f32.mrb[40].mxu1 }
 0x5e0   : > { %v3782_v46 = vsub.f32 %v3632_v43, %v3708_v45  ;;  %v5434_v47 = vpop.f32.mrb[41].mxu1 }
 0x5e2   : > { %v6077_v49 = vadd.f32 %v3782_v46, %v2909_v21  ;;  %v1204_v21 = vrot.slane %v4995_v15, %v1193_v17  ;;  %v1209_v46 = vpop.permute.xlu0 %1208 }
 0x5e3   : > { %v3928_v52 = vpop.f32.mrb[42].mxu1 }
 0x5e4   : > { %v5449_v53 = vpop.f32.mrb[43].mxu1  ;;  %v1205_v34 = vmul.f32 %v1204_v21, %v1199_v22 }
 0x5e7   : > { %v4001_v54 = vpop.f32.mrb[44].mxu1 }
 0x5e8   : > { %v4075_v55 = vsub.f32 %v3928_v52, %v4001_v54  ;;  %v5454_v56 = vpop.f32.mrb[45].mxu1 }
 0x5ea   : > { %5466 = vmatpush3.msk.msra.mxu1 %vm566_vm1, %v4075_v55  ;;  %5476 = vmatpush3.msk.msra.mxu0 %vm566_vm1, %v4075_v55 }
 0x5eb   : > { %5468 = vmatmul.mubr.msk.f32.vlgmr.msra.gmra.mrb[46].mxu1 %vm562_vm2, %v5924_v60  ;;  %5478 = vmatmul.mubr.msk.f32.vlgmr.msra.gmra.mrb[22].mxu0 %vm562_vm2, %v5922_v57 }
 0x5ec   : > { %5470 = vmatprep.subr.mxu1 %v5614_v0  ;;  %5480 = vmatprep.subr.mxu0 %v5614_v0 }
 0x5ed   : > { %5472 = vmatprep.mubr.msk.f32.mxu1 %vm5615_vm0, %v5614_v0  ;;  %5482 = vmatprep.mubr.msk.f32.mxu0 %vm5615_vm0, %v5614_v0 }
 0x5f0   : > { %v4142_v58 = vpop.f32.mrb[20].mxu0 }
 0x5f1   : > { %v5464_v59 = vpop.f32.mrb[21].mxu0  ;;  %5471 = vmatpush3.msk.msra.mxu1 %vm566_vm1, %v4142_v58  ;;  %5481 = vmatpush3.msk.msra.mxu0 %vm566_vm1, %v4142_v58 }
 0x5f2   : > { %5473 = vmatmul.mubr.msk.f32.vlgmr.msra.gmra.mrb[48].mxu1 %vm562_vm2, %v5922_v57  ;;  %5485 = vmatprep.subr.mxu1 %v5614_v0  ;;  %v3857_v57 = vld [vmem:[%s5954_s16 + $0x10] sm:$0xff] }
 0x5f3   : > { %5483 = vmatmul.mubr.msk.f32.vlgmr.msra.gmra.mrb[22].mxu0 %vm562_vm2, %v5924_v60  ;;  %5495 = vmatprep.subr.mxu0 %v5614_v0  ;;  %v870_v60 = vpop.permute.xlu1 %869 }
 0x5f4   : > { %5487 = vmatprep.mubr.msk.f32.mxu1 %vm5615_vm0, %v5614_v0  ;;  %5497 = vmatprep.mubr.msk.f32.mxu0 %vm5615_vm0, %v5614_v0  ;;  %v876_v27 = vmul.f32 %v875_v18, %v870_v60  ;;  %v4759_v18 = vstv %s4758_s24 }
 0x5f7   : > { %v1189_v8 = vpop.permute.xlu1 %1188 }
 0x5f8   : > { %v1213_v35 = vmul.f32 %v1204_v21, %v1189_v8  ;;  %v1195_v39 = vmul.f32 %v1194_v20, %v1189_v8 }
 0x5fa   : > { %v1215_v44 = vadd.f32 %v1214_v31, %v1213_v35  ;;  %v1206_v47 = vsub.f32 %v1195_v39, %v1205_v34 }
 0x5fb   : > { %v880_v10 = vpop.permute.xlu1 %879 }
 0x5fc   : > { %v1216_v54 = vmul.f32 %v1215_v44, %v1209_v46  ;;  %v1211_v55 = vmul.f32 %v1209_v46, %v1206_v47 }
 0x5ff   : > { %v552_v19 = vpop.permute.xlu1 %551 }
 0x600   : > { %v557_v26 = vmul.f32 %v552_v19, %v5832_v32  ;;  %v554_v30 = vmul.f32 %v5834_v33, %v552_v19 }
 0x602   : > { %v558_v37 = vsub.f32 %v556_v25, %v557_v26  ;;  %v555_v41 = vadd.f32 %v554_v30, %v550_v29 }
 0x6be   : > { %v4215_v61 = vpop.f32.mrb[46].mxu1 }
 0x6bf   : > { %v5469_v62 = vpop.f32.mrb[47].mxu1 }
 0x6c5   : > { %v4288_v63 = vpop.f32.mrb[48].mxu1 }
 0x6c6   : > { %v4362_v1 = vsub.f32 %v4215_v61, %v4288_v63  ;;  %v5474_v2 = vpop.f32.mrb[49].mxu1  ;;  %v4429_v3 = vpop.f32.mrb[22].mxu0 }
 0x6c7   : > { %v5484_v4 = vpop.f32.mrb[23].mxu0 }
 0x6c8   : > { %5486 = vmatpush3.msk.msra.mxu1 %vm566_vm1, %v4362_v1  ;;  %5496 = vmatpush3.msk.msra.mxu0 %vm566_vm1, %v4362_v1 }
 0x6c9   : > { %5488 = vmatmul.mubr.msk.f32.vlgmr.msra.gmra.mrb[50].mxu1 %vm562_vm2, %v3857_v57  ;;  %5490 = vmatprep.subr.mxu1 %v5614_v0 }
 0x6ca   : > { %5498 = vmatmul.mubr.msk.f32.vlgmr.msra.gmra.mrb[6].mxu0 %vm562_vm2, %v5080_v6  ;;  %5500 = vmatprep.subr.mxu0 %v5614_v0 }
 0x6cb   : > { %5491 = vmatpush3.msk.msra.mxu1 %vm566_vm1, %v4429_v3  ;;  %5501 = vmatpush3.msk.msra.mxu0 %vm566_vm1, %v4429_v3 }
 0x6cc   : > { %5492 = vmatprep.mubr.msk.f32.mxu1 %vm5615_vm0, %v5614_v0  ;;  %5502 = vmatprep.mubr.msk.f32.mxu0 %vm5615_vm0, %v5614_v0  ;;  %v865_v0 = vrot.slane %v540_v14, %v864_v12 }
 0x6cd   : > { %5493 = vmatmul.mubr.msk.f32.vlgmr.msra.gmra.mrb[52].mxu1 %vm562_vm2, %v5080_v6 }
 0x6ce   : > { %v885_v23 = vmul.f32 %v870_v60, %v865_v0  ;;  %v866_v28 = vmul.f32 %v865_v0, %v860_v16 }
 0x6d0   : > { %v886_v36 = vadd.f32 %v885_v23, %v884_v24  ;;  %v877_v40 = vsub.f32 %v866_v28, %v876_v27 }
 0x6d2   : > { %5503 = vmatmul.mubr.msk.f32.vlgmr.msra.gmra.mrb[6].mxu0 %vm562_vm2, %v3857_v57  ;;  %v887_v43 = vmul.f32 %v886_v36, %v880_v10  ;;  %v882_v45 = vmul.f32 %v880_v10, %v877_v40 }
 0x6d4   : > { %v888_v53 = vadd.f32 %v887_v43, %v558_v37  ;;  %v883_v5 = vadd.f32 %v882_v45, %v555_v41  ;;  %v4782_v37 = vstv %s5101_s25 }
 0x6d6   : > { %v1217_v58 = vadd.f32 %v1216_v54, %v888_v53  ;;  %v1212_v59 = vadd.f32 %v1211_v55, %v883_v5 }
 0x79c   : > { %v4505_v38 = vpop.f32.mrb[50].mxu1 }
 0x79d   : > { %v5489_v42 = vpop.f32.mrb[51].mxu1 }
 0x7a0   : > { %v4581_v52 = vpop.f32.mrb[52].mxu1 }
 0x7a1   : > { %v4655_v32 = vsub.f32 %v4505_v38, %v4581_v52  ;;  %v5494_v33 = vpop.f32.mrb[53].mxu1 }
 0x7a3   : > { %v4726_v56 = vadd.f32 %v4655_v32, %v6077_v49 }
 0x7a5   : > { %v4728_v61 = vadd.f32 %v4726_v56, %v1733_v51  ;;  %v4722_v62 = vpop.f32.mrb[6].mxu0 }
 0x7a6   : > { %v4731_v63 = vsub.f32 %v4722_v62, %v1217_v58  ;;  %v5504_v1 = vpop.f32.mrb[7].mxu0 }
 0x7a7   : > { %v4729_v2 = vsub.f32 %v4728_v61, %v1212_v59 }
 0x7a8   : > { %v4733_v3 = vmul.f32 %v4731_v63, %v4731_v63 }
 0x7a9   : > { %v4732_v57 = vmul.f32 %v4729_v2, %v4729_v2 }
 0x7ab   : > { %v4734_v4 = vadd.f32 %v4733_v3, %v4732_v57 }
 0x7ad   : > { %v4735_v6 = vsel %vm562_vm2, %v4734_v4, 0.0 }
 0x7ae   : > { %4736 = vadd.xlane.f32.xlu1 %v4735_v6 }
 0x83b   : > { %v4737_v60 = vpop.xlane.xlu1 %4736 }
 0x83c   : > { %v4738_v7 = vrot.slane %v4737_v60, 4 }
 0x83e   : > { %v4739_v8 = vadd.f32 %v4738_v7, %v4737_v60 }
 0x840   : > { %v4740_v49 = vrot.slane %v4739_v8, 2 }
 0x842   : > { %v4741_v9 = vadd.f32 %v4740_v49, %v4739_v8 }
 0x844   : > { %v4742_v10 = vrot.slane %v4741_v9, 1 }
 0x846   : > { %v4743_v12 = vadd.f32 %v4742_v10, %v4741_v9 }
 0x848   : > { %5540 = vpush %v4743_v12 }
 0x879   : > { %s5541_s14 = spop %5540 }
 0x87a   : > { %v4745_v48 = vstv %s5541_s14 }
 0x87b   : > { %5574 = vrsqrt.f32 %v4745_v48  ;;  %vm4748_vm5 = vcmp.eq.f32.partialorder %v4745_v48, inf  ;;  %v4751_v14 = vand.u32 2147483648, %v4745_v48  ;;  %vm4750_vm6 = vcmp.eq.f32.partialorder %v4745_v48, 0.0 }
 0x885   : > { %v5575_v50 = vpop.eup %5574 }
 0x886   : > { %v4747_v51 = vmul.f32 %v5575_v50, %v4745_v48 }
 0x888   : > { %v4749_v15 = vsel %vm4748_vm5, %v4745_v48, %v4747_v51 }
 0x889   : > { %v4752_v16 = vsel %vm4750_vm6, %v4751_v14, %v4749_v15 }
 0x88a   : > { %v4753_v17 = vmax.f32 %v4752_v16, 1e-08 }
 0x88c   : > { %5576 = vrcp.f32 %v4753_v17 }
 0x896   : > { %v5577_v0 = vpop.eup %5576 }
 0x897   : > { %v4756_v19 = vmul.f32 %v5577_v0, %v4729_v2  ;;  %v4757_v20 = vmul.f32 %v5577_v0, %v4731_v63 }
 0x899   : > { %v4760_v21 = vmul.f32 %v4759_v18, %v4756_v19  ;;  %v4762_v22 = vmul.f32 %v4759_v18, %v4757_v20  ;;  %v4783_v40 = vmul.f32 %v4782_v37, %v4756_v19  ;;  %v4785_v41 = vmul.f32 %v4782_v37, %v4757_v20 }
 0x89b   : > { %v4761_v23 = vsub.f32 %v5789_v11, %v4760_v21  ;;  %v4763_v24 = vsub.f32 %v5805_v13, %v4762_v22 }
 0x89d   : > { %v4764_v25 = vmul.f32 %v4761_v23, %v4761_v23  ;;  %v4765_v26 = vmul.f32 %v4763_v24, %v4763_v24 }
 0x89f   : > { %v4766_v27 = vadd.f32 %v4765_v26, %v4764_v25 }
 0x8a1   : > { %v4767_v28 = vsel %vm562_vm2, %v4766_v27, 0.0 }
 0x8a2   : > { %4768 = vadd.xlane.f32.xlu0 %v4767_v28 }
 0x92f   : > { %v4769_v29 = vpop.xlane.xlu0 %4768 }
 0x930   : > { %5578 = vrcp.f32 %v4769_v29 }
 0x93a   : > { %v5579_v30 = vpop.eup %5578 }
 0x93b   : > { %v4771_v31 = vmul.f32 0.125, %v5579_v30 }
 0x93d   : > { %5580 = vrsqrt.f32 %v4771_v31  ;;  %vm4774_vm7 = vcmp.eq.f32.partialorder %v4771_v31, inf  ;;  %v4777_v36 = vand.u32 2147483648, %v4771_v31  ;;  %vm4776_vm8 = vcmp.eq.f32.partialorder %v4771_v31, 0.0 }
 0x947   : > { %v5581_v34 = vpop.eup %5580 }
 0x948   : > { %v4773_v35 = vmul.f32 %v5581_v34, %v4771_v31 }
 0x94a   : > { %v4775_v11 = vsel %vm4774_vm7, %v4771_v31, %v4773_v35 }
 0x94b   : > { %v4778_v13 = vsel %vm4776_vm8, %v4777_v36, %v4775_v11 }
 0x94c   : > { %v4779_v38 = vmul.f32 %v4778_v13, %v4761_v23  ;;  %v4780_v39 = vmul.f32 %v4778_v13, %v4763_v24 }
 0x94e   : > { %v4784_v42 = vsub.f32 %v4779_v38, %v4783_v40  ;;  %v4786_v43 = vsub.f32 %v4780_v39, %v4785_v41 }
 0x950   : > { %v4787_v44 = vmul.f32 %v4784_v42, %v4784_v42  ;;  %v4788_v45 = vmul.f32 %v4786_v43, %v4786_v43 }
 0x952   : > { %v4789_v46 = vadd.f32 %v4788_v45, %v4787_v44 }
 0x954   : > { %v4790_v47 = vsel %vm562_vm2, %v4789_v46, 0.0 }
 0x955   : > { %4791 = vadd.xlane.f32.xlu0 %v4790_v47 }
 0x9e2   : > { %v4792_v52 = vpop.xlane.xlu0 %4791 }
 0x9e3   : > { %5582 = vrcp.f32 %v4792_v52 }
 0x9ed   : > { %v5583_v53 = vpop.eup %5582 }
 0x9ee   : > { %v4794_v5 = vmul.f32 0.125, %v5583_v53 }
 0x9f0   : > { %5584 = vrsqrt.f32 %v4794_v5  ;;  %vm4797_vm9 = vcmp.eq.f32.partialorder %v4794_v5, inf  ;;  %v4800_v54 = vand.u32 2147483648, %v4794_v5  ;;  %vm4799_vm10 = vcmp.eq.f32.partialorder %v4794_v5, 0.0 }
 0x9fa   : > { %v5585_v32 = vpop.eup %5584 }
 0x9fb   : > { %v4796_v33 = vmul.f32 %v5585_v32, %v4794_v5 }
 0x9fd   : > { %v4798_v55 = vsel %vm4797_vm9, %v4794_v5, %v4796_v33 }
 0x9fe   : > { %v4801_v56 = vsel %vm4799_vm10, %v4800_v54, %v4798_v55 }
 0x9ff   : > { %v4802_v58 = vmul.f32 %v4801_v56, %v4784_v42  ;;  %v4803_v59 = vmul.f32 %v4801_v56, %v4786_v43 }
 0xa01   : > { %4804 = vst.msk [vmem:[%s527_s27] sm:$0xff] %vm562_vm2, %v4802_v58  ;;  %5102 = vst.msk [vmem:[%s527_s27 + $0x8] sm:$0xff] %vm562_vm2, %v4803_v59 }
 0xa02 PF: > { %s21_s13 = sadd.s32 1, %s5611_s13  }
 0xa03   : > { %p18_p1 = scmp.ge.s32.totalorder %s21_s13, 4  }
 0xa05   :  { %20 = sbr.rel (!%p18_p1) target bundleno = 1 (0x1), region = 128 }
 0xa0c   :  { %4828 = vsyncpa [#allocation3], 1 }
 0xa0d   :  { %4830 = vsyncpa [#allocation3 + $0x1], 1 }

</bundles_post_ra>
